<compile_context>
chip_gen: v7x
topology: tpu7x:2x2x1
jax: 0.10.0
libtpu: 0.0.40
codegen_flags: <defaults>
</compile_context>

<pallas_src>
import math
from functools import partial

import jax
import jax.numpy as jnp
from jax import lax
from jax.experimental import pallas as pl
from jax.experimental.pallas import tpu as pltpu

LN_EPS = 1e-5                    # PyTorch nn.LayerNorm default
MM_DTYPE = jnp.bfloat16          # matmul operand dtype (accumulation stays f32)


def _default_vmem_limit():
    """~96 MiB on v5e/v6e (128 MiB physical VMEM), ~48 MiB on v7x (64 MiB)."""
    try:
        cap = pltpu.get_tpu_info().vmem_capacity_bytes
    except Exception:
        cap = 64 * 1024 * 1024
    return int(min(0.75 * cap, 100 * 1024 * 1024))


VMEM_LIMIT = _default_vmem_limit()


# --------------------------- in-kernel helpers ------------------------------

def _ln(x, g, b):
    """f32 LayerNorm over last axis (biased variance, matches nn.LayerNorm)."""
    mu = jnp.mean(x, axis=-1, keepdims=True)
    var = jnp.mean((x - mu) ** 2, axis=-1, keepdims=True)
    return (x - mu) * lax.rsqrt(var + LN_EPS) * g + b


def _mm(x, w):
    """bf16-in / f32-acc matmul on the MXU."""
    return lax.dot_general(
        x.astype(MM_DTYPE), w.astype(MM_DTYPE),
        (((x.ndim - 1,), (0,)), ((), ())),
        preferred_element_type=jnp.float32)


def _qk(q, k):
    """(Lq, Dh) x (Lk, Dh) -> (Lq, Lk), contracting last dims (no k.T)."""
    return lax.dot_general(
        q.astype(MM_DTYPE), k.astype(MM_DTYPE),
        (((1,), (1,)), ((), ())),
        preferred_element_type=jnp.float32)


def _erf(x):
    """Exact-GELU erf via Abramowitz&Stegun 7.1.26 (|err| <= 1.5e-7).

    Uses only VPU ops + one exp (EUP) + one divide, so it lowers on every TPU
    generation regardless of whether lax.erf has a Mosaic rule.
    """
    a1, a2, a3, a4, a5 = (0.254829592, -0.284496736, 1.421413741,
                          -1.453152027, 1.061405429)
    p = 0.3275911
    ax = jnp.abs(x)
    t = 1.0 / (1.0 + p * ax)
    poly = ((((a5 * t + a4) * t + a3) * t + a2) * t + a1) * t
    y = 1.0 - poly * jnp.exp(-ax * ax)
    return jnp.where(x < 0.0, -y, y)


def _gelu(x):
    """Exact (erf-based) GELU, matching nn.GELU defaults."""
    return 0.5 * x * (1.0 + _erf(x * (1.0 / math.sqrt(2.0))))


def _mha_out(q, k, v, wo, bo, resid, nheads):
    """Multi-head attention + fused output projection + residual.

    q: (Lq, D), k/v: (Lk, D), wo: (D, D), bo: (1, D), resid: (Lq, D).
    Each head's PV result is immediately projected through the matching
    (dh, D) row-slice of wo and accumulated into a lane-dense (Lq, D) output
    -> no per-head lane concatenate and only one live (Lq, D) accumulator.
    """
    d = q.shape[-1]
    dh = d // nheads
    scale = 1.0 / math.sqrt(dh)
    out = resid + bo
    for h in range(nheads):
        sl = slice(h * dh, (h + 1) * dh)
        s = _qk(q[:, sl], k[:, sl]) * scale
        m = jnp.max(s, axis=-1, keepdims=True)
        p = jnp.exp(s - m)
        p = p * pl.reciprocal(jnp.sum(p, axis=-1, keepdims=True), approx=True)
        pv = _mm(p, v[:, sl])                     # (Lq, dh)
        out = out + _mm(pv, wo[sl, :])            # lane-dense accumulate
    return out


def _mlp_body(x, ln_g, ln_b, w1, b1, w2, b2):
    h = _ln(x, ln_g, ln_b)                        # norm3
    h = _mm(h, w1) + b1
    h = _gelu(h)
    return x + _mm(h, w2) + b2                    # fc2 + residual fused


# ------------------------------ Pallas kernels ------------------------------

def _cross_attn_kernel(x_ref, mem_ref,
                       lnq_g, lnq_b, lnkv_g, lnkv_b,
                       w_kv, b_kv, wq, bq, wo, bo,
                       o_ref, *, nheads):
    x = x_ref[0]                                  # (tq, D) f32, residual source
    mem = mem_ref[0]                              # (Lk, D) f32
    d = x.shape[-1]

    qn = _ln(x, lnq_g[...], lnq_b[...])           # norm1(tgt)
    mn = _ln(mem, lnkv_g[...], lnkv_b[...])       # norm1_kv(memory)

    q = _mm(qn, wq[...]) + bq[...]
    # to_k/to_v already folded into the MHA k/v weights: one packed matmul.
    kv = _mm(mn, w_kv[...]) + b_kv[...]           # (Lk, 2D)
    o_ref[0] = _mha_out(q, kv[:, :d], kv[:, d:], wo[...], bo[...], x, nheads)


def _self_attn_kernel(x_ref, ln_g, ln_b, wqkv, bqkv, wo, bo,
                      o_ref, *, nheads):
    x = x_ref[0]                                  # (Lq, D)
    d = x.shape[-1]
    tn = _ln(x, ln_g[...], ln_b[...])             # norm2(tgt)
    # Single packed [wq|wk|wv] matmul; the +1e-8 query offset is folded into
    # the q-part of bqkv at init time (in f32).
    qkv = _mm(tn, wqkv[...]) + bqkv[...]          # (Lq, 3D)
    q, k, v = qkv[:, :d], qkv[:, d:2 * d], qkv[:, 2 * d:]
    o_ref[0] = _mha_out(q, k, v, wo[...], bo[...], x, nheads)


def _self_attn_tiled_kernel(xq_ref, xf_ref, ln_g, ln_b,
                            wq, bq, wkv, bkv, wo, bo,
                            o_ref, *, nheads):
    """Query-tiled self-attention (B small on v7x): q from the (tq, D) tile,
    k/v recomputed from the full (Lq, D) sequence per tile."""
    xq = xq_ref[0]                                # (tq, D)
    xf = xf_ref[0]                                # (Lq, D)
    d = xq.shape[-1]
    qn = _ln(xq, ln_g[...], ln_b[...])
    fn = _ln(xf, ln_g[...], ln_b[...])
    q = _mm(qn, wq[...]) + bq[...]                # bq already includes 1e-8 fold
    kv = _mm(fn, wkv[...]) + bkv[...]             # (Lq, 2D)
    o_ref[0] = _mha_out(q, kv[:, :d], kv[:, d:], wo[...], bo[...], xq, nheads)


def _mlp_kernel(x_ref, ln_g, ln_b, w1, b1, w2, b2, o_ref):
    o_ref[...] = _mlp_body(x_ref[...], ln_g[...], ln_b[...],
                           w1[...], b1[...], w2[...], b2[...])


def _mlp_final_ln_kernel(x_ref, ln_g, ln_b, w1, b1, w2, b2, fg, fb, o_ref):
    """Last block's MLP with the final decoder LayerNorm fused in."""
    y = _mlp_body(x_ref[...], ln_g[...], ln_b[...],
                  w1[...], b1[...], w2[...], b2[...])
    o_ref[...] = _ln(y, fg[...], fb[...])


def _final_ln_kernel(x_ref, g_ref, b_ref, o_ref):
    o_ref[...] = _ln(x_ref[...], g_ref[...], b_ref[...])


# ------------------------------ wrappers ------------------------------------

def _const_spec(shape):
    """BlockSpec for a weight whose block index is constant over the grid.
    Buffered(1) avoids double-buffering it (halves weight VMEM residency)."""
    nd = len(shape)
    idx = lambda *_: (0,) * nd
    try:
        return pl.BlockSpec(shape, idx, pipeline_mode=pl.Buffered(1))
    except Exception:                             # older jax: no pipeline_mode
        return pl.BlockSpec(shape, idx)


def _row_tile(n, cap=512):
    """Largest row tile <= cap that divides n and is a multiple of 8 (else n).

    cap=512 keeps ~85% of HBM roofline (vs ~63% at 256) and still fits the f32
    (tile, hidden) GELU intermediate under v7x's 64 MiB VMEM.
    """
    if n <= cap:
        return n
    for t in range(cap, 7, -8):
        if n % t == 0:
            return t
    return n  # TODO(synk): ragged B*Lq falls back to one full-array block.


def _q_split(batch, seq, min_rows=128, target_steps=4):
    """Number of query tiles: give both v7x TensorCores work when the batch
    grid alone is too small, but keep >=128 query rows per MXU tile."""
    if batch >= target_steps:
        return 1
    for nq in (2, 4, 8):
        tq = seq // nq
        if seq % nq == 0 and tq >= min_rows and tq % 8 == 0 and batch * nq >= target_steps:
            return nq
    if seq % 2 == 0 and (seq // 2) >= min_rows and (seq // 2) % 8 == 0:
        return 2
    return 1


def cross_attn_block(tgt, memory, p, nheads):
    B, Lq, D = tgt.shape
    Lk = memory.shape[1]
    nq = _q_split(B, Lq)
    tq = Lq // nq
    c = p["cross"]
    weights = (p["ln1_g"], p["ln1_b"], p["ln1kv_g"], p["ln1kv_b"],
               c["w_kv"], c["b_kv"], c["wq"], c["bq"], c["wo"], c["bo"])
    in_specs = [pl.BlockSpec((1, tq, D), lambda b, q: (b, q, 0)),
                pl.BlockSpec((1, Lk, D), lambda b, q: (b, 0, 0))]
    in_specs += [_const_spec(w.shape) for w in weights]
    return pl.pallas_call(
        partial(_cross_attn_kernel, nheads=nheads),
        grid=(B, nq),
        in_specs=in_specs,
        out_specs=pl.BlockSpec((1, tq, D), lambda b, q: (b, q, 0)),
        out_shape=jax.ShapeDtypeStruct((B, Lq, D), tgt.dtype),
        compiler_params=pltpu.CompilerParams(
            dimension_semantics=("parallel", "parallel"),
            vmem_limit_bytes=VMEM_LIMIT),
    )(tgt, memory, *weights)


def self_attn_block(tgt, p, nheads):
    B, Lq, D = tgt.shape
    nq = _q_split(B, Lq)
    s = p["self"]
    if nq == 1:
        weights = (p["ln2_g"], p["ln2_b"], s["w_qkv"], s["b_qkv"], s["wo"], s["bo"])
        in_specs = [pl.BlockSpec((1, Lq, D), lambda b: (b, 0, 0))]
        in_specs += [_const_spec(w.shape) for w in weights]
        return pl.pallas_call(
            partial(_self_attn_kernel, nheads=nheads),
            grid=(B,),
            in_specs=in_specs,
            out_specs=pl.BlockSpec((1, Lq, D), lambda b: (b, 0, 0)),
            out_shape=jax.ShapeDtypeStruct((B, Lq, D), tgt.dtype),
            compiler_params=pltpu.CompilerParams(
                dimension_semantics=("parallel",), vmem_limit_bytes=VMEM_LIMIT),
        )(tgt, *weights)

    # Query-tiled path (small batch): q from the tile, k/v from the full seq.
    tq = Lq // nq
    wq, wkv = s["w_qkv"][:, :D], s["w_qkv"][:, D:]
    bq, bkv = s["b_qkv"][:, :D], s["b_qkv"][:, D:]
    weights = (p["ln2_g"], p["ln2_b"], wq, bq, wkv, bkv, s["wo"], s["bo"])
    in_specs = [pl.BlockSpec((1, tq, D), lambda b, q: (b, q, 0)),
                pl.BlockSpec((1, Lq, D), lambda b, q: (b, 0, 0))]
    in_specs += [_const_spec(w.shape) for w in weights]
    return pl.pallas_call(
        partial(_self_attn_tiled_kernel, nheads=nheads),
        grid=(B, nq),
        in_specs=in_specs,
        out_specs=pl.BlockSpec((1, tq, D), lambda b, q: (b, q, 0)),
        out_shape=jax.ShapeDtypeStruct((B, Lq, D), tgt.dtype),
        compiler_params=pltpu.CompilerParams(
            dimension_semantics=("parallel", "parallel"),
            vmem_limit_bytes=VMEM_LIMIT),
    )(tgt, tgt, *weights)


def mlp_block(tgt, p, final_ln=None):
    B, Lq, D = tgt.shape
    N = B * Lq
    tn = _row_tile(N)
    x2d = tgt.reshape(N, D)
    weights = [p["ln3_g"], p["ln3_b"],
               p["fc1_w"], p["fc1_b"], p["fc2_w"], p["fc2_b"]]
    kern = _mlp_kernel
    if final_ln is not None:                      # fuse decoder-final LayerNorm
        weights += [final_ln[0], final_ln[1]]
        kern = _mlp_final_ln_kernel
    in_specs = [pl.BlockSpec((tn, D), lambda i: (i, 0))]
    in_specs += [_const_spec(w.shape) for w in weights]
    out = pl.pallas_call(
        kern,
        grid=(N // tn,),
        in_specs=in_specs,
        out_specs=pl.BlockSpec((tn, D), lambda i: (i, 0)),
        out_shape=jax.ShapeDtypeStruct((N, D), tgt.dtype),
        compiler_params=pltpu.CompilerParams(
            dimension_semantics=("parallel",), vmem_limit_bytes=VMEM_LIMIT),
    )(x2d, *weights)
    return out.reshape(B, Lq, D)


def final_layernorm(x, g, b):
    B, L, D = x.shape
    N = B * L
    tn = _row_tile(N)
    x2d = x.reshape(N, D)
    out = pl.pallas_call(
        _final_ln_kernel,
        grid=(N // tn,),
        in_specs=[pl.BlockSpec((tn, D), lambda i: (i, 0)),
                  _const_spec(g.shape), _const_spec(b.shape)],
        out_specs=pl.BlockSpec((tn, D), lambda i: (i, 0)),
        out_shape=jax.ShapeDtypeStruct((N, D), x.dtype),
        compiler_params=pltpu.CompilerParams(
            dimension_semantics=("parallel",), vmem_limit_bytes=VMEM_LIMIT),
    )(x2d, g, b)
    return out.reshape(B, L, D)


# ------------------------------ module logic --------------------------------

def decoder_forward(query, value, params, nheads):
    blocks = params["blocks"]
    if not blocks:
        return final_layernorm(query, params["norm_g"], params["norm_b"])
    last = len(blocks) - 1
    for i, p in enumerate(blocks):
        query = cross_attn_block(query, value, p, nheads)   # tgt + cross_attn
        query = self_attn_block(query, p, nheads)           # tgt + self_attn
        fl = (params["norm_g"], params["norm_b"]) if i == last else None
        query = mlp_block(query, p, final_ln=fl)            # tgt + mlp (+ final LN)
    return query


# ------------------------------ param init ----------------------------------

def _dense(key, din, dout, scale=0.02):
    return scale * jax.random.normal(key, (din, dout), dtype=jnp.float32)


def _zeros(n):
    return jnp.zeros((1, n), jnp.float32)


def _ones(n):
    return jnp.ones((1, n), jnp.float32)


def init_decoder_params(key, embed_dim, depth, mlp_ratio):
    d = embed_dim
    hidden = int(mlp_ratio * d)
    keys = jax.random.split(key, max(depth, 1))
    blocks = []
    for i in range(depth):
        ks = jax.random.split(keys[i], 12)
        # Raw f32 weights, stored (in, out) = nn.Linear.weight transposed.
        to_k_w, to_v_w = _dense(ks[0], d, d), _dense(ks[1], d, d)
        to_k_b = to_v_b = jnp.zeros((d,), jnp.float32)
        c_wq, c_wk, c_wv, c_wo = (_dense(k, d, d) for k in ks[2:6])
        s_wq, s_wk, s_wv, s_wo = (_dense(k, d, d) for k in ks[6:10])
        c_bq = c_bk = c_bv = jnp.zeros((d,), jnp.float32)
        s_bq = s_bk = s_bv = jnp.zeros((d,), jnp.float32)

        # Cross-attn: fold to_k/to_v into the MHA k/v projections (f32 fold,
        # then bf16 cast): k = LN(mem) @ (to_k_w @ wk) + (to_k_b @ wk + bk).
        w_kv_fold = jnp.concatenate([to_k_w @ c_wk, to_v_w @ c_wv], axis=1)
        b_kv_fold = jnp.concatenate(
            [to_k_b @ c_wk + c_bk, to_v_b @ c_wv + c_bv])[None, :]

        # Self-attn: pack [wq|wk|wv]; fold the +1e-8 query offset into bq (f32).
        w_qkv = jnp.concatenate([s_wq, s_wk, s_wv], axis=1)
        b_qkv = jnp.concatenate(
            [s_bq + 1e-8 * jnp.sum(s_wq, axis=0), s_bk, s_bv])[None, :]

        blocks.append({
            "ln1_g": _ones(d), "ln1_b": _zeros(d),
            "ln1kv_g": _ones(d), "ln1kv_b": _zeros(d),
            "ln2_g": _ones(d), "ln2_b": _zeros(d),
            "ln3_g": _ones(d), "ln3_b": _zeros(d),
            "cross": {
                "wq": c_wq.astype(MM_DTYPE), "bq": c_bq[None, :],
                "w_kv": w_kv_fold.astype(MM_DTYPE), "b_kv": b_kv_fold,
                "wo": c_wo.astype(MM_DTYPE), "bo": _zeros(d),
            },
            "self": {
                "w_qkv": w_qkv.astype(MM_DTYPE), "b_qkv": b_qkv,
                "wo": s_wo.astype(MM_DTYPE), "bo": _zeros(d),
            },
            "fc1_w": _dense(ks[10], d, hidden).astype(MM_DTYPE), "fc1_b": _zeros(hidden),
            "fc2_w": _dense(ks[11], hidden, d).astype(MM_DTYPE), "fc2_b": _zeros(d),
        })
    return {"blocks": blocks, "norm_g": _ones(d), "norm_b": _zeros(d)}


# --------------------------------- main --------------------------------------

if __name__ == "__main__":
    # Small-but-representative config (module default is 768/12/6; scaled down).
    EMBED_DIM = 128
    NUM_HEADS = 4
    DEPTH = 2
    MLP_RATIO = 4.0
    B, LQ, LKV = 2, 16, 16

    root = jax.random.PRNGKey(0)
    k_param, k_q, k_v = jax.random.split(root, 3)

    params = init_decoder_params(k_param, EMBED_DIM, DEPTH, MLP_RATIO)
    query = jax.random.normal(k_q, (B, LQ, EMBED_DIM), dtype=jnp.float32)
    value = jax.random.normal(k_v, (B, LKV, EMBED_DIM), dtype=jnp.float32)

    fwd = jax.jit(partial(decoder_forward, nheads=NUM_HEADS))
    out = fwd(query, value, params)
    out = jax.block_until_ready(out)

    assert out.shape == (B, LQ, EMBED_DIM)
    assert bool(jnp.all(jnp.isfinite(out)))
    print("KERNEL_OK")
</pallas_src>

<mosaic_0001>
module attributes {stable_mosaic.version = 11 : i64} {
  func.func @_cross_attn_kernel(%arg0: i32, %arg1: i32, %arg2: memref<1x16x128xf32, #tpu.memory_space<vmem>>, %arg3: memref<1x16x128xf32, #tpu.memory_space<vmem>>, %arg4: memref<1x128xf32, #tpu.memory_space<vmem>>, %arg5: memref<1x128xf32, #tpu.memory_space<vmem>>, %arg6: memref<1x128xf32, #tpu.memory_space<vmem>>, %arg7: memref<1x128xf32, #tpu.memory_space<vmem>>, %arg8: memref<128x256xbf16, #tpu.memory_space<vmem>>, %arg9: memref<1x256xf32, #tpu.memory_space<vmem>>, %arg10: memref<128x128xbf16, #tpu.memory_space<vmem>>, %arg11: memref<1x128xf32, #tpu.memory_space<vmem>>, %arg12: memref<128x128xbf16, #tpu.memory_space<vmem>>, %arg13: memref<1x128xf32, #tpu.memory_space<vmem>>, %arg14: memref<1x16x128xf32, #tpu.memory_space<vmem>>) attributes {dimension_semantics = [#tpu.dimension_semantics<parallel>, #tpu.dimension_semantics<parallel>], iteration_bounds = array<i64: 2, 1>, scalar_prefetch = 0 : i64, scratch_operands = 0 : i64, tpu.core_type = #tpu.core_type<tc>, window_params = [{transform_indices = @transform_0, window_bounds = array<i64: 1, 16, 128>}, {transform_indices = @transform_1, window_bounds = array<i64: 1, 16, 128>}, {pipeline_mode = #tpu.pipeline_mode<synchronous>, transform_indices = @transform_2, window_bounds = array<i64: 1, 128>}, {pipeline_mode = #tpu.pipeline_mode<synchronous>, transform_indices = @transform_3, window_bounds = array<i64: 1, 128>}, {pipeline_mode = #tpu.pipeline_mode<synchronous>, transform_indices = @transform_4, window_bounds = array<i64: 1, 128>}, {pipeline_mode = #tpu.pipeline_mode<synchronous>, transform_indices = @transform_5, window_bounds = array<i64: 1, 128>}, {pipeline_mode = #tpu.pipeline_mode<synchronous>, transform_indices = @transform_6, window_bounds = array<i64: 128, 256>}, {pipeline_mode = #tpu.pipeline_mode<synchronous>, transform_indices = @transform_7, window_bounds = array<i64: 1, 256>}, {pipeline_mode = #tpu.pipeline_mode<synchronous>, transform_indices = @transform_8, window_bounds = array<i64: 128, 128>}, {pipeline_mode = #tpu.pipeline_mode<synchronous>, transform_indices = @transform_9, window_bounds = array<i64: 1, 128>}, {pipeline_mode = #tpu.pipeline_mode<synchronous>, transform_indices = @transform_10, window_bounds = array<i64: 128, 128>}, {pipeline_mode = #tpu.pipeline_mode<synchronous>, transform_indices = @transform_11, window_bounds = array<i64: 1, 128>}, {transform_indices = @transform_12, window_bounds = array<i64: 1, 16, 128>}]} {
    %c0 = arith.constant 0 : index
    %c0_0 = arith.constant 0 : index
    %c0_1 = arith.constant 0 : index
    %0 = vector.load %arg2[%c0, %c0_0, %c0_1] : memref<1x16x128xf32, #tpu.memory_space<vmem>>, vector<1x16x128xf32>
    %1 = vector.shape_cast %0 : vector<1x16x128xf32> to vector<16x128xf32>
    %c0_2 = arith.constant 0 : index
    %c0_3 = arith.constant 0 : index
    %c0_4 = arith.constant 0 : index
    %2 = vector.load %arg3[%c0_2, %c0_3, %c0_4] : memref<1x16x128xf32, #tpu.memory_space<vmem>>, vector<1x16x128xf32>
    %3 = vector.shape_cast %2 : vector<1x16x128xf32> to vector<16x128xf32>
    %c0_5 = arith.constant 0 : index
    %c0_6 = arith.constant 0 : index
    %4 = vector.load %arg4[%c0_5, %c0_6] : memref<1x128xf32, #tpu.memory_space<vmem>>, vector<1x128xf32>
    %c0_7 = arith.constant 0 : index
    %c0_8 = arith.constant 0 : index
    %5 = vector.load %arg5[%c0_7, %c0_8] : memref<1x128xf32, #tpu.memory_space<vmem>>, vector<1x128xf32>
    %cst = arith.constant dense<0.000000e+00> : vector<16xf32>
    %6 = vector.multi_reduction <add>, %1, %cst [1] : vector<16x128xf32> to vector<16xf32>
    %7 = vector.shape_cast %6 : vector<16xf32> to vector<16x1xf32>
    %cst_9 = arith.constant 1.280000e+02 : f32
    %8 = vector.broadcast %cst_9 : f32 to vector<16x1xf32>
    %9 = arith.divf %7, %8 : vector<16x1xf32>
    %10 = vector.broadcast %9 : vector<16x1xf32> to vector<16x128xf32>
    %11 = arith.subf %1, %10 : vector<16x128xf32>
    %12 = arith.mulf %11, %11 : vector<16x128xf32>
    %cst_10 = arith.constant dense<0.000000e+00> : vector<16xf32>
    %13 = vector.multi_reduction <add>, %12, %cst_10 [1] : vector<16x128xf32> to vector<16xf32>
    %14 = vector.shape_cast %13 : vector<16xf32> to vector<16x1xf32>
    %cst_11 = arith.constant 1.280000e+02 : f32
    %15 = vector.broadcast %cst_11 : f32 to vector<16x1xf32>
    %16 = arith.divf %14, %15 : vector<16x1xf32>
    %17 = vector.broadcast %9 : vector<16x1xf32> to vector<16x128xf32>
    %18 = arith.subf %1, %17 : vector<16x128xf32>
    %cst_12 = arith.constant 9.99999974E-6 : f32
    %19 = vector.broadcast %cst_12 : f32 to vector<16x1xf32>
    %20 = arith.addf %16, %19 : vector<16x1xf32>
    %21 = math.rsqrt %20 : vector<16x1xf32>
    %22 = vector.broadcast %21 : vector<16x1xf32> to vector<16x128xf32>
    %23 = arith.mulf %18, %22 : vector<16x128xf32>
    %24 = vector.broadcast %4 : vector<1x128xf32> to vector<16x128xf32>
    %25 = arith.mulf %23, %24 : vector<16x128xf32>
    %26 = vector.broadcast %5 : vector<1x128xf32> to vector<16x128xf32>
    %27 = arith.addf %25, %26 : vector<16x128xf32>
    %c0_13 = arith.constant 0 : index
    %c0_14 = arith.constant 0 : index
    %28 = vector.load %arg6[%c0_13, %c0_14] : memref<1x128xf32, #tpu.memory_space<vmem>>, vector<1x128xf32>
    %c0_15 = arith.constant 0 : index
    %c0_16 = arith.constant 0 : index
    %29 = vector.load %arg7[%c0_15, %c0_16] : memref<1x128xf32, #tpu.memory_space<vmem>>, vector<1x128xf32>
    %cst_17 = arith.constant dense<0.000000e+00> : vector<16xf32>
    %30 = vector.multi_reduction <add>, %3, %cst_17 [1] : vector<16x128xf32> to vector<16xf32>
    %31 = vector.shape_cast %30 : vector<16xf32> to vector<16x1xf32>
    %cst_18 = arith.constant 1.280000e+02 : f32
    %32 = vector.broadcast %cst_18 : f32 to vector<16x1xf32>
    %33 = arith.divf %31, %32 : vector<16x1xf32>
    %34 = vector.broadcast %33 : vector<16x1xf32> to vector<16x128xf32>
    %35 = arith.subf %3, %34 : vector<16x128xf32>
    %36 = arith.mulf %35, %35 : vector<16x128xf32>
    %cst_19 = arith.constant dense<0.000000e+00> : vector<16xf32>
    %37 = vector.multi_reduction <add>, %36, %cst_19 [1] : vector<16x128xf32> to vector<16xf32>
    %38 = vector.shape_cast %37 : vector<16xf32> to vector<16x1xf32>
    %cst_20 = arith.constant 1.280000e+02 : f32
    %39 = vector.broadcast %cst_20 : f32 to vector<16x1xf32>
    %40 = arith.divf %38, %39 : vector<16x1xf32>
    %41 = vector.broadcast %33 : vector<16x1xf32> to vector<16x128xf32>
    %42 = arith.subf %3, %41 : vector<16x128xf32>
    %cst_21 = arith.constant 9.99999974E-6 : f32
    %43 = vector.broadcast %cst_21 : f32 to vector<16x1xf32>
    %44 = arith.addf %40, %43 : vector<16x1xf32>
    %45 = math.rsqrt %44 : vector<16x1xf32>
    %46 = vector.broadcast %45 : vector<16x1xf32> to vector<16x128xf32>
    %47 = arith.mulf %42, %46 : vector<16x128xf32>
    %48 = vector.broadcast %28 : vector<1x128xf32> to vector<16x128xf32>
    %49 = arith.mulf %47, %48 : vector<16x128xf32>
    %50 = vector.broadcast %29 : vector<1x128xf32> to vector<16x128xf32>
    %51 = arith.addf %49, %50 : vector<16x128xf32>
    %c0_22 = arith.constant 0 : index
    %c0_23 = arith.constant 0 : index
    %52 = vector.load %arg10[%c0_22, %c0_23] : memref<128x128xbf16, #tpu.memory_space<vmem>>, vector<128x128xbf16>
    %53 = arith.truncf %27 : vector<16x128xf32> to vector<16x128xbf16>
    %cst_24 = arith.constant dense<0.000000e+00> : vector<16x128xf32>
    %54 = tpu.matmul %53, %52, %cst_24 {dimension_numbers = #tpu.dot_dimension_numbers<[1], [0], [0], [1], [0, 0, 1, 1], [], []>} : vector<16x128xbf16>, vector<128x128xbf16>, vector<16x128xf32> -> vector<16x128xf32>
    %c0_25 = arith.constant 0 : index
    %c0_26 = arith.constant 0 : index
    %55 = vector.load %arg11[%c0_25, %c0_26] : memref<1x128xf32, #tpu.memory_space<vmem>>, vector<1x128xf32>
    %56 = vector.broadcast %55 : vector<1x128xf32> to vector<16x128xf32>
    %57 = arith.addf %54, %56 : vector<16x128xf32>
    %c0_27 = arith.constant 0 : index
    %c0_28 = arith.constant 0 : index
    %58 = vector.load %arg8[%c0_27, %c0_28] : memref<128x256xbf16, #tpu.memory_space<vmem>>, vector<128x256xbf16>
    %59 = arith.truncf %51 : vector<16x128xf32> to vector<16x128xbf16>
    %cst_29 = arith.constant dense<0.000000e+00> : vector<16x256xf32>
    %60 = tpu.matmul %59, %58, %cst_29 {dimension_numbers = #tpu.dot_dimension_numbers<[1], [0], [0], [1], [0, 0, 1, 1], [], []>} : vector<16x128xbf16>, vector<128x256xbf16>, vector<16x256xf32> -> vector<16x256xf32>
    %c0_30 = arith.constant 0 : index
    %c0_31 = arith.constant 0 : index
    %61 = vector.load %arg9[%c0_30, %c0_31] : memref<1x256xf32, #tpu.memory_space<vmem>>, vector<1x256xf32>
    %62 = vector.broadcast %61 : vector<1x256xf32> to vector<16x256xf32>
    %63 = arith.addf %60, %62 : vector<16x256xf32>
    %64 = vector.extract_strided_slice %63 {offsets = [0, 0], sizes = [16, 128], strides = [1, 1]} : vector<16x256xf32> to vector<16x128xf32>
    %65 = vector.extract_strided_slice %63 {offsets = [0, 128], sizes = [16, 128], strides = [1, 1]} : vector<16x256xf32> to vector<16x128xf32>
    %c0_32 = arith.constant 0 : index
    %c0_33 = arith.constant 0 : index
    %66 = vector.load %arg12[%c0_32, %c0_33] : memref<128x128xbf16, #tpu.memory_space<vmem>>, vector<128x128xbf16>
    %c0_34 = arith.constant 0 : index
    %c0_35 = arith.constant 0 : index
    %67 = vector.load %arg13[%c0_34, %c0_35] : memref<1x128xf32, #tpu.memory_space<vmem>>, vector<1x128xf32>
    %68 = vector.broadcast %67 : vector<1x128xf32> to vector<16x128xf32>
    %69 = arith.addf %1, %68 : vector<16x128xf32>
    %70 = vector.extract_strided_slice %57 {offsets = [0, 0], sizes = [16, 32], strides = [1, 1]} : vector<16x128xf32> to vector<16x32xf32>
    %71 = vector.extract_strided_slice %64 {offsets = [0, 0], sizes = [16, 32], strides = [1, 1]} : vector<16x128xf32> to vector<16x32xf32>
    %72 = arith.truncf %70 : vector<16x32xf32> to vector<16x32xbf16>
    %73 = arith.truncf %71 : vector<16x32xf32> to vector<16x32xbf16>
    %cst_36 = arith.constant dense<0.000000e+00> : vector<16x16xf32>
    %74 = tpu.matmul %72, %73, %cst_36 {dimension_numbers = #tpu.dot_dimension_numbers<[1], [1], [0], [0], [0, 0, 1, 0], [], []>} : vector<16x32xbf16>, vector<16x32xbf16>, vector<16x16xf32> -> vector<16x16xf32>
    %cst_37 = arith.constant 0.176776692 : f32
    %75 = vector.broadcast %cst_37 : f32 to vector<16x16xf32>
    %76 = arith.mulf %74, %75 : vector<16x16xf32>
    %cst_38 = arith.constant dense<0xFF800000> : vector<16xf32>
    %77 = vector.multi_reduction <maximumf>, %76, %cst_38 [1] : vector<16x16xf32> to vector<16xf32>
    %78 = vector.shape_cast %77 : vector<16xf32> to vector<16x1xf32>
    %79 = vector.broadcast %78 : vector<16x1xf32> to vector<16x16xf32>
    %80 = arith.subf %76, %79 : vector<16x16xf32>
    %81 = math.exp %80 : vector<16x16xf32>
    %cst_39 = arith.constant dense<0.000000e+00> : vector<16xf32>
    %82 = vector.multi_reduction <add>, %81, %cst_39 [1] : vector<16x16xf32> to vector<16xf32>
    %83 = vector.shape_cast %82 : vector<16xf32> to vector<16x1xf32>
    %84 = tpu.reciprocal %83 {approx = true} : vector<16x1xf32> -> vector<16x1xf32>
    %85 = vector.broadcast %84 : vector<16x1xf32> to vector<16x16xf32>
    %86 = arith.mulf %81, %85 : vector<16x16xf32>
    %87 = vector.extract_strided_slice %65 {offsets = [0, 0], sizes = [16, 32], strides = [1, 1]} : vector<16x128xf32> to vector<16x32xf32>
    %88 = arith.truncf %86 : vector<16x16xf32> to vector<16x16xbf16>
    %89 = arith.truncf %87 : vector<16x32xf32> to vector<16x32xbf16>
    %cst_40 = arith.constant dense<0.000000e+00> : vector<16x32xf32>
    %90 = tpu.matmul %88, %89, %cst_40 {dimension_numbers = #tpu.dot_dimension_numbers<[1], [0], [0], [1], [0, 0, 1, 1], [], []>} : vector<16x16xbf16>, vector<16x32xbf16>, vector<16x32xf32> -> vector<16x32xf32>
    %91 = vector.extract_strided_slice %66 {offsets = [0, 0], sizes = [32, 128], strides = [1, 1]} : vector<128x128xbf16> to vector<32x128xbf16>
    %92 = arith.truncf %90 : vector<16x32xf32> to vector<16x32xbf16>
    %cst_41 = arith.constant dense<0.000000e+00> : vector<16x128xf32>
    %93 = tpu.matmul %92, %91, %cst_41 {dimension_numbers = #tpu.dot_dimension_numbers<[1], [0], [0], [1], [0, 0, 1, 1], [], []>} : vector<16x32xbf16>, vector<32x128xbf16>, vector<16x128xf32> -> vector<16x128xf32>
    %94 = arith.addf %69, %93 : vector<16x128xf32>
    %95 = vector.extract_strided_slice %57 {offsets = [0, 32], sizes = [16, 32], strides = [1, 1]} : vector<16x128xf32> to vector<16x32xf32>
    %96 = vector.extract_strided_slice %64 {offsets = [0, 32], sizes = [16, 32], strides = [1, 1]} : vector<16x128xf32> to vector<16x32xf32>
    %97 = arith.truncf %95 : vector<16x32xf32> to vector<16x32xbf16>
    %98 = arith.truncf %96 : vector<16x32xf32> to vector<16x32xbf16>
    %cst_42 = arith.constant dense<0.000000e+00> : vector<16x16xf32>
    %99 = tpu.matmul %97, %98, %cst_42 {dimension_numbers = #tpu.dot_dimension_numbers<[1], [1], [0], [0], [0, 0, 1, 0], [], []>} : vector<16x32xbf16>, vector<16x32xbf16>, vector<16x16xf32> -> vector<16x16xf32>
    %cst_43 = arith.constant 0.176776692 : f32
    %100 = vector.broadcast %cst_43 : f32 to vector<16x16xf32>
    %101 = arith.mulf %99, %100 : vector<16x16xf32>
    %cst_44 = arith.constant dense<0xFF800000> : vector<16xf32>
    %102 = vector.multi_reduction <maximumf>, %101, %cst_44 [1] : vector<16x16xf32> to vector<16xf32>
    %103 = vector.shape_cast %102 : vector<16xf32> to vector<16x1xf32>
    %104 = vector.broadcast %103 : vector<16x1xf32> to vector<16x16xf32>
    %105 = arith.subf %101, %104 : vector<16x16xf32>
    %106 = math.exp %105 : vector<16x16xf32>
    %cst_45 = arith.constant dense<0.000000e+00> : vector<16xf32>
    %107 = vector.multi_reduction <add>, %106, %cst_45 [1] : vector<16x16xf32> to vector<16xf32>
    %108 = vector.shape_cast %107 : vector<16xf32> to vector<16x1xf32>
    %109 = tpu.reciprocal %108 {approx = true} : vector<16x1xf32> -> vector<16x1xf32>
    %110 = vector.broadcast %109 : vector<16x1xf32> to vector<16x16xf32>
    %111 = arith.mulf %106, %110 : vector<16x16xf32>
    %112 = vector.extract_strided_slice %65 {offsets = [0, 32], sizes = [16, 32], strides = [1, 1]} : vector<16x128xf32> to vector<16x32xf32>
    %113 = arith.truncf %111 : vector<16x16xf32> to vector<16x16xbf16>
    %114 = arith.truncf %112 : vector<16x32xf32> to vector<16x32xbf16>
    %cst_46 = arith.constant dense<0.000000e+00> : vector<16x32xf32>
    %115 = tpu.matmul %113, %114, %cst_46 {dimension_numbers = #tpu.dot_dimension_numbers<[1], [0], [0], [1], [0, 0, 1, 1], [], []>} : vector<16x16xbf16>, vector<16x32xbf16>, vector<16x32xf32> -> vector<16x32xf32>
    %116 = vector.extract_strided_slice %66 {offsets = [32, 0], sizes = [32, 128], strides = [1, 1]} : vector<128x128xbf16> to vector<32x128xbf16>
    %117 = arith.truncf %115 : vector<16x32xf32> to vector<16x32xbf16>
    %cst_47 = arith.constant dense<0.000000e+00> : vector<16x128xf32>
    %118 = tpu.matmul %117, %116, %cst_47 {dimension_numbers = #tpu.dot_dimension_numbers<[1], [0], [0], [1], [0, 0, 1, 1], [], []>} : vector<16x32xbf16>, vector<32x128xbf16>, vector<16x128xf32> -> vector<16x128xf32>
    %119 = arith.addf %94, %118 : vector<16x128xf32>
    %120 = vector.extract_strided_slice %57 {offsets = [0, 64], sizes = [16, 32], strides = [1, 1]} : vector<16x128xf32> to vector<16x32xf32>
    %121 = vector.extract_strided_slice %64 {offsets = [0, 64], sizes = [16, 32], strides = [1, 1]} : vector<16x128xf32> to vector<16x32xf32>
    %122 = arith.truncf %120 : vector<16x32xf32> to vector<16x32xbf16>
    %123 = arith.truncf %121 : vector<16x32xf32> to vector<16x32xbf16>
    %cst_48 = arith.constant dense<0.000000e+00> : vector<16x16xf32>
    %124 = tpu.matmul %122, %123, %cst_48 {dimension_numbers = #tpu.dot_dimension_numbers<[1], [1], [0], [0], [0, 0, 1, 0], [], []>} : vector<16x32xbf16>, vector<16x32xbf16>, vector<16x16xf32> -> vector<16x16xf32>
    %cst_49 = arith.constant 0.176776692 : f32
    %125 = vector.broadcast %cst_49 : f32 to vector<16x16xf32>
    %126 = arith.mulf %124, %125 : vector<16x16xf32>
    %cst_50 = arith.constant dense<0xFF800000> : vector<16xf32>
    %127 = vector.multi_reduction <maximumf>, %126, %cst_50 [1] : vector<16x16xf32> to vector<16xf32>
    %128 = vector.shape_cast %127 : vector<16xf32> to vector<16x1xf32>
    %129 = vector.broadcast %128 : vector<16x1xf32> to vector<16x16xf32>
    %130 = arith.subf %126, %129 : vector<16x16xf32>
    %131 = math.exp %130 : vector<16x16xf32>
    %cst_51 = arith.constant dense<0.000000e+00> : vector<16xf32>
    %132 = vector.multi_reduction <add>, %131, %cst_51 [1] : vector<16x16xf32> to vector<16xf32>
    %133 = vector.shape_cast %132 : vector<16xf32> to vector<16x1xf32>
    %134 = tpu.reciprocal %133 {approx = true} : vector<16x1xf32> -> vector<16x1xf32>
    %135 = vector.broadcast %134 : vector<16x1xf32> to vector<16x16xf32>
    %136 = arith.mulf %131, %135 : vector<16x16xf32>
    %137 = vector.extract_strided_slice %65 {offsets = [0, 64], sizes = [16, 32], strides = [1, 1]} : vector<16x128xf32> to vector<16x32xf32>
    %138 = arith.truncf %136 : vector<16x16xf32> to vector<16x16xbf16>
    %139 = arith.truncf %137 : vector<16x32xf32> to vector<16x32xbf16>
    %cst_52 = arith.constant dense<0.000000e+00> : vector<16x32xf32>
    %140 = tpu.matmul %138, %139, %cst_52 {dimension_numbers = #tpu.dot_dimension_numbers<[1], [0], [0], [1], [0, 0, 1, 1], [], []>} : vector<16x16xbf16>, vector<16x32xbf16>, vector<16x32xf32> -> vector<16x32xf32>
    %141 = vector.extract_strided_slice %66 {offsets = [64, 0], sizes = [32, 128], strides = [1, 1]} : vector<128x128xbf16> to vector<32x128xbf16>
    %142 = arith.truncf %140 : vector<16x32xf32> to vector<16x32xbf16>
    %cst_53 = arith.constant dense<0.000000e+00> : vector<16x128xf32>
    %143 = tpu.matmul %142, %141, %cst_53 {dimension_numbers = #tpu.dot_dimension_numbers<[1], [0], [0], [1], [0, 0, 1, 1], [], []>} : vector<16x32xbf16>, vector<32x128xbf16>, vector<16x128xf32> -> vector<16x128xf32>
    %144 = arith.addf %119, %143 : vector<16x128xf32>
    %145 = vector.extract_strided_slice %57 {offsets = [0, 96], sizes = [16, 32], strides = [1, 1]} : vector<16x128xf32> to vector<16x32xf32>
    %146 = vector.extract_strided_slice %64 {offsets = [0, 96], sizes = [16, 32], strides = [1, 1]} : vector<16x128xf32> to vector<16x32xf32>
    %147 = arith.truncf %145 : vector<16x32xf32> to vector<16x32xbf16>
    %148 = arith.truncf %146 : vector<16x32xf32> to vector<16x32xbf16>
    %cst_54 = arith.constant dense<0.000000e+00> : vector<16x16xf32>
    %149 = tpu.matmul %147, %148, %cst_54 {dimension_numbers = #tpu.dot_dimension_numbers<[1], [1], [0], [0], [0, 0, 1, 0], [], []>} : vector<16x32xbf16>, vector<16x32xbf16>, vector<16x16xf32> -> vector<16x16xf32>
    %cst_55 = arith.constant 0.176776692 : f32
    %150 = vector.broadcast %cst_55 : f32 to vector<16x16xf32>
    %151 = arith.mulf %149, %150 : vector<16x16xf32>
    %cst_56 = arith.constant dense<0xFF800000> : vector<16xf32>
    %152 = vector.multi_reduction <maximumf>, %151, %cst_56 [1] : vector<16x16xf32> to vector<16xf32>
    %153 = vector.shape_cast %152 : vector<16xf32> to vector<16x1xf32>
    %154 = vector.broadcast %153 : vector<16x1xf32> to vector<16x16xf32>
    %155 = arith.subf %151, %154 : vector<16x16xf32>
    %156 = math.exp %155 : vector<16x16xf32>
    %cst_57 = arith.constant dense<0.000000e+00> : vector<16xf32>
    %157 = vector.multi_reduction <add>, %156, %cst_57 [1] : vector<16x16xf32> to vector<16xf32>
    %158 = vector.shape_cast %157 : vector<16xf32> to vector<16x1xf32>
    %159 = tpu.reciprocal %158 {approx = true} : vector<16x1xf32> -> vector<16x1xf32>
    %160 = vector.broadcast %159 : vector<16x1xf32> to vector<16x16xf32>
    %161 = arith.mulf %156, %160 : vector<16x16xf32>
    %162 = vector.extract_strided_slice %65 {offsets = [0, 96], sizes = [16, 32], strides = [1, 1]} : vector<16x128xf32> to vector<16x32xf32>
    %163 = arith.truncf %161 : vector<16x16xf32> to vector<16x16xbf16>
    %164 = arith.truncf %162 : vector<16x32xf32> to vector<16x32xbf16>
    %cst_58 = arith.constant dense<0.000000e+00> : vector<16x32xf32>
    %165 = tpu.matmul %163, %164, %cst_58 {dimension_numbers = #tpu.dot_dimension_numbers<[1], [0], [0], [1], [0, 0, 1, 1], [], []>} : vector<16x16xbf16>, vector<16x32xbf16>, vector<16x32xf32> -> vector<16x32xf32>
    %166 = vector.extract_strided_slice %66 {offsets = [96, 0], sizes = [32, 128], strides = [1, 1]} : vector<128x128xbf16> to vector<32x128xbf16>
    %167 = arith.truncf %165 : vector<16x32xf32> to vector<16x32xbf16>
    %cst_59 = arith.constant dense<0.000000e+00> : vector<16x128xf32>
    %168 = tpu.matmul %167, %166, %cst_59 {dimension_numbers = #tpu.dot_dimension_numbers<[1], [0], [0], [1], [0, 0, 1, 1], [], []>} : vector<16x32xbf16>, vector<32x128xbf16>, vector<16x128xf32> -> vector<16x128xf32>
    %169 = arith.addf %144, %168 : vector<16x128xf32>
    %c0_60 = arith.constant 0 : index
    %c0_61 = arith.constant 0 : index
    %c0_62 = arith.constant 0 : index
    %170 = vector.load %arg14[%c0_60, %c0_61, %c0_62] : memref<1x16x128xf32, #tpu.memory_space<vmem>>, vector<1x16x128xf32>
    %171 = vector.shape_cast %170 : vector<1x16x128xf32> to vector<16x128xf32>
    %172 = vector.shape_cast %169 : vector<16x128xf32> to vector<1x16x128xf32>
    tpu.vector_store %arg14[%c0_60, %c0_61, %c0_62], %172 {strides = array<i32>} : memref<1x16x128xf32, #tpu.memory_space<vmem>>, vector<1x16x128xf32>,
    return
  }
  func.func @transform_0(%arg0: i32, %arg1: i32) -> (i32, i32, i32) {
    %c0_i32 = arith.constant 0 : i32
    %c0_i32_0 = arith.constant 0 : i32
    return %arg0, %arg1, %c0_i32 : i32, i32, i32
  }
  func.func @transform_1(%arg0: i32, %arg1: i32) -> (i32, i32, i32) {
    %c0_i32 = arith.constant 0 : i32
    %c0_i32_0 = arith.constant 0 : i32
    %c0_i32_1 = arith.constant 0 : i32
    return %arg0, %c0_i32, %c0_i32_0 : i32, i32, i32
  }
  func.func @transform_2(%arg0: i32, %arg1: i32) -> (i32, i32) {
    %c0_i32 = arith.constant 0 : i32
    %c0_i32_0 = arith.constant 0 : i32
    %c0_i32_1 = arith.constant 0 : i32
    return %c0_i32, %c0_i32_0 : i32, i32
  }
  func.func @transform_3(%arg0: i32, %arg1: i32) -> (i32, i32) {
    %c0_i32 = arith.constant 0 : i32
    %c0_i32_0 = arith.constant 0 : i32
    %c0_i32_1 = arith.constant 0 : i32
    return %c0_i32, %c0_i32_0 : i32, i32
  }
  func.func @transform_4(%arg0: i32, %arg1: i32) -> (i32, i32) {
    %c0_i32 = arith.constant 0 : i32
    %c0_i32_0 = arith.constant 0 : i32
    %c0_i32_1 = arith.constant 0 : i32
    return %c0_i32, %c0_i32_0 : i32, i32
  }
  func.func @transform_5(%arg0: i32, %arg1: i32) -> (i32, i32) {
    %c0_i32 = arith.constant 0 : i32
    %c0_i32_0 = arith.constant 0 : i32
    %c0_i32_1 = arith.constant 0 : i32
    return %c0_i32, %c0_i32_0 : i32, i32
  }
  func.func @transform_6(%arg0: i32, %arg1: i32) -> (i32, i32) {
    %c0_i32 = arith.constant 0 : i32
    %c0_i32_0 = arith.constant 0 : i32
    %c0_i32_1 = arith.constant 0 : i32
    return %c0_i32, %c0_i32_0 : i32, i32
  }
  func.func @transform_7(%arg0: i32, %arg1: i32) -> (i32, i32) {
    %c0_i32 = arith.constant 0 : i32
    %c0_i32_0 = arith.constant 0 : i32
    %c0_i32_1 = arith.constant 0 : i32
    return %c0_i32, %c0_i32_0 : i32, i32
  }
  func.func @transform_8(%arg0: i32, %arg1: i32) -> (i32, i32) {
    %c0_i32 = arith.constant 0 : i32
    %c0_i32_0 = arith.constant 0 : i32
    %c0_i32_1 = arith.constant 0 : i32
    return %c0_i32, %c0_i32_0 : i32, i32
  }
  func.func @transform_9(%arg0: i32, %arg1: i32) -> (i32, i32) {
    %c0_i32 = arith.constant 0 : i32
    %c0_i32_0 = arith.constant 0 : i32
    %c0_i32_1 = arith.constant 0 : i32
    return %c0_i32, %c0_i32_0 : i32, i32
  }
  func.func @transform_10(%arg0: i32, %arg1: i32) -> (i32, i32) {
    %c0_i32 = arith.constant 0 : i32
    %c0_i32_0 = arith.constant 0 : i32
    %c0_i32_1 = arith.constant 0 : i32
    return %c0_i32, %c0_i32_0 : i32, i32
  }
  func.func @transform_11(%arg0: i32, %arg1: i32) -> (i32, i32) {
    %c0_i32 = arith.constant 0 : i32
    %c0_i32_0 = arith.constant 0 : i32
    %c0_i32_1 = arith.constant 0 : i32
    return %c0_i32, %c0_i32_0 : i32, i32
  }
  func.func @transform_12(%arg0: i32, %arg1: i32) -> (i32, i32, i32) {
    %c0_i32 = arith.constant 0 : i32
    %c0_i32_0 = arith.constant 0 : i32
    return %arg0, %arg1, %c0_i32 : i32, i32, i32
  }
}

module attributes {stable_mosaic.version = 11 : i64} {
  func.func @_self_attn_kernel(%arg0: i32, %arg1: memref<1x16x128xf32, #tpu.memory_space<vmem>>, %arg2: memref<1x128xf32, #tpu.memory_space<vmem>>, %arg3: memref<1x128xf32, #tpu.memory_space<vmem>>, %arg4: memref<128x384xbf16, #tpu.memory_space<vmem>>, %arg5: memref<1x384xf32, #tpu.memory_space<vmem>>, %arg6: memref<128x128xbf16, #tpu.memory_space<vmem>>, %arg7: memref<1x128xf32, #tpu.memory_space<vmem>>, %arg8: memref<1x16x128xf32, #tpu.memory_space<vmem>>) attributes {dimension_semantics = [#tpu.dimension_semantics<parallel>], iteration_bounds = array<i64: 2>, scalar_prefetch = 0 : i64, scratch_operands = 0 : i64, tpu.core_type = #tpu.core_type<tc>, window_params = [{transform_indices = @transform_0, window_bounds = array<i64: 1, 16, 128>}, {pipeline_mode = #tpu.pipeline_mode<synchronous>, transform_indices = @transform_1, window_bounds = array<i64: 1, 128>}, {pipeline_mode = #tpu.pipeline_mode<synchronous>, transform_indices = @transform_2, window_bounds = array<i64: 1, 128>}, {pipeline_mode = #tpu.pipeline_mode<synchronous>, transform_indices = @transform_3, window_bounds = array<i64: 128, 384>}, {pipeline_mode = #tpu.pipeline_mode<synchronous>, transform_indices = @transform_4, window_bounds = array<i64: 1, 384>}, {pipeline_mode = #tpu.pipeline_mode<synchronous>, transform_indices = @transform_5, window_bounds = array<i64: 128, 128>}, {pipeline_mode = #tpu.pipeline_mode<synchronous>, transform_indices = @transform_6, window_bounds = array<i64: 1, 128>}, {transform_indices = @transform_7, window_bounds = array<i64: 1, 16, 128>}]} {
    %c0 = arith.constant 0 : index
    %c0_0 = arith.constant 0 : index
    %c0_1 = arith.constant 0 : index
    %0 = vector.load %arg1[%c0, %c0_0, %c0_1] : memref<1x16x128xf32, #tpu.memory_space<vmem>>, vector<1x16x128xf32>
    %1 = vector.shape_cast %0 : vector<1x16x128xf32> to vector<16x128xf32>
    %c0_2 = arith.constant 0 : index
    %c0_3 = arith.constant 0 : index
    %2 = vector.load %arg2[%c0_2, %c0_3] : memref<1x128xf32, #tpu.memory_space<vmem>>, vector<1x128xf32>
    %c0_4 = arith.constant 0 : index
    %c0_5 = arith.constant 0 : index
    %3 = vector.load %arg3[%c0_4, %c0_5] : memref<1x128xf32, #tpu.memory_space<vmem>>, vector<1x128xf32>
    %cst = arith.constant dense<0.000000e+00> : vector<16xf32>
    %4 = vector.multi_reduction <add>, %1, %cst [1] : vector<16x128xf32> to vector<16xf32>
    %5 = vector.shape_cast %4 : vector<16xf32> to vector<16x1xf32>
    %cst_6 = arith.constant 1.280000e+02 : f32
    %6 = vector.broadcast %cst_6 : f32 to vector<16x1xf32>
    %7 = arith.divf %5, %6 : vector<16x1xf32>
    %8 = vector.broadcast %7 : vector<16x1xf32> to vector<16x128xf32>
    %9 = arith.subf %1, %8 : vector<16x128xf32>
    %10 = arith.mulf %9, %9 : vector<16x128xf32>
    %cst_7 = arith.constant dense<0.000000e+00> : vector<16xf32>
    %11 = vector.multi_reduction <add>, %10, %cst_7 [1] : vector<16x128xf32> to vector<16xf32>
    %12 = vector.shape_cast %11 : vector<16xf32> to vector<16x1xf32>
    %cst_8 = arith.constant 1.280000e+02 : f32
    %13 = vector.broadcast %cst_8 : f32 to vector<16x1xf32>
    %14 = arith.divf %12, %13 : vector<16x1xf32>
    %15 = vector.broadcast %7 : vector<16x1xf32> to vector<16x128xf32>
    %16 = arith.subf %1, %15 : vector<16x128xf32>
    %cst_9 = arith.constant 9.99999974E-6 : f32
    %17 = vector.broadcast %cst_9 : f32 to vector<16x1xf32>
    %18 = arith.addf %14, %17 : vector<16x1xf32>
    %19 = math.rsqrt %18 : vector<16x1xf32>
    %20 = vector.broadcast %19 : vector<16x1xf32> to vector<16x128xf32>
    %21 = arith.mulf %16, %20 : vector<16x128xf32>
    %22 = vector.broadcast %2 : vector<1x128xf32> to vector<16x128xf32>
    %23 = arith.mulf %21, %22 : vector<16x128xf32>
    %24 = vector.broadcast %3 : vector<1x128xf32> to vector<16x128xf32>
    %25 = arith.addf %23, %24 : vector<16x128xf32>
    %c0_10 = arith.constant 0 : index
    %c0_11 = arith.constant 0 : index
    %26 = vector.load %arg4[%c0_10, %c0_11] : memref<128x384xbf16, #tpu.memory_space<vmem>>, vector<128x384xbf16>
    %27 = arith.truncf %25 : vector<16x128xf32> to vector<16x128xbf16>
    %cst_12 = arith.constant dense<0.000000e+00> : vector<16x384xf32>
    %28 = tpu.matmul %27, %26, %cst_12 {dimension_numbers = #tpu.dot_dimension_numbers<[1], [0], [0], [1], [0, 0, 1, 1], [], []>} : vector<16x128xbf16>, vector<128x384xbf16>, vector<16x384xf32> -> vector<16x384xf32>
    %c0_13 = arith.constant 0 : index
    %c0_14 = arith.constant 0 : index
    %29 = vector.load %arg5[%c0_13, %c0_14] : memref<1x384xf32, #tpu.memory_space<vmem>>, vector<1x384xf32>
    %30 = vector.broadcast %29 : vector<1x384xf32> to vector<16x384xf32>
    %31 = arith.addf %28, %30 : vector<16x384xf32>
    %32 = vector.extract_strided_slice %31 {offsets = [0, 0], sizes = [16, 128], strides = [1, 1]} : vector<16x384xf32> to vector<16x128xf32>
    %33 = vector.extract_strided_slice %31 {offsets = [0, 128], sizes = [16, 128], strides = [1, 1]} : vector<16x384xf32> to vector<16x128xf32>
    %34 = vector.extract_strided_slice %31 {offsets = [0, 256], sizes = [16, 128], strides = [1, 1]} : vector<16x384xf32> to vector<16x128xf32>
    %c0_15 = arith.constant 0 : index
    %c0_16 = arith.constant 0 : index
    %35 = vector.load %arg6[%c0_15, %c0_16] : memref<128x128xbf16, #tpu.memory_space<vmem>>, vector<128x128xbf16>
    %c0_17 = arith.constant 0 : index
    %c0_18 = arith.constant 0 : index
    %36 = vector.load %arg7[%c0_17, %c0_18] : memref<1x128xf32, #tpu.memory_space<vmem>>, vector<1x128xf32>
    %37 = vector.broadcast %36 : vector<1x128xf32> to vector<16x128xf32>
    %38 = arith.addf %1, %37 : vector<16x128xf32>
    %39 = vector.extract_strided_slice %32 {offsets = [0, 0], sizes = [16, 32], strides = [1, 1]} : vector<16x128xf32> to vector<16x32xf32>
    %40 = vector.extract_strided_slice %33 {offsets = [0, 0], sizes = [16, 32], strides = [1, 1]} : vector<16x128xf32> to vector<16x32xf32>
    %41 = arith.truncf %39 : vector<16x32xf32> to vector<16x32xbf16>
    %42 = arith.truncf %40 : vector<16x32xf32> to vector<16x32xbf16>
    %cst_19 = arith.constant dense<0.000000e+00> : vector<16x16xf32>
    %43 = tpu.matmul %41, %42, %cst_19 {dimension_numbers = #tpu.dot_dimension_numbers<[1], [1], [0], [0], [0, 0, 1, 0], [], []>} : vector<16x32xbf16>, vector<16x32xbf16>, vector<16x16xf32> -> vector<16x16xf32>
    %cst_20 = arith.constant 0.176776692 : f32
    %44 = vector.broadcast %cst_20 : f32 to vector<16x16xf32>
    %45 = arith.mulf %43, %44 : vector<16x16xf32>
    %cst_21 = arith.constant dense<0xFF800000> : vector<16xf32>
    %46 = vector.multi_reduction <maximumf>, %45, %cst_21 [1] : vector<16x16xf32> to vector<16xf32>
    %47 = vector.shape_cast %46 : vector<16xf32> to vector<16x1xf32>
    %48 = vector.broadcast %47 : vector<16x1xf32> to vector<16x16xf32>
    %49 = arith.subf %45, %48 : vector<16x16xf32>
    %50 = math.exp %49 : vector<16x16xf32>
    %cst_22 = arith.constant dense<0.000000e+00> : vector<16xf32>
    %51 = vector.multi_reduction <add>, %50, %cst_22 [1] : vector<16x16xf32> to vector<16xf32>
    %52 = vector.shape_cast %51 : vector<16xf32> to vector<16x1xf32>
    %53 = tpu.reciprocal %52 {approx = true} : vector<16x1xf32> -> vector<16x1xf32>
    %54 = vector.broadcast %53 : vector<16x1xf32> to vector<16x16xf32>
    %55 = arith.mulf %50, %54 : vector<16x16xf32>
    %56 = vector.extract_strided_slice %34 {offsets = [0, 0], sizes = [16, 32], strides = [1, 1]} : vector<16x128xf32> to vector<16x32xf32>
    %57 = arith.truncf %55 : vector<16x16xf32> to vector<16x16xbf16>
    %58 = arith.truncf %56 : vector<16x32xf32> to vector<16x32xbf16>
    %cst_23 = arith.constant dense<0.000000e+00> : vector<16x32xf32>
    %59 = tpu.matmul %57, %58, %cst_23 {dimension_numbers = #tpu.dot_dimension_numbers<[1], [0], [0], [1], [0, 0, 1, 1], [], []>} : vector<16x16xbf16>, vector<16x32xbf16>, vector<16x32xf32> -> vector<16x32xf32>
    %60 = vector.extract_strided_slice %35 {offsets = [0, 0], sizes = [32, 128], strides = [1, 1]} : vector<128x128xbf16> to vector<32x128xbf16>
    %61 = arith.truncf %59 : vector<16x32xf32> to vector<16x32xbf16>
    %cst_24 = arith.constant dense<0.000000e+00> : vector<16x128xf32>
    %62 = tpu.matmul %61, %60, %cst_24 {dimension_numbers = #tpu.dot_dimension_numbers<[1], [0], [0], [1], [0, 0, 1, 1], [], []>} : vector<16x32xbf16>, vector<32x128xbf16>, vector<16x128xf32> -> vector<16x128xf32>
    %63 = arith.addf %38, %62 : vector<16x128xf32>
    %64 = vector.extract_strided_slice %32 {offsets = [0, 32], sizes = [16, 32], strides = [1, 1]} : vector<16x128xf32> to vector<16x32xf32>
    %65 = vector.extract_strided_slice %33 {offsets = [0, 32], sizes = [16, 32], strides = [1, 1]} : vector<16x128xf32> to vector<16x32xf32>
    %66 = arith.truncf %64 : vector<16x32xf32> to vector<16x32xbf16>
    %67 = arith.truncf %65 : vector<16x32xf32> to vector<16x32xbf16>
    %cst_25 = arith.constant dense<0.000000e+00> : vector<16x16xf32>
    %68 = tpu.matmul %66, %67, %cst_25 {dimension_numbers = #tpu.dot_dimension_numbers<[1], [1], [0], [0], [0, 0, 1, 0], [], []>} : vector<16x32xbf16>, vector<16x32xbf16>, vector<16x16xf32> -> vector<16x16xf32>
    %cst_26 = arith.constant 0.176776692 : f32
    %69 = vector.broadcast %cst_26 : f32 to vector<16x16xf32>
    %70 = arith.mulf %68, %69 : vector<16x16xf32>
    %cst_27 = arith.constant dense<0xFF800000> : vector<16xf32>
    %71 = vector.multi_reduction <maximumf>, %70, %cst_27 [1] : vector<16x16xf32> to vector<16xf32>
    %72 = vector.shape_cast %71 : vector<16xf32> to vector<16x1xf32>
    %73 = vector.broadcast %72 : vector<16x1xf32> to vector<16x16xf32>
    %74 = arith.subf %70, %73 : vector<16x16xf32>
    %75 = math.exp %74 : vector<16x16xf32>
    %cst_28 = arith.constant dense<0.000000e+00> : vector<16xf32>
    %76 = vector.multi_reduction <add>, %75, %cst_28 [1] : vector<16x16xf32> to vector<16xf32>
    %77 = vector.shape_cast %76 : vector<16xf32> to vector<16x1xf32>
    %78 = tpu.reciprocal %77 {approx = true} : vector<16x1xf32> -> vector<16x1xf32>
    %79 = vector.broadcast %78 : vector<16x1xf32> to vector<16x16xf32>
    %80 = arith.mulf %75, %79 : vector<16x16xf32>
    %81 = vector.extract_strided_slice %34 {offsets = [0, 32], sizes = [16, 32], strides = [1, 1]} : vector<16x128xf32> to vector<16x32xf32>
    %82 = arith.truncf %80 : vector<16x16xf32> to vector<16x16xbf16>
    %83 = arith.truncf %81 : vector<16x32xf32> to vector<16x32xbf16>
    %cst_29 = arith.constant dense<0.000000e+00> : vector<16x32xf32>
    %84 = tpu.matmul %82, %83, %cst_29 {dimension_numbers = #tpu.dot_dimension_numbers<[1], [0], [0], [1], [0, 0, 1, 1], [], []>} : vector<16x16xbf16>, vector<16x32xbf16>, vector<16x32xf32> -> vector<16x32xf32>
    %85 = vector.extract_strided_slice %35 {offsets = [32, 0], sizes = [32, 128], strides = [1, 1]} : vector<128x128xbf16> to vector<32x128xbf16>
    %86 = arith.truncf %84 : vector<16x32xf32> to vector<16x32xbf16>
    %cst_30 = arith.constant dense<0.000000e+00> : vector<16x128xf32>
    %87 = tpu.matmul %86, %85, %cst_30 {dimension_numbers = #tpu.dot_dimension_numbers<[1], [0], [0], [1], [0, 0, 1, 1], [], []>} : vector<16x32xbf16>, vector<32x128xbf16>, vector<16x128xf32> -> vector<16x128xf32>
    %88 = arith.addf %63, %87 : vector<16x128xf32>
    %89 = vector.extract_strided_slice %32 {offsets = [0, 64], sizes = [16, 32], strides = [1, 1]} : vector<16x128xf32> to vector<16x32xf32>
    %90 = vector.extract_strided_slice %33 {offsets = [0, 64], sizes = [16, 32], strides = [1, 1]} : vector<16x128xf32> to vector<16x32xf32>
    %91 = arith.truncf %89 : vector<16x32xf32> to vector<16x32xbf16>
    %92 = arith.truncf %90 : vector<16x32xf32> to vector<16x32xbf16>
    %cst_31 = arith.constant dense<0.000000e+00> : vector<16x16xf32>
    %93 = tpu.matmul %91, %92, %cst_31 {dimension_numbers = #tpu.dot_dimension_numbers<[1], [1], [0], [0], [0, 0, 1, 0], [], []>} : vector<16x32xbf16>, vector<16x32xbf16>, vector<16x16xf32> -> vector<16x16xf32>
    %cst_32 = arith.constant 0.176776692 : f32
    %94 = vector.broadcast %cst_32 : f32 to vector<16x16xf32>
    %95 = arith.mulf %93, %94 : vector<16x16xf32>
    %cst_33 = arith.constant dense<0xFF800000> : vector<16xf32>
    %96 = vector.multi_reduction <maximumf>, %95, %cst_33 [1] : vector<16x16xf32> to vector<16xf32>
    %97 = vector.shape_cast %96 : vector<16xf32> to vector<16x1xf32>
    %98 = vector.broadcast %97 : vector<16x1xf32> to vector<16x16xf32>
    %99 = arith.subf %95, %98 : vector<16x16xf32>
    %100 = math.exp %99 : vector<16x16xf32>
    %cst_34 = arith.constant dense<0.000000e+00> : vector<16xf32>
    %101 = vector.multi_reduction <add>, %100, %cst_34 [1] : vector<16x16xf32> to vector<16xf32>
    %102 = vector.shape_cast %101 : vector<16xf32> to vector<16x1xf32>
    %103 = tpu.reciprocal %102 {approx = true} : vector<16x1xf32> -> vector<16x1xf32>
    %104 = vector.broadcast %103 : vector<16x1xf32> to vector<16x16xf32>
    %105 = arith.mulf %100, %104 : vector<16x16xf32>
    %106 = vector.extract_strided_slice %34 {offsets = [0, 64], sizes = [16, 32], strides = [1, 1]} : vector<16x128xf32> to vector<16x32xf32>
    %107 = arith.truncf %105 : vector<16x16xf32> to vector<16x16xbf16>
    %108 = arith.truncf %106 : vector<16x32xf32> to vector<16x32xbf16>
    %cst_35 = arith.constant dense<0.000000e+00> : vector<16x32xf32>
    %109 = tpu.matmul %107, %108, %cst_35 {dimension_numbers = #tpu.dot_dimension_numbers<[1], [0], [0], [1], [0, 0, 1, 1], [], []>} : vector<16x16xbf16>, vector<16x32xbf16>, vector<16x32xf32> -> vector<16x32xf32>
    %110 = vector.extract_strided_slice %35 {offsets = [64, 0], sizes = [32, 128], strides = [1, 1]} : vector<128x128xbf16> to vector<32x128xbf16>
    %111 = arith.truncf %109 : vector<16x32xf32> to vector<16x32xbf16>
    %cst_36 = arith.constant dense<0.000000e+00> : vector<16x128xf32>
    %112 = tpu.matmul %111, %110, %cst_36 {dimension_numbers = #tpu.dot_dimension_numbers<[1], [0], [0], [1], [0, 0, 1, 1], [], []>} : vector<16x32xbf16>, vector<32x128xbf16>, vector<16x128xf32> -> vector<16x128xf32>
    %113 = arith.addf %88, %112 : vector<16x128xf32>
    %114 = vector.extract_strided_slice %32 {offsets = [0, 96], sizes = [16, 32], strides = [1, 1]} : vector<16x128xf32> to vector<16x32xf32>
    %115 = vector.extract_strided_slice %33 {offsets = [0, 96], sizes = [16, 32], strides = [1, 1]} : vector<16x128xf32> to vector<16x32xf32>
    %116 = arith.truncf %114 : vector<16x32xf32> to vector<16x32xbf16>
    %117 = arith.truncf %115 : vector<16x32xf32> to vector<16x32xbf16>
    %cst_37 = arith.constant dense<0.000000e+00> : vector<16x16xf32>
    %118 = tpu.matmul %116, %117, %cst_37 {dimension_numbers = #tpu.dot_dimension_numbers<[1], [1], [0], [0], [0, 0, 1, 0], [], []>} : vector<16x32xbf16>, vector<16x32xbf16>, vector<16x16xf32> -> vector<16x16xf32>
    %cst_38 = arith.constant 0.176776692 : f32
    %119 = vector.broadcast %cst_38 : f32 to vector<16x16xf32>
    %120 = arith.mulf %118, %119 : vector<16x16xf32>
    %cst_39 = arith.constant dense<0xFF800000> : vector<16xf32>
    %121 = vector.multi_reduction <maximumf>, %120, %cst_39 [1] : vector<16x16xf32> to vector<16xf32>
    %122 = vector.shape_cast %121 : vector<16xf32> to vector<16x1xf32>
    %123 = vector.broadcast %122 : vector<16x1xf32> to vector<16x16xf32>
    %124 = arith.subf %120, %123 : vector<16x16xf32>
    %125 = math.exp %124 : vector<16x16xf32>
    %cst_40 = arith.constant dense<0.000000e+00> : vector<16xf32>
    %126 = vector.multi_reduction <add>, %125, %cst_40 [1] : vector<16x16xf32> to vector<16xf32>
    %127 = vector.shape_cast %126 : vector<16xf32> to vector<16x1xf32>
    %128 = tpu.reciprocal %127 {approx = true} : vector<16x1xf32> -> vector<16x1xf32>
    %129 = vector.broadcast %128 : vector<16x1xf32> to vector<16x16xf32>
    %130 = arith.mulf %125, %129 : vector<16x16xf32>
    %131 = vector.extract_strided_slice %34 {offsets = [0, 96], sizes = [16, 32], strides = [1, 1]} : vector<16x128xf32> to vector<16x32xf32>
    %132 = arith.truncf %130 : vector<16x16xf32> to vector<16x16xbf16>
    %133 = arith.truncf %131 : vector<16x32xf32> to vector<16x32xbf16>
    %cst_41 = arith.constant dense<0.000000e+00> : vector<16x32xf32>
    %134 = tpu.matmul %132, %133, %cst_41 {dimension_numbers = #tpu.dot_dimension_numbers<[1], [0], [0], [1], [0, 0, 1, 1], [], []>} : vector<16x16xbf16>, vector<16x32xbf16>, vector<16x32xf32> -> vector<16x32xf32>
    %135 = vector.extract_strided_slice %35 {offsets = [96, 0], sizes = [32, 128], strides = [1, 1]} : vector<128x128xbf16> to vector<32x128xbf16>
    %136 = arith.truncf %134 : vector<16x32xf32> to vector<16x32xbf16>
    %cst_42 = arith.constant dense<0.000000e+00> : vector<16x128xf32>
    %137 = tpu.matmul %136, %135, %cst_42 {dimension_numbers = #tpu.dot_dimension_numbers<[1], [0], [0], [1], [0, 0, 1, 1], [], []>} : vector<16x32xbf16>, vector<32x128xbf16>, vector<16x128xf32> -> vector<16x128xf32>
    %138 = arith.addf %113, %137 : vector<16x128xf32>
    %c0_43 = arith.constant 0 : index
    %c0_44 = arith.constant 0 : index
    %c0_45 = arith.constant 0 : index
    %139 = vector.load %arg8[%c0_43, %c0_44, %c0_45] : memref<1x16x128xf32, #tpu.memory_space<vmem>>, vector<1x16x128xf32>
    %140 = vector.shape_cast %139 : vector<1x16x128xf32> to vector<16x128xf32>
    %141 = vector.shape_cast %138 : vector<16x128xf32> to vector<1x16x128xf32>
    tpu.vector_store %arg8[%c0_43, %c0_44, %c0_45], %141 {strides = array<i32>} : memref<1x16x128xf32, #tpu.memory_space<vmem>>, vector<1x16x128xf32>,
    return
  }
  func.func @transform_0(%arg0: i32) -> (i32, i32, i32) {
    %c0_i32 = arith.constant 0 : i32
    %c0_i32_0 = arith.constant 0 : i32
    %c0_i32_1 = arith.constant 0 : i32
    return %arg0, %c0_i32, %c0_i32_0 : i32, i32, i32
  }
  func.func @transform_1(%arg0: i32) -> (i32, i32) {
    %c0_i32 = arith.constant 0 : i32
    %c0_i32_0 = arith.constant 0 : i32
    %c0_i32_1 = arith.constant 0 : i32
    return %c0_i32, %c0_i32_0 : i32, i32
  }
  func.func @transform_2(%arg0: i32) -> (i32, i32) {
    %c0_i32 = arith.constant 0 : i32
    %c0_i32_0 = arith.constant 0 : i32
    %c0_i32_1 = arith.constant 0 : i32
    return %c0_i32, %c0_i32_0 : i32, i32
  }
  func.func @transform_3(%arg0: i32) -> (i32, i32) {
    %c0_i32 = arith.constant 0 : i32
    %c0_i32_0 = arith.constant 0 : i32
    %c0_i32_1 = arith.constant 0 : i32
    return %c0_i32, %c0_i32_0 : i32, i32
  }
  func.func @transform_4(%arg0: i32) -> (i32, i32) {
    %c0_i32 = arith.constant 0 : i32
    %c0_i32_0 = arith.constant 0 : i32
    %c0_i32_1 = arith.constant 0 : i32
    return %c0_i32, %c0_i32_0 : i32, i32
  }
  func.func @transform_5(%arg0: i32) -> (i32, i32) {
    %c0_i32 = arith.constant 0 : i32
    %c0_i32_0 = arith.constant 0 : i32
    %c0_i32_1 = arith.constant 0 : i32
    return %c0_i32, %c0_i32_0 : i32, i32
  }
  func.func @transform_6(%arg0: i32) -> (i32, i32) {
    %c0_i32 = arith.constant 0 : i32
    %c0_i32_0 = arith.constant 0 : i32
    %c0_i32_1 = arith.constant 0 : i32
    return %c0_i32, %c0_i32_0 : i32, i32
  }
  func.func @transform_7(%arg0: i32) -> (i32, i32, i32) {
    %c0_i32 = arith.constant 0 : i32
    %c0_i32_0 = arith.constant 0 : i32
    %c0_i32_1 = arith.constant 0 : i32
    return %arg0, %c0_i32, %c0_i32_0 : i32, i32, i32
  }
}

module attributes {stable_mosaic.version = 11 : i64} {
  func.func @_mlp_kernel(%arg0: i32, %arg1: memref<32x128xf32, #tpu.memory_space<vmem>>, %arg2: memref<1x128xf32, #tpu.memory_space<vmem>>, %arg3: memref<1x128xf32, #tpu.memory_space<vmem>>, %arg4: memref<128x512xbf16, #tpu.memory_space<vmem>>, %arg5: memref<1x512xf32, #tpu.memory_space<vmem>>, %arg6: memref<512x128xbf16, #tpu.memory_space<vmem>>, %arg7: memref<1x128xf32, #tpu.memory_space<vmem>>, %arg8: memref<32x128xf32, #tpu.memory_space<vmem>>) attributes {dimension_semantics = [#tpu.dimension_semantics<parallel>], iteration_bounds = array<i64: 1>, scalar_prefetch = 0 : i64, scratch_operands = 0 : i64, tpu.core_type = #tpu.core_type<tc>, window_params = [{transform_indices = @transform_0, window_bounds = array<i64: 32, 128>}, {pipeline_mode = #tpu.pipeline_mode<synchronous>, transform_indices = @transform_1, window_bounds = array<i64: 1, 128>}, {pipeline_mode = #tpu.pipeline_mode<synchronous>, transform_indices = @transform_2, window_bounds = array<i64: 1, 128>}, {pipeline_mode = #tpu.pipeline_mode<synchronous>, transform_indices = @transform_3, window_bounds = array<i64: 128, 512>}, {pipeline_mode = #tpu.pipeline_mode<synchronous>, transform_indices = @transform_4, window_bounds = array<i64: 1, 512>}, {pipeline_mode = #tpu.pipeline_mode<synchronous>, transform_indices = @transform_5, window_bounds = array<i64: 512, 128>}, {pipeline_mode = #tpu.pipeline_mode<synchronous>, transform_indices = @transform_6, window_bounds = array<i64: 1, 128>}, {transform_indices = @transform_7, window_bounds = array<i64: 32, 128>}]} {
    %c0 = arith.constant 0 : index
    %c0_0 = arith.constant 0 : index
    %0 = vector.load %arg1[%c0, %c0_0] : memref<32x128xf32, #tpu.memory_space<vmem>>, vector<32x128xf32>
    %c0_1 = arith.constant 0 : index
    %c0_2 = arith.constant 0 : index
    %1 = vector.load %arg2[%c0_1, %c0_2] : memref<1x128xf32, #tpu.memory_space<vmem>>, vector<1x128xf32>
    %c0_3 = arith.constant 0 : index
    %c0_4 = arith.constant 0 : index
    %2 = vector.load %arg3[%c0_3, %c0_4] : memref<1x128xf32, #tpu.memory_space<vmem>>, vector<1x128xf32>
    %c0_5 = arith.constant 0 : index
    %c0_6 = arith.constant 0 : index
    %3 = vector.load %arg4[%c0_5, %c0_6] : memref<128x512xbf16, #tpu.memory_space<vmem>>, vector<128x512xbf16>
    %c0_7 = arith.constant 0 : index
    %c0_8 = arith.constant 0 : index
    %4 = vector.load %arg5[%c0_7, %c0_8] : memref<1x512xf32, #tpu.memory_space<vmem>>, vector<1x512xf32>
    %c0_9 = arith.constant 0 : index
    %c0_10 = arith.constant 0 : index
    %5 = vector.load %arg6[%c0_9, %c0_10] : memref<512x128xbf16, #tpu.memory_space<vmem>>, vector<512x128xbf16>
    %c0_11 = arith.constant 0 : index
    %c0_12 = arith.constant 0 : index
    %6 = vector.load %arg7[%c0_11, %c0_12] : memref<1x128xf32, #tpu.memory_space<vmem>>, vector<1x128xf32>
    %cst = arith.constant dense<0.000000e+00> : vector<32xf32>
    %7 = vector.multi_reduction <add>, %0, %cst [1] : vector<32x128xf32> to vector<32xf32>
    %8 = vector.shape_cast %7 : vector<32xf32> to vector<32x1xf32>
    %cst_13 = arith.constant 1.280000e+02 : f32
    %9 = vector.broadcast %cst_13 : f32 to vector<32x1xf32>
    %10 = arith.divf %8, %9 : vector<32x1xf32>
    %11 = vector.broadcast %10 : vector<32x1xf32> to vector<32x128xf32>
    %12 = arith.subf %0, %11 : vector<32x128xf32>
    %13 = arith.mulf %12, %12 : vector<32x128xf32>
    %cst_14 = arith.constant dense<0.000000e+00> : vector<32xf32>
    %14 = vector.multi_reduction <add>, %13, %cst_14 [1] : vector<32x128xf32> to vector<32xf32>
    %15 = vector.shape_cast %14 : vector<32xf32> to vector<32x1xf32>
    %cst_15 = arith.constant 1.280000e+02 : f32
    %16 = vector.broadcast %cst_15 : f32 to vector<32x1xf32>
    %17 = arith.divf %15, %16 : vector<32x1xf32>
    %18 = vector.broadcast %10 : vector<32x1xf32> to vector<32x128xf32>
    %19 = arith.subf %0, %18 : vector<32x128xf32>
    %cst_16 = arith.constant 9.99999974E-6 : f32
    %20 = vector.broadcast %cst_16 : f32 to vector<32x1xf32>
    %21 = arith.addf %17, %20 : vector<32x1xf32>
    %22 = math.rsqrt %21 : vector<32x1xf32>
    %23 = vector.broadcast %22 : vector<32x1xf32> to vector<32x128xf32>
    %24 = arith.mulf %19, %23 : vector<32x128xf32>
    %25 = vector.broadcast %1 : vector<1x128xf32> to vector<32x128xf32>
    %26 = arith.mulf %24, %25 : vector<32x128xf32>
    %27 = vector.broadcast %2 : vector<1x128xf32> to vector<32x128xf32>
    %28 = arith.addf %26, %27 : vector<32x128xf32>
    %29 = arith.truncf %28 : vector<32x128xf32> to vector<32x128xbf16>
    %cst_17 = arith.constant dense<0.000000e+00> : vector<32x512xf32>
    %30 = tpu.matmul %29, %3, %cst_17 {dimension_numbers = #tpu.dot_dimension_numbers<[1], [0], [0], [1], [0, 0, 1, 1], [], []>} : vector<32x128xbf16>, vector<128x512xbf16>, vector<32x512xf32> -> vector<32x512xf32>
    %31 = vector.broadcast %4 : vector<1x512xf32> to vector<32x512xf32>
    %32 = arith.addf %30, %31 : vector<32x512xf32>
    %cst_18 = arith.constant 5.000000e-01 : f32
    %33 = vector.broadcast %cst_18 : f32 to vector<32x512xf32>
    %34 = arith.mulf %33, %32 : vector<32x512xf32>
    %cst_19 = arith.constant 0.707106769 : f32
    %35 = vector.broadcast %cst_19 : f32 to vector<32x512xf32>
    %36 = arith.mulf %32, %35 : vector<32x512xf32>
    %37 = math.absf %36 : vector<32x512xf32>
    %cst_20 = arith.constant 0.327591091 : f32
    %38 = vector.broadcast %cst_20 : f32 to vector<32x512xf32>
    %39 = arith.mulf %38, %37 : vector<32x512xf32>
    %cst_21 = arith.constant 1.000000e+00 : f32
    %40 = vector.broadcast %cst_21 : f32 to vector<32x512xf32>
    %41 = arith.addf %40, %39 : vector<32x512xf32>
    %cst_22 = arith.constant 1.000000e+00 : f32
    %42 = vector.broadcast %cst_22 : f32 to vector<32x512xf32>
    %43 = arith.divf %42, %41 : vector<32x512xf32>
    %cst_23 = arith.constant 1.06140542 : f32
    %44 = vector.broadcast %cst_23 : f32 to vector<32x512xf32>
    %45 = arith.mulf %44, %43 : vector<32x512xf32>
    %cst_24 = arith.constant -1.45315206 : f32
    %46 = vector.broadcast %cst_24 : f32 to vector<32x512xf32>
    %47 = arith.addf %45, %46 : vector<32x512xf32>
    %48 = arith.mulf %47, %43 : vector<32x512xf32>
    %cst_25 = arith.constant 1.42141378 : f32
    %49 = vector.broadcast %cst_25 : f32 to vector<32x512xf32>
    %50 = arith.addf %48, %49 : vector<32x512xf32>
    %51 = arith.mulf %50, %43 : vector<32x512xf32>
    %cst_26 = arith.constant -0.284496725 : f32
    %52 = vector.broadcast %cst_26 : f32 to vector<32x512xf32>
    %53 = arith.addf %51, %52 : vector<32x512xf32>
    %54 = arith.mulf %53, %43 : vector<32x512xf32>
    %cst_27 = arith.constant 0.254829586 : f32
    %55 = vector.broadcast %cst_27 : f32 to vector<32x512xf32>
    %56 = arith.addf %54, %55 : vector<32x512xf32>
    %57 = arith.mulf %56, %43 : vector<32x512xf32>
    %cst_28 = arith.constant 0.000000e+00 : f32
    %58 = vector.broadcast %cst_28 : f32 to vector<32x512xf32>
    %59 = arith.subf %58, %37 : vector<32x512xf32>
    %60 = arith.mulf %59, %37 : vector<32x512xf32>
    %61 = math.exp %60 : vector<32x512xf32>
    %62 = arith.mulf %57, %61 : vector<32x512xf32>
    %cst_29 = arith.constant 1.000000e+00 : f32
    %63 = vector.broadcast %cst_29 : f32 to vector<32x512xf32>
    %64 = arith.subf %63, %62 : vector<32x512xf32>
    %cst_30 = arith.constant 0.000000e+00 : f32
    %65 = vector.broadcast %cst_30 : f32 to vector<32x512xf32>
    %66 = arith.cmpf olt, %36, %65 : vector<32x512xf32>
    %cst_31 = arith.constant 0.000000e+00 : f32
    %67 = vector.broadcast %cst_31 : f32 to vector<32x512xf32>
    %68 = arith.subf %67, %64 : vector<32x512xf32>
    %69 = arith.select %66, %68, %64 : vector<32x512xi1>, vector<32x512xf32>
    %cst_32 = arith.constant 1.000000e+00 : f32
    %70 = vector.broadcast %cst_32 : f32 to vector<32x512xf32>
    %71 = arith.addf %70, %69 : vector<32x512xf32>
    %72 = arith.mulf %34, %71 : vector<32x512xf32>
    %73 = arith.truncf %72 : vector<32x512xf32> to vector<32x512xbf16>
    %cst_33 = arith.constant dense<0.000000e+00> : vector<32x128xf32>
    %74 = tpu.matmul %73, %5, %cst_33 {dimension_numbers = #tpu.dot_dimension_numbers<[1], [0], [0], [1], [0, 0, 1, 1], [], []>} : vector<32x512xbf16>, vector<512x128xbf16>, vector<32x128xf32> -> vector<32x128xf32>
    %75 = arith.addf %0, %74 : vector<32x128xf32>
    %76 = vector.broadcast %6 : vector<1x128xf32> to vector<32x128xf32>
    %77 = arith.addf %75, %76 : vector<32x128xf32>
    %c0_34 = arith.constant 0 : index
    %c0_35 = arith.constant 0 : index
    %78 = vector.load %arg8[%c0_34, %c0_35] : memref<32x128xf32, #tpu.memory_space<vmem>>, vector<32x128xf32>
    tpu.vector_store %arg8[%c0_34, %c0_35], %77 {strides = array<i32>} : memref<32x128xf32, #tpu.memory_space<vmem>>, vector<32x128xf32>,
    return
  }
  func.func @transform_0(%arg0: i32) -> (i32, i32) {
    %c0_i32 = arith.constant 0 : i32
    %c0_i32_0 = arith.constant 0 : i32
    return %arg0, %c0_i32 : i32, i32
  }
  func.func @transform_1(%arg0: i32) -> (i32, i32) {
    %c0_i32 = arith.constant 0 : i32
    %c0_i32_0 = arith.constant 0 : i32
    %c0_i32_1 = arith.constant 0 : i32
    return %c0_i32, %c0_i32_0 : i32, i32
  }
  func.func @transform_2(%arg0: i32) -> (i32, i32) {
    %c0_i32 = arith.constant 0 : i32
    %c0_i32_0 = arith.constant 0 : i32
    %c0_i32_1 = arith.constant 0 : i32
    return %c0_i32, %c0_i32_0 : i32, i32
  }
  func.func @transform_3(%arg0: i32) -> (i32, i32) {
    %c0_i32 = arith.constant 0 : i32
    %c0_i32_0 = arith.constant 0 : i32
    %c0_i32_1 = arith.constant 0 : i32
    return %c0_i32, %c0_i32_0 : i32, i32
  }
  func.func @transform_4(%arg0: i32) -> (i32, i32) {
    %c0_i32 = arith.constant 0 : i32
    %c0_i32_0 = arith.constant 0 : i32
    %c0_i32_1 = arith.constant 0 : i32
    return %c0_i32, %c0_i32_0 : i32, i32
  }
  func.func @transform_5(%arg0: i32) -> (i32, i32) {
    %c0_i32 = arith.constant 0 : i32
    %c0_i32_0 = arith.constant 0 : i32
    %c0_i32_1 = arith.constant 0 : i32
    return %c0_i32, %c0_i32_0 : i32, i32
  }
  func.func @transform_6(%arg0: i32) -> (i32, i32) {
    %c0_i32 = arith.constant 0 : i32
    %c0_i32_0 = arith.constant 0 : i32
    %c0_i32_1 = arith.constant 0 : i32
    return %c0_i32, %c0_i32_0 : i32, i32
  }
  func.func @transform_7(%arg0: i32) -> (i32, i32) {
    %c0_i32 = arith.constant 0 : i32
    %c0_i32_0 = arith.constant 0 : i32
    return %arg0, %c0_i32 : i32, i32
  }
}

module attributes {stable_mosaic.version = 11 : i64} {
  func.func @_cross_attn_kernel(%arg0: i32, %arg1: i32, %arg2: memref<1x16x128xf32, #tpu.memory_space<vmem>>, %arg3: memref<1x16x128xf32, #tpu.memory_space<vmem>>, %arg4: memref<1x128xf32, #tpu.memory_space<vmem>>, %arg5: memref<1x128xf32, #tpu.memory_space<vmem>>, %arg6: memref<1x128xf32, #tpu.memory_space<vmem>>, %arg7: memref<1x128xf32, #tpu.memory_space<vmem>>, %arg8: memref<128x256xbf16, #tpu.memory_space<vmem>>, %arg9: memref<1x256xf32, #tpu.memory_space<vmem>>, %arg10: memref<128x128xbf16, #tpu.memory_space<vmem>>, %arg11: memref<1x128xf32, #tpu.memory_space<vmem>>, %arg12: memref<128x128xbf16, #tpu.memory_space<vmem>>, %arg13: memref<1x128xf32, #tpu.memory_space<vmem>>, %arg14: memref<1x16x128xf32, #tpu.memory_space<vmem>>) attributes {dimension_semantics = [#tpu.dimension_semantics<parallel>, #tpu.dimension_semantics<parallel>], iteration_bounds = array<i64: 2, 1>, scalar_prefetch = 0 : i64, scratch_operands = 0 : i64, tpu.core_type = #tpu.core_type<tc>, window_params = [{transform_indices = @transform_0, window_bounds = array<i64: 1, 16, 128>}, {transform_indices = @transform_1, window_bounds = array<i64: 1, 16, 128>}, {pipeline_mode = #tpu.pipeline_mode<synchronous>, transform_indices = @transform_2, window_bounds = array<i64: 1, 128>}, {pipeline_mode = #tpu.pipeline_mode<synchronous>, transform_indices = @transform_3, window_bounds = array<i64: 1, 128>}, {pipeline_mode = #tpu.pipeline_mode<synchronous>, transform_indices = @transform_4, window_bounds = array<i64: 1, 128>}, {pipeline_mode = #tpu.pipeline_mode<synchronous>, transform_indices = @transform_5, window_bounds = array<i64: 1, 128>}, {pipeline_mode = #tpu.pipeline_mode<synchronous>, transform_indices = @transform_6, window_bounds = array<i64: 128, 256>}, {pipeline_mode = #tpu.pipeline_mode<synchronous>, transform_indices = @transform_7, window_bounds = array<i64: 1, 256>}, {pipeline_mode = #tpu.pipeline_mode<synchronous>, transform_indices = @transform_8, window_bounds = array<i64: 128, 128>}, {pipeline_mode = #tpu.pipeline_mode<synchronous>, transform_indices = @transform_9, window_bounds = array<i64: 1, 128>}, {pipeline_mode = #tpu.pipeline_mode<synchronous>, transform_indices = @transform_10, window_bounds = array<i64: 128, 128>}, {pipeline_mode = #tpu.pipeline_mode<synchronous>, transform_indices = @transform_11, window_bounds = array<i64: 1, 128>}, {transform_indices = @transform_12, window_bounds = array<i64: 1, 16, 128>}]} {
    %c0 = arith.constant 0 : index
    %c0_0 = arith.constant 0 : index
    %c0_1 = arith.constant 0 : index
    %0 = vector.load %arg2[%c0, %c0_0, %c0_1] : memref<1x16x128xf32, #tpu.memory_space<vmem>>, vector<1x16x128xf32>
    %1 = vector.shape_cast %0 : vector<1x16x128xf32> to vector<16x128xf32>
    %c0_2 = arith.constant 0 : index
    %c0_3 = arith.constant 0 : index
    %c0_4 = arith.constant 0 : index
    %2 = vector.load %arg3[%c0_2, %c0_3, %c0_4] : memref<1x16x128xf32, #tpu.memory_space<vmem>>, vector<1x16x128xf32>
    %3 = vector.shape_cast %2 : vector<1x16x128xf32> to vector<16x128xf32>
    %c0_5 = arith.constant 0 : index
    %c0_6 = arith.constant 0 : index
    %4 = vector.load %arg4[%c0_5, %c0_6] : memref<1x128xf32, #tpu.memory_space<vmem>>, vector<1x128xf32>
    %c0_7 = arith.constant 0 : index
    %c0_8 = arith.constant 0 : index
    %5 = vector.load %arg5[%c0_7, %c0_8] : memref<1x128xf32, #tpu.memory_space<vmem>>, vector<1x128xf32>
    %cst = arith.constant dense<0.000000e+00> : vector<16xf32>
    %6 = vector.multi_reduction <add>, %1, %cst [1] : vector<16x128xf32> to vector<16xf32>
    %7 = vector.shape_cast %6 : vector<16xf32> to vector<16x1xf32>
    %cst_9 = arith.constant 1.280000e+02 : f32
    %8 = vector.broadcast %cst_9 : f32 to vector<16x1xf32>
    %9 = arith.divf %7, %8 : vector<16x1xf32>
    %10 = vector.broadcast %9 : vector<16x1xf32> to vector<16x128xf32>
    %11 = arith.subf %1, %10 : vector<16x128xf32>
    %12 = arith.mulf %11, %11 : vector<16x128xf32>
    %cst_10 = arith.constant dense<0.000000e+00> : vector<16xf32>
    %13 = vector.multi_reduction <add>, %12, %cst_10 [1] : vector<16x128xf32> to vector<16xf32>
    %14 = vector.shape_cast %13 : vector<16xf32> to vector<16x1xf32>
    %cst_11 = arith.constant 1.280000e+02 : f32
    %15 = vector.broadcast %cst_11 : f32 to vector<16x1xf32>
    %16 = arith.divf %14, %15 : vector<16x1xf32>
    %17 = vector.broadcast %9 : vector<16x1xf32> to vector<16x128xf32>
    %18 = arith.subf %1, %17 : vector<16x128xf32>
    %cst_12 = arith.constant 9.99999974E-6 : f32
    %19 = vector.broadcast %cst_12 : f32 to vector<16x1xf32>
    %20 = arith.addf %16, %19 : vector<16x1xf32>
    %21 = math.rsqrt %20 : vector<16x1xf32>
    %22 = vector.broadcast %21 : vector<16x1xf32> to vector<16x128xf32>
    %23 = arith.mulf %18, %22 : vector<16x128xf32>
    %24 = vector.broadcast %4 : vector<1x128xf32> to vector<16x128xf32>
    %25 = arith.mulf %23, %24 : vector<16x128xf32>
    %26 = vector.broadcast %5 : vector<1x128xf32> to vector<16x128xf32>
    %27 = arith.addf %25, %26 : vector<16x128xf32>
    %c0_13 = arith.constant 0 : index
    %c0_14 = arith.constant 0 : index
    %28 = vector.load %arg6[%c0_13, %c0_14] : memref<1x128xf32, #tpu.memory_space<vmem>>, vector<1x128xf32>
    %c0_15 = arith.constant 0 : index
    %c0_16 = arith.constant 0 : index
    %29 = vector.load %arg7[%c0_15, %c0_16] : memref<1x128xf32, #tpu.memory_space<vmem>>, vector<1x128xf32>
    %cst_17 = arith.constant dense<0.000000e+00> : vector<16xf32>
    %30 = vector.multi_reduction <add>, %3, %cst_17 [1] : vector<16x128xf32> to vector<16xf32>
    %31 = vector.shape_cast %30 : vector<16xf32> to vector<16x1xf32>
    %cst_18 = arith.constant 1.280000e+02 : f32
    %32 = vector.broadcast %cst_18 : f32 to vector<16x1xf32>
    %33 = arith.divf %31, %32 : vector<16x1xf32>
    %34 = vector.broadcast %33 : vector<16x1xf32> to vector<16x128xf32>
    %35 = arith.subf %3, %34 : vector<16x128xf32>
    %36 = arith.mulf %35, %35 : vector<16x128xf32>
    %cst_19 = arith.constant dense<0.000000e+00> : vector<16xf32>
    %37 = vector.multi_reduction <add>, %36, %cst_19 [1] : vector<16x128xf32> to vector<16xf32>
    %38 = vector.shape_cast %37 : vector<16xf32> to vector<16x1xf32>
    %cst_20 = arith.constant 1.280000e+02 : f32
    %39 = vector.broadcast %cst_20 : f32 to vector<16x1xf32>
    %40 = arith.divf %38, %39 : vector<16x1xf32>
    %41 = vector.broadcast %33 : vector<16x1xf32> to vector<16x128xf32>
    %42 = arith.subf %3, %41 : vector<16x128xf32>
    %cst_21 = arith.constant 9.99999974E-6 : f32
    %43 = vector.broadcast %cst_21 : f32 to vector<16x1xf32>
    %44 = arith.addf %40, %43 : vector<16x1xf32>
    %45 = math.rsqrt %44 : vector<16x1xf32>
    %46 = vector.broadcast %45 : vector<16x1xf32> to vector<16x128xf32>
    %47 = arith.mulf %42, %46 : vector<16x128xf32>
    %48 = vector.broadcast %28 : vector<1x128xf32> to vector<16x128xf32>
    %49 = arith.mulf %47, %48 : vector<16x128xf32>
    %50 = vector.broadcast %29 : vector<1x128xf32> to vector<16x128xf32>
    %51 = arith.addf %49, %50 : vector<16x128xf32>
    %c0_22 = arith.constant 0 : index
    %c0_23 = arith.constant 0 : index
    %52 = vector.load %arg10[%c0_22, %c0_23] : memref<128x128xbf16, #tpu.memory_space<vmem>>, vector<128x128xbf16>
    %53 = arith.truncf %27 : vector<16x128xf32> to vector<16x128xbf16>
    %cst_24 = arith.constant dense<0.000000e+00> : vector<16x128xf32>
    %54 = tpu.matmul %53, %52, %cst_24 {dimension_numbers = #tpu.dot_dimension_numbers<[1], [0], [0], [1], [0, 0, 1, 1], [], []>} : vector<16x128xbf16>, vector<128x128xbf16>, vector<16x128xf32> -> vector<16x128xf32>
    %c0_25 = arith.constant 0 : index
    %c0_26 = arith.constant 0 : index
    %55 = vector.load %arg11[%c0_25, %c0_26] : memref<1x128xf32, #tpu.memory_space<vmem>>, vector<1x128xf32>
    %56 = vector.broadcast %55 : vector<1x128xf32> to vector<16x128xf32>
    %57 = arith.addf %54, %56 : vector<16x128xf32>
    %c0_27 = arith.constant 0 : index
    %c0_28 = arith.constant 0 : index
    %58 = vector.load %arg8[%c0_27, %c0_28] : memref<128x256xbf16, #tpu.memory_space<vmem>>, vector<128x256xbf16>
    %59 = arith.truncf %51 : vector<16x128xf32> to vector<16x128xbf16>
    %cst_29 = arith.constant dense<0.000000e+00> : vector<16x256xf32>
    %60 = tpu.matmul %59, %58, %cst_29 {dimension_numbers = #tpu.dot_dimension_numbers<[1], [0], [0], [1], [0, 0, 1, 1], [], []>} : vector<16x128xbf16>, vector<128x256xbf16>, vector<16x256xf32> -> vector<16x256xf32>
    %c0_30 = arith.constant 0 : index
    %c0_31 = arith.constant 0 : index
    %61 = vector.load %arg9[%c0_30, %c0_31] : memref<1x256xf32, #tpu.memory_space<vmem>>, vector<1x256xf32>
    %62 = vector.broadcast %61 : vector<1x256xf32> to vector<16x256xf32>
    %63 = arith.addf %60, %62 : vector<16x256xf32>
    %64 = vector.extract_strided_slice %63 {offsets = [0, 0], sizes = [16, 128], strides = [1, 1]} : vector<16x256xf32> to vector<16x128xf32>
    %65 = vector.extract_strided_slice %63 {offsets = [0, 128], sizes = [16, 128], strides = [1, 1]} : vector<16x256xf32> to vector<16x128xf32>
    %c0_32 = arith.constant 0 : index
    %c0_33 = arith.constant 0 : index
    %66 = vector.load %arg12[%c0_32, %c0_33] : memref<128x128xbf16, #tpu.memory_space<vmem>>, vector<128x128xbf16>
    %c0_34 = arith.constant 0 : index
    %c0_35 = arith.constant 0 : index
    %67 = vector.load %arg13[%c0_34, %c0_35] : memref<1x128xf32, #tpu.memory_space<vmem>>, vector<1x128xf32>
    %68 = vector.broadcast %67 : vector<1x128xf32> to vector<16x128xf32>
    %69 = arith.addf %1, %68 : vector<16x128xf32>
    %70 = vector.extract_strided_slice %57 {offsets = [0, 0], sizes = [16, 32], strides = [1, 1]} : vector<16x128xf32> to vector<16x32xf32>
    %71 = vector.extract_strided_slice %64 {offsets = [0, 0], sizes = [16, 32], strides = [1, 1]} : vector<16x128xf32> to vector<16x32xf32>
    %72 = arith.truncf %70 : vector<16x32xf32> to vector<16x32xbf16>
    %73 = arith.truncf %71 : vector<16x32xf32> to vector<16x32xbf16>
    %cst_36 = arith.constant dense<0.000000e+00> : vector<16x16xf32>
    %74 = tpu.matmul %72, %73, %cst_36 {dimension_numbers = #tpu.dot_dimension_numbers<[1], [1], [0], [0], [0, 0, 1, 0], [], []>} : vector<16x32xbf16>, vector<16x32xbf16>, vector<16x16xf32> -> vector<16x16xf32>
    %cst_37 = arith.constant 0.176776692 : f32
    %75 = vector.broadcast %cst_37 : f32 to vector<16x16xf32>
    %76 = arith.mulf %74, %75 : vector<16x16xf32>
    %cst_38 = arith.constant dense<0xFF800000> : vector<16xf32>
    %77 = vector.multi_reduction <maximumf>, %76, %cst_38 [1] : vector<16x16xf32> to vector<16xf32>
    %78 = vector.shape_cast %77 : vector<16xf32> to vector<16x1xf32>
    %79 = vector.broadcast %78 : vector<16x1xf32> to vector<16x16xf32>
    %80 = arith.subf %76, %79 : vector<16x16xf32>
    %81 = math.exp %80 : vector<16x16xf32>
    %cst_39 = arith.constant dense<0.000000e+00> : vector<16xf32>
    %82 = vector.multi_reduction <add>, %81, %cst_39 [1] : vector<16x16xf32> to vector<16xf32>
    %83 = vector.shape_cast %82 : vector<16xf32> to vector<16x1xf32>
    %84 = tpu.reciprocal %83 {approx = true} : vector<16x1xf32> -> vector<16x1xf32>
    %85 = vector.broadcast %84 : vector<16x1xf32> to vector<16x16xf32>
    %86 = arith.mulf %81, %85 : vector<16x16xf32>
    %87 = vector.extract_strided_slice %65 {offsets = [0, 0], sizes = [16, 32], strides = [1, 1]} : vector<16x128xf32> to vector<16x32xf32>
    %88 = arith.truncf %86 : vector<16x16xf32> to vector<16x16xbf16>
    %89 = arith.truncf %87 : vector<16x32xf32> to vector<16x32xbf16>
    %cst_40 = arith.constant dense<0.000000e+00> : vector<16x32xf32>
    %90 = tpu.matmul %88, %89, %cst_40 {dimension_numbers = #tpu.dot_dimension_numbers<[1], [0], [0], [1], [0, 0, 1, 1], [], []>} : vector<16x16xbf16>, vector<16x32xbf16>, vector<16x32xf32> -> vector<16x32xf32>
    %91 = vector.extract_strided_slice %66 {offsets = [0, 0], sizes = [32, 128], strides = [1, 1]} : vector<128x128xbf16> to vector<32x128xbf16>
    %92 = arith.truncf %90 : vector<16x32xf32> to vector<16x32xbf16>
    %cst_41 = arith.constant dense<0.000000e+00> : vector<16x128xf32>
    %93 = tpu.matmul %92, %91, %cst_41 {dimension_numbers = #tpu.dot_dimension_numbers<[1], [0], [0], [1], [0, 0, 1, 1], [], []>} : vector<16x32xbf16>, vector<32x128xbf16>, vector<16x128xf32> -> vector<16x128xf32>
    %94 = arith.addf %69, %93 : vector<16x128xf32>
    %95 = vector.extract_strided_slice %57 {offsets = [0, 32], sizes = [16, 32], strides = [1, 1]} : vector<16x128xf32> to vector<16x32xf32>
    %96 = vector.extract_strided_slice %64 {offsets = [0, 32], sizes = [16, 32], strides = [1, 1]} : vector<16x128xf32> to vector<16x32xf32>
    %97 = arith.truncf %95 : vector<16x32xf32> to vector<16x32xbf16>
    %98 = arith.truncf %96 : vector<16x32xf32> to vector<16x32xbf16>
    %cst_42 = arith.constant dense<0.000000e+00> : vector<16x16xf32>
    %99 = tpu.matmul %97, %98, %cst_42 {dimension_numbers = #tpu.dot_dimension_numbers<[1], [1], [0], [0], [0, 0, 1, 0], [], []>} : vector<16x32xbf16>, vector<16x32xbf16>, vector<16x16xf32> -> vector<16x16xf32>
    %cst_43 = arith.constant 0.176776692 : f32
    %100 = vector.broadcast %cst_43 : f32 to vector<16x16xf32>
    %101 = arith.mulf %99, %100 : vector<16x16xf32>
    %cst_44 = arith.constant dense<0xFF800000> : vector<16xf32>
    %102 = vector.multi_reduction <maximumf>, %101, %cst_44 [1] : vector<16x16xf32> to vector<16xf32>
    %103 = vector.shape_cast %102 : vector<16xf32> to vector<16x1xf32>
    %104 = vector.broadcast %103 : vector<16x1xf32> to vector<16x16xf32>
    %105 = arith.subf %101, %104 : vector<16x16xf32>
    %106 = math.exp %105 : vector<16x16xf32>
    %cst_45 = arith.constant dense<0.000000e+00> : vector<16xf32>
    %107 = vector.multi_reduction <add>, %106, %cst_45 [1] : vector<16x16xf32> to vector<16xf32>
    %108 = vector.shape_cast %107 : vector<16xf32> to vector<16x1xf32>
    %109 = tpu.reciprocal %108 {approx = true} : vector<16x1xf32> -> vector<16x1xf32>
    %110 = vector.broadcast %109 : vector<16x1xf32> to vector<16x16xf32>
    %111 = arith.mulf %106, %110 : vector<16x16xf32>
    %112 = vector.extract_strided_slice %65 {offsets = [0, 32], sizes = [16, 32], strides = [1, 1]} : vector<16x128xf32> to vector<16x32xf32>
    %113 = arith.truncf %111 : vector<16x16xf32> to vector<16x16xbf16>
    %114 = arith.truncf %112 : vector<16x32xf32> to vector<16x32xbf16>
    %cst_46 = arith.constant dense<0.000000e+00> : vector<16x32xf32>
    %115 = tpu.matmul %113, %114, %cst_46 {dimension_numbers = #tpu.dot_dimension_numbers<[1], [0], [0], [1], [0, 0, 1, 1], [], []>} : vector<16x16xbf16>, vector<16x32xbf16>, vector<16x32xf32> -> vector<16x32xf32>
    %116 = vector.extract_strided_slice %66 {offsets = [32, 0], sizes = [32, 128], strides = [1, 1]} : vector<128x128xbf16> to vector<32x128xbf16>
    %117 = arith.truncf %115 : vector<16x32xf32> to vector<16x32xbf16>
    %cst_47 = arith.constant dense<0.000000e+00> : vector<16x128xf32>
    %118 = tpu.matmul %117, %116, %cst_47 {dimension_numbers = #tpu.dot_dimension_numbers<[1], [0], [0], [1], [0, 0, 1, 1], [], []>} : vector<16x32xbf16>, vector<32x128xbf16>, vector<16x128xf32> -> vector<16x128xf32>
    %119 = arith.addf %94, %118 : vector<16x128xf32>
    %120 = vector.extract_strided_slice %57 {offsets = [0, 64], sizes = [16, 32], strides = [1, 1]} : vector<16x128xf32> to vector<16x32xf32>
    %121 = vector.extract_strided_slice %64 {offsets = [0, 64], sizes = [16, 32], strides = [1, 1]} : vector<16x128xf32> to vector<16x32xf32>
    %122 = arith.truncf %120 : vector<16x32xf32> to vector<16x32xbf16>
    %123 = arith.truncf %121 : vector<16x32xf32> to vector<16x32xbf16>
    %cst_48 = arith.constant dense<0.000000e+00> : vector<16x16xf32>
    %124 = tpu.matmul %122, %123, %cst_48 {dimension_numbers = #tpu.dot_dimension_numbers<[1], [1], [0], [0], [0, 0, 1, 0], [], []>} : vector<16x32xbf16>, vector<16x32xbf16>, vector<16x16xf32> -> vector<16x16xf32>
    %cst_49 = arith.constant 0.176776692 : f32
    %125 = vector.broadcast %cst_49 : f32 to vector<16x16xf32>
    %126 = arith.mulf %124, %125 : vector<16x16xf32>
    %cst_50 = arith.constant dense<0xFF800000> : vector<16xf32>
    %127 = vector.multi_reduction <maximumf>, %126, %cst_50 [1] : vector<16x16xf32> to vector<16xf32>
    %128 = vector.shape_cast %127 : vector<16xf32> to vector<16x1xf32>
    %129 = vector.broadcast %128 : vector<16x1xf32> to vector<16x16xf32>
    %130 = arith.subf %126, %129 : vector<16x16xf32>
    %131 = math.exp %130 : vector<16x16xf32>
    %cst_51 = arith.constant dense<0.000000e+00> : vector<16xf32>
    %132 = vector.multi_reduction <add>, %131, %cst_51 [1] : vector<16x16xf32> to vector<16xf32>
    %133 = vector.shape_cast %132 : vector<16xf32> to vector<16x1xf32>
    %134 = tpu.reciprocal %133 {approx = true} : vector<16x1xf32> -> vector<16x1xf32>
    %135 = vector.broadcast %134 : vector<16x1xf32> to vector<16x16xf32>
    %136 = arith.mulf %131, %135 : vector<16x16xf32>
    %137 = vector.extract_strided_slice %65 {offsets = [0, 64], sizes = [16, 32], strides = [1, 1]} : vector<16x128xf32> to vector<16x32xf32>
    %138 = arith.truncf %136 : vector<16x16xf32> to vector<16x16xbf16>
    %139 = arith.truncf %137 : vector<16x32xf32> to vector<16x32xbf16>
    %cst_52 = arith.constant dense<0.000000e+00> : vector<16x32xf32>
    %140 = tpu.matmul %138, %139, %cst_52 {dimension_numbers = #tpu.dot_dimension_numbers<[1], [0], [0], [1], [0, 0, 1, 1], [], []>} : vector<16x16xbf16>, vector<16x32xbf16>, vector<16x32xf32> -> vector<16x32xf32>
    %141 = vector.extract_strided_slice %66 {offsets = [64, 0], sizes = [32, 128], strides = [1, 1]} : vector<128x128xbf16> to vector<32x128xbf16>
    %142 = arith.truncf %140 : vector<16x32xf32> to vector<16x32xbf16>
    %cst_53 = arith.constant dense<0.000000e+00> : vector<16x128xf32>
    %143 = tpu.matmul %142, %141, %cst_53 {dimension_numbers = #tpu.dot_dimension_numbers<[1], [0], [0], [1], [0, 0, 1, 1], [], []>} : vector<16x32xbf16>, vector<32x128xbf16>, vector<16x128xf32> -> vector<16x128xf32>
    %144 = arith.addf %119, %143 : vector<16x128xf32>
    %145 = vector.extract_strided_slice %57 {offsets = [0, 96], sizes = [16, 32], strides = [1, 1]} : vector<16x128xf32> to vector<16x32xf32>
    %146 = vector.extract_strided_slice %64 {offsets = [0, 96], sizes = [16, 32], strides = [1, 1]} : vector<16x128xf32> to vector<16x32xf32>
    %147 = arith.truncf %145 : vector<16x32xf32> to vector<16x32xbf16>
    %148 = arith.truncf %146 : vector<16x32xf32> to vector<16x32xbf16>
    %cst_54 = arith.constant dense<0.000000e+00> : vector<16x16xf32>
    %149 = tpu.matmul %147, %148, %cst_54 {dimension_numbers = #tpu.dot_dimension_numbers<[1], [1], [0], [0], [0, 0, 1, 0], [], []>} : vector<16x32xbf16>, vector<16x32xbf16>, vector<16x16xf32> -> vector<16x16xf32>
    %cst_55 = arith.constant 0.176776692 : f32
    %150 = vector.broadcast %cst_55 : f32 to vector<16x16xf32>
    %151 = arith.mulf %149, %150 : vector<16x16xf32>
    %cst_56 = arith.constant dense<0xFF800000> : vector<16xf32>
    %152 = vector.multi_reduction <maximumf>, %151, %cst_56 [1] : vector<16x16xf32> to vector<16xf32>
    %153 = vector.shape_cast %152 : vector<16xf32> to vector<16x1xf32>
    %154 = vector.broadcast %153 : vector<16x1xf32> to vector<16x16xf32>
    %155 = arith.subf %151, %154 : vector<16x16xf32>
    %156 = math.exp %155 : vector<16x16xf32>
    %cst_57 = arith.constant dense<0.000000e+00> : vector<16xf32>
    %157 = vector.multi_reduction <add>, %156, %cst_57 [1] : vector<16x16xf32> to vector<16xf32>
    %158 = vector.shape_cast %157 : vector<16xf32> to vector<16x1xf32>
    %159 = tpu.reciprocal %158 {approx = true} : vector<16x1xf32> -> vector<16x1xf32>
    %160 = vector.broadcast %159 : vector<16x1xf32> to vector<16x16xf32>
    %161 = arith.mulf %156, %160 : vector<16x16xf32>
    %162 = vector.extract_strided_slice %65 {offsets = [0, 96], sizes = [16, 32], strides = [1, 1]} : vector<16x128xf32> to vector<16x32xf32>
    %163 = arith.truncf %161 : vector<16x16xf32> to vector<16x16xbf16>
    %164 = arith.truncf %162 : vector<16x32xf32> to vector<16x32xbf16>
    %cst_58 = arith.constant dense<0.000000e+00> : vector<16x32xf32>
    %165 = tpu.matmul %163, %164, %cst_58 {dimension_numbers = #tpu.dot_dimension_numbers<[1], [0], [0], [1], [0, 0, 1, 1], [], []>} : vector<16x16xbf16>, vector<16x32xbf16>, vector<16x32xf32> -> vector<16x32xf32>
    %166 = vector.extract_strided_slice %66 {offsets = [96, 0], sizes = [32, 128], strides = [1, 1]} : vector<128x128xbf16> to vector<32x128xbf16>
    %167 = arith.truncf %165 : vector<16x32xf32> to vector<16x32xbf16>
    %cst_59 = arith.constant dense<0.000000e+00> : vector<16x128xf32>
    %168 = tpu.matmul %167, %166, %cst_59 {dimension_numbers = #tpu.dot_dimension_numbers<[1], [0], [0], [1], [0, 0, 1, 1], [], []>} : vector<16x32xbf16>, vector<32x128xbf16>, vector<16x128xf32> -> vector<16x128xf32>
    %169 = arith.addf %144, %168 : vector<16x128xf32>
    %c0_60 = arith.constant 0 : index
    %c0_61 = arith.constant 0 : index
    %c0_62 = arith.constant 0 : index
    %170 = vector.load %arg14[%c0_60, %c0_61, %c0_62] : memref<1x16x128xf32, #tpu.memory_space<vmem>>, vector<1x16x128xf32>
    %171 = vector.shape_cast %170 : vector<1x16x128xf32> to vector<16x128xf32>
    %172 = vector.shape_cast %169 : vector<16x128xf32> to vector<1x16x128xf32>
    tpu.vector_store %arg14[%c0_60, %c0_61, %c0_62], %172 {strides = array<i32>} : memref<1x16x128xf32, #tpu.memory_space<vmem>>, vector<1x16x128xf32>,
    return
  }
  func.func @transform_0(%arg0: i32, %arg1: i32) -> (i32, i32, i32) {
    %c0_i32 = arith.constant 0 : i32
    %c0_i32_0 = arith.constant 0 : i32
    return %arg0, %arg1, %c0_i32 : i32, i32, i32
  }
  func.func @transform_1(%arg0: i32, %arg1: i32) -> (i32, i32, i32) {
    %c0_i32 = arith.constant 0 : i32
    %c0_i32_0 = arith.constant 0 : i32
    %c0_i32_1 = arith.constant 0 : i32
    return %arg0, %c0_i32, %c0_i32_0 : i32, i32, i32
  }
  func.func @transform_2(%arg0: i32, %arg1: i32) -> (i32, i32) {
    %c0_i32 = arith.constant 0 : i32
    %c0_i32_0 = arith.constant 0 : i32
    %c0_i32_1 = arith.constant 0 : i32
    return %c0_i32, %c0_i32_0 : i32, i32
  }
  func.func @transform_3(%arg0: i32, %arg1: i32) -> (i32, i32) {
    %c0_i32 = arith.constant 0 : i32
    %c0_i32_0 = arith.constant 0 : i32
    %c0_i32_1 = arith.constant 0 : i32
    return %c0_i32, %c0_i32_0 : i32, i32
  }
  func.func @transform_4(%arg0: i32, %arg1: i32) -> (i32, i32) {
    %c0_i32 = arith.constant 0 : i32
    %c0_i32_0 = arith.constant 0 : i32
    %c0_i32_1 = arith.constant 0 : i32
    return %c0_i32, %c0_i32_0 : i32, i32
  }
  func.func @transform_5(%arg0: i32, %arg1: i32) -> (i32, i32) {
    %c0_i32 = arith.constant 0 : i32
    %c0_i32_0 = arith.constant 0 : i32
    %c0_i32_1 = arith.constant 0 : i32
    return %c0_i32, %c0_i32_0 : i32, i32
  }
  func.func @transform_6(%arg0: i32, %arg1: i32) -> (i32, i32) {
    %c0_i32 = arith.constant 0 : i32
    %c0_i32_0 = arith.constant 0 : i32
    %c0_i32_1 = arith.constant 0 : i32
    return %c0_i32, %c0_i32_0 : i32, i32
  }
  func.func @transform_7(%arg0: i32, %arg1: i32) -> (i32, i32) {
    %c0_i32 = arith.constant 0 : i32
    %c0_i32_0 = arith.constant 0 : i32
    %c0_i32_1 = arith.constant 0 : i32
    return %c0_i32, %c0_i32_0 : i32, i32
  }
  func.func @transform_8(%arg0: i32, %arg1: i32) -> (i32, i32) {
    %c0_i32 = arith.constant 0 : i32
    %c0_i32_0 = arith.constant 0 : i32
    %c0_i32_1 = arith.constant 0 : i32
    return %c0_i32, %c0_i32_0 : i32, i32
  }
  func.func @transform_9(%arg0: i32, %arg1: i32) -> (i32, i32) {
    %c0_i32 = arith.constant 0 : i32
    %c0_i32_0 = arith.constant 0 : i32
    %c0_i32_1 = arith.constant 0 : i32
    return %c0_i32, %c0_i32_0 : i32, i32
  }
  func.func @transform_10(%arg0: i32, %arg1: i32) -> (i32, i32) {
    %c0_i32 = arith.constant 0 : i32
    %c0_i32_0 = arith.constant 0 : i32
    %c0_i32_1 = arith.constant 0 : i32
    return %c0_i32, %c0_i32_0 : i32, i32
  }
  func.func @transform_11(%arg0: i32, %arg1: i32) -> (i32, i32) {
    %c0_i32 = arith.constant 0 : i32
    %c0_i32_0 = arith.constant 0 : i32
    %c0_i32_1 = arith.constant 0 : i32
    return %c0_i32, %c0_i32_0 : i32, i32
  }
  func.func @transform_12(%arg0: i32, %arg1: i32) -> (i32, i32, i32) {
    %c0_i32 = arith.constant 0 : i32
    %c0_i32_0 = arith.constant 0 : i32
    return %arg0, %arg1, %c0_i32 : i32, i32, i32
  }
}

module attributes {stable_mosaic.version = 11 : i64} {
  func.func @_self_attn_kernel(%arg0: i32, %arg1: memref<1x16x128xf32, #tpu.memory_space<vmem>>, %arg2: memref<1x128xf32, #tpu.memory_space<vmem>>, %arg3: memref<1x128xf32, #tpu.memory_space<vmem>>, %arg4: memref<128x384xbf16, #tpu.memory_space<vmem>>, %arg5: memref<1x384xf32, #tpu.memory_space<vmem>>, %arg6: memref<128x128xbf16, #tpu.memory_space<vmem>>, %arg7: memref<1x128xf32, #tpu.memory_space<vmem>>, %arg8: memref<1x16x128xf32, #tpu.memory_space<vmem>>) attributes {dimension_semantics = [#tpu.dimension_semantics<parallel>], iteration_bounds = array<i64: 2>, scalar_prefetch = 0 : i64, scratch_operands = 0 : i64, tpu.core_type = #tpu.core_type<tc>, window_params = [{transform_indices = @transform_0, window_bounds = array<i64: 1, 16, 128>}, {pipeline_mode = #tpu.pipeline_mode<synchronous>, transform_indices = @transform_1, window_bounds = array<i64: 1, 128>}, {pipeline_mode = #tpu.pipeline_mode<synchronous>, transform_indices = @transform_2, window_bounds = array<i64: 1, 128>}, {pipeline_mode = #tpu.pipeline_mode<synchronous>, transform_indices = @transform_3, window_bounds = array<i64: 128, 384>}, {pipeline_mode = #tpu.pipeline_mode<synchronous>, transform_indices = @transform_4, window_bounds = array<i64: 1, 384>}, {pipeline_mode = #tpu.pipeline_mode<synchronous>, transform_indices = @transform_5, window_bounds = array<i64: 128, 128>}, {pipeline_mode = #tpu.pipeline_mode<synchronous>, transform_indices = @transform_6, window_bounds = array<i64: 1, 128>}, {transform_indices = @transform_7, window_bounds = array<i64: 1, 16, 128>}]} {
    %c0 = arith.constant 0 : index
    %c0_0 = arith.constant 0 : index
    %c0_1 = arith.constant 0 : index
    %0 = vector.load %arg1[%c0, %c0_0, %c0_1] : memref<1x16x128xf32, #tpu.memory_space<vmem>>, vector<1x16x128xf32>
    %1 = vector.shape_cast %0 : vector<1x16x128xf32> to vector<16x128xf32>
    %c0_2 = arith.constant 0 : index
    %c0_3 = arith.constant 0 : index
    %2 = vector.load %arg2[%c0_2, %c0_3] : memref<1x128xf32, #tpu.memory_space<vmem>>, vector<1x128xf32>
    %c0_4 = arith.constant 0 : index
    %c0_5 = arith.constant 0 : index
    %3 = vector.load %arg3[%c0_4, %c0_5] : memref<1x128xf32, #tpu.memory_space<vmem>>, vector<1x128xf32>
    %cst = arith.constant dense<0.000000e+00> : vector<16xf32>
    %4 = vector.multi_reduction <add>, %1, %cst [1] : vector<16x128xf32> to vector<16xf32>
    %5 = vector.shape_cast %4 : vector<16xf32> to vector<16x1xf32>
    %cst_6 = arith.constant 1.280000e+02 : f32
    %6 = vector.broadcast %cst_6 : f32 to vector<16x1xf32>
    %7 = arith.divf %5, %6 : vector<16x1xf32>
    %8 = vector.broadcast %7 : vector<16x1xf32> to vector<16x128xf32>
    %9 = arith.subf %1, %8 : vector<16x128xf32>
    %10 = arith.mulf %9, %9 : vector<16x128xf32>
    %cst_7 = arith.constant dense<0.000000e+00> : vector<16xf32>
    %11 = vector.multi_reduction <add>, %10, %cst_7 [1] : vector<16x128xf32> to vector<16xf32>
    %12 = vector.shape_cast %11 : vector<16xf32> to vector<16x1xf32>
    %cst_8 = arith.constant 1.280000e+02 : f32
    %13 = vector.broadcast %cst_8 : f32 to vector<16x1xf32>
    %14 = arith.divf %12, %13 : vector<16x1xf32>
    %15 = vector.broadcast %7 : vector<16x1xf32> to vector<16x128xf32>
    %16 = arith.subf %1, %15 : vector<16x128xf32>
    %cst_9 = arith.constant 9.99999974E-6 : f32
    %17 = vector.broadcast %cst_9 : f32 to vector<16x1xf32>
    %18 = arith.addf %14, %17 : vector<16x1xf32>
    %19 = math.rsqrt %18 : vector<16x1xf32>
    %20 = vector.broadcast %19 : vector<16x1xf32> to vector<16x128xf32>
    %21 = arith.mulf %16, %20 : vector<16x128xf32>
    %22 = vector.broadcast %2 : vector<1x128xf32> to vector<16x128xf32>
    %23 = arith.mulf %21, %22 : vector<16x128xf32>
    %24 = vector.broadcast %3 : vector<1x128xf32> to vector<16x128xf32>
    %25 = arith.addf %23, %24 : vector<16x128xf32>
    %c0_10 = arith.constant 0 : index
    %c0_11 = arith.constant 0 : index
    %26 = vector.load %arg4[%c0_10, %c0_11] : memref<128x384xbf16, #tpu.memory_space<vmem>>, vector<128x384xbf16>
    %27 = arith.truncf %25 : vector<16x128xf32> to vector<16x128xbf16>
    %cst_12 = arith.constant dense<0.000000e+00> : vector<16x384xf32>
    %28 = tpu.matmul %27, %26, %cst_12 {dimension_numbers = #tpu.dot_dimension_numbers<[1], [0], [0], [1], [0, 0, 1, 1], [], []>} : vector<16x128xbf16>, vector<128x384xbf16>, vector<16x384xf32> -> vector<16x384xf32>
    %c0_13 = arith.constant 0 : index
    %c0_14 = arith.constant 0 : index
    %29 = vector.load %arg5[%c0_13, %c0_14] : memref<1x384xf32, #tpu.memory_space<vmem>>, vector<1x384xf32>
    %30 = vector.broadcast %29 : vector<1x384xf32> to vector<16x384xf32>
    %31 = arith.addf %28, %30 : vector<16x384xf32>
    %32 = vector.extract_strided_slice %31 {offsets = [0, 0], sizes = [16, 128], strides = [1, 1]} : vector<16x384xf32> to vector<16x128xf32>
    %33 = vector.extract_strided_slice %31 {offsets = [0, 128], sizes = [16, 128], strides = [1, 1]} : vector<16x384xf32> to vector<16x128xf32>
    %34 = vector.extract_strided_slice %31 {offsets = [0, 256], sizes = [16, 128], strides = [1, 1]} : vector<16x384xf32> to vector<16x128xf32>
    %c0_15 = arith.constant 0 : index
    %c0_16 = arith.constant 0 : index
    %35 = vector.load %arg6[%c0_15, %c0_16] : memref<128x128xbf16, #tpu.memory_space<vmem>>, vector<128x128xbf16>
    %c0_17 = arith.constant 0 : index
    %c0_18 = arith.constant 0 : index
    %36 = vector.load %arg7[%c0_17, %c0_18] : memref<1x128xf32, #tpu.memory_space<vmem>>, vector<1x128xf32>
    %37 = vector.broadcast %36 : vector<1x128xf32> to vector<16x128xf32>
    %38 = arith.addf %1, %37 : vector<16x128xf32>
    %39 = vector.extract_strided_slice %32 {offsets = [0, 0], sizes = [16, 32], strides = [1, 1]} : vector<16x128xf32> to vector<16x32xf32>
    %40 = vector.extract_strided_slice %33 {offsets = [0, 0], sizes = [16, 32], strides = [1, 1]} : vector<16x128xf32> to vector<16x32xf32>
    %41 = arith.truncf %39 : vector<16x32xf32> to vector<16x32xbf16>
    %42 = arith.truncf %40 : vector<16x32xf32> to vector<16x32xbf16>
    %cst_19 = arith.constant dense<0.000000e+00> : vector<16x16xf32>
    %43 = tpu.matmul %41, %42, %cst_19 {dimension_numbers = #tpu.dot_dimension_numbers<[1], [1], [0], [0], [0, 0, 1, 0], [], []>} : vector<16x32xbf16>, vector<16x32xbf16>, vector<16x16xf32> -> vector<16x16xf32>
    %cst_20 = arith.constant 0.176776692 : f32
    %44 = vector.broadcast %cst_20 : f32 to vector<16x16xf32>
    %45 = arith.mulf %43, %44 : vector<16x16xf32>
    %cst_21 = arith.constant dense<0xFF800000> : vector<16xf32>
    %46 = vector.multi_reduction <maximumf>, %45, %cst_21 [1] : vector<16x16xf32> to vector<16xf32>
    %47 = vector.shape_cast %46 : vector<16xf32> to vector<16x1xf32>
    %48 = vector.broadcast %47 : vector<16x1xf32> to vector<16x16xf32>
    %49 = arith.subf %45, %48 : vector<16x16xf32>
    %50 = math.exp %49 : vector<16x16xf32>
    %cst_22 = arith.constant dense<0.000000e+00> : vector<16xf32>
    %51 = vector.multi_reduction <add>, %50, %cst_22 [1] : vector<16x16xf32> to vector<16xf32>
    %52 = vector.shape_cast %51 : vector<16xf32> to vector<16x1xf32>
    %53 = tpu.reciprocal %52 {approx = true} : vector<16x1xf32> -> vector<16x1xf32>
    %54 = vector.broadcast %53 : vector<16x1xf32> to vector<16x16xf32>
    %55 = arith.mulf %50, %54 : vector<16x16xf32>
    %56 = vector.extract_strided_slice %34 {offsets = [0, 0], sizes = [16, 32], strides = [1, 1]} : vector<16x128xf32> to vector<16x32xf32>
    %57 = arith.truncf %55 : vector<16x16xf32> to vector<16x16xbf16>
    %58 = arith.truncf %56 : vector<16x32xf32> to vector<16x32xbf16>
    %cst_23 = arith.constant dense<0.000000e+00> : vector<16x32xf32>
    %59 = tpu.matmul %57, %58, %cst_23 {dimension_numbers = #tpu.dot_dimension_numbers<[1], [0], [0], [1], [0, 0, 1, 1], [], []>} : vector<16x16xbf16>, vector<16x32xbf16>, vector<16x32xf32> -> vector<16x32xf32>
    %60 = vector.extract_strided_slice %35 {offsets = [0, 0], sizes = [32, 128], strides = [1, 1]} : vector<128x128xbf16> to vector<32x128xbf16>
    %61 = arith.truncf %59 : vector<16x32xf32> to vector<16x32xbf16>
    %cst_24 = arith.constant dense<0.000000e+00> : vector<16x128xf32>
    %62 = tpu.matmul %61, %60, %cst_24 {dimension_numbers = #tpu.dot_dimension_numbers<[1], [0], [0], [1], [0, 0, 1, 1], [], []>} : vector<16x32xbf16>, vector<32x128xbf16>, vector<16x128xf32> -> vector<16x128xf32>
    %63 = arith.addf %38, %62 : vector<16x128xf32>
    %64 = vector.extract_strided_slice %32 {offsets = [0, 32], sizes = [16, 32], strides = [1, 1]} : vector<16x128xf32> to vector<16x32xf32>
    %65 = vector.extract_strided_slice %33 {offsets = [0, 32], sizes = [16, 32], strides = [1, 1]} : vector<16x128xf32> to vector<16x32xf32>
    %66 = arith.truncf %64 : vector<16x32xf32> to vector<16x32xbf16>
    %67 = arith.truncf %65 : vector<16x32xf32> to vector<16x32xbf16>
    %cst_25 = arith.constant dense<0.000000e+00> : vector<16x16xf32>
    %68 = tpu.matmul %66, %67, %cst_25 {dimension_numbers = #tpu.dot_dimension_numbers<[1], [1], [0], [0], [0, 0, 1, 0], [], []>} : vector<16x32xbf16>, vector<16x32xbf16>, vector<16x16xf32> -> vector<16x16xf32>
    %cst_26 = arith.constant 0.176776692 : f32
    %69 = vector.broadcast %cst_26 : f32 to vector<16x16xf32>
    %70 = arith.mulf %68, %69 : vector<16x16xf32>
    %cst_27 = arith.constant dense<0xFF800000> : vector<16xf32>
    %71 = vector.multi_reduction <maximumf>, %70, %cst_27 [1] : vector<16x16xf32> to vector<16xf32>
    %72 = vector.shape_cast %71 : vector<16xf32> to vector<16x1xf32>
    %73 = vector.broadcast %72 : vector<16x1xf32> to vector<16x16xf32>
    %74 = arith.subf %70, %73 : vector<16x16xf32>
    %75 = math.exp %74 : vector<16x16xf32>
    %cst_28 = arith.constant dense<0.000000e+00> : vector<16xf32>
    %76 = vector.multi_reduction <add>, %75, %cst_28 [1] : vector<16x16xf32> to vector<16xf32>
    %77 = vector.shape_cast %76 : vector<16xf32> to vector<16x1xf32>
    %78 = tpu.reciprocal %77 {approx = true} : vector<16x1xf32> -> vector<16x1xf32>
    %79 = vector.broadcast %78 : vector<16x1xf32> to vector<16x16xf32>
    %80 = arith.mulf %75, %79 : vector<16x16xf32>
    %81 = vector.extract_strided_slice %34 {offsets = [0, 32], sizes = [16, 32], strides = [1, 1]} : vector<16x128xf32> to vector<16x32xf32>
    %82 = arith.truncf %80 : vector<16x16xf32> to vector<16x16xbf16>
    %83 = arith.truncf %81 : vector<16x32xf32> to vector<16x32xbf16>
    %cst_29 = arith.constant dense<0.000000e+00> : vector<16x32xf32>
    %84 = tpu.matmul %82, %83, %cst_29 {dimension_numbers = #tpu.dot_dimension_numbers<[1], [0], [0], [1], [0, 0, 1, 1], [], []>} : vector<16x16xbf16>, vector<16x32xbf16>, vector<16x32xf32> -> vector<16x32xf32>
    %85 = vector.extract_strided_slice %35 {offsets = [32, 0], sizes = [32, 128], strides = [1, 1]} : vector<128x128xbf16> to vector<32x128xbf16>
    %86 = arith.truncf %84 : vector<16x32xf32> to vector<16x32xbf16>
    %cst_30 = arith.constant dense<0.000000e+00> : vector<16x128xf32>
    %87 = tpu.matmul %86, %85, %cst_30 {dimension_numbers = #tpu.dot_dimension_numbers<[1], [0], [0], [1], [0, 0, 1, 1], [], []>} : vector<16x32xbf16>, vector<32x128xbf16>, vector<16x128xf32> -> vector<16x128xf32>
    %88 = arith.addf %63, %87 : vector<16x128xf32>
    %89 = vector.extract_strided_slice %32 {offsets = [0, 64], sizes = [16, 32], strides = [1, 1]} : vector<16x128xf32> to vector<16x32xf32>
    %90 = vector.extract_strided_slice %33 {offsets = [0, 64], sizes = [16, 32], strides = [1, 1]} : vector<16x128xf32> to vector<16x32xf32>
    %91 = arith.truncf %89 : vector<16x32xf32> to vector<16x32xbf16>
    %92 = arith.truncf %90 : vector<16x32xf32> to vector<16x32xbf16>
    %cst_31 = arith.constant dense<0.000000e+00> : vector<16x16xf32>
    %93 = tpu.matmul %91, %92, %cst_31 {dimension_numbers = #tpu.dot_dimension_numbers<[1], [1], [0], [0], [0, 0, 1, 0], [], []>} : vector<16x32xbf16>, vector<16x32xbf16>, vector<16x16xf32> -> vector<16x16xf32>
    %cst_32 = arith.constant 0.176776692 : f32
    %94 = vector.broadcast %cst_32 : f32 to vector<16x16xf32>
    %95 = arith.mulf %93, %94 : vector<16x16xf32>
    %cst_33 = arith.constant dense<0xFF800000> : vector<16xf32>
    %96 = vector.multi_reduction <maximumf>, %95, %cst_33 [1] : vector<16x16xf32> to vector<16xf32>
    %97 = vector.shape_cast %96 : vector<16xf32> to vector<16x1xf32>
    %98 = vector.broadcast %97 : vector<16x1xf32> to vector<16x16xf32>
    %99 = arith.subf %95, %98 : vector<16x16xf32>
    %100 = math.exp %99 : vector<16x16xf32>
    %cst_34 = arith.constant dense<0.000000e+00> : vector<16xf32>
    %101 = vector.multi_reduction <add>, %100, %cst_34 [1] : vector<16x16xf32> to vector<16xf32>
    %102 = vector.shape_cast %101 : vector<16xf32> to vector<16x1xf32>
    %103 = tpu.reciprocal %102 {approx = true} : vector<16x1xf32> -> vector<16x1xf32>
    %104 = vector.broadcast %103 : vector<16x1xf32> to vector<16x16xf32>
    %105 = arith.mulf %100, %104 : vector<16x16xf32>
    %106 = vector.extract_strided_slice %34 {offsets = [0, 64], sizes = [16, 32], strides = [1, 1]} : vector<16x128xf32> to vector<16x32xf32>
    %107 = arith.truncf %105 : vector<16x16xf32> to vector<16x16xbf16>
    %108 = arith.truncf %106 : vector<16x32xf32> to vector<16x32xbf16>
    %cst_35 = arith.constant dense<0.000000e+00> : vector<16x32xf32>
    %109 = tpu.matmul %107, %108, %cst_35 {dimension_numbers = #tpu.dot_dimension_numbers<[1], [0], [0], [1], [0, 0, 1, 1], [], []>} : vector<16x16xbf16>, vector<16x32xbf16>, vector<16x32xf32> -> vector<16x32xf32>
    %110 = vector.extract_strided_slice %35 {offsets = [64, 0], sizes = [32, 128], strides = [1, 1]} : vector<128x128xbf16> to vector<32x128xbf16>
    %111 = arith.truncf %109 : vector<16x32xf32> to vector<16x32xbf16>
    %cst_36 = arith.constant dense<0.000000e+00> : vector<16x128xf32>
    %112 = tpu.matmul %111, %110, %cst_36 {dimension_numbers = #tpu.dot_dimension_numbers<[1], [0], [0], [1], [0, 0, 1, 1], [], []>} : vector<16x32xbf16>, vector<32x128xbf16>, vector<16x128xf32> -> vector<16x128xf32>
    %113 = arith.addf %88, %112 : vector<16x128xf32>
    %114 = vector.extract_strided_slice %32 {offsets = [0, 96], sizes = [16, 32], strides = [1, 1]} : vector<16x128xf32> to vector<16x32xf32>
    %115 = vector.extract_strided_slice %33 {offsets = [0, 96], sizes = [16, 32], strides = [1, 1]} : vector<16x128xf32> to vector<16x32xf32>
    %116 = arith.truncf %114 : vector<16x32xf32> to vector<16x32xbf16>
    %117 = arith.truncf %115 : vector<16x32xf32> to vector<16x32xbf16>
    %cst_37 = arith.constant dense<0.000000e+00> : vector<16x16xf32>
    %118 = tpu.matmul %116, %117, %cst_37 {dimension_numbers = #tpu.dot_dimension_numbers<[1], [1], [0], [0], [0, 0, 1, 0], [], []>} : vector<16x32xbf16>, vector<16x32xbf16>, vector<16x16xf32> -> vector<16x16xf32>
    %cst_38 = arith.constant 0.176776692 : f32
    %119 = vector.broadcast %cst_38 : f32 to vector<16x16xf32>
    %120 = arith.mulf %118, %119 : vector<16x16xf32>
    %cst_39 = arith.constant dense<0xFF800000> : vector<16xf32>
    %121 = vector.multi_reduction <maximumf>, %120, %cst_39 [1] : vector<16x16xf32> to vector<16xf32>
    %122 = vector.shape_cast %121 : vector<16xf32> to vector<16x1xf32>
    %123 = vector.broadcast %122 : vector<16x1xf32> to vector<16x16xf32>
    %124 = arith.subf %120, %123 : vector<16x16xf32>
    %125 = math.exp %124 : vector<16x16xf32>
    %cst_40 = arith.constant dense<0.000000e+00> : vector<16xf32>
    %126 = vector.multi_reduction <add>, %125, %cst_40 [1] : vector<16x16xf32> to vector<16xf32>
    %127 = vector.shape_cast %126 : vector<16xf32> to vector<16x1xf32>
    %128 = tpu.reciprocal %127 {approx = true} : vector<16x1xf32> -> vector<16x1xf32>
    %129 = vector.broadcast %128 : vector<16x1xf32> to vector<16x16xf32>
    %130 = arith.mulf %125, %129 : vector<16x16xf32>
    %131 = vector.extract_strided_slice %34 {offsets = [0, 96], sizes = [16, 32], strides = [1, 1]} : vector<16x128xf32> to vector<16x32xf32>
    %132 = arith.truncf %130 : vector<16x16xf32> to vector<16x16xbf16>
    %133 = arith.truncf %131 : vector<16x32xf32> to vector<16x32xbf16>
    %cst_41 = arith.constant dense<0.000000e+00> : vector<16x32xf32>
    %134 = tpu.matmul %132, %133, %cst_41 {dimension_numbers = #tpu.dot_dimension_numbers<[1], [0], [0], [1], [0, 0, 1, 1], [], []>} : vector<16x16xbf16>, vector<16x32xbf16>, vector<16x32xf32> -> vector<16x32xf32>
    %135 = vector.extract_strided_slice %35 {offsets = [96, 0], sizes = [32, 128], strides = [1, 1]} : vector<128x128xbf16> to vector<32x128xbf16>
    %136 = arith.truncf %134 : vector<16x32xf32> to vector<16x32xbf16>
    %cst_42 = arith.constant dense<0.000000e+00> : vector<16x128xf32>
    %137 = tpu.matmul %136, %135, %cst_42 {dimension_numbers = #tpu.dot_dimension_numbers<[1], [0], [0], [1], [0, 0, 1, 1], [], []>} : vector<16x32xbf16>, vector<32x128xbf16>, vector<16x128xf32> -> vector<16x128xf32>
    %138 = arith.addf %113, %137 : vector<16x128xf32>
    %c0_43 = arith.constant 0 : index
    %c0_44 = arith.constant 0 : index
    %c0_45 = arith.constant 0 : index
    %139 = vector.load %arg8[%c0_43, %c0_44, %c0_45] : memref<1x16x128xf32, #tpu.memory_space<vmem>>, vector<1x16x128xf32>
    %140 = vector.shape_cast %139 : vector<1x16x128xf32> to vector<16x128xf32>
    %141 = vector.shape_cast %138 : vector<16x128xf32> to vector<1x16x128xf32>
    tpu.vector_store %arg8[%c0_43, %c0_44, %c0_45], %141 {strides = array<i32>} : memref<1x16x128xf32, #tpu.memory_space<vmem>>, vector<1x16x128xf32>,
    return
  }
  func.func @transform_0(%arg0: i32) -> (i32, i32, i32) {
    %c0_i32 = arith.constant 0 : i32
    %c0_i32_0 = arith.constant 0 : i32
    %c0_i32_1 = arith.constant 0 : i32
    return %arg0, %c0_i32, %c0_i32_0 : i32, i32, i32
  }
  func.func @transform_1(%arg0: i32) -> (i32, i32) {
    %c0_i32 = arith.constant 0 : i32
    %c0_i32_0 = arith.constant 0 : i32
    %c0_i32_1 = arith.constant 0 : i32
    return %c0_i32, %c0_i32_0 : i32, i32
  }
  func.func @transform_2(%arg0: i32) -> (i32, i32) {
    %c0_i32 = arith.constant 0 : i32
    %c0_i32_0 = arith.constant 0 : i32
    %c0_i32_1 = arith.constant 0 : i32
    return %c0_i32, %c0_i32_0 : i32, i32
  }
  func.func @transform_3(%arg0: i32) -> (i32, i32) {
    %c0_i32 = arith.constant 0 : i32
    %c0_i32_0 = arith.constant 0 : i32
    %c0_i32_1 = arith.constant 0 : i32
    return %c0_i32, %c0_i32_0 : i32, i32
  }
  func.func @transform_4(%arg0: i32) -> (i32, i32) {
    %c0_i32 = arith.constant 0 : i32
    %c0_i32_0 = arith.constant 0 : i32
    %c0_i32_1 = arith.constant 0 : i32
    return %c0_i32, %c0_i32_0 : i32, i32
  }
  func.func @transform_5(%arg0: i32) -> (i32, i32) {
    %c0_i32 = arith.constant 0 : i32
    %c0_i32_0 = arith.constant 0 : i32
    %c0_i32_1 = arith.constant 0 : i32
    return %c0_i32, %c0_i32_0 : i32, i32
  }
  func.func @transform_6(%arg0: i32) -> (i32, i32) {
    %c0_i32 = arith.constant 0 : i32
    %c0_i32_0 = arith.constant 0 : i32
    %c0_i32_1 = arith.constant 0 : i32
    return %c0_i32, %c0_i32_0 : i32, i32
  }
  func.func @transform_7(%arg0: i32) -> (i32, i32, i32) {
    %c0_i32 = arith.constant 0 : i32
    %c0_i32_0 = arith.constant 0 : i32
    %c0_i32_1 = arith.constant 0 : i32
    return %arg0, %c0_i32, %c0_i32_0 : i32, i32, i32
  }
}

module attributes {stable_mosaic.version = 11 : i64} {
  func.func @_mlp_final_ln_kernel(%arg0: i32, %arg1: memref<32x128xf32, #tpu.memory_space<vmem>>, %arg2: memref<1x128xf32, #tpu.memory_space<vmem>>, %arg3: memref<1x128xf32, #tpu.memory_space<vmem>>, %arg4: memref<128x512xbf16, #tpu.memory_space<vmem>>, %arg5: memref<1x512xf32, #tpu.memory_space<vmem>>, %arg6: memref<512x128xbf16, #tpu.memory_space<vmem>>, %arg7: memref<1x128xf32, #tpu.memory_space<vmem>>, %arg8: memref<1x128xf32, #tpu.memory_space<vmem>>, %arg9: memref<1x128xf32, #tpu.memory_space<vmem>>, %arg10: memref<32x128xf32, #tpu.memory_space<vmem>>) attributes {dimension_semantics = [#tpu.dimension_semantics<parallel>], iteration_bounds = array<i64: 1>, scalar_prefetch = 0 : i64, scratch_operands = 0 : i64, tpu.core_type = #tpu.core_type<tc>, window_params = [{transform_indices = @transform_0, window_bounds = array<i64: 32, 128>}, {pipeline_mode = #tpu.pipeline_mode<synchronous>, transform_indices = @transform_1, window_bounds = array<i64: 1, 128>}, {pipeline_mode = #tpu.pipeline_mode<synchronous>, transform_indices = @transform_2, window_bounds = array<i64: 1, 128>}, {pipeline_mode = #tpu.pipeline_mode<synchronous>, transform_indices = @transform_3, window_bounds = array<i64: 128, 512>}, {pipeline_mode = #tpu.pipeline_mode<synchronous>, transform_indices = @transform_4, window_bounds = array<i64: 1, 512>}, {pipeline_mode = #tpu.pipeline_mode<synchronous>, transform_indices = @transform_5, window_bounds = array<i64: 512, 128>}, {pipeline_mode = #tpu.pipeline_mode<synchronous>, transform_indices = @transform_6, window_bounds = array<i64: 1, 128>}, {pipeline_mode = #tpu.pipeline_mode<synchronous>, transform_indices = @transform_7, window_bounds = array<i64: 1, 128>}, {pipeline_mode = #tpu.pipeline_mode<synchronous>, transform_indices = @transform_8, window_bounds = array<i64: 1, 128>}, {transform_indices = @transform_9, window_bounds = array<i64: 32, 128>}]} {
    %c0 = arith.constant 0 : index
    %c0_0 = arith.constant 0 : index
    %0 = vector.load %arg1[%c0, %c0_0] : memref<32x128xf32, #tpu.memory_space<vmem>>, vector<32x128xf32>
    %c0_1 = arith.constant 0 : index
    %c0_2 = arith.constant 0 : index
    %1 = vector.load %arg2[%c0_1, %c0_2] : memref<1x128xf32, #tpu.memory_space<vmem>>, vector<1x128xf32>
    %c0_3 = arith.constant 0 : index
    %c0_4 = arith.constant 0 : index
    %2 = vector.load %arg3[%c0_3, %c0_4] : memref<1x128xf32, #tpu.memory_space<vmem>>, vector<1x128xf32>
    %c0_5 = arith.constant 0 : index
    %c0_6 = arith.constant 0 : index
    %3 = vector.load %arg4[%c0_5, %c0_6] : memref<128x512xbf16, #tpu.memory_space<vmem>>, vector<128x512xbf16>
    %c0_7 = arith.constant 0 : index
    %c0_8 = arith.constant 0 : index
    %4 = vector.load %arg5[%c0_7, %c0_8] : memref<1x512xf32, #tpu.memory_space<vmem>>, vector<1x512xf32>
    %c0_9 = arith.constant 0 : index
    %c0_10 = arith.constant 0 : index
    %5 = vector.load %arg6[%c0_9, %c0_10] : memref<512x128xbf16, #tpu.memory_space<vmem>>, vector<512x128xbf16>
    %c0_11 = arith.constant 0 : index
    %c0_12 = arith.constant 0 : index
    %6 = vector.load %arg7[%c0_11, %c0_12] : memref<1x128xf32, #tpu.memory_space<vmem>>, vector<1x128xf32>
    %cst = arith.constant dense<0.000000e+00> : vector<32xf32>
    %7 = vector.multi_reduction <add>, %0, %cst [1] : vector<32x128xf32> to vector<32xf32>
    %8 = vector.shape_cast %7 : vector<32xf32> to vector<32x1xf32>
    %cst_13 = arith.constant 1.280000e+02 : f32
    %9 = vector.broadcast %cst_13 : f32 to vector<32x1xf32>
    %10 = arith.divf %8, %9 : vector<32x1xf32>
    %11 = vector.broadcast %10 : vector<32x1xf32> to vector<32x128xf32>
    %12 = arith.subf %0, %11 : vector<32x128xf32>
    %13 = arith.mulf %12, %12 : vector<32x128xf32>
    %cst_14 = arith.constant dense<0.000000e+00> : vector<32xf32>
    %14 = vector.multi_reduction <add>, %13, %cst_14 [1] : vector<32x128xf32> to vector<32xf32>
    %15 = vector.shape_cast %14 : vector<32xf32> to vector<32x1xf32>
    %cst_15 = arith.constant 1.280000e+02 : f32
    %16 = vector.broadcast %cst_15 : f32 to vector<32x1xf32>
    %17 = arith.divf %15, %16 : vector<32x1xf32>
    %18 = vector.broadcast %10 : vector<32x1xf32> to vector<32x128xf32>
    %19 = arith.subf %0, %18 : vector<32x128xf32>
    %cst_16 = arith.constant 9.99999974E-6 : f32
    %20 = vector.broadcast %cst_16 : f32 to vector<32x1xf32>
    %21 = arith.addf %17, %20 : vector<32x1xf32>
    %22 = math.rsqrt %21 : vector<32x1xf32>
    %23 = vector.broadcast %22 : vector<32x1xf32> to vector<32x128xf32>
    %24 = arith.mulf %19, %23 : vector<32x128xf32>
    %25 = vector.broadcast %1 : vector<1x128xf32> to vector<32x128xf32>
    %26 = arith.mulf %24, %25 : vector<32x128xf32>
    %27 = vector.broadcast %2 : vector<1x128xf32> to vector<32x128xf32>
    %28 = arith.addf %26, %27 : vector<32x128xf32>
    %29 = arith.truncf %28 : vector<32x128xf32> to vector<32x128xbf16>
    %cst_17 = arith.constant dense<0.000000e+00> : vector<32x512xf32>
    %30 = tpu.matmul %29, %3, %cst_17 {dimension_numbers = #tpu.dot_dimension_numbers<[1], [0], [0], [1], [0, 0, 1, 1], [], []>} : vector<32x128xbf16>, vector<128x512xbf16>, vector<32x512xf32> -> vector<32x512xf32>
    %31 = vector.broadcast %4 : vector<1x512xf32> to vector<32x512xf32>
    %32 = arith.addf %30, %31 : vector<32x512xf32>
    %cst_18 = arith.constant 5.000000e-01 : f32
    %33 = vector.broadcast %cst_18 : f32 to vector<32x512xf32>
    %34 = arith.mulf %33, %32 : vector<32x512xf32>
    %cst_19 = arith.constant 0.707106769 : f32
    %35 = vector.broadcast %cst_19 : f32 to vector<32x512xf32>
    %36 = arith.mulf %32, %35 : vector<32x512xf32>
    %37 = math.absf %36 : vector<32x512xf32>
    %cst_20 = arith.constant 0.327591091 : f32
    %38 = vector.broadcast %cst_20 : f32 to vector<32x512xf32>
    %39 = arith.mulf %38, %37 : vector<32x512xf32>
    %cst_21 = arith.constant 1.000000e+00 : f32
    %40 = vector.broadcast %cst_21 : f32 to vector<32x512xf32>
    %41 = arith.addf %40, %39 : vector<32x512xf32>
    %cst_22 = arith.constant 1.000000e+00 : f32
    %42 = vector.broadcast %cst_22 : f32 to vector<32x512xf32>
    %43 = arith.divf %42, %41 : vector<32x512xf32>
    %cst_23 = arith.constant 1.06140542 : f32
    %44 = vector.broadcast %cst_23 : f32 to vector<32x512xf32>
    %45 = arith.mulf %44, %43 : vector<32x512xf32>
    %cst_24 = arith.constant -1.45315206 : f32
    %46 = vector.broadcast %cst_24 : f32 to vector<32x512xf32>
    %47 = arith.addf %45, %46 : vector<32x512xf32>
    %48 = arith.mulf %47, %43 : vector<32x512xf32>
    %cst_25 = arith.constant 1.42141378 : f32
    %49 = vector.broadcast %cst_25 : f32 to vector<32x512xf32>
    %50 = arith.addf %48, %49 : vector<32x512xf32>
    %51 = arith.mulf %50, %43 : vector<32x512xf32>
    %cst_26 = arith.constant -0.284496725 : f32
    %52 = vector.broadcast %cst_26 : f32 to vector<32x512xf32>
    %53 = arith.addf %51, %52 : vector<32x512xf32>
    %54 = arith.mulf %53, %43 : vector<32x512xf32>
    %cst_27 = arith.constant 0.254829586 : f32
    %55 = vector.broadcast %cst_27 : f32 to vector<32x512xf32>
    %56 = arith.addf %54, %55 : vector<32x512xf32>
    %57 = arith.mulf %56, %43 : vector<32x512xf32>
    %cst_28 = arith.constant 0.000000e+00 : f32
    %58 = vector.broadcast %cst_28 : f32 to vector<32x512xf32>
    %59 = arith.subf %58, %37 : vector<32x512xf32>
    %60 = arith.mulf %59, %37 : vector<32x512xf32>
    %61 = math.exp %60 : vector<32x512xf32>
    %62 = arith.mulf %57, %61 : vector<32x512xf32>
    %cst_29 = arith.constant 1.000000e+00 : f32
    %63 = vector.broadcast %cst_29 : f32 to vector<32x512xf32>
    %64 = arith.subf %63, %62 : vector<32x512xf32>
    %cst_30 = arith.constant 0.000000e+00 : f32
    %65 = vector.broadcast %cst_30 : f32 to vector<32x512xf32>
    %66 = arith.cmpf olt, %36, %65 : vector<32x512xf32>
    %cst_31 = arith.constant 0.000000e+00 : f32
    %67 = vector.broadcast %cst_31 : f32 to vector<32x512xf32>
    %68 = arith.subf %67, %64 : vector<32x512xf32>
    %69 = arith.select %66, %68, %64 : vector<32x512xi1>, vector<32x512xf32>
    %cst_32 = arith.constant 1.000000e+00 : f32
    %70 = vector.broadcast %cst_32 : f32 to vector<32x512xf32>
    %71 = arith.addf %70, %69 : vector<32x512xf32>
    %72 = arith.mulf %34, %71 : vector<32x512xf32>
    %73 = arith.truncf %72 : vector<32x512xf32> to vector<32x512xbf16>
    %cst_33 = arith.constant dense<0.000000e+00> : vector<32x128xf32>
    %74 = tpu.matmul %73, %5, %cst_33 {dimension_numbers = #tpu.dot_dimension_numbers<[1], [0], [0], [1], [0, 0, 1, 1], [], []>} : vector<32x512xbf16>, vector<512x128xbf16>, vector<32x128xf32> -> vector<32x128xf32>
    %75 = arith.addf %0, %74 : vector<32x128xf32>
    %76 = vector.broadcast %6 : vector<1x128xf32> to vector<32x128xf32>
    %77 = arith.addf %75, %76 : vector<32x128xf32>
    %c0_34 = arith.constant 0 : index
    %c0_35 = arith.constant 0 : index
    %78 = vector.load %arg8[%c0_34, %c0_35] : memref<1x128xf32, #tpu.memory_space<vmem>>, vector<1x128xf32>
    %c0_36 = arith.constant 0 : index
    %c0_37 = arith.constant 0 : index
    %79 = vector.load %arg9[%c0_36, %c0_37] : memref<1x128xf32, #tpu.memory_space<vmem>>, vector<1x128xf32>
    %cst_38 = arith.constant dense<0.000000e+00> : vector<32xf32>
    %80 = vector.multi_reduction <add>, %77, %cst_38 [1] : vector<32x128xf32> to vector<32xf32>
    %81 = vector.shape_cast %80 : vector<32xf32> to vector<32x1xf32>
    %cst_39 = arith.constant 1.280000e+02 : f32
    %82 = vector.broadcast %cst_39 : f32 to vector<32x1xf32>
    %83 = arith.divf %81, %82 : vector<32x1xf32>
    %84 = vector.broadcast %83 : vector<32x1xf32> to vector<32x128xf32>
    %85 = arith.subf %77, %84 : vector<32x128xf32>
    %86 = arith.mulf %85, %85 : vector<32x128xf32>
    %cst_40 = arith.constant dense<0.000000e+00> : vector<32xf32>
    %87 = vector.multi_reduction <add>, %86, %cst_40 [1] : vector<32x128xf32> to vector<32xf32>
    %88 = vector.shape_cast %87 : vector<32xf32> to vector<32x1xf32>
    %cst_41 = arith.constant 1.280000e+02 : f32
    %89 = vector.broadcast %cst_41 : f32 to vector<32x1xf32>
    %90 = arith.divf %88, %89 : vector<32x1xf32>
    %91 = vector.broadcast %83 : vector<32x1xf32> to vector<32x128xf32>
    %92 = arith.subf %77, %91 : vector<32x128xf32>
    %cst_42 = arith.constant 9.99999974E-6 : f32
    %93 = vector.broadcast %cst_42 : f32 to vector<32x1xf32>
    %94 = arith.addf %90, %93 : vector<32x1xf32>
    %95 = math.rsqrt %94 : vector<32x1xf32>
    %96 = vector.broadcast %95 : vector<32x1xf32> to vector<32x128xf32>
    %97 = arith.mulf %92, %96 : vector<32x128xf32>
    %98 = vector.broadcast %78 : vector<1x128xf32> to vector<32x128xf32>
    %99 = arith.mulf %97, %98 : vector<32x128xf32>
    %100 = vector.broadcast %79 : vector<1x128xf32> to vector<32x128xf32>
    %101 = arith.addf %99, %100 : vector<32x128xf32>
    %c0_43 = arith.constant 0 : index
    %c0_44 = arith.constant 0 : index
    %102 = vector.load %arg10[%c0_43, %c0_44] : memref<32x128xf32, #tpu.memory_space<vmem>>, vector<32x128xf32>
    tpu.vector_store %arg10[%c0_43, %c0_44], %101 {strides = array<i32>} : memref<32x128xf32, #tpu.memory_space<vmem>>, vector<32x128xf32>,
    return
  }
  func.func @transform_0(%arg0: i32) -> (i32, i32) {
    %c0_i32 = arith.constant 0 : i32
    %c0_i32_0 = arith.constant 0 : i32
    return %arg0, %c0_i32 : i32, i32
  }
  func.func @transform_1(%arg0: i32) -> (i32, i32) {
    %c0_i32 = arith.constant 0 : i32
    %c0_i32_0 = arith.constant 0 : i32
    %c0_i32_1 = arith.constant 0 : i32
    return %c0_i32, %c0_i32_0 : i32, i32
  }
  func.func @transform_2(%arg0: i32) -> (i32, i32) {
    %c0_i32 = arith.constant 0 : i32
    %c0_i32_0 = arith.constant 0 : i32
    %c0_i32_1 = arith.constant 0 : i32
    return %c0_i32, %c0_i32_0 : i32, i32
  }
  func.func @transform_3(%arg0: i32) -> (i32, i32) {
    %c0_i32 = arith.constant 0 : i32
    %c0_i32_0 = arith.constant 0 : i32
    %c0_i32_1 = arith.constant 0 : i32
    return %c0_i32, %c0_i32_0 : i32, i32
  }
  func.func @transform_4(%arg0: i32) -> (i32, i32) {
    %c0_i32 = arith.constant 0 : i32
    %c0_i32_0 = arith.constant 0 : i32
    %c0_i32_1 = arith.constant 0 : i32
    return %c0_i32, %c0_i32_0 : i32, i32
  }
  func.func @transform_5(%arg0: i32) -> (i32, i32) {
    %c0_i32 = arith.constant 0 : i32
    %c0_i32_0 = arith.constant 0 : i32
    %c0_i32_1 = arith.constant 0 : i32
    return %c0_i32, %c0_i32_0 : i32, i32
  }
  func.func @transform_6(%arg0: i32) -> (i32, i32) {
    %c0_i32 = arith.constant 0 : i32
    %c0_i32_0 = arith.constant 0 : i32
    %c0_i32_1 = arith.constant 0 : i32
    return %c0_i32, %c0_i32_0 : i32, i32
  }
  func.func @transform_7(%arg0: i32) -> (i32, i32) {
    %c0_i32 = arith.constant 0 : i32
    %c0_i32_0 = arith.constant 0 : i32
    %c0_i32_1 = arith.constant 0 : i32
    return %c0_i32, %c0_i32_0 : i32, i32
  }
  func.func @transform_8(%arg0: i32) -> (i32, i32) {
    %c0_i32 = arith.constant 0 : i32
    %c0_i32_0 = arith.constant 0 : i32
    %c0_i32_1 = arith.constant 0 : i32
    return %c0_i32, %c0_i32_0 : i32, i32
  }
  func.func @transform_9(%arg0: i32) -> (i32, i32) {
    %c0_i32 = arith.constant 0 : i32
    %c0_i32_0 = arith.constant 0 : i32
    return %arg0, %c0_i32 : i32, i32
  }
}

</mosaic_0001>

<bundles_post_ra>
// kernel: decoder_forward.7
= control target key start
LH: loop header
LB: loop body
LE: loop exit
PB: predicated region body
PF: predicated region fallthrough
CT: control target
= control target key end

     0   :  { %12 = vsyncpa [#allocation3], 0  ;;  %s1828_s24 = smov 0   ;;  %s2101_s0 = inlined_call_operand.vmem [shape: f32[2,16,128], index: 0, kind: input, shape index: {}]   ;;  %s2102_s1 = inlined_call_operand.vmem [shape: f32[1,128], index: 1, kind: input, shape index: {}]   ;;  %s2103_s2 = inlined_call_operand.vmem [shape: f32[1,128], index: 2, kind: input, shape index: {}]   ;;  %s2104_s3 = inlined_call_operand.vmem [shape: bf16[128,384], index: 3, kind: input, shape index: {}]   ;;  %s2105_s4 = inlined_call_operand.vmem [shape: f32[1,384], index: 4, kind: input, shape index: {}]   ;;  %s2106_s5 = inlined_call_operand.hbm [shape: bf16[128,128], index: 5, kind: input, shape index: {}]   ;;  %s2107_s6 = inlined_call_operand.vmem [shape: f32[1,128], index: 6, kind: input, shape index: {}]   ;;  %s2108_s7 = inlined_call_operand.vmem [shape: f32[2,16,128], index: 7, kind: output, shape index: {}]  }
   0x1 LB: > { %s1834_s25 = sadd.s32 4294967295, %s1777_s24   ;;  %p1425_p0 = scmp.ge.s32.totalorder %s1777_s24, 1  ;;  %s1777_s24 = sphi %s1828_s24, %s18_s24  }
   0x2   : > { %p201_p1 = scmp.lt.s32.totalorder %s1777_s24, 3  ;;  %s1779_s26 = smov [#allocation2]  }
   0x3   : > { %s225_s27 = sshll.u32 %s1779_s26, 4  ;;  %p2109_p3 = scmp.eq.s32.totalorder %s1834_s25, 0  ;;  %s226_s27 = int_to_ptr.vmem [resolvable:$true] %s225_s27 }
   0x4   : > { %p1838_p2 = pnand %p1425_p0, %p201_p1  ;;  %s1739_s9 = scalar_lea.hbm %s2106_s5, 1024 }
   0x5   : > { %p1740_p6 = scmp.ne.s32.totalorder %s2106_s5, %s1739_s9  ;;  %p1746_p10 = scmp.lt.u32.totalorder %s1739_s9, %s2106_s5 }
   0x6   : > { %s2111_s28 = scalar_select %p1838_p2, 1, 0 }
   0x7   : > { %p1640_p4 = pneg %p1838_p2 }
   0x9   : > { %p1847_p5 = pnand %p2109_p3, %p1640_p4 }
   0xb   : > { %p1741_p7 = pneg %p1847_p5 }
   0xd   : > { %p1742_p8 = pnand %p1741_p7, %p1740_p6 }
   0xf   : > { %p1743_p9 = pneg %p1742_p8 }
  0x11   : > { %p1748_p11 = pnand %p1746_p10, %p1743_p9 }
  0x13   : > { %1751 = shalt.err (!%p1748_p11)
}
  0x14   : > { %s1752_s14 = scalar_lea.vmem %s226_s27, 1024  ;;  %p1760_p1 = scmp.lt.s32.totalorder %s226_s27, %s226_s27 }
  0x15   : > { %p1753_p12 = scmp.ne.s32.totalorder %s226_s27, %s1752_s14  ;;  %p1761_p4 = scmp.lt.s32.totalorder %s1752_s14, %s1752_s14 }
  0x17   : > { %p1755_p13 = pnand %p1753_p12, %p1741_p7  ;;  %p1762_p3 = por %p1761_p4, %p1760_p1 }
  0x19   : > { %p1756_p0 = pneg %p1755_p13 }
  0x1b   : > { %p1763_p2 = pnand %p1762_p3, %p1756_p0 }
  0x1d   : > { %1766 = shalt.err (!%p1763_p2)
}
  0x1e   : > { %s1780_s15 = smov 64   ;;  %s1781_s16 = smov 4  }
  0x1f   : > { %1643 = dma.hbm_to_vmem [thread:$0]  (!%p1847_p5), %s2106_s5, 1024, %s226_s27, [#allocation3], %s1780_s15, %s1780_s15, %s1781_s16  }
  0x20   : > { %p2113_p6 = scmp.ne.s32.totalorder %s2111_s28, 0 }
  0x21   : > { %p2114_p8 = scmp.eq.s32.totalorder (!%p2113_p6), %s1834_s25, 0 }
  0x22   : > { %252 = sbr.rel (%p2113_p6) target bundleno = 2649 (0xa59), region = 48 }
  0x29   : > { %1772 = dma.done.wait (%p2114_p8), [#allocation3], 1024   ;;  %p2115_p7 = pmov %p2114_p8 }
  0x2a   : > { %p284_p2 = scmp.lt.s32.totalorder %s1834_s25, 1  ;;  %v1663_v2 = vld [vmem:[%s2104_s3 + $0x4] ss:$12 sps:$4 sm:$0xff]   ;;  %v1665_v3 = vld [vmem:[%s2104_s3] ss:$12 sps:$4 sm:$0xff]   ;;  %v1782_v4 = vmov 0.0   ;;  %v373_v53 = vlaneseq }
  0x2b   : > { %1774 = vsyncadd (%p2115_p7), [#allocation3], 4294966272  ;;  %1522 = vmatprep.subr.bf16.mxu1 %v1782_v4  ;;  %v1666_v5 = vld [vmem:[%s2104_s3 + $0x8] ss:$12 sps:$4 sm:$0xff]   ;;  %516 = vmatprep.subr.bf16.mxu0 %v1663_v2  ;;  %v1669_v15 = vld [vmem:[%s2104_s3 + $0x18] ss:$12 sps:$4 sm:$0xff]  }
  0x2c   : > { %s2117_s25 = smov (!%p284_p2, %s1834_s25), 1  ;;  %v1667_v6 = vld [vmem:[%s2104_s3 + $0x1c] ss:$12 sps:$4 sm:$0xff]   ;;  %517 = vmatpush1.bf16.msra.mxu0 %v1665_v3  ;;  %1523 = vmatpush3.bf16.msra.mxu1 %v1666_v5  ;;  %v1670_v16 = vld [vmem:[%s2104_s3 + $0x20] ss:$12 sps:$4 sm:$0xff]   ;;  %v1783_v30 = vmov 0  }
  0x2d   : > { %s1483_s19 = sshll.u32 %s2117_s25, 4  ;;  %518 = vmatprep.subr.bf16.mxu0 %v1667_v6  ;;  %1524 = vmatprep.subr.bf16.mxu1 %v1782_v4  ;;  %v1671_v17 = vld [vmem:[%s2104_s3 + $0x34] ss:$12 sps:$4 sm:$0xff]   ;;  %v1673_v18 = vld [vmem:[%s2104_s3 + $0x30] ss:$12 sps:$4 sm:$0xff]   ;;  %vm1784_vm0 = vmmov 0  }
  0x2e   : > { %s288_s22 = scalar_lea.vmem %s2101_s0, %s1483_s19  ;;  %v1674_v19 = vld [vmem:[%s2104_s3 + $0x38] ss:$12 sps:$4 sm:$0xff]   ;;  %v1677_v21 = vld [vmem:[%s2104_s3 + $0x48] ss:$12 sps:$4 sm:$0xff]   ;;  %v1678_v22 = vld [vmem:[%s2104_s3 + $0x50] ss:$12 sps:$4 sm:$0xff]   ;;  %548 = vmatprep.mubr.bf16.mxu0 %v1783_v30  ;;  %1538 = vmatprep.mubr.msk.bf16.mxu1 %vm1784_vm0, %v1782_v4  ;;  %s293_s26 = scalar_lea.vmem %s2108_s7, %s1483_s19 }
  0x2f   : > { %v1883_v0 = vld [vmem:[%s288_s22] sm:$0xff]  ;;  %v1885_v1 = vld [vmem:[%s288_s22 + $0x8] sm:$0xff]  ;;  %v1689_v31 = vld [vmem:[%s2104_s3 + $0x90] ss:$12 sps:$4 sm:$0xff]   ;;  %v374_v54 = vshrl.u32 %v373_v53, 7  ;;  %vm627_vm1 = vcmask 261120  }
  0x30   : > { %299 = vadd.xlane.f32.xlu0 %v1883_v0  ;;  %519 = vmatpush1.bf16.msra.mxu0 %v1669_v15  ;;  %v1675_v20 = vld [vmem:[%s2104_s3 + $0x4c] ss:$12 sps:$4 sm:$0xff]   ;;  %v1679_v23 = vld [vmem:[%s2104_s3 + $0x64] ss:$12 sps:$4 sm:$0xff]   ;;  %v1682_v25 = vld [vmem:[%s2104_s3 + $0x68] ss:$12 sps:$4 sm:$0xff]  }
  0x31   : > { %1525 = vmatpush3.bf16.msra.mxu1 %v1670_v16  ;;  %520 = vmatprep.subr.bf16.mxu0 %v1671_v17  ;;  %v1681_v24 = vld [vmem:[%s2104_s3 + $0x60] ss:$12 sps:$4 sm:$0xff]   ;;  %v1683_v26 = vld [vmem:[%s2104_s3 + $0x7c] ss:$12 sps:$4 sm:$0xff]   ;;  %v1685_v27 = vld [vmem:[%s2104_s3 + $0x78] ss:$12 sps:$4 sm:$0xff]  }
  0x32   : > { %1526 = vmatprep.subr.bf16.mxu1 %v1782_v4  ;;  %v1686_v28 = vld [vmem:[%s2104_s3 + $0x80] ss:$12 sps:$4 sm:$0xff]   ;;  %v1690_v32 = vld [vmem:[%s2104_s3 + $0x98] ss:$12 sps:$4 sm:$0xff]   ;;  %v1693_v34 = vld [vmem:[%s2104_s3 + $0xa8] ss:$12 sps:$4 sm:$0xff]  }
  0x33   : > { %v1687_v29 = vld [vmem:[%s2104_s3 + $0x94] ss:$12 sps:$4 sm:$0xff]   ;;  %v1691_v33 = vld [vmem:[%s2104_s3 + $0xac] ss:$12 sps:$4 sm:$0xff]   ;;  %v1694_v35 = vld [vmem:[%s2104_s3 + $0xb0] ss:$12 sps:$4 sm:$0xff]  }
  0x34   : > { %301 = vadd.xlane.f32.xlu0 %v1885_v1  ;;  %521 = vmatpush1.bf16.msra.mxu0 %v1673_v18  ;;  %v1434_v44 = vld [vmem:[%s2102_s1] ss:$0 sm:$0xff]  ;;  %v375_v55 = vsub.s32 0, %v374_v54  ;;  %v383_v56 = vsub.s32 2, %v374_v54  ;;  %v379_v58 = vsub.s32 1, %v374_v54  ;;  %vm677_vm2 = vcmask 130048  }
  0x35   : > { %1527 = vmatpush3.bf16.msra.mxu1 %v1674_v19  ;;  %522 = vmatprep.subr.bf16.mxu0 %v1675_v20  ;;  %v1435_v48 = vld [vmem:[%s2103_s2] ss:$0 sm:$0xff]  ;;  %s1785_s16 = smov 96   ;;  %s1786_s17 = smov 64  }
  0x36   : > { %1528 = vmatprep.subr.bf16.mxu1 %v1782_v4  ;;  %v371_v57 = vld [vmem:[%s2105_s4] sm:$0x7]  ;;  %s1787_s18 = smov 32  }
  0x37   : > { %v376_v59 = vrot.slane %v371_v57, %v375_v55  ;;  %v384_v60 = vrot.slane %v371_v57, %v383_v56  ;;  %v380_v63 = vrot.slane %v371_v57, %v379_v58 }
  0x38   : > { %523 = vmatpush1.bf16.msra.mxu0 %v1677_v21 }
  0x39   : > { %1529 = vmatpush3.bf16.msra.mxu1 %v1678_v22  ;;  %524 = vmatprep.subr.bf16.mxu0 %v1679_v23 }
  0x3a   : > { %1530 = vmatprep.subr.bf16.mxu1 %v1782_v4 }
  0x3c   : > { %525 = vmatpush1.bf16.msra.mxu0 %v1681_v24 }
  0x3d   : > { %1531 = vmatpush3.bf16.msra.mxu1 %v1682_v25  ;;  %526 = vmatprep.subr.bf16.mxu0 %v1683_v26 }
  0x3e   : > { %1532 = vmatprep.subr.bf16.mxu1 %v1782_v4 }
  0x40   : > { %527 = vmatpush1.bf16.msra.mxu0 %v1685_v27 }
  0x41   : > { %1533 = vmatpush3.bf16.msra.mxu1 %v1686_v28  ;;  %528 = vmatprep.subr.bf16.mxu0 %v1687_v29 }
  0x42   : > { %1534 = vmatprep.subr.bf16.mxu1 %v1782_v4 }
  0x44   : > { %529 = vmatpush1.bf16.msra.mxu0 %v1689_v31 }
  0x45   : > { %1535 = vmatpush3.bf16.msra.mxu1 %v1690_v32  ;;  %530 = vmatprep.subr.bf16.mxu0 %v1691_v33 }
  0x46   : > { %1536 = vmatprep.subr.bf16.mxu1 %v1782_v4 }
  0x48   : > { %531 = vmatpush1.bf16.msra.mxu0 %v1693_v34 }
  0x49   : > { %1537 = vmatpush3.bf16.msra.mxu1 %v1694_v35  ;;  %1554 = vmatprep.subr.bf16.mxu0 %v1782_v4 }
  0x4a   : > { %1542 = vmatprep.subr.bf16.mxu1 %v1782_v4 }
  0xbd   : > { %v300_v7 = vpop.xlane.xlu0 %299 }
  0xbe   : > { %v304_v8 = vmul.f32 0.0078125, %v300_v7 }
  0xc0   : > { %v1904_v9 = vsub.f32 %v1883_v0, %v304_v8 }
  0xc1   : > { %v302_v10 = vpop.xlane.xlu0 %301 }
  0xc2   : > { %v305_v11 = vmul.f32 0.0078125, %v302_v10  ;;  %v308_v12 = vmul.f32 %v1904_v9, %v1904_v9 }
  0xc4   : > { %v1909_v13 = vsub.f32 %v1885_v1, %v305_v11  ;;  %310 = vadd.xlane.f32.xlu1 %v308_v12 }
  0xc6   : > { %v309_v14 = vmul.f32 %v1909_v13, %v1909_v13 }
  0xc8   : > { %312 = vadd.xlane.f32.xlu1 %v309_v14 }
 0x151   : > { %v311_v36 = vpop.xlane.xlu1 %310 }
 0x152   : > { %v314_v37 = vmul.f32 0.0078125, %v311_v36 }
 0x154   : > { %v316_v38 = vadd.f32 1e-05, %v314_v37  ;;  %v1695_v37 = vld [vmem:[#allocation2] sm:$0xff]  }
 0x155   : > { %v313_v39 = vpop.xlane.xlu1 %312 }
 0x156   : > { %1703 = vrsqrt.f32 %v316_v38  ;;  %v315_v40 = vmul.f32 0.0078125, %v313_v39 }
 0x158   : > { %v317_v41 = vadd.f32 1e-05, %v315_v40 }
 0x15a   : > { %1705 = vrsqrt.f32 %v317_v41 }
 0x160   : > { %v1704_v42 = vpop.eup %1703 }
 0x161   : > { %v320_v43 = vmul.f32 %v1704_v42, %v1904_v9 }
 0x163   : > { %v328_v47 = vmul.f32 %v1434_v44, %v320_v43 }
 0x164   : > { %v1706_v45 = vpop.eup %1705 }
 0x165   : > { %v321_v46 = vmul.f32 %v1706_v45, %v1909_v13  ;;  %v336_v50 = vadd.f32 %v1435_v48, %v328_v47 }
 0x167   : > { %v329_v49 = vmul.f32 %v1434_v44, %v321_v46 }
 0x169   : > { %v337_v51 = vadd.f32 %v1435_v48, %v329_v49 }
 0x16b   : > { %v370_v52 = vpack.c.bf16 %v337_v51, %v336_v50  ;;  %v1696_v51 = vld [vmem:[#allocation2 + $0x8] sm:$0xff]  }
 0x16d   : > { %549 = vmatmul.mubr.bf16.vlgmr.msra.gmra.mrb[0].mxu0 %v370_v52  ;;  %1539 = vmatmul.mubr.bf16.vlgmr.msra.gmra.mrb[0].mxu1 %v370_v52 }
 0x16e   : > { %1544 = vmatprep.mubr.msk.bf16.mxu1 %vm1784_vm0, %v1782_v4  ;;  %1558 = vmatprep.mubr.msk.bf16.mxu0 %vm1784_vm0, %v1782_v4 }
 0x16f   : > { %1555 = vmatpush3.bf16.msra.mxu0 %v1695_v37 }
 0x170   : > { %1556 = vmatprep.subr.bf16.mxu0 %v1782_v4 }
 0x173   : > { %1557 = vmatpush3.bf16.msra.mxu0 %v1696_v51 }
 0x174   : > { %1568 = vmatprep.subr.bf16.mxu0 %v1782_v4 }
 0x240   : > { %v550_v61 = vpop.f32.mrb[0].mxu0  ;;  %v593_v62 = vpop.f32.mrb[0].mxu1 }
 0x241   : > { %v552_v2 = vpop.f32.mrb[1].mxu0  ;;  %v1540_v3 = vpop.f32.mrb[1].mxu1  ;;  %v551_v7 = vadd.f32 %v550_v61, %v376_v59  ;;  %v594_v8 = vadd.f32 %v593_v62, %v384_v60 }
 0x242   : > { %v554_v5 = vpop.f32.mrb[2].mxu0  ;;  %v596_v6 = vpop.f32.mrb[2].mxu1  ;;  %v553_v13 = vadd.f32 %v552_v2, %v380_v63 }
 0x243   : > { %v555_v9 = vadd.f32 %v554_v5, %v376_v59  ;;  %v597_v10 = vadd.f32 %v596_v6, %v384_v60  ;;  %v556_v11 = vpop.f32.mrb[3].mxu0  ;;  %v1541_v12 = vpop.f32.mrb[3].mxu1 }
 0x244   : > { %v557_v14 = vadd.f32 %v556_v11, %v380_v63 }
 0x245   : > { %v1998_v15 = vpack.c.bf16 %v555_v9, %v551_v7  ;;  %v2000_v16 = vpack.c.bf16 %v597_v10, %v594_v8 }
 0x246   : > { %v2002_v17 = vpack.c.bf16 %v557_v14, %v553_v13 }
 0x248   : > { %v632_v18 = vsel %vm627_vm1, %v2002_v17, 0 }
 0x249   : > { %1543 = vmatpush3.bf16.xpose.msra.mxu1 %v632_v18 }
 0x24a   : > { %1548 = vmatprep.subr.bf16.mxu1 %v1782_v4 }
 0x250   : > { %1545 = vmatmul.mubr.msk.bf16.vlgmr.msra.gmra.mrb[4].mxu1 %vm627_vm1, %v1998_v15 }
 0x251   : > { %1549 = vmatpush3.bf16.msra.mxu1 %v2000_v16  ;;  %1550 = vmatprep.mubr.msk.bf16.mxu1 %vm1784_vm0, %v1782_v4 }
 0x252   : > { %1562 = vmatprep.subr.bf16.mxu1 %v1782_v4 }
 0x323   : > { %v668_v19 = vpop.f32.mrb[4].mxu1 }
 0x324   : > { %v675_v20 = vmul.f32 0.17677669, %v668_v19  ;;  %v1546_v21 = vpop.f32.mrb[5].mxu1 }
 0x325   : > { %v671_v22 = vpop.f32.mrb[6].mxu1 }
 0x326   : > { %v676_v23 = vmul.f32 0.17677669, %v671_v22  ;;  %v1547_v24 = vpop.f32.mrb[7].mxu1  ;;  %v678_v25 = vsel %vm677_vm2, %v675_v20, -inf }
 0x327   : > { %679 = vmax.xlane.f32.xlu0 %v678_v25 }
 0x328   : > { %v681_v26 = vsel %vm677_vm2, %v676_v23, -inf }
 0x329   : > { %682 = vmax.xlane.f32.xlu1 %v681_v26 }
 0x3b4   : > { %v680_v27 = vpop.xlane.xlu0 %679 }
 0x3b5   : > { %v684_v28 = vsub.f32 %v675_v20, %v680_v27 }
 0x3b6   : > { %v683_v29 = vpop.xlane.xlu1 %682 }
 0x3b7   : > { %v686_v30 = vmul.f32 1.442695, %v684_v28  ;;  %v685_v31 = vsub.f32 %v676_v23, %v683_v29 }
 0x3b9   : > { %1707 = vpow2.f32 %v686_v30  ;;  %v688_v32 = vmul.f32 1.442695, %v685_v31 }
 0x3bb   : > { %1709 = vpow2.f32 %v688_v32 }
 0x3c3   : > { %v1708_v33 = vpop.eup %1707 }
 0x3c4   : > { %v690_v34 = vsel %vm677_vm2, %v1708_v33, 0.0 }
 0x3c5   : > { %v1710_v35 = vpop.eup %1709  ;;  %691 = vadd.xlane.f32.xlu0 %v690_v34 }
 0x3c6   : > { %v693_v36 = vsel %vm677_vm2, %v1710_v35, 0.0 }
 0x3c7   : > { %694 = vadd.xlane.f32.xlu1 %v693_v36 }
 0x3d8   : > { %806 = vrot.lane.b32.xlu1 %v1998_v15, %s1785_s16 }
 0x3db   : > { %809 = vrot.lane.b32.xlu0 %v2002_v17, %s1785_s16 }
 0x3dc   : > { %992 = vrot.lane.b32.xlu1 %v2002_v17, %s1786_s17 }
 0x3e0   : > { %990 = vrot.lane.b32.xlu1 %v1998_v15, %s1786_s17 }
 0x452   : > { %v692_v38 = vpop.xlane.xlu0 %691 }
 0x453   : > { %1711 = vrcp.f32 %v692_v38 }
 0x454   : > { %v695_v39 = vpop.xlane.xlu1 %694 }
 0x455   : > { %1713 = vrcp.f32 %v695_v39 }
 0x456   : > { %v810_v44 = vpop.permute.xlu0 %809 }
 0x457   : > { %v815_v47 = vsel %vm627_vm1, %v810_v44, 0 }
 0x458   : > { %v807_v46 = vpop.permute.xlu1 %806 }
 0x45c   : > { %v993_v48 = vpop.permute.xlu1 %992 }
 0x45d   : > { %v1712_v40 = vpop.eup %1711  ;;  %v998_v49 = vsel %vm627_vm1, %v993_v48, 0 }
 0x45e   : > { %v698_v42 = vmul.f32 %v1712_v40, %v1708_v33 }
 0x45f   : > { %v1714_v41 = vpop.eup %1713 }
 0x460   : > { %v699_v43 = vmul.f32 %v1714_v41, %v1710_v35  ;;  %v991_v50 = vpop.permute.xlu1 %990 }
 0x462   : > { %v700_v45 = vpack.c.bf16 %v699_v43, %v698_v42 }
 0x464   : > { %1551 = vmatmul.mubr.msk.bf16.vlgmr.msra.gmra.mrb[8].mxu1 %vm677_vm2, %v700_v45 }
 0x465   : > { %1563 = vmatpush3.bf16.xpose.msra.mxu1 %v815_v47  ;;  %1564 = vmatprep.mubr.msk.bf16.mxu1 %vm1784_vm0, %v1782_v4 }
 0x466   : > { %1582 = vmatprep.subr.bf16.mxu1 %v1782_v4 }
 0x46c   : > { %1565 = vmatmul.mubr.msk.bf16.vlgmr.msra.gmra.mrb[12].mxu1 %vm627_vm1, %v807_v46 }
 0x46d   : > { %1583 = vmatpush3.bf16.xpose.msra.mxu1 %v998_v49  ;;  %1584 = vmatprep.mubr.msk.bf16.mxu1 %vm1784_vm0, %v1782_v4 }
 0x46e   : > { %1588 = vmatprep.subr.bf16.mxu1 %v1782_v4 }
 0x474   : > { %1585 = vmatmul.mubr.msk.bf16.vlgmr.msra.gmra.mrb[16].mxu1 %vm627_vm1, %v991_v50 }
 0x475   : > { %1590 = vmatprep.mubr.msk.bf16.mxu1 %vm1784_vm0, %v1782_v4 }
 0x537   : > { %v739_v52 = vpop.f32.mrb[8].mxu1 }
 0x538   : > { %v1552_v53 = vpop.f32.mrb[9].mxu1 }
 0x539   : > { %v742_v54 = vpop.f32.mrb[10].mxu1 }
 0x53a   : > { %v746_v55 = vpack.c.bf16 %v742_v54, %v739_v52  ;;  %v1553_v56 = vpop.f32.mrb[11].mxu1 }
 0x53c   : > { %1559 = vmatmul.mubr.msk.bf16.vlgmr.msra.gmra.mrb[4].mxu0 %vm627_vm1, %v746_v55 }
 0x53d   : > { %1570 = vmatprep.mubr.msk.bf16.mxu0 %vm1784_vm0, %v1782_v4 }
 0x53f   : > { %v851_v57 = vpop.f32.mrb[12].mxu1 }
 0x540   : > { %v1566_v58 = vpop.f32.mrb[13].mxu1  ;;  %v858_v8 = vmul.f32 0.17677669, %v851_v57 }
 0x541   : > { %v854_v59 = vpop.f32.mrb[14].mxu1 }
 0x542   : > { %v1567_v60 = vpop.f32.mrb[15].mxu1  ;;  %v860_v9 = vsel %vm677_vm2, %v858_v8, -inf  ;;  %v859_v27 = vmul.f32 0.17677669, %v854_v59 }
 0x544   : > { %v863_v28 = vsel %vm677_vm2, %v859_v27, -inf }
 0x547   : > { %v1034_v61 = vpop.f32.mrb[16].mxu1 }
 0x548   : > { %v1041_v62 = vmul.f32 0.17677669, %v1034_v61  ;;  %v1586_v63 = vpop.f32.mrb[17].mxu1 }
 0x549   : > { %v1037_v2 = vpop.f32.mrb[18].mxu1 }
 0x54a   : > { %v1042_v3 = vmul.f32 0.17677669, %v1037_v2  ;;  %v1587_v5 = vpop.f32.mrb[19].mxu1  ;;  %v1043_v6 = vsel %vm677_vm2, %v1041_v62, -inf  ;;  %v1697_v2 = vld [vmem:[#allocation2 + $0x10] sm:$0xff]  }
 0x54b   : > { %1044 = vmax.xlane.f32.xlu0 %v1043_v6 }
 0x54c   : > { %v1046_v7 = vsel %vm677_vm2, %v1042_v3, -inf }
 0x54d   : > { %1047 = vmax.xlane.f32.xlu1 %v1046_v7 }
 0x55e   : > { %1174 = vrot.lane.b32.xlu1 %v2002_v17, %s1787_s18 }
 0x562   : > { %1172 = vrot.lane.b32.xlu1 %v1998_v15, %s1787_s18 }
 0x586   : > { %861 = vmax.xlane.f32.xlu1 %v860_v9 }
 0x597   : > { %884 = vrot.lane.b32.xlu1 %v2000_v16, %s1785_s16 }
 0x59b   : > { %1248 = vrot.lane.b32.xlu1 %v2000_v16, %s1787_s18 }
 0x5d8   : > { %v1045_v10 = vpop.xlane.xlu0 %1044 }
 0x5d9   : > { %v1049_v11 = vsub.f32 %v1041_v62, %v1045_v10 }
 0x5da   : > { %v1048_v12 = vpop.xlane.xlu1 %1047 }
 0x5db   : > { %v1051_v13 = vmul.f32 1.442695, %v1049_v11  ;;  %v1050_v14 = vsub.f32 %v1042_v3, %v1048_v12  ;;  %v1698_v3 = vld [vmem:[#allocation2 + $0x18] sm:$0xff]  }
 0x5dd   : > { %1715 = vpow2.f32 %v1051_v13  ;;  %v1053_v18 = vmul.f32 1.442695, %v1050_v14 }
 0x5de   : > { %v1175_v21 = vpop.permute.xlu1 %1174 }
 0x5df   : > { %1717 = vpow2.f32 %v1053_v18  ;;  %v1180_v38 = vsel %vm627_vm1, %v1175_v21, 0 }
 0x5e2   : > { %v1173_v22 = vpop.permute.xlu1 %1172 }
 0x5e7   : > { %v1716_v17 = vpop.eup %1715 }
 0x5e8   : > { %v1055_v15 = vsel %vm677_vm2, %v1716_v17, 0.0 }
 0x5e9   : > { %v1718_v19 = vpop.eup %1717  ;;  %1056 = vadd.xlane.f32.xlu0 %v1055_v15 }
 0x5ea   : > { %v1058_v20 = vsel %vm677_vm2, %v1718_v19, 0.0 }
 0x5ed   : > { %1059 = vadd.xlane.f32.xlu0 %v1058_v20 }
 0x603   : > { %1066 = vrot.lane.b32.xlu0 %v2000_v16, %s1786_s17 }
 0x613   : > { %v862_v23 = vpop.xlane.xlu1 %861 }
 0x614   : > { %v866_v24 = vsub.f32 %v858_v8, %v862_v23 }
 0x616   : > { %v868_v25 = vmul.f32 1.442695, %v866_v24 }
 0x617   : > { %v885_v26 = vpop.permute.xlu1 %884 }
 0x618   : > { %1719 = vpow2.f32 %v868_v25  ;;  %1569 = vmatpush3.bf16.msra.mxu0 %v885_v26 }
 0x619   : > { %1574 = vmatprep.subr.bf16.mxu0 %v1782_v4 }
 0x61b   : > { %v1249_v23 = vpop.permute.xlu1 %1248 }
 0x622   : > { %v1720_v29 = vpop.eup %1719  ;;  %864 = vmax.xlane.f32.xlu0 %v863_v28 }
 0x623   : > { %v872_v30 = vsel %vm677_vm2, %v1720_v29, 0.0 }
 0x626   : > { %873 = vadd.xlane.f32.xlu0 %v872_v30  ;;  %v1701_v30 = vld [vmem:[#allocation2 + $0x30] sm:$0xff]  }
 0x676   : > { %v1057_v31 = vpop.xlane.xlu0 %1056 }
 0x677   : > { %1721 = vrcp.f32 %v1057_v31 }
 0x67a   : > { %v1060_v16 = vpop.xlane.xlu0 %1059 }
 0x67b   : > { %1723 = vrcp.f32 %v1060_v16  ;;  %v1702_v16 = vld [vmem:[#allocation2 + $0x38] sm:$0xff]  }
 0x67e   : > { %v1067_v32 = vpop.permute.xlu0 %1066 }
 0x67f   : > { %1589 = vmatpush3.bf16.msra.mxu1 %v1067_v32 }
 0x680   : > { %1602 = vmatprep.subr.bf16.mxu1 %v1782_v4 }
 0x681   : > { %v1722_v33 = vpop.eup %1721 }
 0x682   : > { %v1063_v35 = vmul.f32 %v1722_v33, %v1716_v17 }
 0x685   : > { %v1724_v34 = vpop.eup %1723 }
 0x686   : > { %v1064_v36 = vmul.f32 %v1724_v34, %v1718_v19  ;;  %v1699_v19 = vld [vmem:[#allocation2 + $0x20] sm:$0xff]  }
 0x688   : > { %v1065_v37 = vpack.c.bf16 %v1064_v36, %v1063_v35 }
 0x68a   : > { %1591 = vmatmul.mubr.msk.bf16.vlgmr.msra.gmra.mrb[20].mxu1 %vm677_vm2, %v1065_v37  ;;  %v1460_v37 = vld [vmem:[%s2107_s6] ss:$0 sm:$0xff] }
 0x68b   : > { %1603 = vmatpush3.bf16.xpose.msra.mxu1 %v1180_v38  ;;  %1604 = vmatprep.mubr.msk.bf16.mxu1 %vm1784_vm0, %v1782_v4  ;;  %v623_v38 = vadd.f32 %v1460_v37, %v1883_v0 }
 0x692   : > { %1605 = vmatmul.mubr.msk.bf16.vlgmr.msra.gmra.mrb[24].mxu1 %vm627_vm1, %v1173_v22  ;;  %v1700_v22 = vld [vmem:[#allocation2 + $0x28] sm:$0xff]  }
 0x6af   : > { %v865_v39 = vpop.xlane.xlu0 %864 }
 0x6b0   : > { %v867_v40 = vsub.f32 %v859_v27, %v865_v39  ;;  %v624_v39 = vadd.f32 %v1460_v37, %v1885_v1 }
 0x6b2   : > { %v870_v41 = vmul.f32 1.442695, %v867_v40 }
 0x6b3   : > { %v874_v44 = vpop.xlane.xlu0 %873 }
 0x6b4   : > { %1725 = vpow2.f32 %v870_v41 }
 0x6b5   : > { %1727 = vrcp.f32 %v874_v44 }
 0x6be   : > { %v1726_v42 = vpop.eup %1725 }
 0x6bf   : > { %v875_v43 = vsel %vm677_vm2, %v1726_v42, 0.0  ;;  %v1728_v46 = vpop.eup %1727 }
 0x6c0   : > { %876 = vadd.xlane.f32.xlu0 %v875_v43  ;;  %v880_v48 = vmul.f32 %v1728_v46, %v1720_v29 }
 0x74d   : > { %v877_v45 = vpop.xlane.xlu0 %876 }
 0x74e   : > { %1729 = vrcp.f32 %v877_v45 }
 0x758   : > { %v1730_v47 = vpop.eup %1729 }
 0x759   : > { %v881_v49 = vmul.f32 %v1730_v47, %v1726_v42 }
 0x75b   : > { %v882_v50 = vpack.c.bf16 %v881_v49, %v880_v48 }
 0x75d   : > { %1571 = vmatmul.mubr.msk.bf16.vlgmr.msra.gmra.mrb[8].mxu0 %vm677_vm2, %v882_v50  ;;  %v1106_v51 = vpop.f32.mrb[20].mxu1 }
 0x75e   : > { %v1592_v52 = vpop.f32.mrb[21].mxu1  ;;  %1578 = vmatprep.mubr.msk.bf16.mxu0 %vm1784_vm0, %v1782_v4  ;;  %1575 = vmatpush3.bf16.msra.mxu0 %v1697_v2 }
 0x75f   : > { %v1109_v53 = vpop.f32.mrb[22].mxu1  ;;  %1576 = vmatprep.subr.bf16.mxu0 %v1782_v4 }
 0x760   : > { %v1113_v54 = vpack.c.bf16 %v1109_v53, %v1106_v51  ;;  %v1593_v55 = vpop.f32.mrb[23].mxu1 }
 0x762   : > { %1577 = vmatpush3.bf16.msra.mxu0 %v1698_v3 }
 0x763   : > { %1594 = vmatprep.subr.bf16.mxu0 %v1782_v4 }
 0x765   : > { %v1216_v56 = vpop.f32.mrb[24].mxu1 }
 0x766   : > { %v1223_v57 = vmul.f32 0.17677669, %v1216_v56  ;;  %v1606_v58 = vpop.f32.mrb[25].mxu1 }
 0x767   : > { %v1219_v59 = vpop.f32.mrb[26].mxu1 }
 0x768   : > { %v1224_v60 = vmul.f32 0.17677669, %v1219_v59  ;;  %v1607_v61 = vpop.f32.mrb[27].mxu1  ;;  %v1225_v62 = vsel %vm677_vm2, %v1223_v57, -inf }
 0x769   : > { %1226 = vmax.xlane.f32.xlu0 %v1225_v62 }
 0x76a   : > { %v1228_v63 = vsel %vm677_vm2, %v1224_v60, -inf }
 0x76d   : > { %1229 = vmax.xlane.f32.xlu0 %v1228_v63 }
 0x7f6   : > { %v1227_v5 = vpop.xlane.xlu0 %1226 }
 0x7f7   : > { %v1231_v6 = vsub.f32 %v1223_v57, %v1227_v5 }
 0x7f9   : > { %v1233_v7 = vmul.f32 1.442695, %v1231_v6 }
 0x7fa   : > { %v1230_v8 = vpop.xlane.xlu0 %1229 }
 0x7fb   : > { %1731 = vpow2.f32 %v1233_v7  ;;  %v1232_v9 = vsub.f32 %v1224_v60, %v1230_v8 }
 0x7fd   : > { %v1235_v10 = vmul.f32 1.442695, %v1232_v9 }
 0x7ff   : > { %1733 = vpow2.f32 %v1235_v10 }
 0x805   : > { %v1732_v11 = vpop.eup %1731 }
 0x806   : > { %v1237_v12 = vsel %vm677_vm2, %v1732_v11, 0.0 }
 0x807   : > { %1238 = vadd.xlane.f32.xlu0 %v1237_v12 }
 0x809   : > { %v1734_v13 = vpop.eup %1733 }
 0x80a   : > { %v1240_v14 = vsel %vm677_vm2, %v1734_v13, 0.0 }
 0x80b   : > { %1241 = vadd.xlane.f32.xlu0 %v1240_v14 }
 0x830   : > { %v924_v18 = vpop.f32.mrb[8].mxu0 }
 0x831   : > { %v1572_v17 = vpop.f32.mrb[9].mxu0 }
 0x832   : > { %v927_v15 = vpop.f32.mrb[10].mxu0 }
 0x833   : > { %v931_v20 = vpack.c.bf16 %v927_v15, %v924_v18  ;;  %v1573_v21 = vpop.f32.mrb[11].mxu0 }
 0x835   : > { %1579 = vmatmul.mubr.msk.bf16.vlgmr.msra.gmra.mrb[4].mxu0 %vm627_vm1, %v931_v20 }
 0x836   : > { %1595 = vmatpush3.bf16.msra.mxu0 %v1699_v19  ;;  %1598 = vmatprep.mubr.msk.bf16.mxu0 %vm1784_vm0, %v1782_v4 }
 0x837   : > { %1596 = vmatprep.subr.bf16.mxu0 %v1782_v4 }
 0x83a   : > { %1597 = vmatpush3.bf16.msra.mxu0 %v1700_v22 }
 0x83b   : > { %1608 = vmatprep.subr.bf16.mxu0 %v1782_v4 }
 0x841   : > { %1599 = vmatmul.mubr.msk.bf16.vlgmr.msra.gmra.mrb[4].mxu0 %vm627_vm1, %v1113_v54 }
 0x842   : > { %1609 = vmatpush3.bf16.msra.mxu0 %v1249_v23  ;;  %1610 = vmatprep.mubr.msk.bf16.mxu0 %vm1784_vm0, %v1782_v4 }
 0x843   : > { %1614 = vmatprep.subr.bf16.mxu0 %v1782_v4 }
 0x894   : > { %v1239_v24 = vpop.xlane.xlu0 %1238 }
 0x895   : > { %1735 = vrcp.f32 %v1239_v24 }
 0x898   : > { %v1242_v25 = vpop.xlane.xlu0 %1241 }
 0x899   : > { %1737 = vrcp.f32 %v1242_v25 }
 0x89f   : > { %v1736_v26 = vpop.eup %1735 }
 0x8a0   : > { %v1245_v28 = vmul.f32 %v1736_v26, %v1732_v11 }
 0x8a3   : > { %v1738_v27 = vpop.eup %1737 }
 0x8a4   : > { %v1246_v29 = vmul.f32 %v1738_v27, %v1734_v13 }
 0x8a6   : > { %v1247_v31 = vpack.c.bf16 %v1246_v29, %v1245_v28 }
 0x8a8   : > { %1611 = vmatmul.mubr.msk.bf16.vlgmr.msra.gmra.mrb[12].mxu0 %vm677_vm2, %v1247_v31 }
 0x8a9   : > { %1615 = vmatpush3.bf16.msra.mxu0 %v1701_v30  ;;  %1618 = vmatprep.mubr.msk.bf16.mxu0 %vm1784_vm0, %v1782_v4 }
 0x8aa   : > { %1616 = vmatprep.subr.bf16.mxu0 %v1782_v4 }
 0x8ad   : > { %1617 = vmatpush3.bf16.msra.mxu0 %v1702_v16 }
 0x97b   : > { %v1288_v32 = vpop.f32.mrb[12].mxu0 }
 0x97c   : > { %v1612_v33 = vpop.f32.mrb[13].mxu0 }
 0x97d   : > { %v1291_v34 = vpop.f32.mrb[14].mxu0 }
 0x97e   : > { %v1295_v35 = vpack.c.bf16 %v1291_v34, %v1288_v32  ;;  %v1613_v36 = vpop.f32.mrb[15].mxu0 }
 0x980   : > { %1619 = vmatmul.mubr.msk.bf16.vlgmr.msra.gmra.mrb[4].mxu0 %vm627_vm1, %v1295_v35 }
 0xa53   : > { %v1345_v4 = vpop.f32.mrb[4].mxu0 }
 0xa54   : > { %v1622_v40 = vadd.f32 %v1345_v4, %v623_v38  ;;  %v1620_v41 = vpop.f32.mrb[5].mxu0 }
 0xa55   : > { %v1348_v42 = vpop.f32.mrb[6].mxu0 }
 0xa56   : > { %1354 = vst [vmem:[%s293_s26] sm:$0xff] %v1622_v40  ;;  %v1623_v43 = vadd.f32 %v1348_v42, %v624_v39  ;;  %v1621_v44 = vpop.f32.mrb[7].mxu0 }
 0xa58   : > { %1355 = vst [vmem:[%s293_s26 + $0x8] sm:$0xff] %v1623_v43 }
 0xa59 PF: > { %s18_s24 = sadd.s32 1, %s1777_s24  }
 0xa5a   : > { %p15_p3 = scmp.ge.s32.totalorder %s18_s24, 4  }
 0xa5c   :  { %17 = sbr.rel (!%p15_p3) target bundleno = 1 (0x1), region = 83 }
 0xa63   :  { %1377 = vsyncpa [#allocation3], 1 }
 0xa64   :  { %1379 = vsyncpa [#allocation3 + $0x1], 1 }

// kernel: decoder_forward.6
= control target key start
LH: loop header
LB: loop body
LE: loop exit
PB: predicated region body
PF: predicated region fallthrough
CT: control target
= control target key end

     0   :  { %s3074_s0 = inlined_call_operand.hbm [shape: f32[2,16,128], index: 0, kind: input, shape index: {}]   ;;  %s3075_s1 = inlined_call_operand.vmem [shape: f32[2,16,128], index: 1, kind: input, shape index: {}]   ;;  %s3076_s2 = inlined_call_operand.vmem [shape: f32[1,128], index: 2, kind: input, shape index: {}]   ;;  %s3077_s3 = inlined_call_operand.vmem [shape: f32[1,128], index: 3, kind: input, shape index: {}]   ;;  %s3078_s4 = inlined_call_operand.vmem [shape: f32[1,128], index: 4, kind: input, shape index: {}]   ;;  %s3079_s5 = inlined_call_operand.vmem [shape: f32[1,128], index: 5, kind: input, shape index: {}]   ;;  %s3080_s6 = inlined_call_operand.hbm [shape: bf16[128,256], index: 6, kind: input, shape index: {}]   ;;  %s3081_s7 = inlined_call_operand.hbm [shape: f32[1,256], index: 7, kind: input, shape index: {}]   ;;  %s3082_s8 = inlined_call_operand.hbm [shape: bf16[128,128], index: 8, kind: input, shape index: {}]   ;;  %s3083_s9 = inlined_call_operand.hbm [shape: f32[1,128], index: 9, kind: input, shape index: {}]   ;;  %s3084_s10 = inlined_call_operand.hbm [shape: bf16[128,128], index: 10, kind: input, shape index: {}]   ;;  %s3085_s11 = inlined_call_operand.hbm [shape: f32[1,128], index: 11, kind: input, shape index: {}]   ;;  %s3086_s12 = inlined_call_operand.vmem [shape: f32[2,16,128], index: 12, kind: output, shape index: {}]  }
   0x1   :  { %3092 = sst [smem:[#allocation17_spill]] %s3076_s2 }
   0x2   :  { %3093 = sst [smem:[#allocation18_spill]] %s3077_s3 }
   0x3   :  { %3094 = sst [smem:[#allocation19_spill]] %s3078_s4 }
   0x4   :  { %3095 = sst [smem:[#allocation20_spill]] %s3079_s5 }
   0x5   :  { %3096 = sst [smem:[#allocation21_spill]] %s3080_s6 }
   0x6   :  { %3097 = sst [smem:[#allocation22_spill]] %s3086_s12 }
   0x7   :  { %17 = vsyncpa [#allocation3], 0 }
   0x8   :  { %19 = vsyncpa [#allocation3 + $0x1], 0 }
   0x9   :  { %20 = vsyncpa [#allocation5], 0 }
   0xa   :  { %21 = vsyncpa [#allocation8], 0 }
   0xb   :  { %22 = vsyncpa [#allocation11], 0  ;;  %s2615_s21 = smov 0   ;;  %s2617_s22 = smov 0  }
   0xc   :  { %s2619_s23 = smov 0   ;;  %s2621_s24 = smov 0  }
   0xd   :  { %s2623_s25 = smov 0   ;;  %s2625_s26 = smov 0  }
   0xe LB: > { %s1834_s27 = sadd.s32 4294967295, %s2531_s26   ;;  %p1836_p0 = scmp.ge.s32.totalorder %s2531_s26, 1  ;;  %s2531_s26 = sphi %s2625_s26, %s28_s26   ;;  %s2527_s25 = sphi %s2623_s25, %s3120_s25   ;;  %s2523_s24 = sphi %s2621_s24, %s3119_s24   ;;  %s2519_s23 = sphi %s2619_s23, %s3118_s23   ;;  %s2515_s22 = sphi %s2617_s22, %s3117_s22   ;;  %s2511_s21 = sphi %s2615_s21, %s3116_s21  }
   0xf   : > { %p2647_p1 = scmp.eq.s32.totalorder %s1834_s27, 0  ;;  %p337_p2 = scmp.lt.s32.totalorder %s2531_s26, 3 }
  0x10   : > { %s2533_s30 = smov [#allocation4]   ;;  %s2534_s15 = smov [#allocation7]  }
  0x11   : > { %s3098_s28 = scalar_select %p2647_p1, 1, 0 }
  0x12   : > { %p2652_p3 = pnand %p1836_p0, %p337_p2  ;;  %s361_s13 = sshll.u32 %s2533_s30, 4  ;;  %s362_s13 = int_to_ptr.vmem [resolvable:$true] %s361_s13 }
  0x13   : > { %s385_s16 = sshll.u32 %s2534_s15, 4  ;;  %s3101_s6 = sld [smem:[#allocation21_spill]]  ;;  %s2664_s16 = int_to_ptr.vmem [resolvable:$true] %s385_s16 }
  0x14   : > { %s3099_s29 = scalar_select %p2652_p3, 1, 0 }
  0x15   : > { %p2091_p4 = pneg %p2652_p3 }
  0x17   : > { %p2660_p5 = pnand %p2091_p4, %p2647_p1 }
  0x19   : > { %s2271_s19 = scalar_lea.hbm %s3101_s6, 2048  ;;  %p2674_p7 = pneg %p2660_p5 }
  0x1a   : > { %p2272_p6 = scmp.ne.s32.totalorder %s3101_s6, %s2271_s19  ;;  %p2278_p10 = scmp.lt.u32.totalorder %s2271_s19, %s3101_s6 }
  0x1c   : > { %p2274_p8 = pnand %p2674_p7, %p2272_p6 }
  0x1e   : > { %p2275_p9 = pneg %p2274_p8 }
  0x20   : > { %p2280_p11 = pnand %p2278_p10, %p2275_p9 }
  0x22   : > { %2283 = shalt.err (!%p2280_p11)
}
  0x23   : > { %s2284_s17 = scalar_lea.vmem %s362_s13, 2048  ;;  %p2292_p2 = scmp.lt.s32.totalorder %s362_s13, %s362_s13 }
  0x24   : > { %p2285_p12 = scmp.ne.s32.totalorder %s362_s13, %s2284_s17  ;;  %p2293_p4 = scmp.lt.s32.totalorder %s2284_s17, %s2284_s17 }
  0x26   : > { %p2287_p13 = pnand %p2285_p12, %p2674_p7  ;;  %p2294_p3 = por %p2293_p4, %p2292_p2 }
  0x28   : > { %p2288_p0 = pneg %p2287_p13 }
  0x2a   : > { %p2295_p1 = pnand %p2294_p3, %p2288_p0 }
  0x2c   : > { %2298 = shalt.err (!%p2295_p1)
}
  0x2d   : > { %s3090_s18 = smov 128   ;;  %s3091_s20 = smov 8  }
  0x2e   : > { %2094 = dma.hbm_to_vmem [thread:$0]  (!%p2660_p5), %s3101_s6, 2048, %s362_s13, [#allocation5], %s3090_s18, %s3090_s18, %s3091_s20  }
  0x2f   : > { %s2299_s3 = scalar_lea.hbm %s3082_s8, 1024 }
  0x30   : > { %p2300_p1 = scmp.ne.s32.totalorder %s3082_s8, %s2299_s3  ;;  %p2306_p8 = scmp.lt.u32.totalorder %s2299_s3, %s3082_s8 }
  0x32   : > { %p2302_p3 = pnand %p2300_p1, %p2674_p7 }
  0x34   : > { %p2303_p6 = pneg %p2302_p3 }
  0x36   : > { %p2308_p9 = pnand %p2306_p8, %p2303_p6 }
  0x38   : > { %2311 = shalt.err (!%p2308_p9)
}
  0x39   : > { %s2312_s13 = scalar_lea.vmem %s2664_s16, 1024  ;;  %p2320_p13 = scmp.lt.s32.totalorder %s2664_s16, %s2664_s16 }
  0x3a   : > { %p2313_p10 = scmp.ne.s32.totalorder %s2664_s16, %s2312_s13  ;;  %p2321_p0 = scmp.lt.s32.totalorder %s2312_s13, %s2312_s13 }
  0x3c   : > { %p2315_p11 = pnand %p2313_p10, %p2674_p7  ;;  %p2322_p2 = por %p2321_p0, %p2320_p13 }
  0x3e   : > { %p2316_p12 = pneg %p2315_p11 }
  0x40   : > { %p2323_p4 = pnand %p2322_p2, %p2316_p12 }
  0x42   : > { %2326 = shalt.err (!%p2323_p4)
}
  0x43   : > { %s2537_s5 = smov 64   ;;  %s2538_s2 = smov 4  }
  0x44   : > { %2100 = dma.hbm_to_vmem [thread:$0]  (!%p2660_p5), %s3082_s8, 1024, %s2664_s16, [#allocation8], %s2537_s5, %s2537_s5, %s2538_s2  }
  0x45   : > { %s2539_s12 = smov [#allocation10]   ;;  %s2540_s27 = smov [#allocation6]  }
  0x46   : > { %s409_s19 = sshll.u32 %s2539_s12, 4  ;;  %s375_s15 = sshll.u32 %s2540_s27, 4  ;;  %s410_s19 = int_to_ptr.vmem [resolvable:$true] %s409_s19  ;;  %s2716_s15 = int_to_ptr.vmem [resolvable:$true] %s375_s15 }
  0x47   : > { %s2327_s18 = scalar_lea.hbm %s3084_s10, 1024 }
  0x48   : > { %p2328_p1 = scmp.ne.s32.totalorder %s3084_s10, %s2327_s18  ;;  %p2334_p8 = scmp.lt.u32.totalorder %s2327_s18, %s3084_s10 }
  0x4a   : > { %p2330_p3 = pnand %p2328_p1, %p2674_p7 }
  0x4c   : > { %p2331_p6 = pneg %p2330_p3 }
  0x4e   : > { %p2336_p9 = pnand %p2334_p8, %p2331_p6 }
  0x50   : > { %2339 = shalt.err (!%p2336_p9)
}
  0x51   : > { %s2340_s4 = scalar_lea.vmem %s410_s19, 1024  ;;  %p2348_p13 = scmp.lt.s32.totalorder %s410_s19, %s410_s19 }
  0x52   : > { %p2341_p10 = scmp.ne.s32.totalorder %s410_s19, %s2340_s4  ;;  %p2349_p0 = scmp.lt.s32.totalorder %s2340_s4, %s2340_s4 }
  0x54   : > { %p2343_p11 = pnand %p2341_p10, %p2674_p7  ;;  %p2350_p2 = por %p2349_p0, %p2348_p13 }
  0x56   : > { %p2344_p12 = pneg %p2343_p11 }
  0x58   : > { %p2351_p4 = pnand %p2350_p2, %p2344_p12 }
  0x5a   : > { %2354 = shalt.err (!%p2351_p4)
}
  0x5b   : > { %2106 = dma.hbm_to_vmem [thread:$0]  (!%p2660_p5), %s3084_s10, 1024, %s410_s19, [#allocation11], %s2537_s5, %s2537_s5, %s2538_s2  }
  0x5c   : > { %s2355_s27 = scalar_lea.hbm %s3081_s7, 32 }
  0x5d   : > { %p2356_p1 = scmp.ne.s32.totalorder %s3081_s7, %s2355_s27  ;;  %p2362_p8 = scmp.lt.u32.totalorder %s2355_s27, %s3081_s7 }
  0x5f   : > { %p2358_p3 = pnand %p2356_p1, %p2674_p7 }
  0x61   : > { %p2359_p6 = pneg %p2358_p3 }
  0x63   : > { %p2364_p9 = pnand %p2362_p8, %p2359_p6 }
  0x65   : > { %2367 = shalt.err (!%p2364_p9)
}
  0x66   : > { %s2368_s5 = scalar_lea.vmem %s2716_s15, 32  ;;  %p2376_p13 = scmp.lt.s32.totalorder %s2716_s15, %s2716_s15 }
  0x67   : > { %p2369_p10 = scmp.ne.s32.totalorder %s2716_s15, %s2368_s5  ;;  %p2377_p0 = scmp.lt.s32.totalorder %s2368_s5, %s2368_s5 }
  0x69   : > { %p2371_p11 = pnand %p2369_p10, %p2674_p7  ;;  %p2378_p2 = por %p2377_p0, %p2376_p13 }
  0x6b   : > { %p2372_p12 = pneg %p2371_p11 }
  0x6d   : > { %p2379_p4 = pnand %p2378_p2, %p2372_p12 }
  0x6f   : > { %2382 = shalt.err (!%p2379_p4)
}
  0x70   : > { %2097 = dma.hbm_to_vmem [thread:$0]  (!%p2660_p5), %s3081_s7, 32, %s2716_s15, [#allocation5]  }
  0x71   : > { %s2541_s4 = smov [#allocation9]   ;;  %s2542_s20 = smov [#allocation12]  }
  0x72   : > { %s399_s6 = sshll.u32 %s2541_s4, 4  ;;  %s423_s18 = sshll.u32 %s2542_s20, 4  ;;  %s400_s6 = int_to_ptr.vmem [resolvable:$true] %s399_s6  ;;  %s2759_s18 = int_to_ptr.vmem [resolvable:$true] %s423_s18 }
  0x73   : > { %s2383_s17 = scalar_lea.hbm %s3083_s9, 16 }
  0x74   : > { %p2384_p1 = scmp.ne.s32.totalorder %s3083_s9, %s2383_s17  ;;  %p2390_p8 = scmp.lt.u32.totalorder %s2383_s17, %s3083_s9 }
  0x76   : > { %p2386_p3 = pnand %p2384_p1, %p2674_p7 }
  0x78   : > { %p2387_p6 = pneg %p2386_p3 }
  0x7a   : > { %p2392_p9 = pnand %p2390_p8, %p2387_p6 }
  0x7c   : > { %2395 = shalt.err (!%p2392_p9)
}
  0x7d   : > { %s2396_s5 = scalar_lea.vmem %s400_s6, 16  ;;  %s2403_s2 = scalar_lea.vmem %s400_s6, 32 }
  0x7e   : > { %p2397_p10 = scmp.ne.s32.totalorder %s400_s6, %s2396_s5  ;;  %p2404_p13 = scmp.lt.s32.totalorder %s400_s6, %s400_s6 }
  0x7f   : > { %p2405_p0 = scmp.lt.s32.totalorder %s2403_s2, %s2396_s5 }
  0x80   : > { %p2399_p11 = pnand %p2397_p10, %p2674_p7 }
  0x81   : > { %p2406_p2 = por %p2405_p0, %p2404_p13 }
  0x82   : > { %p2400_p12 = pneg %p2399_p11 }
  0x84   : > { %p2407_p4 = pnand %p2406_p2, %p2400_p12 }
  0x86   : > { %2410 = shalt.err (!%p2407_p4)
}
  0x87   : > { %2103 = dma.hbm_to_vmem [thread:$0]  (!%p2660_p5), %s3083_s9, 16, %s400_s6, [#allocation8]  }
  0x88   : > { %s2411_s27 = scalar_lea.hbm %s3085_s11, 16 }
  0x89   : > { %p2412_p1 = scmp.ne.s32.totalorder %s3085_s11, %s2411_s27  ;;  %p2418_p8 = scmp.lt.u32.totalorder %s2411_s27, %s3085_s11 }
  0x8b   : > { %p2414_p3 = pnand %p2412_p1, %p2674_p7 }
  0x8d   : > { %p2415_p6 = pneg %p2414_p3 }
  0x8f   : > { %p2420_p9 = pnand %p2418_p8, %p2415_p6 }
  0x91   : > { %2423 = shalt.err (!%p2420_p9)
}
  0x92   : > { %s2424_s6 = scalar_lea.vmem %s2759_s18, 16  ;;  %s2431_s15 = scalar_lea.vmem %s2759_s18, 32 }
  0x93   : > { %p2425_p10 = scmp.ne.s32.totalorder %s2759_s18, %s2424_s6  ;;  %p2432_p13 = scmp.lt.s32.totalorder %s2759_s18, %s2759_s18 }
  0x94   : > { %p2433_p0 = scmp.lt.s32.totalorder %s2431_s15, %s2424_s6 }
  0x95   : > { %p2427_p11 = pnand %p2425_p10, %p2674_p7 }
  0x96   : > { %p2434_p2 = por %p2433_p0, %p2432_p13 }
  0x97   : > { %p2428_p12 = pneg %p2427_p11 }
  0x99   : > { %p2435_p4 = pnand %p2434_p2, %p2428_p12 }
  0x9b   : > { %2438 = shalt.err (!%p2435_p4)
}
  0x9c   : > { %2109 = dma.hbm_to_vmem [thread:$0]  (!%p2660_p5), %s3085_s11, 16, %s2759_s18, [#allocation11]  }
  0x9d   : > { %s40_s30 = sadd.s32 1, %s2527_s25  ;;  %s49_s14 = sadd.s32 1, %s2519_s23 }
  0x9e   : > { %p42_p7 = scmp.ge.s32.totalorder %s40_s30, 2  ;;  %p56_p1 = scmp.ne.s32.totalorder %s2519_s23, %s2515_s22 }
  0x9f   : > { %p57_p3 = scmp.eq.s32.totalorder %s2531_s26, 0  ;;  %p62_p6 = scmp.ne.s32.totalorder %s2515_s22, %s2511_s21 }
  0xa0   : > { %s3122_s30 = smov (%p42_p7, %s40_s30), 0  ;;  %p3104_p9 = scmp.ne.s32.totalorder %s3098_s28, 0 }
  0xa1   : > { %p2812_p8 = por %p57_p3, %p56_p1  ;;  %s44_s18 = ssub.s32 %s2527_s25, %s3122_s30 }
  0xa2   : > { %p2818_p10 = por %p3104_p9, %p62_p6  ;;  %p2120_p5 = scmp.lt.s32.totalorder %s2531_s26, 2 }
  0xa3   : > { %p47_p11 = scmp.eq.s32.totalorder %s44_s18, 0  ;;  %s434_s20 = sand.u32 1, %s2519_s23  }
  0xa4   : > { %s1844_s12 = sshll.u32 %s434_s20, 4  ;;  %s1911_s21 = sshll.u32 %s2527_s25, 8 }
  0xa5   : > { %s2827_s27 = scalar_select %p47_p11, %s2519_s23, %s49_s14  }
  0xa6   : > { %s2833_s3 = scalar_lea.hbm %s3074_s0, %s1911_s21  ;;  %s438_s16 = scalar_lea.vmem [#allocation2], %s1844_s12 }
  0xa7   : > { %s447_s6 = sshll.u32 %s438_s16, 4  ;;  %p2839_p12 = pnand %p2120_p5, %p2812_p8  ;;  %s2835_s6 = int_to_ptr.vmem [resolvable:$true] %s447_s6 }
  0xa8   : > { %s2843_s5 = scalar_lea.sflag [#allocation3], %s434_s20  ;;  %s2439_s2 = scalar_lea.hbm %s2833_s3, 256 }
  0xa9   : > { %p2440_p13 = scmp.ne.s32.totalorder %s2833_s3, %s2439_s2  ;;  %p2441_p0 = pneg %p2839_p12 }
  0xaa   : > { %s2444_s19 = scalar_lea.hbm %s3074_s0, 512  ;;  %p2445_p7 = scmp.lt.u32.totalorder %s2833_s3, %s3074_s0 }
  0xab   : > { %p2442_p2 = pnand %p2441_p0, %p2440_p13  ;;  %p2446_p1 = scmp.lt.u32.totalorder %s2444_s19, %s2439_s2 }
  0xac   : > { %p2448_p6 = scmp.lt.u32.totalorder %s2439_s2, %s2833_s3 }
  0xad   : > { %p2443_p4 = pneg %p2442_p2  ;;  %p2447_p3 = por %p2446_p1, %p2445_p7 }
  0xaf   : > { %p2449_p8 = por %p2448_p6, %p2447_p3 }
  0xb1   : > { %p2450_p9 = pnand %p2449_p8, %p2443_p4 }
  0xb3   : > { %2453 = shalt.err (!%p2450_p9)
}
  0xb4   : > { %s2454_s20 = scalar_lea.vmem %s2835_s6, 256  ;;  %s2543_s17 = smov [#allocation2]  }
  0xb5   : > { %p2455_p5 = scmp.ne.s32.totalorder %s2835_s6, %s2454_s20  ;;  %s2459_s13 = sshll.u32 %s2543_s17, 4  ;;  %s2460_s13 = int_to_ptr.vmem [resolvable:$false] %s2459_s13 }
  0xb6   : > { %s2461_s16 = scalar_lea.vmem %s2460_s13, 512  ;;  %p2462_p2 = scmp.lt.s32.totalorder %s2835_s6, %s2460_s13 }
  0xb7   : > { %p2457_p11 = pnand %p2455_p5, %p2441_p0  ;;  %p2463_p7 = scmp.lt.s32.totalorder %s2461_s16, %s2454_s20 }
  0xb9   : > { %p2458_p13 = pneg %p2457_p11  ;;  %p2464_p1 = por %p2463_p7, %p2462_p2 }
  0xbb   : > { %p2465_p3 = pnand %p2464_p1, %p2458_p13 }
  0xbd   : > { %2468 = shalt.err (!%p2465_p3)
}
  0xbe   : > { %s3107_s2 = smov 8   ;;  %s3108_s14 = smov 128  }
  0xbf   : > { %2113 = dma.hbm_to_vmem [thread:$0]  (!%p2839_p12), %s2833_s3, 256, %s2835_s6, %s2843_s5, %s3108_s14, %s3108_s14, %s3107_s2  }
  0xc0   : > { %p3109_p0 = scmp.ne.s32.totalorder %s3099_s29, 0 }
  0xc1   : > { %s469_s18 = sand.u32 (!%p3109_p0), 1, %s2515_s22  }
  0xc2   : > { %467 = sbr.rel (%p3109_p0) target bundleno = 2816 (0xb00), region = 68  ;;  %s1848_s19 = sshll.u32 (!%p3109_p0), %s469_s18, 4 }
  0xc3   : > { %s470_s12 = scalar_lea.sflag (!%p3109_p0), [#allocation3], %s469_s18  ;;  %s473_s21 = scalar_lea.vmem (!%p3109_p0), [#allocation2], %s1848_s19 }
  0xc9   : > { %2494 = dma.done.wait (%p2818_p10), %s470_s12, 256  }
  0xca   : > { %2496 = vsyncadd (%p2818_p10), %s470_s12, 4294967040  ;;  %p3110_p4 = scmp.ne.s32.totalorder %s3098_s28, 0 }
  0xcc   : > { %2498 = dma.done.wait (%p3110_p4), [#allocation5], 2080  }
  0xcd   : > { %2500 = vsyncadd (%p3110_p4), [#allocation5], 4294965216 }
  0xce   : > { %2502 = dma.done.wait (%p3110_p4), [#allocation8], 1040  }
  0xcf   : > { %2504 = vsyncadd (%p3110_p4), [#allocation8], 4294966256 }
  0xd0   : > { %2506 = dma.done.wait (%p3110_p4), [#allocation11], 1040  }
  0xd1   : > { %2508 = vsyncadd (%p3110_p4), [#allocation11], 4294966256  ;;  %p548_p10 = scmp.lt.s32.totalorder %s2523_s24, 1  ;;  %v2903_v2 = vld [vmem:[%s473_s21] sm:$0xff]  ;;  %v2906_v3 = vld [vmem:[%s473_s21 + $0x8] sm:$0xff]  ;;  %v2544_v6 = vmov 0.0  }
  0xd2   : > { %570 = vadd.xlane.f32.xlu1 %v2903_v2  ;;  %v2191_v4 = vld [vmem:[#allocation4 + $0x4] ss:$8 sps:$4 sm:$0xff]   ;;  %v2193_v5 = vld [vmem:[#allocation4] ss:$8 sps:$4 sm:$0xff]   ;;  %1951 = vmatprep.subr.bf16.mxu0 %v2544_v6  ;;  %v2194_v7 = vld [vmem:[#allocation4 + $0x14] ss:$8 sps:$4 sm:$0xff]  }
  0xd3   : > { %s3124_s24 = smov (!%p548_p10, %s2523_s24), 1  ;;  %871 = vmatprep.subr.bf16.mxu1 %v2191_v4  ;;  %v2196_v24 = vld [vmem:[#allocation7] sm:$0xff]   ;;  %v2197_v25 = vld [vmem:[#allocation4 + $0x10] ss:$8 sps:$4 sm:$0xff]   ;;  %v2202_v29 = vld [vmem:[#allocation4 + $0x34] ss:$8 sps:$4 sm:$0xff]  }
  0xd4   : > { %s1912_s29 = sshll.u32 %s3124_s24, 4  ;;  %872 = vmatpush1.bf16.msra.mxu1 %v2193_v5  ;;  %1952 = vmatpush3.bf16.msra.mxu0 %v2196_v24  ;;  %v2198_v26 = vld [vmem:[#allocation4 + $0x24] ss:$8 sps:$4 sm:$0xff]   ;;  %v2201_v28 = vld [vmem:[#allocation4 + $0x20] ss:$8 sps:$4 sm:$0xff]   ;;  %v2204_v30 = vld [vmem:[#allocation7 + $0x10] sm:$0xff]  }
  0xd5   : > { %s552_s6 = scalar_lea.vmem %s3075_s1, %s1912_s29  ;;  %873 = vmatprep.subr.bf16.mxu1 %v2194_v7  ;;  %1953 = vmatprep.subr.bf16.mxu0 %v2544_v6  ;;  %v2200_v27 = vld [vmem:[#allocation7 + $0x8] sm:$0xff]   ;;  %v2208_v33 = vld [vmem:[#allocation7 + $0x18] sm:$0xff]   ;;  %v2212_v36 = vld [vmem:[#allocation7 + $0x20] sm:$0xff]   ;;  %v2545_v39 = vmov 0   ;;  %vm2546_vm0 = vmmov 0   ;;  %s3111_s5 = sld [smem:[#allocation19_spill]] }
  0xd6   : > { %v566_v0 = vld [vmem:[%s552_s6] sm:$0xff]  ;;  %v567_v1 = vld [vmem:[%s552_s6 + $0x8] sm:$0xff]  ;;  %572 = vadd.xlane.f32.xlu1 %v2906_v3  ;;  %v2205_v31 = vld [vmem:[#allocation4 + $0x30] ss:$8 sps:$4 sm:$0xff]   ;;  %903 = vmatprep.mubr.bf16.mxu1 %v2545_v39  ;;  %s3112_s13 = sld [smem:[#allocation17_spill]]  ;;  %s3113_s14 = sld [smem:[#allocation20_spill]] }
  0xd7   : > { %611 = vadd.xlane.f32.xlu0 %v566_v0  ;;  %v2206_v32 = vld [vmem:[#allocation4 + $0x44] ss:$8 sps:$4 sm:$0xff]   ;;  %v2209_v34 = vld [vmem:[#allocation4 + $0x40] ss:$8 sps:$4 sm:$0xff]   ;;  %v2210_v35 = vld [vmem:[#allocation4 + $0x54] ss:$8 sps:$4 sm:$0xff]   ;;  %1967 = vmatprep.mubr.msk.bf16.mxu0 %vm2546_vm0, %v2544_v6 }
  0xd8   : > { %874 = vmatpush1.bf16.msra.mxu1 %v2197_v25  ;;  %1954 = vmatpush3.bf16.msra.mxu0 %v2200_v27  ;;  %v2213_v37 = vld [vmem:[#allocation4 + $0x50] ss:$8 sps:$4 sm:$0xff]   ;;  %v2214_v38 = vld [vmem:[#allocation4 + $0x64] ss:$8 sps:$4 sm:$0xff]   ;;  %v2217_v41 = vld [vmem:[#allocation4 + $0x60] ss:$8 sps:$4 sm:$0xff]  }
  0xd9   : > { %875 = vmatprep.subr.bf16.mxu1 %v2198_v26  ;;  %1955 = vmatprep.subr.bf16.mxu0 %v2544_v6  ;;  %v2216_v40 = vld [vmem:[#allocation7 + $0x28] sm:$0xff]   ;;  %v2218_v42 = vld [vmem:[#allocation4 + $0x74] ss:$8 sps:$4 sm:$0xff]   ;;  %s3114_s12 = sld [smem:[#allocation18_spill]]  ;;  %vm941_vm1 = vcmask 261120   ;;  %vm991_vm2 = vcmask 130048  }
  0xda   : > { %v2220_v43 = vld [vmem:[#allocation7 + $0x30] sm:$0xff]   ;;  %v2222_v45 = vld [vmem:[#allocation7 + $0x38] sm:$0xff]   ;;  %s2547_s21 = smov 96   ;;  %s2548_s4 = smov 64  }
  0xdb   : > { %613 = vadd.xlane.f32.xlu0 %v567_v1  ;;  %v2221_v44 = vld [vmem:[#allocation4 + $0x70] ss:$8 sps:$4 sm:$0xff]   ;;  %v1861_v60 = vld [vmem:[%s3111_s5] ss:$0 sm:$0xff]  ;;  %s2549_s3 = smov 32   ;;  %s3115_s15 = sld [smem:[#allocation22_spill]] }
  0xdc   : > { %876 = vmatpush1.bf16.msra.mxu1 %v2201_v28  ;;  %1956 = vmatpush3.bf16.msra.mxu0 %v2204_v30  ;;  %v1859_v4 = vld [vmem:[%s3112_s13] ss:$0 sm:$0xff] }
  0xdd   : > { %877 = vmatprep.subr.bf16.mxu1 %v2202_v29  ;;  %1957 = vmatprep.subr.bf16.mxu0 %v2544_v6  ;;  %v1862_v5 = vld [vmem:[%s3113_s14] ss:$0 sm:$0xff] }
  0xe0   : > { %878 = vmatpush1.bf16.msra.mxu1 %v2205_v31  ;;  %1958 = vmatpush3.bf16.msra.mxu0 %v2208_v33 }
  0xe1   : > { %879 = vmatprep.subr.bf16.mxu1 %v2206_v32  ;;  %1959 = vmatprep.subr.bf16.mxu0 %v2544_v6  ;;  %v1863_v32 = vld [vmem:[#allocation9] ss:$0 sm:$0xff]  ;;  %s561_s5 = scalar_lea.vmem %s3115_s15, %s1912_s29 }
  0xe4   : > { %880 = vmatpush1.bf16.msra.mxu1 %v2209_v34  ;;  %1960 = vmatpush3.bf16.msra.mxu0 %v2212_v36 }
  0xe5   : > { %881 = vmatprep.subr.bf16.mxu1 %v2210_v35  ;;  %1961 = vmatprep.subr.bf16.mxu0 %v2544_v6 }
  0xe8   : > { %882 = vmatpush1.bf16.msra.mxu1 %v2213_v37  ;;  %1962 = vmatpush3.bf16.msra.mxu0 %v2216_v40 }
  0xe9   : > { %883 = vmatprep.subr.bf16.mxu1 %v2214_v38  ;;  %1963 = vmatprep.subr.bf16.mxu0 %v2544_v6 }
  0xec   : > { %884 = vmatpush1.bf16.msra.mxu1 %v2217_v41  ;;  %1964 = vmatpush3.bf16.msra.mxu0 %v2220_v43 }
  0xed   : > { %885 = vmatprep.subr.bf16.mxu1 %v2218_v42  ;;  %1965 = vmatprep.subr.bf16.mxu0 %v2544_v6 }
  0xf0   : > { %886 = vmatpush1.bf16.msra.mxu1 %v2221_v44  ;;  %1966 = vmatpush3.bf16.msra.mxu0 %v2222_v45 }
  0xf1   : > { %1971 = vmatprep.subr.bf16.mxu1 %v2544_v6  ;;  %1983 = vmatprep.subr.bf16.mxu0 %v2544_v6 }
 0x15f   : > { %v571_v9 = vpop.xlane.xlu1 %570 }
 0x160   : > { %v575_v11 = vmul.f32 0.0078125, %v571_v9 }
 0x162   : > { %v2913_v13 = vsub.f32 %v2903_v2, %v575_v11 }
 0x163   : > { %v573_v15 = vpop.xlane.xlu1 %572 }
 0x164   : > { %v612_v8 = vpop.xlane.xlu0 %611  ;;  %v576_v18 = vmul.f32 0.0078125, %v573_v15  ;;  %v579_v21 = vmul.f32 %v2913_v13, %v2913_v13 }
 0x165   : > { %v615_v10 = vmul.f32 0.0078125, %v612_v8 }
 0x166   : > { %v2920_v20 = vsub.f32 %v2906_v3, %v576_v18 }
 0x167   : > { %v2910_v12 = vsub.f32 %v566_v0, %v615_v10 }
 0x168   : > { %v614_v14 = vpop.xlane.xlu0 %613  ;;  %v580_v23 = vmul.f32 %v2920_v20, %v2920_v20 }
 0x169   : > { %v616_v16 = vmul.f32 0.0078125, %v614_v14  ;;  %v619_v17 = vmul.f32 %v2910_v12, %v2910_v12 }
 0x16b   : > { %v2917_v19 = vsub.f32 %v567_v1, %v616_v16  ;;  %621 = vadd.xlane.f32.xlu0 %v619_v17 }
 0x16d   : > { %v620_v22 = vmul.f32 %v2917_v19, %v2917_v19 }
 0x16f   : > { %623 = vadd.xlane.f32.xlu1 %v620_v22  ;;  %581 = vadd.xlane.f32.xlu0 %v579_v21  ;;  %v779_v22 = vld [vmem:[#allocation6] sm:$0x3] }
 0x173   : > { %583 = vadd.xlane.f32.xlu1 %v580_v23 }
 0x1f8   : > { %v622_v46 = vpop.xlane.xlu0 %621 }
 0x1f9   : > { %v625_v47 = vmul.f32 0.0078125, %v622_v46 }
 0x1fb   : > { %v627_v48 = vadd.f32 1e-05, %v625_v47 }
 0x1fc   : > { %v582_v49 = vpop.xlane.xlu0 %581  ;;  %v624_v50 = vpop.xlane.xlu1 %623 }
 0x1fd   : > { %2231 = vrsqrt.f32 %v627_v48  ;;  %v585_v51 = vmul.f32 0.0078125, %v582_v49  ;;  %v626_v52 = vmul.f32 0.0078125, %v624_v50 }
 0x1ff   : > { %v587_v53 = vadd.f32 1e-05, %v585_v51  ;;  %v628_v54 = vadd.f32 1e-05, %v626_v52 }
 0x200   : > { %v584_v55 = vpop.xlane.xlu1 %583 }
 0x201   : > { %2233 = vrsqrt.f32 %v587_v53  ;;  %v586_v56 = vmul.f32 0.0078125, %v584_v55 }
 0x202   : > { %2235 = vrsqrt.f32 %v628_v54 }
 0x203   : > { %v588_v57 = vadd.f32 1e-05, %v586_v56 }
 0x205   : > { %2237 = vrsqrt.f32 %v588_v57 }
 0x207   : > { %v2232_v58 = vpop.eup %2231 }
 0x208   : > { %v631_v59 = vmul.f32 %v2232_v58, %v2910_v12 }
 0x20a   : > { %v639_v1 = vmul.f32 %v1861_v60, %v631_v59 }
 0x20b   : > { %v2234_v61 = vpop.eup %2233 }
 0x20c   : > { %v2236_v62 = vpop.eup %2235  ;;  %v591_v63 = vmul.f32 %v2234_v61, %v2913_v13  ;;  %v647_v11 = vadd.f32 %v1862_v5, %v639_v1  ;;  %v1860_v13 = vld [vmem:[%s3114_s12] ss:$0 sm:$0xff] }
 0x20d   : > { %v632_v0 = vmul.f32 %v2236_v62, %v2917_v19  ;;  %v781_v19 = vlaneseq }
 0x20e   : > { %v599_v10 = vmul.f32 %v1859_v4, %v591_v63  ;;  %v2223_v63 = vld [vmem:[#allocation10] sm:$0xff]  }
 0x20f   : > { %v2238_v7 = vpop.eup %2237  ;;  %v640_v8 = vmul.f32 %v1861_v60, %v632_v0 }
 0x210   : > { %v592_v9 = vmul.f32 %v2238_v7, %v2920_v20  ;;  %v607_v16 = vadd.f32 %v1860_v13, %v599_v10  ;;  %v782_v20 = vshrl.u32 %v781_v19, 7 }
 0x211   : > { %v648_v12 = vadd.f32 %v1862_v5, %v640_v8 }
 0x212   : > { %v600_v14 = vmul.f32 %v1859_v4, %v592_v9  ;;  %v783_v21 = vsub.s32 0, %v782_v20  ;;  %v787_v23 = vsub.s32 1, %v782_v20 }
 0x213   : > { %v778_v15 = vpack.c.bf16 %v648_v12, %v647_v11 }
 0x214   : > { %v608_v17 = vadd.f32 %v1860_v13, %v600_v14  ;;  %v784_v24 = vrot.slane %v779_v22, %v783_v21  ;;  %v788_v26 = vrot.slane %v779_v22, %v787_v23 }
 0x215   : > { %904 = vmatmul.mubr.bf16.vlgmr.msra.gmra.mrb[0].mxu1 %v778_v15 }
 0x216   : > { %v665_v18 = vpack.c.bf16 %v608_v17, %v607_v16  ;;  %1973 = vmatprep.mubr.msk.bf16.mxu1 %vm2546_vm0, %v2544_v6  ;;  %v2224_v16 = vld [vmem:[#allocation10 + $0x8] sm:$0xff]  }
 0x218   : > { %1968 = vmatmul.mubr.bf16.vlgmr.msra.gmra.mrb[0].mxu0 %v665_v18 }
 0x219   : > { %1987 = vmatprep.mubr.msk.bf16.mxu0 %vm2546_vm0, %v2544_v6  ;;  %1984 = vmatpush3.bf16.msra.mxu0 %v2223_v63 }
 0x21a   : > { %1985 = vmatprep.subr.bf16.mxu0 %v2544_v6 }
 0x21d   : > { %1986 = vmatpush3.bf16.msra.mxu0 %v2224_v16 }
 0x21e   : > { %1997 = vmatprep.subr.bf16.mxu0 %v2544_v6 }
 0x2e8   : > { %v905_v25 = vpop.f32.mrb[0].mxu1 }
 0x2e9   : > { %v907_v27 = vpop.f32.mrb[1].mxu1  ;;  %v906_v29 = vadd.f32 %v905_v25, %v784_v24 }
 0x2ea   : > { %v909_v28 = vpop.f32.mrb[2].mxu1  ;;  %v908_v34 = vadd.f32 %v907_v27, %v788_v26 }
 0x2eb   : > { %v910_v30 = vadd.f32 %v909_v28, %v784_v24  ;;  %v911_v31 = vpop.f32.mrb[3].mxu1  ;;  %v755_v33 = vpop.f32.mrb[0].mxu0 }
 0x2ec   : > { %v912_v35 = vadd.f32 %v911_v31, %v788_v26  ;;  %v1969_v36 = vpop.f32.mrb[1].mxu0  ;;  %v756_v40 = vadd.f32 %v1863_v32, %v755_v33 }
 0x2ed   : > { %v2959_v37 = vpack.c.bf16 %v910_v30, %v906_v29  ;;  %v758_v38 = vpop.f32.mrb[2].mxu0 }
 0x2ee   : > { %v2961_v39 = vpack.c.bf16 %v912_v35, %v908_v34  ;;  %v759_v41 = vadd.f32 %v1863_v32, %v758_v38  ;;  %v1970_v42 = vpop.f32.mrb[3].mxu0 }
 0x2ef   : > { %v946_v43 = vsel %vm941_vm1, %v2959_v37, 0 }
 0x2f0   : > { %v2965_v44 = vpack.c.bf16 %v759_v41, %v756_v40  ;;  %1972 = vmatpush3.bf16.xpose.msra.mxu1 %v946_v43 }
 0x2f1   : > { %1977 = vmatprep.subr.bf16.mxu1 %v2544_v6 }
 0x2f7   : > { %1974 = vmatmul.mubr.msk.bf16.vlgmr.msra.gmra.mrb[4].mxu1 %vm941_vm1, %v2965_v44 }
 0x2f8   : > { %1978 = vmatpush3.bf16.msra.mxu1 %v2961_v39  ;;  %1979 = vmatprep.mubr.msk.bf16.mxu1 %vm2546_vm0, %v2544_v6 }
 0x2f9   : > { %1991 = vmatprep.subr.bf16.mxu1 %v2544_v6 }
 0x3ca   : > { %v982_v45 = vpop.f32.mrb[4].mxu1 }
 0x3cb   : > { %v989_v46 = vmul.f32 0.17677669, %v982_v45  ;;  %v1975_v47 = vpop.f32.mrb[5].mxu1 }
 0x3cc   : > { %v985_v48 = vpop.f32.mrb[6].mxu1 }
 0x3cd   : > { %v990_v49 = vmul.f32 0.17677669, %v985_v48  ;;  %v1976_v50 = vpop.f32.mrb[7].mxu1  ;;  %v992_v51 = vsel %vm991_vm2, %v989_v46, -inf }
 0x3ce   : > { %993 = vmax.xlane.f32.xlu0 %v992_v51 }
 0x3cf   : > { %v995_v52 = vsel %vm991_vm2, %v990_v49, -inf }
 0x3d0   : > { %996 = vmax.xlane.f32.xlu1 %v995_v52 }
 0x45b   : > { %v994_v53 = vpop.xlane.xlu0 %993 }
 0x45c   : > { %v998_v54 = vsub.f32 %v989_v46, %v994_v53 }
 0x45d   : > { %v997_v55 = vpop.xlane.xlu1 %996 }
 0x45e   : > { %v1000_v56 = vmul.f32 1.442695, %v998_v54  ;;  %v999_v57 = vsub.f32 %v990_v49, %v997_v55 }
 0x460   : > { %2239 = vpow2.f32 %v1000_v56  ;;  %v1002_v58 = vmul.f32 1.442695, %v999_v57 }
 0x462   : > { %2241 = vpow2.f32 %v1002_v58 }
 0x46a   : > { %v2240_v59 = vpop.eup %2239 }
 0x46b   : > { %v1004_v60 = vsel %vm991_vm2, %v2240_v59, 0.0 }
 0x46c   : > { %v2242_v61 = vpop.eup %2241  ;;  %1005 = vadd.xlane.f32.xlu0 %v1004_v60 }
 0x46d   : > { %v1007_v62 = vsel %vm991_vm2, %v2242_v61, 0.0 }
 0x46e   : > { %1008 = vadd.xlane.f32.xlu1 %v1007_v62 }
 0x47f   : > { %1120 = vrot.lane.b32.xlu1 %v2965_v44, %s2547_s21 }
 0x482   : > { %1123 = vrot.lane.b32.xlu0 %v2959_v37, %s2547_s21 }
 0x483   : > { %1306 = vrot.lane.b32.xlu1 %v2959_v37, %s2548_s4 }
 0x487   : > { %1304 = vrot.lane.b32.xlu1 %v2965_v44, %s2548_s4 }
 0x4f9   : > { %v1006_v0 = vpop.xlane.xlu0 %1005 }
 0x4fa   : > { %2243 = vrcp.f32 %v1006_v0 }
 0x4fb   : > { %v1009_v1 = vpop.xlane.xlu1 %1008 }
 0x4fc   : > { %2245 = vrcp.f32 %v1009_v1 }
 0x4fd   : > { %v1124_v9 = vpop.permute.xlu0 %1123 }
 0x4fe   : > { %v1129_v12 = vsel %vm941_vm1, %v1124_v9, 0 }
 0x4ff   : > { %v1121_v11 = vpop.permute.xlu1 %1120 }
 0x503   : > { %v1307_v13 = vpop.permute.xlu1 %1306 }
 0x504   : > { %v2244_v4 = vpop.eup %2243  ;;  %v1312_v14 = vsel %vm941_vm1, %v1307_v13, 0 }
 0x505   : > { %v1012_v7 = vmul.f32 %v2244_v4, %v2240_v59 }
 0x506   : > { %v2246_v5 = vpop.eup %2245 }
 0x507   : > { %v1013_v8 = vmul.f32 %v2246_v5, %v2242_v61  ;;  %v1305_v15 = vpop.permute.xlu1 %1304 }
 0x509   : > { %v1014_v10 = vpack.c.bf16 %v1013_v8, %v1012_v7 }
 0x50b   : > { %1980 = vmatmul.mubr.msk.bf16.vlgmr.msra.gmra.mrb[8].mxu1 %vm991_vm2, %v1014_v10 }
 0x50c   : > { %1992 = vmatpush3.bf16.xpose.msra.mxu1 %v1129_v12  ;;  %1993 = vmatprep.mubr.msk.bf16.mxu1 %vm2546_vm0, %v2544_v6 }
 0x50d   : > { %2011 = vmatprep.subr.bf16.mxu1 %v2544_v6 }
 0x513   : > { %1994 = vmatmul.mubr.msk.bf16.vlgmr.msra.gmra.mrb[12].mxu1 %vm941_vm1, %v1121_v11 }
 0x514   : > { %2012 = vmatpush3.bf16.xpose.msra.mxu1 %v1312_v14  ;;  %2013 = vmatprep.mubr.msk.bf16.mxu1 %vm2546_vm0, %v2544_v6 }
 0x515   : > { %2017 = vmatprep.subr.bf16.mxu1 %v2544_v6 }
 0x51b   : > { %2014 = vmatmul.mubr.msk.bf16.vlgmr.msra.gmra.mrb[16].mxu1 %vm941_vm1, %v1305_v15 }
 0x51c   : > { %2019 = vmatprep.mubr.msk.bf16.mxu1 %vm2546_vm0, %v2544_v6 }
 0x5de   : > { %v1053_v17 = vpop.f32.mrb[8].mxu1 }
 0x5df   : > { %v1981_v18 = vpop.f32.mrb[9].mxu1 }
 0x5e0   : > { %v1056_v19 = vpop.f32.mrb[10].mxu1 }
 0x5e1   : > { %v1060_v20 = vpack.c.bf16 %v1056_v19, %v1053_v17  ;;  %v1982_v21 = vpop.f32.mrb[11].mxu1 }
 0x5e3   : > { %1988 = vmatmul.mubr.msk.bf16.vlgmr.msra.gmra.mrb[4].mxu0 %vm941_vm1, %v1060_v20 }
 0x5e4   : > { %1999 = vmatprep.mubr.msk.bf16.mxu0 %vm2546_vm0, %v2544_v6 }
 0x5e6   : > { %v1165_v22 = vpop.f32.mrb[12].mxu1 }
 0x5e7   : > { %v1995_v23 = vpop.f32.mrb[13].mxu1  ;;  %v1172_v34 = vmul.f32 0.17677669, %v1165_v22 }
 0x5e8   : > { %v1168_v24 = vpop.f32.mrb[14].mxu1 }
 0x5e9   : > { %v1996_v25 = vpop.f32.mrb[15].mxu1  ;;  %v1174_v35 = vsel %vm991_vm2, %v1172_v34, -inf  ;;  %v1173_v53 = vmul.f32 0.17677669, %v1168_v24 }
 0x5eb   : > { %v1177_v54 = vsel %vm991_vm2, %v1173_v53, -inf }
 0x5ee   : > { %v1348_v26 = vpop.f32.mrb[16].mxu1 }
 0x5ef   : > { %v1355_v27 = vmul.f32 0.17677669, %v1348_v26  ;;  %v2015_v28 = vpop.f32.mrb[17].mxu1 }
 0x5f0   : > { %v1351_v29 = vpop.f32.mrb[18].mxu1 }
 0x5f1   : > { %v1356_v30 = vmul.f32 0.17677669, %v1351_v29  ;;  %v2016_v31 = vpop.f32.mrb[19].mxu1  ;;  %v1357_v32 = vsel %vm991_vm2, %v1355_v27, -inf  ;;  %v2225_v29 = vld [vmem:[#allocation10 + $0x10] sm:$0xff]  }
 0x5f2   : > { %1358 = vmax.xlane.f32.xlu0 %v1357_v32 }
 0x5f3   : > { %v1360_v33 = vsel %vm991_vm2, %v1356_v30, -inf }
 0x5f4   : > { %1361 = vmax.xlane.f32.xlu1 %v1360_v33 }
 0x605   : > { %1488 = vrot.lane.b32.xlu1 %v2959_v37, %s2549_s3 }
 0x609   : > { %1486 = vrot.lane.b32.xlu1 %v2965_v44, %s2549_s3 }
 0x62d   : > { %1175 = vmax.xlane.f32.xlu1 %v1174_v35 }
 0x63e   : > { %1198 = vrot.lane.b32.xlu1 %v2961_v39, %s2547_s21 }
 0x642   : > { %1562 = vrot.lane.b32.xlu1 %v2961_v39, %s2549_s3 }
 0x67f   : > { %v1359_v36 = vpop.xlane.xlu0 %1358 }
 0x680   : > { %v1363_v38 = vsub.f32 %v1355_v27, %v1359_v36 }
 0x681   : > { %v1362_v40 = vpop.xlane.xlu1 %1361 }
 0x682   : > { %v1365_v41 = vmul.f32 1.442695, %v1363_v38  ;;  %v1364_v42 = vsub.f32 %v1356_v30, %v1362_v40  ;;  %v2226_v30 = vld [vmem:[#allocation10 + $0x18] sm:$0xff]  }
 0x684   : > { %2247 = vpow2.f32 %v1365_v41  ;;  %v1367_v43 = vmul.f32 1.442695, %v1364_v42 }
 0x685   : > { %v1489_v47 = vpop.permute.xlu1 %1488 }
 0x686   : > { %2249 = vpow2.f32 %v1367_v43  ;;  %v1494_v0 = vsel %vm941_vm1, %v1489_v47, 0 }
 0x689   : > { %v1487_v48 = vpop.permute.xlu1 %1486 }
 0x68e   : > { %v2248_v37 = vpop.eup %2247 }
 0x68f   : > { %v1369_v44 = vsel %vm991_vm2, %v2248_v37, 0.0 }
 0x690   : > { %v2250_v45 = vpop.eup %2249  ;;  %1370 = vadd.xlane.f32.xlu0 %v1369_v44 }
 0x691   : > { %v1372_v46 = vsel %vm991_vm2, %v2250_v45, 0.0 }
 0x694   : > { %1373 = vadd.xlane.f32.xlu0 %v1372_v46 }
 0x6aa   : > { %1380 = vrot.lane.b32.xlu0 %v2961_v39, %s2548_s4 }
 0x6ba   : > { %v1176_v49 = vpop.xlane.xlu1 %1175 }
 0x6bb   : > { %v1180_v50 = vsub.f32 %v1172_v34, %v1176_v49 }
 0x6bd   : > { %v1182_v51 = vmul.f32 1.442695, %v1180_v50 }
 0x6be   : > { %v1199_v52 = vpop.permute.xlu1 %1198 }
 0x6bf   : > { %2251 = vpow2.f32 %v1182_v51  ;;  %1998 = vmatpush3.bf16.msra.mxu0 %v1199_v52 }
 0x6c0   : > { %2003 = vmatprep.subr.bf16.mxu0 %v2544_v6 }
 0x6c2   : > { %v1563_v49 = vpop.permute.xlu1 %1562 }
 0x6c9   : > { %v2252_v55 = vpop.eup %2251  ;;  %1178 = vmax.xlane.f32.xlu0 %v1177_v54 }
 0x6ca   : > { %v1186_v56 = vsel %vm991_vm2, %v2252_v55, 0.0 }
 0x6cd   : > { %1187 = vadd.xlane.f32.xlu0 %v1186_v56  ;;  %v2229_v56 = vld [vmem:[#allocation10 + $0x30] sm:$0xff]  }
 0x71d   : > { %v1371_v57 = vpop.xlane.xlu0 %1370 }
 0x71e   : > { %2253 = vrcp.f32 %v1371_v57 }
 0x721   : > { %v1374_v39 = vpop.xlane.xlu0 %1373 }
 0x722   : > { %2255 = vrcp.f32 %v1374_v39  ;;  %v2230_v39 = vld [vmem:[#allocation10 + $0x38] sm:$0xff]  }
 0x725   : > { %v1381_v58 = vpop.permute.xlu0 %1380 }
 0x726   : > { %2018 = vmatpush3.bf16.msra.mxu1 %v1381_v58 }
 0x727   : > { %2031 = vmatprep.subr.bf16.mxu1 %v2544_v6 }
 0x728   : > { %v2254_v59 = vpop.eup %2253 }
 0x729   : > { %v1377_v61 = vmul.f32 %v2254_v59, %v2248_v37 }
 0x72c   : > { %v2256_v60 = vpop.eup %2255 }
 0x72d   : > { %v1378_v62 = vmul.f32 %v2256_v60, %v2250_v45  ;;  %v2227_v45 = vld [vmem:[#allocation10 + $0x20] sm:$0xff]  }
 0x72f   : > { %v1379_v63 = vpack.c.bf16 %v1378_v62, %v1377_v61 }
 0x731   : > { %2020 = vmatmul.mubr.msk.bf16.vlgmr.msra.gmra.mrb[20].mxu1 %vm991_vm2, %v1379_v63  ;;  %v1888_v63 = vld [vmem:[#allocation12] ss:$0 sm:$0xff] }
 0x732   : > { %2032 = vmatpush3.bf16.xpose.msra.mxu1 %v1494_v0  ;;  %2033 = vmatprep.mubr.msk.bf16.mxu1 %vm2546_vm0, %v2544_v6  ;;  %v937_v0 = vadd.f32 %v1888_v63, %v2903_v2 }
 0x739   : > { %2034 = vmatmul.mubr.msk.bf16.vlgmr.msra.gmra.mrb[24].mxu1 %vm941_vm1, %v1487_v48  ;;  %v2228_v48 = vld [vmem:[#allocation10 + $0x28] sm:$0xff]  }
 0x756   : > { %v1179_v1 = vpop.xlane.xlu0 %1178 }
 0x757   : > { %v1181_v4 = vsub.f32 %v1173_v53, %v1179_v1  ;;  %v938_v1 = vadd.f32 %v1888_v63, %v2906_v3 }
 0x759   : > { %v1184_v5 = vmul.f32 1.442695, %v1181_v4 }
 0x75a   : > { %v1188_v9 = vpop.xlane.xlu0 %1187 }
 0x75b   : > { %2257 = vpow2.f32 %v1184_v5 }
 0x75c   : > { %2259 = vrcp.f32 %v1188_v9 }
 0x765   : > { %v2258_v7 = vpop.eup %2257 }
 0x766   : > { %v1189_v8 = vsel %vm991_vm2, %v2258_v7, 0.0  ;;  %v2260_v11 = vpop.eup %2259 }
 0x767   : > { %1190 = vadd.xlane.f32.xlu0 %v1189_v8  ;;  %v1194_v13 = vmul.f32 %v2260_v11, %v2252_v55 }
 0x7f4   : > { %v1191_v10 = vpop.xlane.xlu0 %1190 }
 0x7f5   : > { %2261 = vrcp.f32 %v1191_v10 }
 0x7ff   : > { %v2262_v12 = vpop.eup %2261 }
 0x800   : > { %v1195_v14 = vmul.f32 %v2262_v12, %v2258_v7 }
 0x802   : > { %v1196_v15 = vpack.c.bf16 %v1195_v14, %v1194_v13 }
 0x804   : > { %2000 = vmatmul.mubr.msk.bf16.vlgmr.msra.gmra.mrb[8].mxu0 %vm991_vm2, %v1196_v15  ;;  %v1420_v16 = vpop.f32.mrb[20].mxu1 }
 0x805   : > { %v2021_v17 = vpop.f32.mrb[21].mxu1  ;;  %2007 = vmatprep.mubr.msk.bf16.mxu0 %vm2546_vm0, %v2544_v6  ;;  %2004 = vmatpush3.bf16.msra.mxu0 %v2225_v29 }
 0x806   : > { %v1423_v18 = vpop.f32.mrb[22].mxu1  ;;  %2005 = vmatprep.subr.bf16.mxu0 %v2544_v6 }
 0x807   : > { %v1427_v19 = vpack.c.bf16 %v1423_v18, %v1420_v16  ;;  %v2022_v20 = vpop.f32.mrb[23].mxu1 }
 0x809   : > { %2006 = vmatpush3.bf16.msra.mxu0 %v2226_v30 }
 0x80a   : > { %2023 = vmatprep.subr.bf16.mxu0 %v2544_v6 }
 0x80c   : > { %v1530_v21 = vpop.f32.mrb[24].mxu1 }
 0x80d   : > { %v1537_v22 = vmul.f32 0.17677669, %v1530_v21  ;;  %v2035_v23 = vpop.f32.mrb[25].mxu1 }
 0x80e   : > { %v1533_v24 = vpop.f32.mrb[26].mxu1 }
 0x80f   : > { %v1538_v25 = vmul.f32 0.17677669, %v1533_v24  ;;  %v2036_v26 = vpop.f32.mrb[27].mxu1  ;;  %v1539_v27 = vsel %vm991_vm2, %v1537_v22, -inf }
 0x810   : > { %1540 = vmax.xlane.f32.xlu0 %v1539_v27 }
 0x811   : > { %v1542_v28 = vsel %vm991_vm2, %v1538_v25, -inf }
 0x814   : > { %1543 = vmax.xlane.f32.xlu0 %v1542_v28 }
 0x89d   : > { %v1541_v31 = vpop.xlane.xlu0 %1540 }
 0x89e   : > { %v1545_v32 = vsub.f32 %v1537_v22, %v1541_v31 }
 0x8a0   : > { %v1547_v33 = vmul.f32 1.442695, %v1545_v32 }
 0x8a1   : > { %v1544_v34 = vpop.xlane.xlu0 %1543 }
 0x8a2   : > { %2263 = vpow2.f32 %v1547_v33  ;;  %v1546_v35 = vsub.f32 %v1538_v25, %v1544_v34 }
 0x8a4   : > { %v1549_v36 = vmul.f32 1.442695, %v1546_v35 }
 0x8a6   : > { %2265 = vpow2.f32 %v1549_v36 }
 0x8ac   : > { %v2264_v38 = vpop.eup %2263 }
 0x8ad   : > { %v1551_v40 = vsel %vm991_vm2, %v2264_v38, 0.0 }
 0x8ae   : > { %1552 = vadd.xlane.f32.xlu0 %v1551_v40 }
 0x8b0   : > { %v2266_v41 = vpop.eup %2265 }
 0x8b1   : > { %v1554_v42 = vsel %vm991_vm2, %v2266_v41, 0.0 }
 0x8b2   : > { %1555 = vadd.xlane.f32.xlu0 %v1554_v42 }
 0x8d7   : > { %v1238_v43 = vpop.f32.mrb[8].mxu0 }
 0x8d8   : > { %v2001_v37 = vpop.f32.mrb[9].mxu0 }
 0x8d9   : > { %v1241_v44 = vpop.f32.mrb[10].mxu0 }
 0x8da   : > { %v1245_v46 = vpack.c.bf16 %v1241_v44, %v1238_v43  ;;  %v2002_v47 = vpop.f32.mrb[11].mxu0 }
 0x8dc   : > { %2008 = vmatmul.mubr.msk.bf16.vlgmr.msra.gmra.mrb[4].mxu0 %vm941_vm1, %v1245_v46 }
 0x8dd   : > { %2024 = vmatpush3.bf16.msra.mxu0 %v2227_v45  ;;  %2027 = vmatprep.mubr.msk.bf16.mxu0 %vm2546_vm0, %v2544_v6 }
 0x8de   : > { %2025 = vmatprep.subr.bf16.mxu0 %v2544_v6 }
 0x8e1   : > { %2026 = vmatpush3.bf16.msra.mxu0 %v2228_v48 }
 0x8e2   : > { %2037 = vmatprep.subr.bf16.mxu0 %v2544_v6 }
 0x8e8   : > { %2028 = vmatmul.mubr.msk.bf16.vlgmr.msra.gmra.mrb[4].mxu0 %vm941_vm1, %v1427_v19 }
 0x8e9   : > { %2038 = vmatpush3.bf16.msra.mxu0 %v1563_v49  ;;  %2039 = vmatprep.mubr.msk.bf16.mxu0 %vm2546_vm0, %v2544_v6 }
 0x8ea   : > { %2043 = vmatprep.subr.bf16.mxu0 %v2544_v6 }
 0x93b   : > { %v1553_v50 = vpop.xlane.xlu0 %1552 }
 0x93c   : > { %2267 = vrcp.f32 %v1553_v50 }
 0x93f   : > { %v1556_v51 = vpop.xlane.xlu0 %1555 }
 0x940   : > { %2269 = vrcp.f32 %v1556_v51 }
 0x946   : > { %v2268_v52 = vpop.eup %2267 }
 0x947   : > { %v1559_v54 = vmul.f32 %v2268_v52, %v2264_v38 }
 0x94a   : > { %v2270_v53 = vpop.eup %2269 }
 0x94b   : > { %v1560_v55 = vmul.f32 %v2270_v53, %v2266_v41 }
 0x94d   : > { %v1561_v57 = vpack.c.bf16 %v1560_v55, %v1559_v54 }
 0x94f   : > { %2040 = vmatmul.mubr.msk.bf16.vlgmr.msra.gmra.mrb[12].mxu0 %vm991_vm2, %v1561_v57 }
 0x950   : > { %2044 = vmatpush3.bf16.msra.mxu0 %v2229_v56  ;;  %2047 = vmatprep.mubr.msk.bf16.mxu0 %vm2546_vm0, %v2544_v6 }
 0x951   : > { %2045 = vmatprep.subr.bf16.mxu0 %v2544_v6 }
 0x954   : > { %2046 = vmatpush3.bf16.msra.mxu0 %v2230_v39 }
 0xa22   : > { %v1602_v58 = vpop.f32.mrb[12].mxu0 }
 0xa23   : > { %v2041_v59 = vpop.f32.mrb[13].mxu0 }
 0xa24   : > { %v1605_v60 = vpop.f32.mrb[14].mxu0 }
 0xa25   : > { %v1609_v61 = vpack.c.bf16 %v1605_v60, %v1602_v58  ;;  %v2042_v62 = vpop.f32.mrb[15].mxu0 }
 0xa27   : > { %2048 = vmatmul.mubr.msk.bf16.vlgmr.msra.gmra.mrb[4].mxu0 %vm941_vm1, %v1609_v61 }
 0xafa   : > { %v1659_v6 = vpop.f32.mrb[4].mxu0 }
 0xafb   : > { %v2051_v4 = vadd.f32 %v1659_v6, %v937_v0  ;;  %v2049_v5 = vpop.f32.mrb[5].mxu0 }
 0xafc   : > { %v1662_v7 = vpop.f32.mrb[6].mxu0 }
 0xafd   : > { %1668 = vst [vmem:[%s561_s5] sm:$0xff] %v2051_v4  ;;  %v2052_v8 = vadd.f32 %v1662_v7, %v938_v1  ;;  %v2050_v9 = vpop.f32.mrb[7].mxu0 }
 0xaff   : > { %1669 = vst [vmem:[%s561_s5 + $0x8] sm:$0xff] %v2052_v8 }
 0xb00 PF: > { %s28_s26 = sadd.s32 1, %s2531_s26   ;;  %s3116_s21 = smov %s2515_s22 }
 0xb01   : > { %p25_p12 = scmp.ge.s32.totalorder %s28_s26, 4   ;;  %s3117_s22 = smov %s2519_s23 }
 0xb02   : > { %s3118_s23 = smov %s2827_s27  ;;  %s3119_s24 = smov %s2527_s25 }
 0xb03   : > { %s3120_s25 = smov %s3122_s30  ;;  %27 = sbr.rel (!%p25_p12) target bundleno = 14 (0xe), region = 135 }
 0xb0a   :  { %1700 = vsyncpa [#allocation3], 1 }
 0xb0b   :  { %1702 = vsyncpa [#allocation3 + $0x1], 1 }
 0xb0c   :  { %1703 = vsyncpa [#allocation5], 1 }
 0xb0d   :  { %1704 = vsyncpa [#allocation8], 1 }
 0xb0e   :  { %1705 = vsyncpa [#allocation11], 1 }

// kernel: decoder_forward.8
= control target key start
LH: loop header
LB: loop body
LE: loop exit
PB: predicated region body
PF: predicated region fallthrough
CT: control target
= control target key end

     0   :  { %v1517_v50 = vmov 0   ;;  %s2188_s0 = inlined_call_operand.vmem [shape: f32[32,128], index: 0, kind: input, shape index: {}]   ;;  %s2189_s3 = inlined_call_operand.vmem [shape: bf16[128,512], index: 3, kind: input, shape index: {}]   ;;  %s2190_s1 = inlined_call_operand.vmem [shape: f32[1,128], index: 1, kind: input, shape index: {}]   ;;  %s2191_s2 = inlined_call_operand.vmem [shape: f32[1,128], index: 2, kind: input, shape index: {}]   ;;  %s2192_s5 = inlined_call_operand.vmem [shape: bf16[512,128], index: 5, kind: input, shape index: {}]   ;;  %s2193_s4 = inlined_call_operand.vmem [shape: f32[1,512], index: 4, kind: input, shape index: {}]   ;;  %s2194_s6 = inlined_call_operand.vmem [shape: f32[1,128], index: 6, kind: input, shape index: {}]   ;;  %s2195_s7 = inlined_call_operand.vmem [shape: f32[32,128], index: 7, kind: output, shape index: {}]  }
   0x1   :  { %v27_v0 = vld [vmem:[%s2188_s0] sm:$0xff]  ;;  %v29_v1 = vld [vmem:[%s2188_s0 + $0x10] sm:$0xff]  ;;  %v28_v2 = vld [vmem:[%s2188_s0 + $0x8] sm:$0xff]  ;;  %411 = vmatprep.mubr.bf16.mxu0 %v1517_v50  ;;  %464 = vmatprep.mubr.bf16.mxu1 %v1517_v50 }
   0x2   :  { %131 = vadd.xlane.f32.xlu0 %v27_v0  ;;  %135 = vadd.xlane.f32.xlu1 %v29_v1  ;;  %v30_v3 = vld [vmem:[%s2188_s0 + $0x18] sm:$0xff]  ;;  %v1361_v4 = vld [vmem:[%s2189_s3 + $0x4] ss:$16 sps:$4 sm:$0xff]   ;;  %v1365_v6 = vld [vmem:[%s2189_s3] ss:$16 sps:$4 sm:$0xff]  }
   0x3   :  { %v1363_v5 = vld [vmem:[%s2189_s3 + $0xc] ss:$16 sps:$4 sm:$0xff]   ;;  %379 = vmatprep.subr.bf16.mxu0 %v1361_v4  ;;  %v1366_v7 = vld [vmem:[%s2189_s3 + $0x8] ss:$16 sps:$4 sm:$0xff]   ;;  %v1367_v8 = vld [vmem:[%s2189_s3 + $0x24] ss:$16 sps:$4 sm:$0xff]  }
   0x4   :  { %432 = vmatprep.subr.bf16.mxu1 %v1363_v5  ;;  %380 = vmatpush1.bf16.msra.mxu0 %v1365_v6  ;;  %v1369_v9 = vld [vmem:[%s2189_s3 + $0x2c] ss:$16 sps:$4 sm:$0xff]   ;;  %v1371_v26 = vld [vmem:[%s2189_s3 + $0x20] ss:$16 sps:$4 sm:$0xff]   ;;  %v1372_v27 = vld [vmem:[%s2189_s3 + $0x28] ss:$16 sps:$4 sm:$0xff]  }
   0x5   :  { %433 = vmatpush1.bf16.msra.mxu1 %v1366_v7  ;;  %381 = vmatprep.subr.bf16.mxu0 %v1367_v8  ;;  %v1373_v28 = vld [vmem:[%s2189_s3 + $0x44] ss:$16 sps:$4 sm:$0xff]   ;;  %v1375_v29 = vld [vmem:[%s2189_s3 + $0x4c] ss:$16 sps:$4 sm:$0xff]   ;;  %v1377_v30 = vld [vmem:[%s2189_s3 + $0x40] ss:$16 sps:$4 sm:$0xff]  }
   0x6   :  { %133 = vadd.xlane.f32.xlu0 %v28_v2  ;;  %137 = vadd.xlane.f32.xlu1 %v30_v3  ;;  %v1378_v31 = vld [vmem:[%s2189_s3 + $0x48] ss:$16 sps:$4 sm:$0xff]   ;;  %v1379_v32 = vld [vmem:[%s2189_s3 + $0x64] ss:$16 sps:$4 sm:$0xff]   ;;  %v1381_v33 = vld [vmem:[%s2189_s3 + $0x6c] ss:$16 sps:$4 sm:$0xff]  }
   0x7   :  { %434 = vmatprep.subr.bf16.mxu1 %v1369_v9  ;;  %v1383_v34 = vld [vmem:[%s2189_s3 + $0x60] ss:$16 sps:$4 sm:$0xff]   ;;  %v1384_v35 = vld [vmem:[%s2189_s3 + $0x68] ss:$16 sps:$4 sm:$0xff]   ;;  %v1385_v36 = vld [vmem:[%s2189_s3 + $0x84] ss:$16 sps:$4 sm:$0xff]  }
   0x8   :  { %382 = vmatpush1.bf16.msra.mxu0 %v1371_v26  ;;  %v1387_v37 = vld [vmem:[%s2189_s3 + $0x8c] ss:$16 sps:$4 sm:$0xff]   ;;  %v1389_v38 = vld [vmem:[%s2189_s3 + $0x80] ss:$16 sps:$4 sm:$0xff]   ;;  %v1390_v39 = vld [vmem:[%s2189_s3 + $0x88] ss:$16 sps:$4 sm:$0xff]  }
   0x9   :  { %435 = vmatpush1.bf16.msra.mxu1 %v1372_v27  ;;  %383 = vmatprep.subr.bf16.mxu0 %v1373_v28  ;;  %v1391_v40 = vld [vmem:[%s2189_s3 + $0xa4] ss:$16 sps:$4 sm:$0xff]   ;;  %v1393_v41 = vld [vmem:[%s2189_s3 + $0xac] ss:$16 sps:$4 sm:$0xff]   ;;  %v1395_v42 = vld [vmem:[%s2189_s3 + $0xa0] ss:$16 sps:$4 sm:$0xff]  }
   0xa   :  { %436 = vmatprep.subr.bf16.mxu1 %v1375_v29  ;;  %v1396_v43 = vld [vmem:[%s2189_s3 + $0xa8] ss:$16 sps:$4 sm:$0xff]   ;;  %v1397_v44 = vld [vmem:[%s2189_s3 + $0xc4] ss:$16 sps:$4 sm:$0xff]   ;;  %v1399_v45 = vld [vmem:[%s2189_s3 + $0xcc] ss:$16 sps:$4 sm:$0xff]  }
   0xb   :  { %v1401_v46 = vld [vmem:[%s2189_s3 + $0xc0] ss:$16 sps:$4 sm:$0xff]   ;;  %v1402_v47 = vld [vmem:[%s2189_s3 + $0xc8] ss:$16 sps:$4 sm:$0xff]   ;;  %v1403_v48 = vld [vmem:[%s2189_s3 + $0xe4] ss:$16 sps:$4 sm:$0xff]  }
   0xc   :  { %384 = vmatpush1.bf16.msra.mxu0 %v1377_v30  ;;  %v1405_v49 = vld [vmem:[%s2189_s3 + $0xec] ss:$16 sps:$4 sm:$0xff]   ;;  %v1407_v51 = vld [vmem:[%s2189_s3 + $0xe0] ss:$16 sps:$4 sm:$0xff]   ;;  %v1408_v52 = vld [vmem:[%s2189_s3 + $0xe8] ss:$16 sps:$4 sm:$0xff]  }
   0xd   :  { %437 = vmatpush1.bf16.msra.mxu1 %v1378_v31  ;;  %385 = vmatprep.subr.bf16.mxu0 %v1379_v32  ;;  %v1238_v8 = vld [vmem:[%s2191_s2] ss:$0 sm:$0xff]  ;;  %v1414_v26 = vld [vmem:[%s2192_s5 + $0xc8] sm:$0xff]   ;;  %v1417_v29 = vld [vmem:[%s2192_s5 + $0x50] sm:$0xff]  }
   0xe   :  { %438 = vmatprep.subr.bf16.mxu1 %v1381_v33  ;;  %v1415_v27 = vld [vmem:[%s2192_s5 + $0x8] sm:$0xff]   ;;  %v1418_v30 = vld [vmem:[%s2192_s5 + $0xd0] sm:$0xff]   ;;  %v1421_v33 = vld [vmem:[%s2192_s5 + $0x58] sm:$0xff]  }
   0xf   :  { %v1416_v28 = vld [vmem:[%s2192_s5 + $0x88] sm:$0xff]   ;;  %v1419_v31 = vld [vmem:[%s2192_s5 + $0x10] sm:$0xff]  }
  0x10   :  { %386 = vmatpush1.bf16.msra.mxu0 %v1383_v34  ;;  %v1420_v32 = vld [vmem:[%s2192_s5 + $0x90] sm:$0xff]   ;;  %v1422_v34 = vld [vmem:[%s2192_s5 + $0xd8] sm:$0xff]  }
  0x11   :  { %439 = vmatpush1.bf16.msra.mxu1 %v1384_v35  ;;  %387 = vmatprep.subr.bf16.mxu0 %v1385_v36  ;;  %v1423_v35 = vld [vmem:[%s2192_s5 + $0x18] sm:$0xff]  }
  0x12   :  { %440 = vmatprep.subr.bf16.mxu1 %v1387_v37  ;;  %v1424_v36 = vld [vmem:[%s2192_s5 + $0x98] sm:$0xff]   ;;  %v1425_v37 = vld [vmem:[%s2192_s5 + $0x60] sm:$0xff]  }
  0x14   :  { %388 = vmatpush1.bf16.msra.mxu0 %v1389_v38  ;;  %v1426_v38 = vld [vmem:[%s2192_s5 + $0xe0] sm:$0xff]  }
  0x15   :  { %441 = vmatpush1.bf16.msra.mxu1 %v1390_v39  ;;  %389 = vmatprep.subr.bf16.mxu0 %v1391_v40  ;;  %v1427_v39 = vld [vmem:[%s2192_s5 + $0x20] sm:$0xff]  }
  0x16   :  { %442 = vmatprep.subr.bf16.mxu1 %v1393_v41  ;;  %v1428_v40 = vld [vmem:[%s2192_s5 + $0xa0] sm:$0xff]   ;;  %v1429_v41 = vld [vmem:[%s2192_s5 + $0x68] sm:$0xff]  }
  0x18   :  { %390 = vmatpush1.bf16.msra.mxu0 %v1395_v42  ;;  %v1430_v42 = vld [vmem:[%s2192_s5 + $0xe8] sm:$0xff]  }
  0x19   :  { %443 = vmatpush1.bf16.msra.mxu1 %v1396_v43  ;;  %391 = vmatprep.subr.bf16.mxu0 %v1397_v44  ;;  %v199_v43 = vlaneseq  ;;  %v1431_v44 = vld [vmem:[%s2192_s5 + $0x28] sm:$0xff]  }
  0x1a   :  { %444 = vmatprep.subr.bf16.mxu1 %v1399_v45  ;;  %v1432_v45 = vld [vmem:[%s2192_s5 + $0xa8] sm:$0xff]  }
  0x1c   :  { %392 = vmatpush1.bf16.msra.mxu0 %v1401_v46  ;;  %v1433_v46 = vld [vmem:[%s2192_s5 + $0x70] sm:$0xff]  }
  0x1d   :  { %445 = vmatpush1.bf16.msra.mxu1 %v1402_v47  ;;  %393 = vmatprep.subr.bf16.mxu0 %v1403_v48  ;;  %v1434_v47 = vld [vmem:[%s2192_s5 + $0xf0] sm:$0xff]   ;;  %v200_v48 = vshrl.u32 %v199_v43, 7 }
  0x1e   :  { %446 = vmatprep.subr.bf16.mxu1 %v1405_v49  ;;  %v1435_v49 = vld [vmem:[%s2192_s5 + $0x30] sm:$0xff]  }
  0x20   :  { %394 = vmatpush1.bf16.msra.mxu0 %v1407_v51  ;;  %v1437_v51 = vld [vmem:[%s2192_s5 + $0x78] sm:$0xff]  }
  0x21   :  { %447 = vmatpush1.bf16.msra.mxu1 %v1408_v52  ;;  %v1438_v52 = vld [vmem:[%s2192_s5 + $0xf8] sm:$0xff]  }
  0x8f   :  { %v132_v10 = vpop.xlane.xlu0 %131  ;;  %v136_v11 = vpop.xlane.xlu1 %135 }
  0x90   :  { %v140_v12 = vmul.f32 0.0078125, %v132_v10  ;;  %v142_v13 = vmul.f32 0.0078125, %v136_v11 }
  0x92   :  { %v1588_v14 = vsub.f32 %v27_v0, %v140_v12  ;;  %v1590_v15 = vsub.f32 %v29_v1, %v142_v13 }
  0x93   :  { %v134_v16 = vpop.xlane.xlu0 %133  ;;  %v138_v17 = vpop.xlane.xlu1 %137 }
  0x94   :  { %v141_v18 = vmul.f32 0.0078125, %v134_v16  ;;  %v148_v19 = vmul.f32 %v1588_v14, %v1588_v14  ;;  %v143_v20 = vmul.f32 0.0078125, %v138_v17  ;;  %v150_v23 = vmul.f32 %v1590_v15, %v1590_v15 }
  0x96   :  { %v1594_v21 = vsub.f32 %v28_v2, %v141_v18  ;;  %152 = vadd.xlane.f32.xlu0 %v148_v19  ;;  %v1596_v22 = vsub.f32 %v30_v3, %v143_v20  ;;  %v1237_v3 = vld [vmem:[%s2190_s1] ss:$0 sm:$0xff] }
  0x98   :  { %v149_v24 = vmul.f32 %v1594_v21, %v1594_v21  ;;  %v151_v25 = vmul.f32 %v1596_v22, %v1596_v22 }
  0x9a   :  { %156 = vadd.xlane.f32.xlu0 %v150_v23  ;;  %154 = vadd.xlane.f32.xlu1 %v149_v24  ;;  %v1409_v23 = vld [vmem:[%s2192_s5 + $0x40] sm:$0xff]  }
  0x9b   :  { %1304 = vmatprep.subr.bf16.mxu0 %v1409_v23  ;;  %v1412_v24 = vld [vmem:[%s2192_s5 + $0x80] sm:$0xff]  }
  0x9e   :  { %158 = vadd.xlane.f32.xlu1 %v151_v25  ;;  %v1413_v25 = vld [vmem:[%s2192_s5 + $0x48] sm:$0xff]  }
 0x123   :  { %v153_v53 = vpop.xlane.xlu0 %152 }
 0x124   :  { %v160_v54 = vmul.f32 0.0078125, %v153_v53  ;;  %v201_v53 = vsub.s32 0, %v200_v48 }
 0x126   :  { %v164_v55 = vadd.f32 1e-05, %v160_v54  ;;  %v1439_v54 = vld [vmem:[%s2192_s5 + $0x38] sm:$0xff]  }
 0x127   :  { %v155_v56 = vpop.xlane.xlu1 %154  ;;  %v157_v57 = vpop.xlane.xlu0 %156 }
 0x128   :  { %1441 = vrsqrt.f32 %v164_v55  ;;  %v161_v58 = vmul.f32 0.0078125, %v155_v56  ;;  %v162_v59 = vmul.f32 0.0078125, %v157_v57  ;;  %v209_v55 = vsub.s32 2, %v200_v48  ;;  %v1440_v56 = vld [vmem:[%s2192_s5 + $0xb8] sm:$0xff]   ;;  %v65_v57 = vld [vmem:[%s2193_s4] sm:$0xf] }
 0x12a   :  { %v165_v60 = vadd.f32 1e-05, %v161_v58  ;;  %v166_v61 = vadd.f32 1e-05, %v162_v59  ;;  %v205_v58 = vsub.s32 1, %v200_v48  ;;  %v213_v59 = vsub.s32 3, %v200_v48 }
 0x12b   :  { %v159_v62 = vpop.xlane.xlu1 %158 }
 0x12c   :  { %1443 = vrsqrt.f32 %v165_v60  ;;  %v163_v63 = vmul.f32 0.0078125, %v159_v62  ;;  %v1791_v60 = vrot.slane %v65_v57, %v201_v53  ;;  %v1795_v62 = vrot.slane %v65_v57, %v205_v58 }
 0x12d   :  { %1445 = vrsqrt.f32 %v166_v61  ;;  %v1793_v61 = vrot.slane %v65_v57, %v209_v55 }
 0x12e   :  { %v167_v0 = vadd.f32 1e-05, %v163_v63  ;;  %v1797_v63 = vrot.slane %v65_v57, %v213_v59 }
 0x130   :  { %1447 = vrsqrt.f32 %v167_v0 }
 0x132   :  { %v1442_v1 = vpop.eup %1441 }
 0x133   :  { %v172_v2 = vmul.f32 %v1442_v1, %v1588_v14 }
 0x135   :  { %v182_v6 = vmul.f32 %v1237_v3, %v172_v2 }
 0x136   :  { %v1444_v4 = vpop.eup %1443 }
 0x137   :  { %v173_v5 = vmul.f32 %v1444_v4, %v1594_v21  ;;  %v1446_v7 = vpop.eup %1445  ;;  %v192_v11 = vadd.f32 %v1238_v8, %v182_v6 }
 0x138   :  { %v174_v13 = vmul.f32 %v1446_v7, %v1590_v15  ;;  %v1410_v15 = vld [vmem:[%s2192_s5 + $0xc0] sm:$0xff]  }
 0x139   :  { %v183_v9 = vmul.f32 %v1237_v3, %v173_v5  ;;  %1332 = vmatprep.subr.bf16.mxu1 %v1410_v15 }
 0x13a   :  { %v1448_v10 = vpop.eup %1447  ;;  %v184_v18 = vmul.f32 %v1237_v3, %v174_v13 }
 0x13b   :  { %v193_v12 = vadd.f32 %v1238_v8, %v183_v9  ;;  %v175_v14 = vmul.f32 %v1448_v10, %v1596_v22  ;;  %v1411_v22 = vld [vmem:[%s2192_s5] sm:$0xff]  }
 0x13c   :  { %v194_v20 = vadd.f32 %v1238_v8, %v184_v18 }
 0x13d   :  { %v196_v16 = vpack.c.bf16 %v193_v12, %v192_v11  ;;  %v185_v17 = vmul.f32 %v1237_v3, %v175_v14 }
 0x13f   :  { %412 = vmatmul.mubr.bf16.vlgmr.msra.gmra.mrb[0].mxu0 %v196_v16  ;;  %465 = vmatmul.mubr.bf16.vlgmr.msra.gmra.mrb[0].mxu1 %v196_v16  ;;  %v195_v19 = vadd.f32 %v1238_v8, %v185_v17 }
 0x140   :  { %421 = vmatprep.mubr.bf16.mxu0 %v1517_v50  ;;  %474 = vmatprep.mubr.bf16.mxu1 %v1517_v50  ;;  %v1436_v50 = vld [vmem:[%s2192_s5 + $0xb0] sm:$0xff]  }
 0x141   :  { %v197_v21 = vpack.c.bf16 %v195_v19, %v194_v20  ;;  %1305 = vmatpush3.bf16.msra.mxu0 %v1411_v22  ;;  %1333 = vmatpush3.bf16.msra.mxu1 %v1412_v24 }
 0x142   :  { %1306 = vmatprep.subr.bf16.mxu0 %v1413_v25  ;;  %1334 = vmatprep.subr.bf16.mxu1 %v1414_v26 }
 0x145   :  { %1307 = vmatpush3.bf16.msra.mxu0 %v1415_v27  ;;  %1335 = vmatpush3.bf16.msra.mxu1 %v1416_v28 }
 0x146   :  { %1308 = vmatprep.subr.bf16.mxu0 %v1417_v29  ;;  %1336 = vmatprep.subr.bf16.mxu1 %v1418_v30 }
 0x147   :  { %422 = vmatmul.mubr.bf16.gmra.mrb[4].mxu0 %v197_v21  ;;  %475 = vmatmul.mubr.bf16.gmra.mrb[4].mxu1 %v197_v21 }
 0x149   :  { %1309 = vmatpush3.bf16.msra.mxu0 %v1419_v31  ;;  %1337 = vmatpush3.bf16.msra.mxu1 %v1420_v32 }
 0x14a   :  { %1310 = vmatprep.subr.bf16.mxu0 %v1421_v33  ;;  %1338 = vmatprep.subr.bf16.mxu1 %v1422_v34 }
 0x14d   :  { %1311 = vmatpush3.bf16.msra.mxu0 %v1423_v35  ;;  %1339 = vmatpush3.bf16.msra.mxu1 %v1424_v36 }
 0x14e   :  { %1312 = vmatprep.subr.bf16.mxu0 %v1425_v37  ;;  %1340 = vmatprep.subr.bf16.mxu1 %v1426_v38 }
 0x151   :  { %1313 = vmatpush3.bf16.msra.mxu0 %v1427_v39  ;;  %1341 = vmatpush3.bf16.msra.mxu1 %v1428_v40 }
 0x152   :  { %1314 = vmatprep.subr.bf16.mxu0 %v1429_v41  ;;  %1342 = vmatprep.subr.bf16.mxu1 %v1430_v42 }
 0x155   :  { %1315 = vmatpush3.bf16.msra.mxu0 %v1431_v44  ;;  %1343 = vmatpush3.bf16.msra.mxu1 %v1432_v45 }
 0x156   :  { %1316 = vmatprep.subr.bf16.mxu0 %v1433_v46  ;;  %1344 = vmatprep.subr.bf16.mxu1 %v1434_v47 }
 0x159   :  { %1317 = vmatpush3.bf16.msra.mxu0 %v1435_v49  ;;  %1345 = vmatpush3.bf16.msra.mxu1 %v1436_v50 }
 0x15a   :  { %1318 = vmatprep.subr.bf16.mxu0 %v1437_v51  ;;  %1346 = vmatprep.subr.bf16.mxu1 %v1438_v52 }
 0x15d   :  { %1319 = vmatpush3.bf16.msra.mxu0 %v1439_v54  ;;  %1347 = vmatpush3.bf16.msra.mxu1 %v1440_v56 }
 0x212   :  { %v413_v0 = vpop.f32.mrb[0].mxu0  ;;  %v466_v1 = vpop.f32.mrb[0].mxu1 }
 0x213   :  { %v1800_v2 = vadd.f32 %v413_v0, %v1791_v60  ;;  %v1803_v3 = vadd.f32 %v466_v1, %v1793_v61  ;;  %v415_v4 = vpop.f32.mrb[1].mxu0  ;;  %v468_v5 = vpop.f32.mrb[1].mxu1 }
 0x214   :  { %v1806_v6 = vadd.f32 %v415_v4, %v1795_v62  ;;  %v1809_v7 = vadd.f32 %v468_v5, %v1797_v63  ;;  %v417_v8 = vpop.f32.mrb[2].mxu0  ;;  %v470_v9 = vpop.f32.mrb[2].mxu1 }
 0x215   :  { %v1812_v10 = vmul.f32 0.70710677, %v1800_v2  ;;  %v1815_v11 = vmul.f32 0.70710677, %v1803_v3  ;;  %v419_v24 = vpop.f32.mrb[3].mxu0  ;;  %v472_v25 = vpop.f32.mrb[3].mxu1  ;;  %v1836_v29 = vadd.f32 %v417_v8, %v1791_v60  ;;  %v1843_v32 = vadd.f32 %v470_v9, %v1793_v61 }
 0x216   :  { %v1818_v12 = vmul.f32 0.70710677, %v1806_v6  ;;  %v1821_v13 = vmul.f32 0.70710677, %v1809_v7  ;;  %v1853_v37 = vadd.f32 %v419_v24, %v1795_v62  ;;  %v1864_v43 = vadd.f32 %v472_v25, %v1797_v63 }
 0x217   :  { %v517_v14 = vand.u32 2147483647, %v1812_v10  ;;  %v519_v16 = vand.u32 2147483647, %v1815_v11  ;;  %v1850_v36 = vmul.f32 0.70710677, %v1836_v29 }
 0x218   :  { %v1826_v17 = vand.u32 2147483647, %v1818_v12  ;;  %v1829_v18 = vand.u32 2147483647, %v1821_v13  ;;  %v1860_v41 = vmul.f32 0.70710677, %v1843_v32 }
 0x219   :  { %v533_v19 = vmul.f32 0.3275911, %v517_v14  ;;  %v535_v20 = vmul.f32 0.3275911, %v519_v16  ;;  %v741_v40 = vsub.f32 0.0, %v517_v14  ;;  %v743_v44 = vsub.f32 0.0, %v519_v16 }
 0x21a   :  { %v534_v21 = vmul.f32 0.3275911, %v1826_v17  ;;  %v536_v22 = vmul.f32 0.3275911, %v1829_v18  ;;  %v423_v26 = vpop.f32.mrb[4].mxu0  ;;  %v1833_v27 = vpop.f32.mrb[4].mxu1 }
 0x21b   :  { %v549_v23 = vadd.f32 1.0, %v533_v19  ;;  %v551_v15 = vadd.f32 1.0, %v535_v20  ;;  %v1838_v30 = vpop.f32.mrb[5].mxu0  ;;  %v1840_v31 = vpop.f32.mrb[5].mxu1  ;;  %v521_v42 = vand.u32 2147483647, %v1850_v36  ;;  %v757_v48 = vmul.f32 %v741_v40, %v517_v14 }
 0x21c   :  { %v550_v28 = vadd.f32 1.0, %v534_v21  ;;  %v1845_v33 = vpop.f32.mrb[6].mxu0  ;;  %v1847_v34 = vpop.f32.mrb[6].mxu1  ;;  %v552_v35 = vadd.f32 1.0, %v536_v22  ;;  %v523_v45 = vand.u32 2147483647, %v1860_v41  ;;  %v759_v53 = vmul.f32 %v743_v44, %v519_v16 }
 0x21d   :  { %1449 = vrcp.f32 %v549_v23  ;;  %v1855_v38 = vpop.f32.mrb[7].mxu0  ;;  %v1857_v39 = vpop.f32.mrb[7].mxu1  ;;  %v1868_v46 = vmul.f32 0.70710677, %v1853_v37  ;;  %v537_v47 = vmul.f32 0.3275911, %v521_v42  ;;  %v1888_v20 = vadd.f32 %v423_v26, %v1791_v60 }
 0x21e   :  { %1451 = vrcp.f32 %v551_v15  ;;  %v539_v49 = vmul.f32 0.3275911, %v523_v45  ;;  %v1872_v52 = vmul.f32 0.70710677, %v1864_v43  ;;  %v745_v57 = vsub.f32 0.0, %v521_v42 }
 0x21f   :  { %1453 = vrcp.f32 %v550_v28  ;;  %v522_v50 = vand.u32 2147483647, %v1868_v46  ;;  %v553_v51 = vadd.f32 1.0, %v537_v47  ;;  %v773_v1 = vmul.f32 1.442695, %v757_v48  ;;  %2198 = vst [vmem:[#allocation2_spill] sm:$0xff] %v1888_v20 }
 0x220   :  { %1455 = vrcp.f32 %v552_v35  ;;  %v555_v54 = vadd.f32 1.0, %v539_v49  ;;  %v1877_v58 = vand.u32 2147483647, %v1872_v52  ;;  %v747_v8 = vsub.f32 0.0, %v523_v45 }
 0x221   :  { %v538_v55 = vmul.f32 0.3275911, %v522_v50  ;;  %1457 = vrcp.f32 %v553_v51  ;;  %v1885_v14 = vmul.f32 0.5, %v1800_v2  ;;  %v777_v19 = vmul.f32 1.442695, %v759_v53 }
 0x222   :  { %1459 = vrcp.f32 %v555_v54  ;;  %v540_v9 = vmul.f32 0.3275911, %v1877_v58  ;;  %v761_v15 = vmul.f32 %v745_v57, %v521_v42  ;;  %v1894_v25 = vmul.f32 0.5, %v1803_v3 }
 0x223   :  { %v554_v4 = vadd.f32 1.0, %v538_v55  ;;  %v742_v2 = vsub.f32 0.0, %v1826_v17  ;;  %v763_v40 = vmul.f32 %v747_v8, %v523_v45  ;;  %v1902_v44 = vmul.f32 0.70710677, %v1888_v20 }
 0x224   :  { %v556_v22 = vadd.f32 1.0, %v540_v9  ;;  %v781_v49 = vmul.f32 1.442695, %v761_v15  ;;  %v746_v51 = vsub.f32 0.0, %v522_v50  ;;  %vm837_vm0 = vcmp.lt.f32.partialorder %v1812_v10, 0.0 }
 0x225   :  { %1461 = vrcp.f32 %v554_v4  ;;  %2199 = vst [vmem:[#allocation3_spill] sm:$0xff] %v1902_v44  ;;  %v1908_v57 = vand.u32 2147483647, %v1902_v44  ;;  %v744_v4 = vsub.f32 0.0, %v1829_v18  ;;  %vm839_vm1 = vcmp.lt.f32.partialorder %v1815_v11, 0.0 }
 0x226   :  { %1463 = vpow2.f32 %v773_v1  ;;  %v758_v1 = vmul.f32 %v742_v2, %v1826_v17  ;;  %v748_v17 = vsub.f32 0.0, %v1877_v58  ;;  %vm841_vm2 = vcmp.lt.f32.partialorder %v1850_v36, 0.0 }
 0x227   :  { %v1874_v56 = vpop.eup %1449  ;;  %1465 = vrcp.f32 %v556_v22  ;;  %v541_v2 = vmul.f32 0.3275911, %v1908_v57  ;;  %vm843_vm3 = vcmp.lt.f32.partialorder %v1860_v41, 0.0  ;;  %v1975_v36 = vadd.f32 %v1838_v30, %v1795_v62 }
 0x228   :  { %v1879_v59 = vpop.eup %1451  ;;  %v597_v0 = vmul.f32 1.0614054, %v1874_v56  ;;  %1467 = vpow2.f32 %v777_v19  ;;  %vm842_vm4 = vcmp.lt.f32.partialorder %v1868_v46, 0.0  ;;  %vm838_vm5 = vcmp.lt.f32.partialorder %v1818_v12, 0.0 }
 0x229   :  { %v599_v5 = vmul.f32 1.0614054, %v1879_v59  ;;  %v1890_v21 = vpop.eup %1453  ;;  %1469 = vpow2.f32 %v781_v49  ;;  %vm840_vm6 = vcmp.lt.f32.partialorder %v1821_v13, 0.0  ;;  %vm844_vm7 = vcmp.lt.f32.partialorder %v1872_v52, 0.0 }
 0x22a   :  { %v613_v16 = vadd.f32 -1.4531521, %v597_v0  ;;  %v598_v28 = vmul.f32 1.0614054, %v1890_v21  ;;  %v1898_v35 = vpop.eup %1455 }
 0x22b   :  { %v615_v23 = vadd.f32 -1.4531521, %v599_v5  ;;  %v600_v48 = vmul.f32 1.0614054, %v1898_v35  ;;  %v1910_v45 = vpop.eup %1457  ;;  %v785_v5 = vmul.f32 1.442695, %v763_v40 }
 0x22c   :  { %v629_v24 = vmul.f32 %v1874_v56, %v613_v16  ;;  %v614_v47 = vadd.f32 -1.4531521, %v598_v28  ;;  %v1915_v8 = vpop.eup %1459 }
 0x22d   :  { %v631_v26 = vmul.f32 %v1879_v59, %v615_v23  ;;  %v616_v55 = vadd.f32 -1.4531521, %v600_v48  ;;  %v601_v23 = vmul.f32 1.0614054, %v1910_v45  ;;  %v603_v22 = vmul.f32 1.0614054, %v1915_v8 }
 0x22e   :  { %v645_v42 = vadd.f32 1.4214138, %v629_v24  ;;  %v630_v54 = vmul.f32 %v1890_v21, %v614_v47  ;;  %v762_v24 = vmul.f32 %v746_v51, %v522_v50  ;;  %v760_v47 = vmul.f32 %v744_v4, %v1829_v18 }
 0x22f   :  { %v647_v3 = vadd.f32 1.4214138, %v631_v26  ;;  %v632_v19 = vmul.f32 %v1898_v35, %v616_v55  ;;  %v617_v26 = vadd.f32 -1.4531521, %v601_v23  ;;  %v1923_v40 = vpop.eup %1461  ;;  %v619_v48 = vadd.f32 -1.4531521, %v603_v22 }
 0x230   :  { %v661_v53 = vmul.f32 %v1874_v56, %v645_v42  ;;  %v646_v16 = vadd.f32 1.4214138, %v630_v54  ;;  %1471 = vpow2.f32 %v785_v5  ;;  %v1464_v51 = vpop.eup %1463  ;;  %v764_v4 = vmul.f32 %v748_v17, %v1877_v58 }
 0x231   :  { %v663_v0 = vmul.f32 %v1879_v59, %v647_v3  ;;  %v633_v50 = vmul.f32 %v1910_v45, %v617_v26  ;;  %v635_v55 = vmul.f32 %v1915_v8, %v619_v48  ;;  %v1931_v23 = vpop.eup %1465  ;;  %v557_v5 = vadd.f32 1.0, %v541_v2 }
 0x232   :  { %v677_v9 = vadd.f32 -0.28449672, %v661_v53  ;;  %v662_v49 = vmul.f32 %v1890_v21, %v646_v16  ;;  %v648_v53 = vadd.f32 1.4214138, %v632_v19  ;;  %v1468_v22 = vpop.eup %1467  ;;  %v604_v26 = vmul.f32 1.0614054, %v1931_v23 }
 0x233   :  { %v679_v15 = vadd.f32 -0.28449672, %v663_v0  ;;  %v602_v0 = vmul.f32 1.0614054, %v1923_v40  ;;  %v649_v18 = vadd.f32 1.4214138, %v633_v50  ;;  %v1470_v50 = vpop.eup %1469 }
 0x234   :  { %v693_v28 = vmul.f32 %v1874_v56, %v677_v9  ;;  %v783_v9 = vmul.f32 1.442695, %v762_v24  ;;  %v651_v19 = vadd.f32 1.4214138, %v635_v55  ;;  %v678_v48 = vadd.f32 -0.28449672, %v662_v49 }
 0x235   :  { %v695_v42 = vmul.f32 %v1879_v59, %v679_v15  ;;  %v664_v44 = vmul.f32 %v1898_v35, %v648_v53  ;;  %v665_v24 = vmul.f32 %v1910_v45, %v649_v18  ;;  %v620_v58 = vadd.f32 -1.4531521, %v604_v26 }
 0x236   :  { %v709_v3 = vadd.f32 0.2548296, %v693_v28  ;;  %v618_v28 = vadd.f32 -1.4531521, %v602_v0  ;;  %v775_v17 = vmul.f32 1.442695, %v758_v1  ;;  %1473 = vpow2.f32 %v783_v9 }
 0x237   :  { %v711_v54 = vadd.f32 0.2548296, %v695_v42  ;;  %v681_v2 = vadd.f32 -0.28449672, %v665_v24  ;;  %1475 = vrcp.f32 %v557_v5  ;;  %v694_v0 = vmul.f32 %v1890_v21, %v678_v48 }
 0x238   :  { %v725_v15 = vmul.f32 %v1874_v56, %v709_v3  ;;  %v667_v56 = vmul.f32 %v1915_v8, %v651_v19  ;;  %v634_v3 = vmul.f32 %v1923_v40, %v618_v28  ;;  %1477 = vpow2.f32 %v775_v17 }
 0x239   :  { %v727_v16 = vmul.f32 %v1879_v59, %v711_v54  ;;  %v787_v59 = vmul.f32 1.442695, %v764_v4  ;;  %v779_v4 = vmul.f32 1.442695, %v760_v47  ;;  %v489_v47 = vmul.f32 0.5, %v1836_v29 }
 0x23a   :  { %v805_v42 = vmul.f32 %v1464_v51, %v725_v15  ;;  %v683_v54 = vadd.f32 -0.28449672, %v667_v56  ;;  %v650_v55 = vadd.f32 1.4214138, %v634_v3  ;;  %v636_v51 = vmul.f32 %v1931_v23, %v620_v58  ;;  %v1472_v18 = vpop.eup %1471 }
 0x23b   :  { %v807_v20 = vmul.f32 %v1468_v22, %v727_v16  ;;  %v697_v15 = vmul.f32 %v1910_v45, %v681_v2  ;;  %v680_v22 = vadd.f32 -0.28449672, %v664_v44  ;;  %1479 = vpow2.f32 %v787_v59 }
 0x23c   :  { %v821_v49 = vsub.f32 1.0, %v805_v42  ;;  %v699_v16 = vmul.f32 %v1915_v8, %v683_v54  ;;  %v666_v1 = vmul.f32 %v1923_v40, %v650_v55  ;;  %v652_v9 = vadd.f32 1.4214138, %v636_v51 }
 0x23d   :  { %v823_v53 = vsub.f32 1.0, %v807_v20  ;;  %v713_v19 = vadd.f32 0.2548296, %v697_v15  ;;  %v710_v42 = vadd.f32 0.2548296, %v694_v0  ;;  %v696_v48 = vmul.f32 %v1898_v35, %v680_v22 }
 0x23e   :  { %v715_v5 = vadd.f32 0.2548296, %v699_v16  ;;  %v682_v20 = vadd.f32 -0.28449672, %v666_v1  ;;  %v853_v28 = vsub.f32 0.0, %v821_v49  ;;  %v668_v3 = vmul.f32 %v1931_v23, %v652_v9 }
 0x23f   :  { %v855_v26 = vsub.f32 0.0, %v823_v53  ;;  %v729_v44 = vmul.f32 %v1910_v45, %v713_v19  ;;  %1481 = vpow2.f32 %v779_v4  ;;  %v1956_v17 = vadd.f32 %v1833_v27, %v1793_v61 }
 0x240   :  { %v731_v24 = vmul.f32 %v1915_v8, %v715_v5  ;;  %v698_v56 = vmul.f32 %v1923_v40, %v682_v20  ;;  %v491_v2 = vmul.f32 0.5, %v1843_v32  ;;  %v684_v54 = vadd.f32 -0.28449672, %v668_v3  ;;  %v1474_v55 = vpop.eup %1473 }
 0x241   :  { %v809_v58 = vmul.f32 %v1470_v50, %v729_v44  ;;  %v869_v8 = vsel %vm837_vm0, %v853_v28, %v821_v49  ;;  %v871_v51 = vsel %vm839_vm1, %v855_v26, %v823_v53  ;;  %v1964_v29 = vpop.eup %1475  ;;  %v726_v27 = vmul.f32 %v1890_v21, %v710_v42 }
 0x242   :  { %v811_v59 = vmul.f32 %v1472_v18, %v731_v24  ;;  %v714_v45 = vadd.f32 0.2548296, %v698_v56  ;;  %v712_v50 = vadd.f32 0.2548296, %v696_v48  ;;  %v700_v10 = vmul.f32 %v1931_v23, %v684_v54  ;;  %v1478_v21 = vpop.eup %1477 }
 0x243   :  { %v825_v0 = vsub.f32 1.0, %v809_v58  ;;  %v1971_v49 = vmul.f32 0.70710677, %v1956_v17  ;;  %v885_v11 = vadd.f32 1.0, %v869_v8  ;;  %v887_v53 = vadd.f32 1.0, %v871_v51 }
 0x244   :  { %v827_v15 = vsub.f32 1.0, %v811_v59  ;;  %v730_v32 = vmul.f32 %v1923_v40, %v714_v45  ;;  %v716_v9 = vadd.f32 0.2548296, %v700_v10  ;;  %v806_v19 = vmul.f32 %v1478_v21, %v726_v27 }
 0x245   :  { %v857_v18 = vsub.f32 0.0, %v825_v0  ;;  %v1978_v40 = vand.u32 2147483647, %v1971_v49  ;;  %v1480_v4 = vpop.eup %1479  ;;  %v728_v5 = vmul.f32 %v1898_v35, %v712_v50  ;;  %v605_v30 = vmul.f32 1.0614054, %v1964_v29 }
 0x246   :  { %v859_v22 = vsub.f32 0.0, %v827_v15  ;;  %v810_v1 = vmul.f32 %v1474_v55, %v730_v32  ;;  %v732_v42 = vmul.f32 %v1931_v23, %v716_v9  ;;  %v1987_v48 = vmul.f32 %v885_v11, %v1885_v14 }
 0x247   :  { %v873_v16 = vsel %vm841_vm2, %v857_v18, %v825_v0  ;;  %v543_v44 = vmul.f32 0.3275911, %v1978_v40  ;;  %v1990_v24 = vmul.f32 %v887_v53, %v1894_v25  ;;  %v1995_v35 = vmul.f32 0.70710677, %v1975_v36 }
 0x248   :  { %v889_v20 = vadd.f32 1.0, %v873_v16  ;;  %v875_v28 = vsel %vm843_vm3, %v859_v22, %v827_v15  ;;  %v826_v58 = vsub.f32 1.0, %v810_v1  ;;  %v812_v23 = vmul.f32 %v1480_v4, %v732_v42 }
 0x249   :  { %v891_v26 = vadd.f32 1.0, %v875_v28  ;;  %v1482_v41 = vpop.eup %1481  ;;  %v559_v59 = vadd.f32 1.0, %v543_v44  ;;  %v2002_v14 = vand.u32 2147483647, %v1995_v35  ;;  %v822_v25 = vsub.f32 1.0, %v806_v19 }
 0x24a   :  { %v1992_v56 = vmul.f32 %v889_v20, %v489_v47  ;;  %v808_v45 = vmul.f32 %v1482_v41, %v728_v5  ;;  %v621_v55 = vadd.f32 -1.4531521, %v605_v30  ;;  %v828_v51 = vsub.f32 1.0, %v812_v23 }
 0x24b   :  { %v1997_v3 = vmul.f32 %v891_v26, %v491_v2  ;;  %1483 = vrcp.f32 %v559_v59  ;;  %v542_v8 = vmul.f32 0.3275911, %v2002_v14  ;;  %v858_v2 = vsub.f32 0.0, %v826_v58 }
 0x24c   :  { %v917_v54 = vpack.c.bf16 %v1992_v56, %v1987_v48  ;;  %v824_v0 = vsub.f32 1.0, %v808_v45  ;;  %v2009_v50 = vadd.f32 %v1840_v31, %v1797_v63  ;;  %v854_v15 = vsub.f32 0.0, %v822_v25 }
 0x24d   :  { %v919_v47 = vpack.c.bf16 %v1997_v3, %v1990_v24  ;;  %v558_v27 = vadd.f32 1.0, %v542_v8  ;;  %v637_v32 = vmul.f32 %v1964_v29, %v621_v55  ;;  %v2014_v18 = vadd.f32 %v1845_v33, %v1791_v60 }
 0x24e   :  { %v2018_v10 = vadd.f32 %v1847_v34, %v1793_v61  ;;  %v486_v11 = vmul.f32 0.5, %v1806_v6  ;;  %v488_v53 = vmul.f32 0.5, %v1809_v7  ;;  %v874_v31 = vsel %vm842_vm4, %v858_v2, %v826_v58 }
 0x24f   :  { %1485 = vrcp.f32 %v558_v27  ;;  %v860_v22 = vsub.f32 0.0, %v828_v51  ;;  %v2024_v21 = vmul.f32 0.70710677, %v2009_v50  ;;  %v2027_v16 = vmul.f32 0.70710677, %v2014_v18 }
 0x250   :  { %v856_v60 = vsub.f32 0.0, %v824_v0  ;;  %v749_v61 = vsub.f32 0.0, %v1908_v57  ;;  %v2032_v6 = vmul.f32 0.70710677, %v2018_v10  ;;  %v870_v7 = vsel %vm838_vm5, %v854_v15, %v822_v25 }
 0x251   :  { %v653_v33 = vadd.f32 1.4214138, %v637_v32  ;;  %v2035_v34 = vand.u32 2147483647, %v2024_v21  ;;  %v2038_v46 = vand.u32 2147483647, %v2027_v16  ;;  %v876_v4 = vsel %vm844_vm7, %v860_v22, %v828_v51 }
 0x252   :  { %v890_v1 = vadd.f32 1.0, %v874_v31  ;;  %v2043_v12 = vand.u32 2147483647, %v2032_v6  ;;  %v490_v9 = vmul.f32 0.5, %v1853_v37  ;;  %v886_v28 = vadd.f32 1.0, %v870_v7 }
 0x253   :  { %v544_v19 = vmul.f32 0.3275911, %v2035_v34  ;;  %v545_v5 = vmul.f32 0.3275911, %v2038_v46  ;;  %v872_v26 = vsel %vm840_vm6, %v856_v60, %v824_v0  ;;  %v765_v42 = vmul.f32 %v749_v61, %v1908_v57 }
 0x254   :  { %v547_v13 = vmul.f32 0.3275911, %v2043_v12  ;;  %v669_v52 = vmul.f32 %v1964_v29, %v653_v33  ;;  %v2056_v37 = vadd.f32 %v1855_v38, %v1795_v62  ;;  %v906_v41 = vmul.f32 %v890_v1, %v490_v9 }
 0x255   :  { %v2048_v20 = vpop.eup %1483  ;;  %v560_v44 = vadd.f32 1.0, %v544_v19  ;;  %v892_v58 = vadd.f32 1.0, %v876_v4  ;;  %v751_v23 = vsub.f32 0.0, %v1978_v40  ;;  %v561_v59 = vadd.f32 1.0, %v545_v5 }
 0x256   :  { %v607_v30 = vmul.f32 1.0614054, %v2048_v20  ;;  %v492_v45 = vmul.f32 0.5, %v1864_v43  ;;  %v563_v57 = vadd.f32 1.0, %v547_v13  ;;  %v902_v8 = vmul.f32 %v886_v28, %v486_v11 }
 0x257   :  { %1487 = vrcp.f32 %v560_v44  ;;  %v888_v2 = vadd.f32 1.0, %v872_v26  ;;  %v789_v51 = vmul.f32 1.442695, %v765_v42  ;;  %v685_v0 = vadd.f32 -0.28449672, %v669_v52 }
 0x258   :  { %v623_v25 = vadd.f32 -1.4531521, %v607_v30  ;;  %1489 = vrcp.f32 %v561_v59  ;;  %v2065_v27 = vmul.f32 0.70710677, %v2056_v37  ;;  %v908_v15 = vmul.f32 %v892_v58, %v492_v45 }
 0x259   :  { %v2060_v55 = vpop.eup %1485  ;;  %v767_v43 = vmul.f32 %v751_v23, %v1978_v40  ;;  %v2070_v32 = vadd.f32 %v1857_v39, %v1797_v63  ;;  %v918_v31 = vpack.c.bf16 %v906_v41, %v902_v8  ;;  %1491 = vrcp.f32 %v563_v57 }
 0x25a   :  { %v639_v62 = vmul.f32 %v2048_v20, %v623_v25  ;;  %v606_v38 = vmul.f32 1.0614054, %v2060_v55  ;;  %v2073_v60 = vand.u32 2147483647, %v2065_v27  ;;  %v904_v61 = vmul.f32 %v888_v2, %v488_v53 }
 0x25b   :  { %1493 = vpow2.f32 %v789_v51  ;;  %v750_v7 = vsub.f32 0.0, %v2002_v14  ;;  %v2077_v33 = vmul.f32 0.70710677, %v2070_v32  ;;  %1149 = vmatprep.mubr.bf16.mxu0 %v918_v31  ;;  %v701_v40 = vmul.f32 %v1964_v29, %v685_v0 }
 0x25c   :  { %v655_v11 = vadd.f32 1.4214138, %v639_v62  ;;  %v622_v22 = vadd.f32 -1.4531521, %v606_v38  ;;  %v546_v1 = vmul.f32 0.3275911, %v2073_v60  ;;  %1150 = vmatmul.mubr.bf16.vlgmr.msra.gmra.mrb[8].mxu0 %v917_v54  ;;  %v920_v19 = vpack.c.bf16 %v908_v15, %v904_v61 }
 0x25d   :  { %v793_v53 = vmul.f32 1.442695, %v767_v43  ;;  %v753_v9 = vsub.f32 0.0, %v2038_v46  ;;  %v2088_v4 = vand.u32 2147483647, %v2077_v33  ;;  %v766_v42 = vmul.f32 %v750_v7, %v2002_v14 }
 0x25e   :  { %v671_v63 = vmul.f32 %v2048_v20, %v655_v11  ;;  %v638_v39 = vmul.f32 %v2060_v55, %v622_v22  ;;  %v562_v26 = vadd.f32 1.0, %v546_v1  ;;  %v752_v13 = vsub.f32 0.0, %v2035_v34  ;;  %1198 = vmatprep.mubr.bf16.mxu1 %v920_v19 }
 0x25f   :  { %v548_v52 = vmul.f32 0.3275911, %v2088_v4  ;;  %v717_v48 = vadd.f32 0.2548296, %v701_v40  ;;  %v755_v54 = vsub.f32 0.0, %v2043_v12  ;;  %1199 = vmatmul.mubr.bf16.vlgmr.msra.gmra.mrb[8].mxu1 %v919_v47  ;;  %v769_v58 = vmul.f32 %v753_v9, %v2038_v46 }
 0x260   :  { %v687_v5 = vadd.f32 -0.28449672, %v671_v63  ;;  %v654_v28 = vadd.f32 1.4214138, %v638_v39  ;;  %1495 = vrcp.f32 %v562_v26  ;;  %v791_v25 = vmul.f32 1.442695, %v766_v42 }
 0x261   :  { %v2093_v30 = vpop.eup %1487  ;;  %v564_v23 = vadd.f32 1.0, %v548_v52  ;;  %1497 = vpow2.f32 %v793_v53  ;;  %v768_v8 = vmul.f32 %v752_v13, %v2035_v34  ;;  %v733_v3 = vmul.f32 %v1964_v29, %v717_v48 }
 0x262   :  { %v670_v56 = vmul.f32 %v2060_v55, %v654_v28  ;;  %v2100_v44 = vpop.eup %1489  ;;  %v703_v14 = vmul.f32 %v2048_v20, %v687_v5  ;;  %v608_v41 = vmul.f32 1.0614054, %v2093_v30  ;;  %v771_v2 = vmul.f32 %v755_v54, %v2043_v12 }
 0x263   :  { %v609_v45 = vmul.f32 1.0614054, %v2100_v44  ;;  %1499 = vrcp.f32 %v564_v23  ;;  %v2107_v24 = vpop.eup %1491  ;;  %v797_v62 = vmul.f32 1.442695, %v769_v58  ;;  %v754_v34 = vsub.f32 0.0, %v2073_v60 }
 0x264   :  { %v686_v59 = vadd.f32 -0.28449672, %v670_v56  ;;  %v624_v57 = vadd.f32 -1.4531521, %v608_v41  ;;  %v719_v0 = vadd.f32 0.2548296, %v703_v14  ;;  %1501 = vpow2.f32 %v791_v25 }
 0x265   :  { %v625_v47 = vadd.f32 -1.4531521, %v609_v45  ;;  %v1494_v51 = vpop.eup %1493  ;;  %v611_v38 = vmul.f32 1.0614054, %v2107_v24  ;;  %v795_v11 = vmul.f32 1.442695, %v768_v8  ;;  %1503 = vpow2.f32 %v797_v62 }
 0x266   :  { %v640_v46 = vmul.f32 %v2093_v30, %v624_v57  ;;  %v702_v15 = vmul.f32 %v2060_v55, %v686_v59  ;;  %v813_v22 = vmul.f32 %v1494_v51, %v733_v3  ;;  %v801_v12 = vmul.f32 1.442695, %v771_v2 }
 0x267   :  { %v641_v43 = vmul.f32 %v2100_v44, %v625_v47  ;;  %v627_v29 = vadd.f32 -1.4531521, %v611_v38  ;;  %v756_v7 = vsub.f32 0.0, %v2088_v4  ;;  %v735_v40 = vmul.f32 %v2048_v20, %v719_v0 }
 0x268   :  { %v656_v31 = vadd.f32 1.4214138, %v640_v46  ;;  %v718_v53 = vadd.f32 0.2548296, %v702_v15  ;;  %v770_v19 = vmul.f32 %v754_v34, %v2073_v60  ;;  %1505 = vpow2.f32 %v795_v11  ;;  %v2200_v11 = vld [vmem:[#allocation2_spill] sm:$0xff] }
 0x269   :  { %v657_v61 = vadd.f32 1.4214138, %v641_v43  ;;  %v643_v39 = vmul.f32 %v2107_v24, %v627_v29  ;;  %v829_v13 = vsub.f32 1.0, %v813_v22  ;;  %1507 = vpow2.f32 %v801_v12  ;;  %v2201_v22 = vld [vmem:[#allocation3_spill] sm:$0xff] }
 0x26a   :  { %v672_v63 = vmul.f32 %v2093_v30, %v656_v31  ;;  %v2120_v1 = vpop.eup %1495  ;;  %v772_v52 = vmul.f32 %v756_v7, %v2088_v4  ;;  %v799_v58 = vmul.f32 1.442695, %v770_v19  ;;  %v734_v59 = vmul.f32 %v2060_v55, %v718_v53 }
 0x26b   :  { %v673_v9 = vmul.f32 %v2100_v44, %v657_v61  ;;  %v659_v28 = vadd.f32 1.4214138, %v643_v39  ;;  %v610_v26 = vmul.f32 1.0614054, %v2120_v1  ;;  %v1498_v42 = vpop.eup %1497  ;;  %v861_v4 = vsub.f32 0.0, %v829_v13 }
 0x26c   :  { %v688_v5 = vadd.f32 -0.28449672, %v672_v63  ;;  %v815_v56 = vmul.f32 %v1498_v42, %v735_v40  ;;  %v803_v46 = vmul.f32 1.442695, %v772_v52  ;;  %1509 = vpow2.f32 %v799_v58 }
 0x26d   :  { %v689_v20 = vadd.f32 -0.28449672, %v673_v9  ;;  %v2126_v48 = vpop.eup %1499  ;;  %v675_v14 = vmul.f32 %v2107_v24, %v659_v28  ;;  %v626_v41 = vadd.f32 -1.4531521, %v610_v26  ;;  %v493_v29 = vmul.f32 0.5, %v2200_v11 }
 0x26e   :  { %v704_v54 = vmul.f32 %v2093_v30, %v688_v5  ;;  %v612_v23 = vmul.f32 1.0614054, %v2126_v48  ;;  %v1502_v47 = vpop.eup %1501  ;;  %v831_v2 = vsub.f32 1.0, %v815_v56  ;;  %vm845_vm8 = vcmp.lt.f32.partialorder %v2201_v22, 0.0 }
 0x26f   :  { %v705_v60 = vmul.f32 %v2100_v44, %v689_v20  ;;  %v691_v25 = vadd.f32 -0.28449672, %v675_v14  ;;  %v642_v57 = vmul.f32 %v2120_v1, %v626_v41  ;;  %v1504_v15 = vpop.eup %1503  ;;  %v814_v43 = vmul.f32 %v1502_v47, %v734_v59 }
 0x270   :  { %v720_v45 = vadd.f32 0.2548296, %v704_v54  ;;  %v628_v3 = vadd.f32 -1.4531521, %v612_v23  ;;  %v863_v40 = vsub.f32 0.0, %v831_v2  ;;  %1511 = vpow2.f32 %v803_v46 }
 0x271   :  { %v721_v8 = vadd.f32 0.2548296, %v705_v60  ;;  %v707_v51 = vmul.f32 %v2107_v24, %v691_v25  ;;  %v658_v0 = vadd.f32 1.4214138, %v642_v57  ;;  %v877_v39 = vsel %vm845_vm8, %v861_v4, %v829_v13 }
 0x272   :  { %v736_v62 = vmul.f32 %v2093_v30, %v720_v45  ;;  %v644_v55 = vmul.f32 %v2126_v48, %v628_v3  ;;  %v1506_v7 = vpop.eup %1505  ;;  %v495_v5 = vmul.f32 0.5, %v1956_v17  ;;  %v830_v28 = vsub.f32 1.0, %v814_v43 }
 0x273   :  { %v737_v38 = vmul.f32 %v2100_v44, %v721_v8  ;;  %v723_v34 = vadd.f32 0.2548296, %v707_v51  ;;  %v674_v31 = vmul.f32 %v2120_v1, %v658_v0  ;;  %v1508_v44 = vpop.eup %1507  ;;  %vm847_vm9 = vcmp.lt.f32.partialorder %v1971_v49, 0.0 }
 0x274   :  { %v660_v12 = vadd.f32 1.4214138, %v644_v55  ;;  %v816_v53 = vmul.f32 %v1506_v7, %v736_v62  ;;  %vm849_vm10 = vcmp.lt.f32.partialorder %v2027_v16, 0.0  ;;  %v893_v52 = vadd.f32 1.0, %v877_v39 }
 0x275   :  { %v817_v61 = vmul.f32 %v1504_v15, %v737_v38  ;;  %v739_v30 = vmul.f32 %v2107_v24, %v723_v34  ;;  %v690_v63 = vadd.f32 -0.28449672, %v674_v31  ;;  %v879_v56 = vsel %vm847_vm9, %v863_v40, %v831_v2 }
 0x276   :  { %v676_v19 = vmul.f32 %v2126_v48, %v660_v12  ;;  %v832_v14 = vsub.f32 1.0, %v816_v53  ;;  %v497_v41 = vmul.f32 0.5, %v2014_v18  ;;  %v862_v58 = vsub.f32 0.0, %v830_v28  ;;  %v1510_v49 = vpop.eup %1509 }
 0x277   :  { %v833_v9 = vsub.f32 1.0, %v817_v61  ;;  %v819_v26 = vmul.f32 %v1508_v44, %v739_v30  ;;  %v706_v42 = vmul.f32 %v2120_v1, %v690_v63  ;;  %v895_v25 = vadd.f32 1.0, %v879_v56  ;;  %v1513_v56 = vld [vmem:[%s2188_s0] sm:$0xff] }
 0x278   :  { %v692_v24 = vadd.f32 -0.28449672, %v676_v19  ;;  %vm846_vm11 = vcmp.lt.f32.partialorder %v1995_v35, 0.0  ;;  %vm851_vm12 = vcmp.lt.f32.partialorder %v2032_v6, 0.0  ;;  %v909_v57 = vmul.f32 %v893_v52, %v493_v29  ;;  %v1303_v52 = vld [vmem:[%s2194_s6] ss:$0 sm:$0xff] }
 0x279   :  { %v865_v20 = vsub.f32 0.0, %v833_v9  ;;  %v835_v54 = vsub.f32 1.0, %v819_v26  ;;  %v722_v13 = vadd.f32 0.2548296, %v706_v42  ;;  %v864_v18 = vsub.f32 0.0, %v832_v14 }
 0x27a   :  { %v708_v17 = vmul.f32 %v2126_v48, %v692_v24  ;;  %v499_v47 = vmul.f32 0.5, %v2018_v10  ;;  %v1512_v0 = vpop.eup %1511  ;;  %v878_v46 = vsel %vm846_vm11, %v862_v58, %v830_v28  ;;  %v911_v38 = vmul.f32 %v895_v25, %v495_v5 }
 0x27b   :  { %v881_v60 = vsel %vm849_vm10, %v865_v20, %v833_v9  ;;  %v867_v59 = vsub.f32 0.0, %v835_v54  ;;  %v738_v45 = vmul.f32 %v2120_v1, %v722_v13  ;;  %vm848_vm13 = vcmp.lt.f32.partialorder %v2024_v21, 0.0 }
 0x27c   :  { %v897_v23 = vadd.f32 1.0, %v881_v60  ;;  %v724_v16 = vadd.f32 0.2548296, %v708_v17  ;;  %vm850_vm14 = vcmp.lt.f32.partialorder %v2065_v27, 0.0  ;;  %v894_v15 = vadd.f32 1.0, %v878_v46 }
 0x27d   :  { %v883_v8 = vsel %vm851_vm12, %v867_v59, %v835_v54  ;;  %v818_v3 = vmul.f32 %v1510_v49, %v738_v45  ;;  %v880_v43 = vsel %vm848_vm13, %v864_v18, %v832_v14  ;;  %v494_v11 = vmul.f32 0.5, %v1975_v36 }
 0x27e   :  { %v913_v4 = vmul.f32 %v897_v23, %v497_v41  ;;  %v899_v2 = vadd.f32 1.0, %v883_v8  ;;  %v740_v51 = vmul.f32 %v2126_v48, %v724_v16  ;;  %v498_v48 = vmul.f32 0.5, %v2056_v37  ;;  %v1514_v41 = vld [vmem:[%s2188_s0 + $0x8] sm:$0xff] }
 0x27f   :  { %v834_v1 = vsub.f32 1.0, %v818_v3  ;;  %v896_v61 = vadd.f32 1.0, %v880_v43  ;;  %vm852_vm15 = vcmp.lt.f32.partialorder %v2077_v33, 0.0  ;;  %v910_v12 = vmul.f32 %v894_v15, %v494_v11 }
 0x280   :  { %v921_v62 = vpack.c.bf16 %v913_v4, %v909_v57  ;;  %v915_v55 = vmul.f32 %v899_v2, %v499_v47  ;;  %v820_v35 = vmul.f32 %v1512_v0, %v740_v51  ;;  %v496_v27 = vmul.f32 0.5, %v2009_v50  ;;  %v1515_v2 = vld [vmem:[%s2188_s0 + $0x10] sm:$0xff] }
 0x281   :  { %v866_v6 = vsub.f32 0.0, %v834_v1  ;;  %v500_v40 = vmul.f32 0.5, %v2070_v32 }
 0x282   :  { %v836_v34 = vsub.f32 1.0, %v820_v35  ;;  %v923_v31 = vpack.c.bf16 %v915_v55, %v911_v38  ;;  %v912_v44 = vmul.f32 %v896_v61, %v496_v27 }
 0x283   :  { %v882_v10 = vsel %vm850_vm14, %v866_v6, %v834_v1  ;;  %v1516_v1 = vld [vmem:[%s2188_s0 + $0x18] sm:$0xff] }
 0x284   :  { %v898_v29 = vadd.f32 1.0, %v882_v10  ;;  %v868_v22 = vsub.f32 0.0, %v836_v34 }
 0x286   :  { %v914_v7 = vmul.f32 %v898_v29, %v498_v48  ;;  %v884_v21 = vsel %vm852_vm15, %v868_v22, %v836_v34 }
 0x287   :  { %v900_v30 = vadd.f32 1.0, %v884_v21 }
 0x288   :  { %v922_v63 = vpack.c.bf16 %v914_v7, %v910_v12 }
 0x289   :  { %v916_v39 = vmul.f32 %v900_v30, %v500_v40 }
 0x28a   :  { %1157 = vmatprep.mubr.bf16.mxu0 %v922_v63 }
 0x28b   :  { %v924_v36 = vpack.c.bf16 %v916_v39, %v912_v44  ;;  %1158 = vmatmul.mubr.bf16.gmra.mrb[12].mxu0 %v921_v62 }
 0x28d   :  { %1206 = vmatprep.mubr.bf16.mxu1 %v924_v36 }
 0x28e   :  { %1207 = vmatmul.mubr.bf16.gmra.mrb[12].mxu1 %v923_v31 }
 0x32f   :  { %v1320_v37 = vpop.f32.mrb[8].mxu0 }
 0x330   :  { %v1321_v53 = vpop.f32.mrb[9].mxu0 }
 0x331   :  { %v1322_v9 = vadd.f32 %v1321_v53, %v1320_v37  ;;  %v1323_v33 = vpop.f32.mrb[10].mxu0 }
 0x332   :  { %v1324_v19 = vpop.f32.mrb[11].mxu0  ;;  %v1348_v5 = vpop.f32.mrb[8].mxu1 }
 0x333   :  { %v1325_v28 = vadd.f32 %v1324_v19, %v1323_v33  ;;  %v1349_v26 = vpop.f32.mrb[9].mxu1 }
 0x334   :  { %v1350_v50 = vadd.f32 %v1349_v26, %v1348_v5  ;;  %v1351_v42 = vpop.f32.mrb[10].mxu1 }
 0x335   :  { %v1352_v32 = vpop.f32.mrb[11].mxu1 }
 0x336   :  { %v1201_v20 = vadd.f32 %v1350_v50, %v1322_v9  ;;  %v1353_v24 = vadd.f32 %v1352_v32, %v1351_v42 }
 0x338   :  { %v1215_v54 = vadd.f32 %v1513_v56, %v1201_v20  ;;  %v1204_v13 = vadd.f32 %v1353_v24, %v1325_v28 }
 0x33a   :  { %v1225_v14 = vadd.f32 %v1303_v52, %v1215_v54  ;;  %v1216_v60 = vadd.f32 %v1514_v41, %v1204_v13 }
 0x33c   :  { %1229 = vst [vmem:[%s2195_s7] sm:$0xff] %v1225_v14  ;;  %v1226_v17 = vadd.f32 %v1303_v52, %v1216_v60 }
 0x33e   :  { %1230 = vst [vmem:[%s2195_s7 + $0x8] sm:$0xff] %v1226_v17 }
 0x35e   :  { %v1326_v58 = vpop.f32.mrb[12].mxu0 }
 0x35f   :  { %v1327_v23 = vpop.f32.mrb[13].mxu0 }
 0x360   :  { %v1328_v59 = vadd.f32 %v1327_v23, %v1326_v58  ;;  %v1329_v45 = vpop.f32.mrb[14].mxu0 }
 0x361   :  { %v1354_v49 = vpop.f32.mrb[12].mxu1  ;;  %v1330_v25 = vpop.f32.mrb[15].mxu0 }
 0x362   :  { %v1355_v16 = vpop.f32.mrb[13].mxu1  ;;  %v1331_v57 = vadd.f32 %v1330_v25, %v1329_v45 }
 0x363   :  { %v1356_v4 = vadd.f32 %v1355_v16, %v1354_v49  ;;  %v1357_v8 = vpop.f32.mrb[14].mxu1 }
 0x364   :  { %v1358_v3 = vpop.f32.mrb[15].mxu1 }
 0x365   :  { %v1209_v18 = vadd.f32 %v1356_v4, %v1328_v59  ;;  %v1359_v47 = vadd.f32 %v1358_v3, %v1357_v8 }
 0x367   :  { %v1217_v51 = vadd.f32 %v1515_v2, %v1209_v18  ;;  %v1212_v0 = vadd.f32 %v1359_v47, %v1331_v57 }
 0x369   :  { %v1227_v46 = vadd.f32 %v1303_v52, %v1217_v51  ;;  %v1218_v62 = vadd.f32 %v1516_v1, %v1212_v0 }
 0x36b   :  { %1231 = vst [vmem:[%s2195_s7 + $0x10] sm:$0xff] %v1227_v46  ;;  %v1228_v38 = vadd.f32 %v1303_v52, %v1218_v62 }
 0x36d   :  { %1232 = vst [vmem:[%s2195_s7 + $0x18] sm:$0xff] %v1228_v38 }

// kernel: decoder_forward.9
= control target key start
LH: loop header
LB: loop body
LE: loop exit
PB: predicated region body
PF: predicated region fallthrough
CT: control target
= control target key end

     0   :  { %s2101_s21 = smov 0   ;;  %s2103_s22 = smov 0   ;;  %s2395_s0 = inlined_call_operand.vmem [shape: f32[2,16,128], index: 0, kind: input, shape index: {}]   ;;  %s2396_s1 = inlined_call_operand.vmem [shape: f32[2,16,128], index: 1, kind: input, shape index: {}]   ;;  %s2397_s2 = inlined_call_operand.vmem [shape: f32[1,128], index: 2, kind: input, shape index: {}]   ;;  %s2398_s3 = inlined_call_operand.vmem [shape: f32[1,128], index: 3, kind: input, shape index: {}]   ;;  %s2399_s4 = inlined_call_operand.vmem [shape: f32[1,128], index: 4, kind: input, shape index: {}]   ;;  %s2400_s5 = inlined_call_operand.vmem [shape: f32[1,128], index: 5, kind: input, shape index: {}]   ;;  %s2401_s6 = inlined_call_operand.vmem [shape: bf16[128,256], index: 6, kind: input, shape index: {}]   ;;  %s2402_s7 = inlined_call_operand.vmem [shape: f32[1,256], index: 7, kind: input, shape index: {}]   ;;  %s2403_s8 = inlined_call_operand.vmem [shape: bf16[128,128], index: 8, kind: input, shape index: {}]   ;;  %s2404_s9 = inlined_call_operand.vmem [shape: f32[1,128], index: 9, kind: input, shape index: {}]   ;;  %s2405_s10 = inlined_call_operand.vmem [shape: bf16[128,128], index: 10, kind: input, shape index: {}]   ;;  %s2406_s11 = inlined_call_operand.vmem [shape: f32[1,128], index: 11, kind: input, shape index: {}]   ;;  %s2407_s12 = inlined_call_operand.vmem [shape: f32[2,16,128], index: 12, kind: output, shape index: {}]  }
   0x1   :  { %s2105_s23 = smov 0  }
   0x2 LB: > { %s34_s24 = sadd.s32 1, %s2024_s22  ;;  %p1683_p0 = scmp.ge.s32.totalorder %s2028_s23, 1  ;;  %s2028_s23 = sphi %s2105_s23, %s22_s23   ;;  %s2024_s22 = sphi %s2103_s22, %s2409_s22   ;;  %s2020_s21 = sphi %s2101_s21, %s2408_s21  }
   0x3   : > { %p36_p1 = scmp.ge.s32.totalorder %s34_s24, 2  ;;  %p393_p2 = scmp.lt.s32.totalorder %s2028_s23, 3 }
   0x5   : > { %s2411_s24 = smov (%p36_p1, %s34_s24), 0  ;;  %p394_p3 = pnand %p1683_p0, %p393_p2 }
   0x6   : > { %p449_p4 = scmp.lt.s32.totalorder (!%p394_p3), %s2020_s21, 1  ;;  %v1926_v4 = vld [vmem:[%s2401_s6 + $0x4] ss:$8 sps:$4 sm:$0xff] (!%p394_p3)   ;;  %v1928_v5 = vld [vmem:[%s2401_s6] ss:$8 sps:$4 sm:$0xff] (!%p394_p3)   ;;  %v2030_v6 = vmov (!%p394_p3), 0.0  }
   0x7   : > { %397 = sbr.rel (%p394_p3) target bundleno = 2619 (0xa3b), region = 68  ;;  %1782 = vmatprep.subr.bf16.mxu0 (!%p394_p3), %v2030_v6  ;;  %v1929_v7 = vld [vmem:[%s2401_s6 + $0x14] ss:$8 sps:$4 sm:$0xff] (!%p394_p3)   ;;  %781 = vmatprep.subr.bf16.mxu1 (!%p394_p3), %v1926_v4  ;;  %v1931_v24 = vld [vmem:[%s2403_s8] sm:$0xff] (!%p394_p3)   ;;  %v1932_v25 = vld [vmem:[%s2401_s6 + $0x10] ss:$8 sps:$4 sm:$0xff] (!%p394_p3)  }
   0x8   : > { %782 = vmatpush1.bf16.msra.mxu1 (!%p394_p3), %v1928_v5  ;;  %1783 = vmatpush3.bf16.msra.mxu0 (!%p394_p3), %v1931_v24  ;;  %v1933_v26 = vld [vmem:[%s2401_s6 + $0x24] ss:$8 sps:$4 sm:$0xff] (!%p394_p3)   ;;  %v1936_v28 = vld [vmem:[%s2401_s6 + $0x20] ss:$8 sps:$4 sm:$0xff] (!%p394_p3)   ;;  %v1937_v29 = vld [vmem:[%s2401_s6 + $0x34] ss:$8 sps:$4 sm:$0xff] (!%p394_p3)  }
   0x9   : > { %783 = vmatprep.subr.bf16.mxu1 (!%p394_p3), %v1929_v7  ;;  %1784 = vmatprep.subr.bf16.mxu0 (!%p394_p3), %v2030_v6  ;;  %v1935_v27 = vld [vmem:[%s2403_s8 + $0x8] sm:$0xff] (!%p394_p3)   ;;  %v1939_v30 = vld [vmem:[%s2403_s8 + $0x10] sm:$0xff] (!%p394_p3)   ;;  %v1943_v33 = vld [vmem:[%s2403_s8 + $0x18] sm:$0xff] (!%p394_p3)   ;;  %v2031_v39 = vmov (!%p394_p3), 0   ;;  %vm2032_vm0 = vmmov (!%p394_p3), 0   ;;  %vm851_vm1 = vcmask (!%p394_p3), 261120  }
   0xa   : > { %v1940_v31 = vld [vmem:[%s2401_s6 + $0x30] ss:$8 sps:$4 sm:$0xff] (!%p394_p3)   ;;  %v1941_v32 = vld [vmem:[%s2401_s6 + $0x44] ss:$8 sps:$4 sm:$0xff] (!%p394_p3)   ;;  %v1944_v34 = vld [vmem:[%s2401_s6 + $0x40] ss:$8 sps:$4 sm:$0xff] (!%p394_p3)   ;;  %813 = vmatprep.mubr.bf16.mxu1 (!%p394_p3), %v2031_v39  ;;  %1798 = vmatprep.mubr.msk.bf16.mxu0 (!%p394_p3), %vm2032_vm0, %v2030_v6 }
   0xb   : > { %v1945_v35 = vld [vmem:[%s2401_s6 + $0x54] ss:$8 sps:$4 sm:$0xff] (!%p394_p3)   ;;  %v1947_v36 = vld [vmem:[%s2403_s8 + $0x20] sm:$0xff] (!%p394_p3)   ;;  %v1948_v37 = vld [vmem:[%s2401_s6 + $0x50] ss:$8 sps:$4 sm:$0xff] (!%p394_p3)   ;;  %vm901_vm2 = vcmask (!%p394_p3), 130048  }
   0xc   : > { %784 = vmatpush1.bf16.msra.mxu1 (!%p394_p3), %v1932_v25  ;;  %1785 = vmatpush3.bf16.msra.mxu0 (!%p394_p3), %v1935_v27  ;;  %v1949_v38 = vld [vmem:[%s2401_s6 + $0x64] ss:$8 sps:$4 sm:$0xff] (!%p394_p3)   ;;  %v1952_v41 = vld [vmem:[%s2401_s6 + $0x60] ss:$8 sps:$4 sm:$0xff] (!%p394_p3)   ;;  %v1953_v42 = vld [vmem:[%s2401_s6 + $0x74] ss:$8 sps:$4 sm:$0xff] (!%p394_p3)  }
   0xd   : > { %785 = vmatprep.subr.bf16.mxu1 (!%p394_p3), %v1933_v26  ;;  %1786 = vmatprep.subr.bf16.mxu0 (!%p394_p3), %v2030_v6  ;;  %v1951_v40 = vld [vmem:[%s2403_s8 + $0x28] sm:$0xff] (!%p394_p3)   ;;  %v1955_v43 = vld [vmem:[%s2403_s8 + $0x30] sm:$0xff] (!%p394_p3)   ;;  %v1957_v45 = vld [vmem:[%s2403_s8 + $0x38] sm:$0xff] (!%p394_p3)   ;;  %s2033_s18 = smov (!%p394_p3), 96   ;;  %s2034_s19 = smov (!%p394_p3), 64  }
   0xe   : > { %s2413_s21 = smov (!%p449_p4, %s2020_s21), 1  ;;  %v1956_v44 = vld [vmem:[%s2401_s6 + $0x70] ss:$8 sps:$4 sm:$0xff]   ;;  %v1692_v60 = vld [vmem:[%s2399_s4] ss:$0 sm:$0xff] }
   0xf   : > { %s2119_s25 = sshll.u32 %s2413_s21, 4  ;;  %v1690_v4 = vld [vmem:[%s2397_s2] ss:$0 sm:$0xff] }
  0x10   : > { %s462_s28 = scalar_lea.vmem %s2396_s1, %s2119_s25  ;;  %s456_s13 = scalar_lea.vmem %s2395_s0, %s2119_s25  ;;  %786 = vmatpush1.bf16.msra.mxu1 %v1936_v28  ;;  %1787 = vmatpush3.bf16.msra.mxu0 %v1939_v30  ;;  %v1693_v5 = vld [vmem:[%s2400_s5] ss:$0 sm:$0xff] }
  0x11   : > { %v476_v0 = vld [vmem:[%s462_s28] sm:$0xff]  ;;  %v477_v1 = vld [vmem:[%s462_s28 + $0x8] sm:$0xff]  ;;  %787 = vmatprep.subr.bf16.mxu1 %v1937_v29  ;;  %1788 = vmatprep.subr.bf16.mxu0 %v2030_v6  ;;  %s2035_s28 = smov 32  }
  0x12   : > { %v2129_v2 = vld [vmem:[%s456_s13] sm:$0xff]  ;;  %521 = vadd.xlane.f32.xlu0 %v476_v0  ;;  %v2132_v3 = vld [vmem:[%s456_s13 + $0x8] sm:$0xff]  ;;  %s471_s13 = scalar_lea.vmem %s2407_s12, %s2119_s25 }
  0x13   : > { %480 = vadd.xlane.f32.xlu1 %v2129_v2 }
  0x14   : > { %788 = vmatpush1.bf16.msra.mxu1 %v1940_v31  ;;  %1789 = vmatpush3.bf16.msra.mxu0 %v1943_v33 }
  0x15   : > { %789 = vmatprep.subr.bf16.mxu1 %v1941_v32  ;;  %1790 = vmatprep.subr.bf16.mxu0 %v2030_v6  ;;  %v1694_v32 = vld [vmem:[%s2404_s9] ss:$0 sm:$0xff] }
  0x16   : > { %523 = vadd.xlane.f32.xlu0 %v477_v1 }
  0x17   : > { %482 = vadd.xlane.f32.xlu1 %v2132_v3 }
  0x18   : > { %790 = vmatpush1.bf16.msra.mxu1 %v1944_v34  ;;  %1791 = vmatpush3.bf16.msra.mxu0 %v1947_v36 }
  0x19   : > { %791 = vmatprep.subr.bf16.mxu1 %v1945_v35  ;;  %1792 = vmatprep.subr.bf16.mxu0 %v2030_v6 }
  0x1c   : > { %792 = vmatpush1.bf16.msra.mxu1 %v1948_v37  ;;  %1793 = vmatpush3.bf16.msra.mxu0 %v1951_v40 }
  0x1d   : > { %793 = vmatprep.subr.bf16.mxu1 %v1949_v38  ;;  %1794 = vmatprep.subr.bf16.mxu0 %v2030_v6 }
  0x20   : > { %794 = vmatpush1.bf16.msra.mxu1 %v1952_v41  ;;  %1795 = vmatpush3.bf16.msra.mxu0 %v1955_v43 }
  0x21   : > { %795 = vmatprep.subr.bf16.mxu1 %v1953_v42  ;;  %1796 = vmatprep.subr.bf16.mxu0 %v2030_v6 }
  0x24   : > { %796 = vmatpush1.bf16.msra.mxu1 %v1956_v44  ;;  %1797 = vmatpush3.bf16.msra.mxu0 %v1957_v45 }
  0x25   : > { %1802 = vmatprep.subr.bf16.mxu1 %v2030_v6  ;;  %1814 = vmatprep.subr.bf16.mxu0 %v2030_v6 }
  0x9f   : > { %v522_v8 = vpop.xlane.xlu0 %521 }
  0xa0   : > { %v481_v9 = vpop.xlane.xlu1 %480  ;;  %v525_v10 = vmul.f32 0.0078125, %v522_v8 }
  0xa1   : > { %v485_v11 = vmul.f32 0.0078125, %v481_v9 }
  0xa2   : > { %v2145_v12 = vsub.f32 %v476_v0, %v525_v10 }
  0xa3   : > { %v2148_v13 = vsub.f32 %v2129_v2, %v485_v11  ;;  %v524_v14 = vpop.xlane.xlu0 %523 }
  0xa4   : > { %v483_v15 = vpop.xlane.xlu1 %482  ;;  %v526_v16 = vmul.f32 0.0078125, %v524_v14  ;;  %v529_v17 = vmul.f32 %v2145_v12, %v2145_v12 }
  0xa5   : > { %v486_v18 = vmul.f32 0.0078125, %v483_v15  ;;  %v489_v21 = vmul.f32 %v2148_v13, %v2148_v13 }
  0xa6   : > { %v2152_v19 = vsub.f32 %v477_v1, %v526_v16  ;;  %531 = vadd.xlane.f32.xlu0 %v529_v17 }
  0xa7   : > { %v2155_v20 = vsub.f32 %v2132_v3, %v486_v18 }
  0xa8   : > { %v530_v22 = vmul.f32 %v2152_v19, %v2152_v19 }
  0xa9   : > { %v490_v23 = vmul.f32 %v2155_v20, %v2155_v20 }
  0xaa   : > { %533 = vadd.xlane.f32.xlu1 %v530_v22  ;;  %491 = vadd.xlane.f32.xlu0 %v489_v21  ;;  %v689_v22 = vld [vmem:[%s2402_s7] sm:$0x3] }
  0xae   : > { %493 = vadd.xlane.f32.xlu1 %v490_v23 }
 0x133   : > { %v532_v46 = vpop.xlane.xlu0 %531 }
 0x134   : > { %v535_v47 = vmul.f32 0.0078125, %v532_v46 }
 0x136   : > { %v537_v48 = vadd.f32 1e-05, %v535_v47 }
 0x137   : > { %v492_v49 = vpop.xlane.xlu0 %491  ;;  %v534_v50 = vpop.xlane.xlu1 %533 }
 0x138   : > { %1966 = vrsqrt.f32 %v537_v48  ;;  %v495_v51 = vmul.f32 0.0078125, %v492_v49  ;;  %v536_v52 = vmul.f32 0.0078125, %v534_v50 }
 0x13a   : > { %v497_v53 = vadd.f32 1e-05, %v495_v51  ;;  %v538_v54 = vadd.f32 1e-05, %v536_v52 }
 0x13b   : > { %v494_v55 = vpop.xlane.xlu1 %493 }
 0x13c   : > { %1968 = vrsqrt.f32 %v497_v53  ;;  %v496_v56 = vmul.f32 0.0078125, %v494_v55 }
 0x13d   : > { %1970 = vrsqrt.f32 %v538_v54 }
 0x13e   : > { %v498_v57 = vadd.f32 1e-05, %v496_v56 }
 0x140   : > { %1972 = vrsqrt.f32 %v498_v57 }
 0x142   : > { %v1967_v58 = vpop.eup %1966 }
 0x143   : > { %v541_v59 = vmul.f32 %v1967_v58, %v2145_v12 }
 0x145   : > { %v549_v1 = vmul.f32 %v1692_v60, %v541_v59 }
 0x146   : > { %v1969_v61 = vpop.eup %1968 }
 0x147   : > { %v1971_v62 = vpop.eup %1970  ;;  %v501_v63 = vmul.f32 %v1969_v61, %v2148_v13  ;;  %v557_v11 = vadd.f32 %v1693_v5, %v549_v1  ;;  %v1691_v13 = vld [vmem:[%s2398_s3] ss:$0 sm:$0xff] }
 0x148   : > { %v542_v0 = vmul.f32 %v1971_v62, %v2152_v19  ;;  %v691_v19 = vlaneseq }
 0x149   : > { %v509_v10 = vmul.f32 %v1690_v4, %v501_v63  ;;  %v1958_v63 = vld [vmem:[%s2405_s10] sm:$0xff]  }
 0x14a   : > { %v1973_v7 = vpop.eup %1972  ;;  %v550_v8 = vmul.f32 %v1692_v60, %v542_v0 }
 0x14b   : > { %v502_v9 = vmul.f32 %v1973_v7, %v2155_v20  ;;  %v517_v16 = vadd.f32 %v1691_v13, %v509_v10  ;;  %v692_v20 = vshrl.u32 %v691_v19, 7 }
 0x14c   : > { %v558_v12 = vadd.f32 %v1693_v5, %v550_v8 }
 0x14d   : > { %v510_v14 = vmul.f32 %v1690_v4, %v502_v9  ;;  %v693_v21 = vsub.s32 0, %v692_v20  ;;  %v697_v23 = vsub.s32 1, %v692_v20 }
 0x14e   : > { %v688_v15 = vpack.c.bf16 %v558_v12, %v557_v11 }
 0x14f   : > { %v518_v17 = vadd.f32 %v1691_v13, %v510_v14  ;;  %v694_v24 = vrot.slane %v689_v22, %v693_v21  ;;  %v698_v26 = vrot.slane %v689_v22, %v697_v23 }
 0x150   : > { %814 = vmatmul.mubr.bf16.vlgmr.msra.gmra.mrb[0].mxu1 %v688_v15 }
 0x151   : > { %v575_v18 = vpack.c.bf16 %v518_v17, %v517_v16  ;;  %1804 = vmatprep.mubr.msk.bf16.mxu1 %vm2032_vm0, %v2030_v6  ;;  %v1959_v16 = vld [vmem:[%s2405_s10 + $0x8] sm:$0xff]  }
 0x153   : > { %1799 = vmatmul.mubr.bf16.vlgmr.msra.gmra.mrb[0].mxu0 %v575_v18 }
 0x154   : > { %1818 = vmatprep.mubr.msk.bf16.mxu0 %vm2032_vm0, %v2030_v6  ;;  %1815 = vmatpush3.bf16.msra.mxu0 %v1958_v63 }
 0x155   : > { %1816 = vmatprep.subr.bf16.mxu0 %v2030_v6 }
 0x158   : > { %1817 = vmatpush3.bf16.msra.mxu0 %v1959_v16 }
 0x159   : > { %1828 = vmatprep.subr.bf16.mxu0 %v2030_v6 }
 0x223   : > { %v815_v25 = vpop.f32.mrb[0].mxu1 }
 0x224   : > { %v817_v27 = vpop.f32.mrb[1].mxu1  ;;  %v816_v29 = vadd.f32 %v815_v25, %v694_v24 }
 0x225   : > { %v819_v28 = vpop.f32.mrb[2].mxu1  ;;  %v818_v34 = vadd.f32 %v817_v27, %v698_v26 }
 0x226   : > { %v820_v30 = vadd.f32 %v819_v28, %v694_v24  ;;  %v821_v31 = vpop.f32.mrb[3].mxu1  ;;  %v665_v33 = vpop.f32.mrb[0].mxu0 }
 0x227   : > { %v822_v35 = vadd.f32 %v821_v31, %v698_v26  ;;  %v1800_v36 = vpop.f32.mrb[1].mxu0  ;;  %v666_v40 = vadd.f32 %v1694_v32, %v665_v33 }
 0x228   : > { %v2263_v37 = vpack.c.bf16 %v820_v30, %v816_v29  ;;  %v668_v38 = vpop.f32.mrb[2].mxu0 }
 0x229   : > { %v2265_v39 = vpack.c.bf16 %v822_v35, %v818_v34  ;;  %v669_v41 = vadd.f32 %v1694_v32, %v668_v38  ;;  %v1801_v42 = vpop.f32.mrb[3].mxu0 }
 0x22a   : > { %v856_v43 = vsel %vm851_vm1, %v2263_v37, 0 }
 0x22b   : > { %v2269_v44 = vpack.c.bf16 %v669_v41, %v666_v40  ;;  %1803 = vmatpush3.bf16.xpose.msra.mxu1 %v856_v43 }
 0x22c   : > { %1808 = vmatprep.subr.bf16.mxu1 %v2030_v6 }
 0x232   : > { %1805 = vmatmul.mubr.msk.bf16.vlgmr.msra.gmra.mrb[4].mxu1 %vm851_vm1, %v2269_v44 }
 0x233   : > { %1809 = vmatpush3.bf16.msra.mxu1 %v2265_v39  ;;  %1810 = vmatprep.mubr.msk.bf16.mxu1 %vm2032_vm0, %v2030_v6 }
 0x234   : > { %1822 = vmatprep.subr.bf16.mxu1 %v2030_v6 }
 0x305   : > { %v892_v45 = vpop.f32.mrb[4].mxu1 }
 0x306   : > { %v899_v46 = vmul.f32 0.17677669, %v892_v45  ;;  %v1806_v47 = vpop.f32.mrb[5].mxu1 }
 0x307   : > { %v895_v48 = vpop.f32.mrb[6].mxu1 }
 0x308   : > { %v900_v49 = vmul.f32 0.17677669, %v895_v48  ;;  %v1807_v50 = vpop.f32.mrb[7].mxu1  ;;  %v902_v51 = vsel %vm901_vm2, %v899_v46, -inf }
 0x309   : > { %903 = vmax.xlane.f32.xlu0 %v902_v51 }
 0x30a   : > { %v905_v52 = vsel %vm901_vm2, %v900_v49, -inf }
 0x30b   : > { %906 = vmax.xlane.f32.xlu1 %v905_v52 }
 0x396   : > { %v904_v53 = vpop.xlane.xlu0 %903 }
 0x397   : > { %v908_v54 = vsub.f32 %v899_v46, %v904_v53 }
 0x398   : > { %v907_v55 = vpop.xlane.xlu1 %906 }
 0x399   : > { %v910_v56 = vmul.f32 1.442695, %v908_v54  ;;  %v909_v57 = vsub.f32 %v900_v49, %v907_v55 }
 0x39b   : > { %1974 = vpow2.f32 %v910_v56  ;;  %v912_v58 = vmul.f32 1.442695, %v909_v57 }
 0x39d   : > { %1976 = vpow2.f32 %v912_v58 }
 0x3a5   : > { %v1975_v59 = vpop.eup %1974 }
 0x3a6   : > { %v914_v60 = vsel %vm901_vm2, %v1975_v59, 0.0 }
 0x3a7   : > { %v1977_v61 = vpop.eup %1976  ;;  %915 = vadd.xlane.f32.xlu0 %v914_v60 }
 0x3a8   : > { %v917_v62 = vsel %vm901_vm2, %v1977_v61, 0.0 }
 0x3a9   : > { %918 = vadd.xlane.f32.xlu1 %v917_v62 }
 0x3ba   : > { %1030 = vrot.lane.b32.xlu1 %v2269_v44, %s2033_s18 }
 0x3bd   : > { %1033 = vrot.lane.b32.xlu0 %v2263_v37, %s2033_s18 }
 0x3be   : > { %1216 = vrot.lane.b32.xlu1 %v2263_v37, %s2034_s19 }
 0x3c2   : > { %1214 = vrot.lane.b32.xlu1 %v2269_v44, %s2034_s19 }
 0x434   : > { %v916_v0 = vpop.xlane.xlu0 %915 }
 0x435   : > { %1978 = vrcp.f32 %v916_v0 }
 0x436   : > { %v919_v1 = vpop.xlane.xlu1 %918 }
 0x437   : > { %1980 = vrcp.f32 %v919_v1 }
 0x438   : > { %v1034_v9 = vpop.permute.xlu0 %1033 }
 0x439   : > { %v1039_v12 = vsel %vm851_vm1, %v1034_v9, 0 }
 0x43a   : > { %v1031_v11 = vpop.permute.xlu1 %1030 }
 0x43e   : > { %v1217_v13 = vpop.permute.xlu1 %1216 }
 0x43f   : > { %v1979_v4 = vpop.eup %1978  ;;  %v1222_v14 = vsel %vm851_vm1, %v1217_v13, 0 }
 0x440   : > { %v922_v7 = vmul.f32 %v1979_v4, %v1975_v59 }
 0x441   : > { %v1981_v5 = vpop.eup %1980 }
 0x442   : > { %v923_v8 = vmul.f32 %v1981_v5, %v1977_v61  ;;  %v1215_v15 = vpop.permute.xlu1 %1214 }
 0x444   : > { %v924_v10 = vpack.c.bf16 %v923_v8, %v922_v7 }
 0x446   : > { %1811 = vmatmul.mubr.msk.bf16.vlgmr.msra.gmra.mrb[8].mxu1 %vm901_vm2, %v924_v10 }
 0x447   : > { %1823 = vmatpush3.bf16.xpose.msra.mxu1 %v1039_v12  ;;  %1824 = vmatprep.mubr.msk.bf16.mxu1 %vm2032_vm0, %v2030_v6 }
 0x448   : > { %1842 = vmatprep.subr.bf16.mxu1 %v2030_v6 }
 0x44e   : > { %1825 = vmatmul.mubr.msk.bf16.vlgmr.msra.gmra.mrb[12].mxu1 %vm851_vm1, %v1031_v11 }
 0x44f   : > { %1843 = vmatpush3.bf16.xpose.msra.mxu1 %v1222_v14  ;;  %1844 = vmatprep.mubr.msk.bf16.mxu1 %vm2032_vm0, %v2030_v6 }
 0x450   : > { %1848 = vmatprep.subr.bf16.mxu1 %v2030_v6 }
 0x456   : > { %1845 = vmatmul.mubr.msk.bf16.vlgmr.msra.gmra.mrb[16].mxu1 %vm851_vm1, %v1215_v15 }
 0x457   : > { %1850 = vmatprep.mubr.msk.bf16.mxu1 %vm2032_vm0, %v2030_v6 }
 0x519   : > { %v963_v17 = vpop.f32.mrb[8].mxu1 }
 0x51a   : > { %v1812_v18 = vpop.f32.mrb[9].mxu1 }
 0x51b   : > { %v966_v19 = vpop.f32.mrb[10].mxu1 }
 0x51c   : > { %v970_v20 = vpack.c.bf16 %v966_v19, %v963_v17  ;;  %v1813_v21 = vpop.f32.mrb[11].mxu1 }
 0x51e   : > { %1819 = vmatmul.mubr.msk.bf16.vlgmr.msra.gmra.mrb[4].mxu0 %vm851_vm1, %v970_v20 }
 0x51f   : > { %1830 = vmatprep.mubr.msk.bf16.mxu0 %vm2032_vm0, %v2030_v6 }
 0x521   : > { %v1075_v22 = vpop.f32.mrb[12].mxu1 }
 0x522   : > { %v1826_v23 = vpop.f32.mrb[13].mxu1  ;;  %v1082_v34 = vmul.f32 0.17677669, %v1075_v22 }
 0x523   : > { %v1078_v24 = vpop.f32.mrb[14].mxu1 }
 0x524   : > { %v1827_v25 = vpop.f32.mrb[15].mxu1  ;;  %v1084_v35 = vsel %vm901_vm2, %v1082_v34, -inf  ;;  %v1083_v53 = vmul.f32 0.17677669, %v1078_v24 }
 0x526   : > { %v1087_v54 = vsel %vm901_vm2, %v1083_v53, -inf }
 0x529   : > { %v1258_v26 = vpop.f32.mrb[16].mxu1 }
 0x52a   : > { %v1265_v27 = vmul.f32 0.17677669, %v1258_v26  ;;  %v1846_v28 = vpop.f32.mrb[17].mxu1 }
 0x52b   : > { %v1261_v29 = vpop.f32.mrb[18].mxu1 }
 0x52c   : > { %v1266_v30 = vmul.f32 0.17677669, %v1261_v29  ;;  %v1847_v31 = vpop.f32.mrb[19].mxu1  ;;  %v1267_v32 = vsel %vm901_vm2, %v1265_v27, -inf  ;;  %v1960_v29 = vld [vmem:[%s2405_s10 + $0x10] sm:$0xff]  }
 0x52d   : > { %1268 = vmax.xlane.f32.xlu0 %v1267_v32 }
 0x52e   : > { %v1270_v33 = vsel %vm901_vm2, %v1266_v30, -inf }
 0x52f   : > { %1271 = vmax.xlane.f32.xlu1 %v1270_v33 }
 0x540   : > { %1398 = vrot.lane.b32.xlu1 %v2263_v37, %s2035_s28 }
 0x544   : > { %1396 = vrot.lane.b32.xlu1 %v2269_v44, %s2035_s28 }
 0x568   : > { %1085 = vmax.xlane.f32.xlu1 %v1084_v35 }
 0x579   : > { %1108 = vrot.lane.b32.xlu1 %v2265_v39, %s2033_s18 }
 0x57d   : > { %1472 = vrot.lane.b32.xlu1 %v2265_v39, %s2035_s28 }
 0x5ba   : > { %v1269_v36 = vpop.xlane.xlu0 %1268 }
 0x5bb   : > { %v1273_v38 = vsub.f32 %v1265_v27, %v1269_v36 }
 0x5bc   : > { %v1272_v40 = vpop.xlane.xlu1 %1271 }
 0x5bd   : > { %v1275_v41 = vmul.f32 1.442695, %v1273_v38  ;;  %v1274_v42 = vsub.f32 %v1266_v30, %v1272_v40  ;;  %v1961_v30 = vld [vmem:[%s2405_s10 + $0x18] sm:$0xff]  }
 0x5bf   : > { %1982 = vpow2.f32 %v1275_v41  ;;  %v1277_v43 = vmul.f32 1.442695, %v1274_v42 }
 0x5c0   : > { %v1399_v47 = vpop.permute.xlu1 %1398 }
 0x5c1   : > { %1984 = vpow2.f32 %v1277_v43  ;;  %v1404_v0 = vsel %vm851_vm1, %v1399_v47, 0 }
 0x5c4   : > { %v1397_v48 = vpop.permute.xlu1 %1396 }
 0x5c9   : > { %v1983_v37 = vpop.eup %1982 }
 0x5ca   : > { %v1279_v44 = vsel %vm901_vm2, %v1983_v37, 0.0 }
 0x5cb   : > { %v1985_v45 = vpop.eup %1984  ;;  %1280 = vadd.xlane.f32.xlu0 %v1279_v44 }
 0x5cc   : > { %v1282_v46 = vsel %vm901_vm2, %v1985_v45, 0.0 }
 0x5cf   : > { %1283 = vadd.xlane.f32.xlu0 %v1282_v46 }
 0x5e5   : > { %1290 = vrot.lane.b32.xlu0 %v2265_v39, %s2034_s19 }
 0x5f5   : > { %v1086_v49 = vpop.xlane.xlu1 %1085 }
 0x5f6   : > { %v1090_v50 = vsub.f32 %v1082_v34, %v1086_v49 }
 0x5f8   : > { %v1092_v51 = vmul.f32 1.442695, %v1090_v50 }
 0x5f9   : > { %v1109_v52 = vpop.permute.xlu1 %1108 }
 0x5fa   : > { %1986 = vpow2.f32 %v1092_v51  ;;  %1829 = vmatpush3.bf16.msra.mxu0 %v1109_v52 }
 0x5fb   : > { %1834 = vmatprep.subr.bf16.mxu0 %v2030_v6 }
 0x5fd   : > { %v1473_v49 = vpop.permute.xlu1 %1472 }
 0x604   : > { %v1987_v55 = vpop.eup %1986  ;;  %1088 = vmax.xlane.f32.xlu0 %v1087_v54 }
 0x605   : > { %v1096_v56 = vsel %vm901_vm2, %v1987_v55, 0.0 }
 0x608   : > { %1097 = vadd.xlane.f32.xlu0 %v1096_v56  ;;  %v1964_v56 = vld [vmem:[%s2405_s10 + $0x30] sm:$0xff]  }
 0x658   : > { %v1281_v57 = vpop.xlane.xlu0 %1280 }
 0x659   : > { %1988 = vrcp.f32 %v1281_v57 }
 0x65c   : > { %v1284_v39 = vpop.xlane.xlu0 %1283 }
 0x65d   : > { %1990 = vrcp.f32 %v1284_v39  ;;  %v1965_v39 = vld [vmem:[%s2405_s10 + $0x38] sm:$0xff]  }
 0x660   : > { %v1291_v58 = vpop.permute.xlu0 %1290 }
 0x661   : > { %1849 = vmatpush3.bf16.msra.mxu1 %v1291_v58 }
 0x662   : > { %1862 = vmatprep.subr.bf16.mxu1 %v2030_v6 }
 0x663   : > { %v1989_v59 = vpop.eup %1988 }
 0x664   : > { %v1287_v61 = vmul.f32 %v1989_v59, %v1983_v37 }
 0x667   : > { %v1991_v60 = vpop.eup %1990 }
 0x668   : > { %v1288_v62 = vmul.f32 %v1991_v60, %v1985_v45  ;;  %v1962_v45 = vld [vmem:[%s2405_s10 + $0x20] sm:$0xff]  }
 0x66a   : > { %v1289_v63 = vpack.c.bf16 %v1288_v62, %v1287_v61 }
 0x66c   : > { %1851 = vmatmul.mubr.msk.bf16.vlgmr.msra.gmra.mrb[20].mxu1 %vm901_vm2, %v1289_v63  ;;  %v1719_v63 = vld [vmem:[%s2406_s11] ss:$0 sm:$0xff] }
 0x66d   : > { %1863 = vmatpush3.bf16.xpose.msra.mxu1 %v1404_v0  ;;  %1864 = vmatprep.mubr.msk.bf16.mxu1 %vm2032_vm0, %v2030_v6  ;;  %v847_v0 = vadd.f32 %v1719_v63, %v2129_v2 }
 0x674   : > { %1865 = vmatmul.mubr.msk.bf16.vlgmr.msra.gmra.mrb[24].mxu1 %vm851_vm1, %v1397_v48  ;;  %v1963_v48 = vld [vmem:[%s2405_s10 + $0x28] sm:$0xff]  }
 0x691   : > { %v1089_v1 = vpop.xlane.xlu0 %1088 }
 0x692   : > { %v1091_v4 = vsub.f32 %v1083_v53, %v1089_v1 }
 0x694   : > { %v1094_v5 = vmul.f32 1.442695, %v1091_v4 }
 0x695   : > { %v1098_v9 = vpop.xlane.xlu0 %1097 }
 0x696   : > { %1992 = vpow2.f32 %v1094_v5 }
 0x697   : > { %1994 = vrcp.f32 %v1098_v9 }
 0x6a0   : > { %v1993_v7 = vpop.eup %1992 }
 0x6a1   : > { %v1099_v8 = vsel %vm901_vm2, %v1993_v7, 0.0  ;;  %v1995_v11 = vpop.eup %1994 }
 0x6a2   : > { %1100 = vadd.xlane.f32.xlu0 %v1099_v8  ;;  %v1104_v13 = vmul.f32 %v1995_v11, %v1987_v55 }
 0x72f   : > { %v1101_v10 = vpop.xlane.xlu0 %1100 }
 0x730   : > { %1996 = vrcp.f32 %v1101_v10 }
 0x73a   : > { %v1997_v12 = vpop.eup %1996 }
 0x73b   : > { %v1105_v14 = vmul.f32 %v1997_v12, %v1993_v7 }
 0x73d   : > { %v1106_v15 = vpack.c.bf16 %v1105_v14, %v1104_v13 }
 0x73f   : > { %1831 = vmatmul.mubr.msk.bf16.vlgmr.msra.gmra.mrb[8].mxu0 %vm901_vm2, %v1106_v15  ;;  %v1330_v16 = vpop.f32.mrb[20].mxu1 }
 0x740   : > { %v1852_v17 = vpop.f32.mrb[21].mxu1  ;;  %1838 = vmatprep.mubr.msk.bf16.mxu0 %vm2032_vm0, %v2030_v6  ;;  %1835 = vmatpush3.bf16.msra.mxu0 %v1960_v29 }
 0x741   : > { %v1333_v18 = vpop.f32.mrb[22].mxu1  ;;  %1836 = vmatprep.subr.bf16.mxu0 %v2030_v6 }
 0x742   : > { %v1337_v19 = vpack.c.bf16 %v1333_v18, %v1330_v16  ;;  %v1853_v20 = vpop.f32.mrb[23].mxu1 }
 0x744   : > { %1837 = vmatpush3.bf16.msra.mxu0 %v1961_v30 }
 0x745   : > { %1854 = vmatprep.subr.bf16.mxu0 %v2030_v6 }
 0x747   : > { %v1440_v21 = vpop.f32.mrb[24].mxu1 }
 0x748   : > { %v1447_v22 = vmul.f32 0.17677669, %v1440_v21  ;;  %v1866_v23 = vpop.f32.mrb[25].mxu1 }
 0x749   : > { %v1443_v24 = vpop.f32.mrb[26].mxu1 }
 0x74a   : > { %v1448_v25 = vmul.f32 0.17677669, %v1443_v24  ;;  %v1867_v26 = vpop.f32.mrb[27].mxu1  ;;  %v1449_v27 = vsel %vm901_vm2, %v1447_v22, -inf }
 0x74b   : > { %1450 = vmax.xlane.f32.xlu0 %v1449_v27 }
 0x74c   : > { %v1452_v28 = vsel %vm901_vm2, %v1448_v25, -inf }
 0x74f   : > { %1453 = vmax.xlane.f32.xlu0 %v1452_v28 }
 0x7d8   : > { %v1451_v31 = vpop.xlane.xlu0 %1450 }
 0x7d9   : > { %v1455_v32 = vsub.f32 %v1447_v22, %v1451_v31 }
 0x7db   : > { %v1457_v33 = vmul.f32 1.442695, %v1455_v32 }
 0x7dc   : > { %v1454_v34 = vpop.xlane.xlu0 %1453 }
 0x7dd   : > { %1998 = vpow2.f32 %v1457_v33  ;;  %v1456_v35 = vsub.f32 %v1448_v25, %v1454_v34 }
 0x7df   : > { %v1459_v36 = vmul.f32 1.442695, %v1456_v35 }
 0x7e1   : > { %2000 = vpow2.f32 %v1459_v36 }
 0x7e7   : > { %v1999_v38 = vpop.eup %1998 }
 0x7e8   : > { %v1461_v40 = vsel %vm901_vm2, %v1999_v38, 0.0 }
 0x7e9   : > { %1462 = vadd.xlane.f32.xlu0 %v1461_v40 }
 0x7eb   : > { %v2001_v41 = vpop.eup %2000 }
 0x7ec   : > { %v1464_v42 = vsel %vm901_vm2, %v2001_v41, 0.0 }
 0x7ed   : > { %1465 = vadd.xlane.f32.xlu0 %v1464_v42 }
 0x812   : > { %v1148_v43 = vpop.f32.mrb[8].mxu0 }
 0x813   : > { %v1832_v37 = vpop.f32.mrb[9].mxu0 }
 0x814   : > { %v1151_v44 = vpop.f32.mrb[10].mxu0 }
 0x815   : > { %v1155_v46 = vpack.c.bf16 %v1151_v44, %v1148_v43  ;;  %v1833_v47 = vpop.f32.mrb[11].mxu0 }
 0x817   : > { %1839 = vmatmul.mubr.msk.bf16.vlgmr.msra.gmra.mrb[4].mxu0 %vm851_vm1, %v1155_v46 }
 0x818   : > { %1855 = vmatpush3.bf16.msra.mxu0 %v1962_v45  ;;  %1858 = vmatprep.mubr.msk.bf16.mxu0 %vm2032_vm0, %v2030_v6 }
 0x819   : > { %1856 = vmatprep.subr.bf16.mxu0 %v2030_v6 }
 0x81c   : > { %1857 = vmatpush3.bf16.msra.mxu0 %v1963_v48 }
 0x81d   : > { %1868 = vmatprep.subr.bf16.mxu0 %v2030_v6 }
 0x823   : > { %1859 = vmatmul.mubr.msk.bf16.vlgmr.msra.gmra.mrb[4].mxu0 %vm851_vm1, %v1337_v19 }
 0x824   : > { %1869 = vmatpush3.bf16.msra.mxu0 %v1473_v49  ;;  %1870 = vmatprep.mubr.msk.bf16.mxu0 %vm2032_vm0, %v2030_v6 }
 0x825   : > { %1874 = vmatprep.subr.bf16.mxu0 %v2030_v6 }
 0x876   : > { %v1463_v50 = vpop.xlane.xlu0 %1462 }
 0x877   : > { %2002 = vrcp.f32 %v1463_v50 }
 0x87a   : > { %v1466_v51 = vpop.xlane.xlu0 %1465 }
 0x87b   : > { %2004 = vrcp.f32 %v1466_v51 }
 0x881   : > { %v2003_v52 = vpop.eup %2002 }
 0x882   : > { %v1469_v54 = vmul.f32 %v2003_v52, %v1999_v38 }
 0x885   : > { %v2005_v53 = vpop.eup %2004 }
 0x886   : > { %v1470_v55 = vmul.f32 %v2005_v53, %v2001_v41 }
 0x888   : > { %v1471_v57 = vpack.c.bf16 %v1470_v55, %v1469_v54 }
 0x88a   : > { %1871 = vmatmul.mubr.msk.bf16.vlgmr.msra.gmra.mrb[12].mxu0 %vm901_vm2, %v1471_v57 }
 0x88b   : > { %1875 = vmatpush3.bf16.msra.mxu0 %v1964_v56  ;;  %1878 = vmatprep.mubr.msk.bf16.mxu0 %vm2032_vm0, %v2030_v6 }
 0x88c   : > { %1876 = vmatprep.subr.bf16.mxu0 %v2030_v6  ;;  %v848_v6 = vadd.f32 %v1719_v63, %v2132_v3 }
 0x88f   : > { %1877 = vmatpush3.bf16.msra.mxu0 %v1965_v39 }
 0x95d   : > { %v1512_v58 = vpop.f32.mrb[12].mxu0 }
 0x95e   : > { %v1872_v59 = vpop.f32.mrb[13].mxu0 }
 0x95f   : > { %v1515_v60 = vpop.f32.mrb[14].mxu0 }
 0x960   : > { %v1519_v61 = vpack.c.bf16 %v1515_v60, %v1512_v58  ;;  %v1873_v62 = vpop.f32.mrb[15].mxu0 }
 0x962   : > { %1879 = vmatmul.mubr.msk.bf16.vlgmr.msra.gmra.mrb[4].mxu0 %vm851_vm1, %v1519_v61 }
 0xa35   : > { %v1569_v1 = vpop.f32.mrb[4].mxu0 }
 0xa36   : > { %v1882_v4 = vadd.f32 %v1569_v1, %v847_v0  ;;  %v1880_v5 = vpop.f32.mrb[5].mxu0 }
 0xa37   : > { %v1572_v7 = vpop.f32.mrb[6].mxu0 }
 0xa38   : > { %1578 = vst [vmem:[%s471_s13] sm:$0xff] %v1882_v4  ;;  %v1883_v8 = vadd.f32 %v1572_v7, %v848_v6  ;;  %v1881_v9 = vpop.f32.mrb[7].mxu0 }
 0xa3a   : > { %1579 = vst [vmem:[%s471_s13 + $0x8] sm:$0xff] %v1883_v8 }
 0xa3b PF: > { %s22_s23 = sadd.s32 1, %s2028_s23   ;;  %s2408_s21 = smov %s2024_s22 }
 0xa3c   : > { %p19_p5 = scmp.ge.s32.totalorder %s22_s23, 4   ;;  %s2409_s22 = smov %s2411_s24 }
 0xa3e   :  { %21 = sbr.rel (!%p19_p5) target bundleno = 2 (0x2), region = 101 }

// kernel: decoder_forward.10
= control target key start
LH: loop header
LB: loop body
LE: loop exit
PB: predicated region body
PF: predicated region fallthrough
CT: control target
= control target key end

     0   :  { %s1751_s24 = smov 0   ;;  %s2009_s0 = inlined_call_operand.vmem [shape: f32[2,16,128], index: 0, kind: input, shape index: {}]   ;;  %s2010_s1 = inlined_call_operand.vmem [shape: f32[1,128], index: 1, kind: input, shape index: {}]   ;;  %s2011_s2 = inlined_call_operand.vmem [shape: f32[1,128], index: 2, kind: input, shape index: {}]   ;;  %s2012_s3 = inlined_call_operand.vmem [shape: bf16[128,384], index: 3, kind: input, shape index: {}]   ;;  %s2013_s4 = inlined_call_operand.vmem [shape: f32[1,384], index: 4, kind: input, shape index: {}]   ;;  %s2014_s5 = inlined_call_operand.vmem [shape: bf16[128,128], index: 5, kind: input, shape index: {}]   ;;  %s2015_s6 = inlined_call_operand.vmem [shape: f32[1,128], index: 6, kind: input, shape index: {}]   ;;  %s2016_s7 = inlined_call_operand.vmem [shape: f32[2,16,128], index: 7, kind: output, shape index: {}]  }
   0x1 LB: > { %s1396_s25 = sadd.s32 4294967295, %s1703_s24   ;;  %p1400_p0 = scmp.ge.s32.totalorder %s1703_s24, 1  ;;  %s1703_s24 = sphi %s1751_s24, %s17_s24  }
   0x2   : > { %p237_p1 = scmp.lt.s32.totalorder %s1703_s24, 3 }
   0x4   : > { %p238_p2 = pnand %p1400_p0, %p237_p1 }
   0x5   : > { %p269_p3 = scmp.lt.s32.totalorder (!%p238_p2), %s1396_s25, 1  ;;  %v1621_v2 = vld [vmem:[%s2012_s3 + $0x4] ss:$12 sps:$4 sm:$0xff] (!%p238_p2)   ;;  %v1623_v3 = vld [vmem:[%s2012_s3] ss:$12 sps:$4 sm:$0xff] (!%p238_p2)   ;;  %v1705_v4 = vmov (!%p238_p2), 0.0   ;;  %v358_v53 = vlaneseq (!%p238_p2) }
   0x6   : > { %241 = sbr.rel (%p238_p2) target bundleno = 2618 (0xa3a), region = 48  ;;  %1493 = vmatprep.subr.bf16.mxu1 (!%p238_p2), %v1705_v4  ;;  %v1624_v5 = vld [vmem:[%s2012_s3 + $0x8] ss:$12 sps:$4 sm:$0xff] (!%p238_p2)   ;;  %501 = vmatprep.subr.bf16.mxu0 (!%p238_p2), %v1621_v2  ;;  %v1627_v15 = vld [vmem:[%s2012_s3 + $0x18] ss:$12 sps:$4 sm:$0xff] (!%p238_p2)   ;;  %v1706_v30 = vmov (!%p238_p2), 0  }
   0x7   : > { %v1625_v6 = vld [vmem:[%s2012_s3 + $0x1c] ss:$12 sps:$4 sm:$0xff] (!%p238_p2)   ;;  %502 = vmatpush1.bf16.msra.mxu0 (!%p238_p2), %v1623_v3  ;;  %1494 = vmatpush3.bf16.msra.mxu1 (!%p238_p2), %v1624_v5  ;;  %v1628_v16 = vld [vmem:[%s2012_s3 + $0x20] ss:$12 sps:$4 sm:$0xff] (!%p238_p2)   ;;  %v1632_v19 = vld [vmem:[%s2012_s3 + $0x38] ss:$12 sps:$4 sm:$0xff] (!%p238_p2)  }
   0x8   : > { %503 = vmatprep.subr.bf16.mxu0 (!%p238_p2), %v1625_v6  ;;  %1495 = vmatprep.subr.bf16.mxu1 (!%p238_p2), %v1705_v4  ;;  %v1629_v17 = vld [vmem:[%s2012_s3 + $0x34] ss:$12 sps:$4 sm:$0xff] (!%p238_p2)   ;;  %v1631_v18 = vld [vmem:[%s2012_s3 + $0x30] ss:$12 sps:$4 sm:$0xff] (!%p238_p2)   ;;  %v1633_v20 = vld [vmem:[%s2012_s3 + $0x4c] ss:$12 sps:$4 sm:$0xff] (!%p238_p2)  }
   0x9   : > { %v1635_v21 = vld [vmem:[%s2012_s3 + $0x48] ss:$12 sps:$4 sm:$0xff] (!%p238_p2)   ;;  %v1636_v22 = vld [vmem:[%s2012_s3 + $0x50] ss:$12 sps:$4 sm:$0xff] (!%p238_p2)   ;;  %v1639_v24 = vld [vmem:[%s2012_s3 + $0x60] ss:$12 sps:$4 sm:$0xff] (!%p238_p2)   ;;  %533 = vmatprep.mubr.bf16.mxu0 (!%p238_p2), %v1706_v30 }
   0xa   : > { %v1637_v23 = vld [vmem:[%s2012_s3 + $0x64] ss:$12 sps:$4 sm:$0xff] (!%p238_p2)   ;;  %v1640_v25 = vld [vmem:[%s2012_s3 + $0x68] ss:$12 sps:$4 sm:$0xff] (!%p238_p2)   ;;  %v1644_v28 = vld [vmem:[%s2012_s3 + $0x80] ss:$12 sps:$4 sm:$0xff] (!%p238_p2)  }
   0xb   : > { %504 = vmatpush1.bf16.msra.mxu0 (!%p238_p2), %v1627_v15  ;;  %1496 = vmatpush3.bf16.msra.mxu1 (!%p238_p2), %v1628_v16  ;;  %v1641_v26 = vld [vmem:[%s2012_s3 + $0x7c] ss:$12 sps:$4 sm:$0xff] (!%p238_p2)   ;;  %v1643_v27 = vld [vmem:[%s2012_s3 + $0x78] ss:$12 sps:$4 sm:$0xff] (!%p238_p2)   ;;  %v1645_v29 = vld [vmem:[%s2012_s3 + $0x94] ss:$12 sps:$4 sm:$0xff] (!%p238_p2)  }
   0xc   : > { %1497 = vmatprep.subr.bf16.mxu1 (!%p238_p2), %v1705_v4  ;;  %505 = vmatprep.subr.bf16.mxu0 (!%p238_p2), %v1629_v17  ;;  %vm1707_vm0 = vmmov (!%p238_p2), 0   ;;  %v1647_v31 = vld [vmem:[%s2012_s3 + $0x90] ss:$12 sps:$4 sm:$0xff] (!%p238_p2)   ;;  %v1648_v32 = vld [vmem:[%s2012_s3 + $0x98] ss:$12 sps:$4 sm:$0xff] (!%p238_p2)   ;;  %v359_v54 = vshrl.u32 (!%p238_p2), %v358_v53, 7 }
   0xd   : > { %s2018_s25 = smov (!%p269_p3, %s1396_s25), 1  ;;  %1509 = vmatprep.mubr.msk.bf16.mxu1 %vm1707_vm0, %v1705_v4  ;;  %v1649_v33 = vld [vmem:[%s2012_s3 + $0xac] ss:$12 sps:$4 sm:$0xff]   ;;  %v1651_v34 = vld [vmem:[%s2012_s3 + $0xa8] ss:$12 sps:$4 sm:$0xff]   ;;  %vm612_vm1 = vcmask 261120  }
   0xe   : > { %s1454_s26 = sshll.u32 %s2018_s25, 4  ;;  %v1652_v35 = vld [vmem:[%s2012_s3 + $0xb0] ss:$12 sps:$4 sm:$0xff]   ;;  %v1405_v44 = vld [vmem:[%s2010_s1] ss:$0 sm:$0xff]  ;;  %v360_v55 = vsub.s32 0, %v359_v54 }
   0xf   : > { %s273_s29 = scalar_lea.vmem %s2009_s0, %s1454_s26  ;;  %506 = vmatpush1.bf16.msra.mxu0 %v1631_v18  ;;  %1498 = vmatpush3.bf16.msra.mxu1 %v1632_v19  ;;  %v1406_v48 = vld [vmem:[%s2011_s2] ss:$0 sm:$0xff]  ;;  %v368_v56 = vsub.s32 2, %v359_v54  ;;  %v364_v58 = vsub.s32 1, %v359_v54  ;;  %vm662_vm2 = vcmask 130048   ;;  %s1708_s21 = smov 96  }
  0x10   : > { %v1767_v0 = vld [vmem:[%s273_s29] sm:$0xff]  ;;  %v1769_v1 = vld [vmem:[%s273_s29 + $0x8] sm:$0xff]  ;;  %1499 = vmatprep.subr.bf16.mxu1 %v1705_v4  ;;  %507 = vmatprep.subr.bf16.mxu0 %v1633_v20  ;;  %s1709_s22 = smov 64   ;;  %s1710_s30 = smov 32  }
  0x11   : > { %284 = vadd.xlane.f32.xlu0 %v1767_v0  ;;  %v356_v57 = vld [vmem:[%s2013_s4] sm:$0x7]  ;;  %s278_s27 = scalar_lea.vmem %s2016_s7, %s1454_s26 }
  0x12   : > { %v361_v59 = vrot.slane %v356_v57, %v360_v55  ;;  %v369_v60 = vrot.slane %v356_v57, %v368_v56  ;;  %v365_v63 = vrot.slane %v356_v57, %v364_v58 }
  0x13   : > { %508 = vmatpush1.bf16.msra.mxu0 %v1635_v21  ;;  %1500 = vmatpush3.bf16.msra.mxu1 %v1636_v22 }
  0x14   : > { %1501 = vmatprep.subr.bf16.mxu1 %v1705_v4  ;;  %509 = vmatprep.subr.bf16.mxu0 %v1637_v23 }
  0x15   : > { %286 = vadd.xlane.f32.xlu0 %v1769_v1 }
  0x17   : > { %510 = vmatpush1.bf16.msra.mxu0 %v1639_v24  ;;  %1502 = vmatpush3.bf16.msra.mxu1 %v1640_v25 }
  0x18   : > { %511 = vmatprep.subr.bf16.mxu0 %v1641_v26  ;;  %1503 = vmatprep.subr.bf16.mxu1 %v1705_v4 }
  0x1b   : > { %512 = vmatpush1.bf16.msra.mxu0 %v1643_v27  ;;  %1504 = vmatpush3.bf16.msra.mxu1 %v1644_v28 }
  0x1c   : > { %513 = vmatprep.subr.bf16.mxu0 %v1645_v29  ;;  %1505 = vmatprep.subr.bf16.mxu1 %v1705_v4 }
  0x1f   : > { %514 = vmatpush1.bf16.msra.mxu0 %v1647_v31  ;;  %1506 = vmatpush3.bf16.msra.mxu1 %v1648_v32 }
  0x20   : > { %515 = vmatprep.subr.bf16.mxu0 %v1649_v33  ;;  %1507 = vmatprep.subr.bf16.mxu1 %v1705_v4 }
  0x23   : > { %516 = vmatpush1.bf16.msra.mxu0 %v1651_v34  ;;  %1508 = vmatpush3.bf16.msra.mxu1 %v1652_v35 }
  0x24   : > { %1513 = vmatprep.subr.bf16.mxu1 %v1705_v4  ;;  %1525 = vmatprep.subr.bf16.mxu0 %v1705_v4 }
  0x9e   : > { %v285_v7 = vpop.xlane.xlu0 %284 }
  0x9f   : > { %v289_v8 = vmul.f32 0.0078125, %v285_v7 }
  0xa1   : > { %v1788_v9 = vsub.f32 %v1767_v0, %v289_v8 }
  0xa2   : > { %v287_v10 = vpop.xlane.xlu0 %286 }
  0xa3   : > { %v290_v11 = vmul.f32 0.0078125, %v287_v10  ;;  %v293_v12 = vmul.f32 %v1788_v9, %v1788_v9 }
  0xa5   : > { %v1793_v13 = vsub.f32 %v1769_v1, %v290_v11  ;;  %295 = vadd.xlane.f32.xlu1 %v293_v12 }
  0xa7   : > { %v294_v14 = vmul.f32 %v1793_v13, %v1793_v13 }
  0xa9   : > { %297 = vadd.xlane.f32.xlu1 %v294_v14 }
 0x132   : > { %v296_v36 = vpop.xlane.xlu1 %295 }
 0x133   : > { %v299_v37 = vmul.f32 0.0078125, %v296_v36 }
 0x135   : > { %v301_v38 = vadd.f32 1e-05, %v299_v37  ;;  %v1653_v37 = vld [vmem:[%s2014_s5] sm:$0xff]  }
 0x136   : > { %v298_v39 = vpop.xlane.xlu1 %297 }
 0x137   : > { %1661 = vrsqrt.f32 %v301_v38  ;;  %v300_v40 = vmul.f32 0.0078125, %v298_v39 }
 0x139   : > { %v302_v41 = vadd.f32 1e-05, %v300_v40 }
 0x13b   : > { %1663 = vrsqrt.f32 %v302_v41 }
 0x141   : > { %v1662_v42 = vpop.eup %1661 }
 0x142   : > { %v305_v43 = vmul.f32 %v1662_v42, %v1788_v9 }
 0x144   : > { %v313_v47 = vmul.f32 %v1405_v44, %v305_v43 }
 0x145   : > { %v1664_v45 = vpop.eup %1663 }
 0x146   : > { %v306_v46 = vmul.f32 %v1664_v45, %v1793_v13  ;;  %v321_v50 = vadd.f32 %v1406_v48, %v313_v47 }
 0x148   : > { %v314_v49 = vmul.f32 %v1405_v44, %v306_v46 }
 0x14a   : > { %v322_v51 = vadd.f32 %v1406_v48, %v314_v49 }
 0x14c   : > { %v355_v52 = vpack.c.bf16 %v322_v51, %v321_v50  ;;  %v1654_v51 = vld [vmem:[%s2014_s5 + $0x8] sm:$0xff]  }
 0x14e   : > { %534 = vmatmul.mubr.bf16.vlgmr.msra.gmra.mrb[0].mxu0 %v355_v52  ;;  %1510 = vmatmul.mubr.bf16.vlgmr.msra.gmra.mrb[0].mxu1 %v355_v52 }
 0x14f   : > { %1515 = vmatprep.mubr.msk.bf16.mxu1 %vm1707_vm0, %v1705_v4  ;;  %1529 = vmatprep.mubr.msk.bf16.mxu0 %vm1707_vm0, %v1705_v4 }
 0x150   : > { %1526 = vmatpush3.bf16.msra.mxu0 %v1653_v37 }
 0x151   : > { %1527 = vmatprep.subr.bf16.mxu0 %v1705_v4 }
 0x154   : > { %1528 = vmatpush3.bf16.msra.mxu0 %v1654_v51 }
 0x155   : > { %1539 = vmatprep.subr.bf16.mxu0 %v1705_v4 }
 0x221   : > { %v535_v61 = vpop.f32.mrb[0].mxu0  ;;  %v578_v62 = vpop.f32.mrb[0].mxu1 }
 0x222   : > { %v537_v2 = vpop.f32.mrb[1].mxu0  ;;  %v1511_v3 = vpop.f32.mrb[1].mxu1  ;;  %v536_v7 = vadd.f32 %v535_v61, %v361_v59  ;;  %v579_v8 = vadd.f32 %v578_v62, %v369_v60 }
 0x223   : > { %v539_v5 = vpop.f32.mrb[2].mxu0  ;;  %v581_v6 = vpop.f32.mrb[2].mxu1  ;;  %v538_v13 = vadd.f32 %v537_v2, %v365_v63 }
 0x224   : > { %v540_v9 = vadd.f32 %v539_v5, %v361_v59  ;;  %v582_v10 = vadd.f32 %v581_v6, %v369_v60  ;;  %v541_v11 = vpop.f32.mrb[3].mxu0  ;;  %v1512_v12 = vpop.f32.mrb[3].mxu1 }
 0x225   : > { %v542_v14 = vadd.f32 %v541_v11, %v365_v63 }
 0x226   : > { %v1882_v15 = vpack.c.bf16 %v540_v9, %v536_v7  ;;  %v1884_v16 = vpack.c.bf16 %v582_v10, %v579_v8 }
 0x227   : > { %v1886_v17 = vpack.c.bf16 %v542_v14, %v538_v13 }
 0x229   : > { %v617_v18 = vsel %vm612_vm1, %v1886_v17, 0 }
 0x22a   : > { %1514 = vmatpush3.bf16.xpose.msra.mxu1 %v617_v18 }
 0x22b   : > { %1519 = vmatprep.subr.bf16.mxu1 %v1705_v4 }
 0x231   : > { %1516 = vmatmul.mubr.msk.bf16.vlgmr.msra.gmra.mrb[4].mxu1 %vm612_vm1, %v1882_v15 }
 0x232   : > { %1520 = vmatpush3.bf16.msra.mxu1 %v1884_v16  ;;  %1521 = vmatprep.mubr.msk.bf16.mxu1 %vm1707_vm0, %v1705_v4 }
 0x233   : > { %1533 = vmatprep.subr.bf16.mxu1 %v1705_v4 }
 0x304   : > { %v653_v19 = vpop.f32.mrb[4].mxu1 }
 0x305   : > { %v660_v20 = vmul.f32 0.17677669, %v653_v19  ;;  %v1517_v21 = vpop.f32.mrb[5].mxu1 }
 0x306   : > { %v656_v22 = vpop.f32.mrb[6].mxu1 }
 0x307   : > { %v661_v23 = vmul.f32 0.17677669, %v656_v22  ;;  %v1518_v24 = vpop.f32.mrb[7].mxu1  ;;  %v663_v25 = vsel %vm662_vm2, %v660_v20, -inf }
 0x308   : > { %664 = vmax.xlane.f32.xlu0 %v663_v25 }
 0x309   : > { %v666_v26 = vsel %vm662_vm2, %v661_v23, -inf }
 0x30a   : > { %667 = vmax.xlane.f32.xlu1 %v666_v26 }
 0x395   : > { %v665_v27 = vpop.xlane.xlu0 %664 }
 0x396   : > { %v669_v28 = vsub.f32 %v660_v20, %v665_v27 }
 0x397   : > { %v668_v29 = vpop.xlane.xlu1 %667 }
 0x398   : > { %v671_v30 = vmul.f32 1.442695, %v669_v28  ;;  %v670_v31 = vsub.f32 %v661_v23, %v668_v29 }
 0x39a   : > { %1665 = vpow2.f32 %v671_v30  ;;  %v673_v32 = vmul.f32 1.442695, %v670_v31 }
 0x39c   : > { %1667 = vpow2.f32 %v673_v32 }
 0x3a4   : > { %v1666_v33 = vpop.eup %1665 }
 0x3a5   : > { %v675_v34 = vsel %vm662_vm2, %v1666_v33, 0.0 }
 0x3a6   : > { %v1668_v35 = vpop.eup %1667  ;;  %676 = vadd.xlane.f32.xlu0 %v675_v34 }
 0x3a7   : > { %v678_v36 = vsel %vm662_vm2, %v1668_v35, 0.0 }
 0x3a8   : > { %679 = vadd.xlane.f32.xlu1 %v678_v36 }
 0x3b9   : > { %791 = vrot.lane.b32.xlu1 %v1882_v15, %s1708_s21 }
 0x3bc   : > { %794 = vrot.lane.b32.xlu0 %v1886_v17, %s1708_s21 }
 0x3bd   : > { %977 = vrot.lane.b32.xlu1 %v1886_v17, %s1709_s22 }
 0x3c1   : > { %975 = vrot.lane.b32.xlu1 %v1882_v15, %s1709_s22 }
 0x433   : > { %v677_v38 = vpop.xlane.xlu0 %676 }
 0x434   : > { %1669 = vrcp.f32 %v677_v38 }
 0x435   : > { %v680_v39 = vpop.xlane.xlu1 %679 }
 0x436   : > { %1671 = vrcp.f32 %v680_v39 }
 0x437   : > { %v795_v44 = vpop.permute.xlu0 %794 }
 0x438   : > { %v800_v47 = vsel %vm612_vm1, %v795_v44, 0 }
 0x439   : > { %v792_v46 = vpop.permute.xlu1 %791 }
 0x43d   : > { %v978_v48 = vpop.permute.xlu1 %977 }
 0x43e   : > { %v1670_v40 = vpop.eup %1669  ;;  %v983_v49 = vsel %vm612_vm1, %v978_v48, 0 }
 0x43f   : > { %v683_v42 = vmul.f32 %v1670_v40, %v1666_v33 }
 0x440   : > { %v1672_v41 = vpop.eup %1671 }
 0x441   : > { %v684_v43 = vmul.f32 %v1672_v41, %v1668_v35  ;;  %v976_v50 = vpop.permute.xlu1 %975 }
 0x443   : > { %v685_v45 = vpack.c.bf16 %v684_v43, %v683_v42 }
 0x445   : > { %1522 = vmatmul.mubr.msk.bf16.vlgmr.msra.gmra.mrb[8].mxu1 %vm662_vm2, %v685_v45 }
 0x446   : > { %1534 = vmatpush3.bf16.xpose.msra.mxu1 %v800_v47  ;;  %1535 = vmatprep.mubr.msk.bf16.mxu1 %vm1707_vm0, %v1705_v4 }
 0x447   : > { %1553 = vmatprep.subr.bf16.mxu1 %v1705_v4 }
 0x44d   : > { %1536 = vmatmul.mubr.msk.bf16.vlgmr.msra.gmra.mrb[12].mxu1 %vm612_vm1, %v792_v46 }
 0x44e   : > { %1554 = vmatpush3.bf16.xpose.msra.mxu1 %v983_v49  ;;  %1555 = vmatprep.mubr.msk.bf16.mxu1 %vm1707_vm0, %v1705_v4 }
 0x44f   : > { %1559 = vmatprep.subr.bf16.mxu1 %v1705_v4 }
 0x455   : > { %1556 = vmatmul.mubr.msk.bf16.vlgmr.msra.gmra.mrb[16].mxu1 %vm612_vm1, %v976_v50 }
 0x456   : > { %1561 = vmatprep.mubr.msk.bf16.mxu1 %vm1707_vm0, %v1705_v4 }
 0x518   : > { %v724_v52 = vpop.f32.mrb[8].mxu1 }
 0x519   : > { %v1523_v53 = vpop.f32.mrb[9].mxu1 }
 0x51a   : > { %v727_v54 = vpop.f32.mrb[10].mxu1 }
 0x51b   : > { %v731_v55 = vpack.c.bf16 %v727_v54, %v724_v52  ;;  %v1524_v56 = vpop.f32.mrb[11].mxu1 }
 0x51d   : > { %1530 = vmatmul.mubr.msk.bf16.vlgmr.msra.gmra.mrb[4].mxu0 %vm612_vm1, %v731_v55 }
 0x51e   : > { %1541 = vmatprep.mubr.msk.bf16.mxu0 %vm1707_vm0, %v1705_v4 }
 0x520   : > { %v836_v57 = vpop.f32.mrb[12].mxu1 }
 0x521   : > { %v1537_v58 = vpop.f32.mrb[13].mxu1  ;;  %v843_v8 = vmul.f32 0.17677669, %v836_v57 }
 0x522   : > { %v839_v59 = vpop.f32.mrb[14].mxu1 }
 0x523   : > { %v1538_v60 = vpop.f32.mrb[15].mxu1  ;;  %v845_v9 = vsel %vm662_vm2, %v843_v8, -inf  ;;  %v844_v27 = vmul.f32 0.17677669, %v839_v59 }
 0x525   : > { %v848_v28 = vsel %vm662_vm2, %v844_v27, -inf }
 0x528   : > { %v1019_v61 = vpop.f32.mrb[16].mxu1 }
 0x529   : > { %v1026_v62 = vmul.f32 0.17677669, %v1019_v61  ;;  %v1557_v63 = vpop.f32.mrb[17].mxu1 }
 0x52a   : > { %v1022_v2 = vpop.f32.mrb[18].mxu1 }
 0x52b   : > { %v1027_v3 = vmul.f32 0.17677669, %v1022_v2  ;;  %v1558_v5 = vpop.f32.mrb[19].mxu1  ;;  %v1028_v6 = vsel %vm662_vm2, %v1026_v62, -inf  ;;  %v1655_v2 = vld [vmem:[%s2014_s5 + $0x10] sm:$0xff]  }
 0x52c   : > { %1029 = vmax.xlane.f32.xlu0 %v1028_v6 }
 0x52d   : > { %v1031_v7 = vsel %vm662_vm2, %v1027_v3, -inf }
 0x52e   : > { %1032 = vmax.xlane.f32.xlu1 %v1031_v7 }
 0x53f   : > { %1159 = vrot.lane.b32.xlu1 %v1886_v17, %s1710_s30 }
 0x543   : > { %1157 = vrot.lane.b32.xlu1 %v1882_v15, %s1710_s30 }
 0x567   : > { %846 = vmax.xlane.f32.xlu1 %v845_v9 }
 0x578   : > { %869 = vrot.lane.b32.xlu1 %v1884_v16, %s1708_s21 }
 0x57c   : > { %1233 = vrot.lane.b32.xlu1 %v1884_v16, %s1710_s30 }
 0x5b9   : > { %v1030_v10 = vpop.xlane.xlu0 %1029 }
 0x5ba   : > { %v1034_v11 = vsub.f32 %v1026_v62, %v1030_v10 }
 0x5bb   : > { %v1033_v12 = vpop.xlane.xlu1 %1032 }
 0x5bc   : > { %v1036_v13 = vmul.f32 1.442695, %v1034_v11  ;;  %v1035_v14 = vsub.f32 %v1027_v3, %v1033_v12  ;;  %v1656_v3 = vld [vmem:[%s2014_s5 + $0x18] sm:$0xff]  }
 0x5be   : > { %1673 = vpow2.f32 %v1036_v13  ;;  %v1038_v18 = vmul.f32 1.442695, %v1035_v14 }
 0x5bf   : > { %v1160_v21 = vpop.permute.xlu1 %1159 }
 0x5c0   : > { %1675 = vpow2.f32 %v1038_v18  ;;  %v1165_v38 = vsel %vm612_vm1, %v1160_v21, 0 }
 0x5c3   : > { %v1158_v22 = vpop.permute.xlu1 %1157 }
 0x5c8   : > { %v1674_v17 = vpop.eup %1673 }
 0x5c9   : > { %v1040_v15 = vsel %vm662_vm2, %v1674_v17, 0.0 }
 0x5ca   : > { %v1676_v19 = vpop.eup %1675  ;;  %1041 = vadd.xlane.f32.xlu0 %v1040_v15 }
 0x5cb   : > { %v1043_v20 = vsel %vm662_vm2, %v1676_v19, 0.0 }
 0x5ce   : > { %1044 = vadd.xlane.f32.xlu0 %v1043_v20 }
 0x5e4   : > { %1051 = vrot.lane.b32.xlu0 %v1884_v16, %s1709_s22 }
 0x5f4   : > { %v847_v23 = vpop.xlane.xlu1 %846 }
 0x5f5   : > { %v851_v24 = vsub.f32 %v843_v8, %v847_v23 }
 0x5f7   : > { %v853_v25 = vmul.f32 1.442695, %v851_v24 }
 0x5f8   : > { %v870_v26 = vpop.permute.xlu1 %869 }
 0x5f9   : > { %1677 = vpow2.f32 %v853_v25  ;;  %1540 = vmatpush3.bf16.msra.mxu0 %v870_v26 }
 0x5fa   : > { %1545 = vmatprep.subr.bf16.mxu0 %v1705_v4 }
 0x5fc   : > { %v1234_v23 = vpop.permute.xlu1 %1233 }
 0x603   : > { %v1678_v29 = vpop.eup %1677  ;;  %849 = vmax.xlane.f32.xlu0 %v848_v28 }
 0x604   : > { %v857_v30 = vsel %vm662_vm2, %v1678_v29, 0.0 }
 0x607   : > { %858 = vadd.xlane.f32.xlu0 %v857_v30  ;;  %v1659_v30 = vld [vmem:[%s2014_s5 + $0x30] sm:$0xff]  }
 0x657   : > { %v1042_v31 = vpop.xlane.xlu0 %1041 }
 0x658   : > { %1679 = vrcp.f32 %v1042_v31 }
 0x65b   : > { %v1045_v16 = vpop.xlane.xlu0 %1044 }
 0x65c   : > { %1681 = vrcp.f32 %v1045_v16  ;;  %v1660_v16 = vld [vmem:[%s2014_s5 + $0x38] sm:$0xff]  }
 0x65f   : > { %v1052_v32 = vpop.permute.xlu0 %1051 }
 0x660   : > { %1560 = vmatpush3.bf16.msra.mxu1 %v1052_v32 }
 0x661   : > { %1573 = vmatprep.subr.bf16.mxu1 %v1705_v4 }
 0x662   : > { %v1680_v33 = vpop.eup %1679 }
 0x663   : > { %v1048_v35 = vmul.f32 %v1680_v33, %v1674_v17 }
 0x666   : > { %v1682_v34 = vpop.eup %1681 }
 0x667   : > { %v1049_v36 = vmul.f32 %v1682_v34, %v1676_v19  ;;  %v1657_v19 = vld [vmem:[%s2014_s5 + $0x20] sm:$0xff]  }
 0x669   : > { %v1050_v37 = vpack.c.bf16 %v1049_v36, %v1048_v35 }
 0x66b   : > { %1562 = vmatmul.mubr.msk.bf16.vlgmr.msra.gmra.mrb[20].mxu1 %vm662_vm2, %v1050_v37  ;;  %v1431_v37 = vld [vmem:[%s2015_s6] ss:$0 sm:$0xff] }
 0x66c   : > { %1574 = vmatpush3.bf16.xpose.msra.mxu1 %v1165_v38  ;;  %1575 = vmatprep.mubr.msk.bf16.mxu1 %vm1707_vm0, %v1705_v4  ;;  %v608_v38 = vadd.f32 %v1431_v37, %v1767_v0 }
 0x673   : > { %1576 = vmatmul.mubr.msk.bf16.vlgmr.msra.gmra.mrb[24].mxu1 %vm612_vm1, %v1158_v22  ;;  %v1658_v22 = vld [vmem:[%s2014_s5 + $0x28] sm:$0xff]  }
 0x690   : > { %v850_v39 = vpop.xlane.xlu0 %849 }
 0x691   : > { %v852_v40 = vsub.f32 %v844_v27, %v850_v39 }
 0x693   : > { %v855_v41 = vmul.f32 1.442695, %v852_v40 }
 0x694   : > { %v859_v44 = vpop.xlane.xlu0 %858 }
 0x695   : > { %1683 = vpow2.f32 %v855_v41 }
 0x696   : > { %1685 = vrcp.f32 %v859_v44 }
 0x69f   : > { %v1684_v42 = vpop.eup %1683 }
 0x6a0   : > { %v860_v43 = vsel %vm662_vm2, %v1684_v42, 0.0  ;;  %v1686_v46 = vpop.eup %1685 }
 0x6a1   : > { %861 = vadd.xlane.f32.xlu0 %v860_v43  ;;  %v865_v48 = vmul.f32 %v1686_v46, %v1678_v29 }
 0x72e   : > { %v862_v45 = vpop.xlane.xlu0 %861 }
 0x72f   : > { %1687 = vrcp.f32 %v862_v45 }
 0x739   : > { %v1688_v47 = vpop.eup %1687 }
 0x73a   : > { %v866_v49 = vmul.f32 %v1688_v47, %v1684_v42 }
 0x73c   : > { %v867_v50 = vpack.c.bf16 %v866_v49, %v865_v48 }
 0x73e   : > { %1542 = vmatmul.mubr.msk.bf16.vlgmr.msra.gmra.mrb[8].mxu0 %vm662_vm2, %v867_v50  ;;  %v1091_v51 = vpop.f32.mrb[20].mxu1 }
 0x73f   : > { %v1563_v52 = vpop.f32.mrb[21].mxu1  ;;  %1549 = vmatprep.mubr.msk.bf16.mxu0 %vm1707_vm0, %v1705_v4  ;;  %1546 = vmatpush3.bf16.msra.mxu0 %v1655_v2 }
 0x740   : > { %v1094_v53 = vpop.f32.mrb[22].mxu1  ;;  %1547 = vmatprep.subr.bf16.mxu0 %v1705_v4 }
 0x741   : > { %v1098_v54 = vpack.c.bf16 %v1094_v53, %v1091_v51  ;;  %v1564_v55 = vpop.f32.mrb[23].mxu1 }
 0x743   : > { %1548 = vmatpush3.bf16.msra.mxu0 %v1656_v3 }
 0x744   : > { %1565 = vmatprep.subr.bf16.mxu0 %v1705_v4 }
 0x746   : > { %v1201_v56 = vpop.f32.mrb[24].mxu1 }
 0x747   : > { %v1208_v57 = vmul.f32 0.17677669, %v1201_v56  ;;  %v1577_v58 = vpop.f32.mrb[25].mxu1 }
 0x748   : > { %v1204_v59 = vpop.f32.mrb[26].mxu1 }
 0x749   : > { %v1209_v60 = vmul.f32 0.17677669, %v1204_v59  ;;  %v1578_v61 = vpop.f32.mrb[27].mxu1  ;;  %v1210_v62 = vsel %vm662_vm2, %v1208_v57, -inf }
 0x74a   : > { %1211 = vmax.xlane.f32.xlu0 %v1210_v62 }
 0x74b   : > { %v1213_v63 = vsel %vm662_vm2, %v1209_v60, -inf }
 0x74e   : > { %1214 = vmax.xlane.f32.xlu0 %v1213_v63 }
 0x7d7   : > { %v1212_v5 = vpop.xlane.xlu0 %1211 }
 0x7d8   : > { %v1216_v6 = vsub.f32 %v1208_v57, %v1212_v5 }
 0x7da   : > { %v1218_v7 = vmul.f32 1.442695, %v1216_v6 }
 0x7db   : > { %v1215_v8 = vpop.xlane.xlu0 %1214 }
 0x7dc   : > { %1689 = vpow2.f32 %v1218_v7  ;;  %v1217_v9 = vsub.f32 %v1209_v60, %v1215_v8 }
 0x7de   : > { %v1220_v10 = vmul.f32 1.442695, %v1217_v9 }
 0x7e0   : > { %1691 = vpow2.f32 %v1220_v10 }
 0x7e6   : > { %v1690_v11 = vpop.eup %1689 }
 0x7e7   : > { %v1222_v12 = vsel %vm662_vm2, %v1690_v11, 0.0 }
 0x7e8   : > { %1223 = vadd.xlane.f32.xlu0 %v1222_v12 }
 0x7ea   : > { %v1692_v13 = vpop.eup %1691 }
 0x7eb   : > { %v1225_v14 = vsel %vm662_vm2, %v1692_v13, 0.0 }
 0x7ec   : > { %1226 = vadd.xlane.f32.xlu0 %v1225_v14 }
 0x811   : > { %v909_v18 = vpop.f32.mrb[8].mxu0 }
 0x812   : > { %v1543_v17 = vpop.f32.mrb[9].mxu0 }
 0x813   : > { %v912_v15 = vpop.f32.mrb[10].mxu0 }
 0x814   : > { %v916_v20 = vpack.c.bf16 %v912_v15, %v909_v18  ;;  %v1544_v21 = vpop.f32.mrb[11].mxu0 }
 0x816   : > { %1550 = vmatmul.mubr.msk.bf16.vlgmr.msra.gmra.mrb[4].mxu0 %vm612_vm1, %v916_v20 }
 0x817   : > { %1566 = vmatpush3.bf16.msra.mxu0 %v1657_v19  ;;  %1569 = vmatprep.mubr.msk.bf16.mxu0 %vm1707_vm0, %v1705_v4 }
 0x818   : > { %1567 = vmatprep.subr.bf16.mxu0 %v1705_v4 }
 0x81b   : > { %1568 = vmatpush3.bf16.msra.mxu0 %v1658_v22 }
 0x81c   : > { %1579 = vmatprep.subr.bf16.mxu0 %v1705_v4 }
 0x822   : > { %1570 = vmatmul.mubr.msk.bf16.vlgmr.msra.gmra.mrb[4].mxu0 %vm612_vm1, %v1098_v54 }
 0x823   : > { %1580 = vmatpush3.bf16.msra.mxu0 %v1234_v23  ;;  %1581 = vmatprep.mubr.msk.bf16.mxu0 %vm1707_vm0, %v1705_v4 }
 0x824   : > { %1585 = vmatprep.subr.bf16.mxu0 %v1705_v4 }
 0x875   : > { %v1224_v24 = vpop.xlane.xlu0 %1223 }
 0x876   : > { %1693 = vrcp.f32 %v1224_v24 }
 0x879   : > { %v1227_v25 = vpop.xlane.xlu0 %1226 }
 0x87a   : > { %1695 = vrcp.f32 %v1227_v25 }
 0x880   : > { %v1694_v26 = vpop.eup %1693 }
 0x881   : > { %v1230_v28 = vmul.f32 %v1694_v26, %v1690_v11 }
 0x884   : > { %v1696_v27 = vpop.eup %1695 }
 0x885   : > { %v1231_v29 = vmul.f32 %v1696_v27, %v1692_v13 }
 0x887   : > { %v1232_v31 = vpack.c.bf16 %v1231_v29, %v1230_v28 }
 0x889   : > { %1582 = vmatmul.mubr.msk.bf16.vlgmr.msra.gmra.mrb[12].mxu0 %vm662_vm2, %v1232_v31 }
 0x88a   : > { %1586 = vmatpush3.bf16.msra.mxu0 %v1659_v30  ;;  %1589 = vmatprep.mubr.msk.bf16.mxu0 %vm1707_vm0, %v1705_v4 }
 0x88b   : > { %1587 = vmatprep.subr.bf16.mxu0 %v1705_v4  ;;  %v609_v4 = vadd.f32 %v1431_v37, %v1769_v1 }
 0x88e   : > { %1588 = vmatpush3.bf16.msra.mxu0 %v1660_v16 }
 0x95c   : > { %v1273_v32 = vpop.f32.mrb[12].mxu0 }
 0x95d   : > { %v1583_v33 = vpop.f32.mrb[13].mxu0 }
 0x95e   : > { %v1276_v34 = vpop.f32.mrb[14].mxu0 }
 0x95f   : > { %v1280_v35 = vpack.c.bf16 %v1276_v34, %v1273_v32  ;;  %v1584_v36 = vpop.f32.mrb[15].mxu0 }
 0x961   : > { %1590 = vmatmul.mubr.msk.bf16.vlgmr.msra.gmra.mrb[4].mxu0 %vm612_vm1, %v1280_v35 }
 0xa34   : > { %v1330_v39 = vpop.f32.mrb[4].mxu0 }
 0xa35   : > { %v1593_v40 = vadd.f32 %v1330_v39, %v608_v38  ;;  %v1591_v41 = vpop.f32.mrb[5].mxu0 }
 0xa36   : > { %v1333_v42 = vpop.f32.mrb[6].mxu0 }
 0xa37   : > { %1339 = vst [vmem:[%s278_s27] sm:$0xff] %v1593_v40  ;;  %v1594_v43 = vadd.f32 %v1333_v42, %v609_v4  ;;  %v1592_v44 = vpop.f32.mrb[7].mxu0 }
 0xa39   : > { %1340 = vst [vmem:[%s278_s27 + $0x8] sm:$0xff] %v1594_v43 }
 0xa3a PF: > { %s17_s24 = sadd.s32 1, %s1703_s24  }
 0xa3b   : > { %p14_p4 = scmp.ge.s32.totalorder %s17_s24, 4  }
 0xa3d   :  { %16 = sbr.rel (!%p14_p4) target bundleno = 1 (0x1), region = 78 }

// kernel: decoder_forward.11
= control target key start
LH: loop header
LB: loop body
LE: loop exit
PB: predicated region body
PF: predicated region fallthrough
CT: control target
= control target key end

     0   :  { %s2329_s0 = inlined_call_operand.vmem [shape: f32[32,128], index: 0, kind: input, shape index: {}]   ;;  %s2330_s1 = inlined_call_operand.vmem [shape: f32[1,128], index: 1, kind: input, shape index: {}]   ;;  %s2331_s2 = inlined_call_operand.vmem [shape: f32[1,128], index: 2, kind: input, shape index: {}]   ;;  %s2332_s3 = inlined_call_operand.vmem [shape: bf16[128,512], index: 3, kind: input, shape index: {}]   ;;  %s2333_s4 = inlined_call_operand.vmem [shape: f32[1,512], index: 4, kind: input, shape index: {}]   ;;  %s2334_s5 = inlined_call_operand.vmem [shape: bf16[512,128], index: 5, kind: input, shape index: {}]   ;;  %s2335_s6 = inlined_call_operand.vmem [shape: f32[1,128], index: 6, kind: input, shape index: {}]   ;;  %s2336_s7 = inlined_call_operand.vmem [shape: f32[1,128], index: 7, kind: input, shape index: {}]   ;;  %s2337_s8 = inlined_call_operand.vmem [shape: f32[1,128], index: 8, kind: input, shape index: {}]   ;;  %s2338_s9 = inlined_call_operand.hbm [shape: f32[32,128], index: 9, kind: output, shape index: {}]  }
   0x1   :  { %v34_v0 = vld [vmem:[%s2329_s0] sm:$0xff]  ;;  %v36_v1 = vld [vmem:[%s2329_s0 + $0x10] sm:$0xff]  ;;  %v35_v2 = vld [vmem:[%s2329_s0 + $0x8] sm:$0xff] }
   0x2   :  { %138 = vadd.xlane.f32.xlu0 %v34_v0  ;;  %142 = vadd.xlane.f32.xlu1 %v36_v1  ;;  %v37_v3 = vld [vmem:[%s2329_s0 + $0x18] sm:$0xff]  ;;  %v1451_v4 = vld [vmem:[%s2332_s3 + $0x4] ss:$16 sps:$4 sm:$0xff]   ;;  %v1455_v6 = vld [vmem:[%s2332_s3] ss:$16 sps:$4 sm:$0xff]  }
   0x3   :  { %v1453_v5 = vld [vmem:[%s2332_s3 + $0xc] ss:$16 sps:$4 sm:$0xff]   ;;  %v1456_v7 = vld [vmem:[%s2332_s3 + $0x8] ss:$16 sps:$4 sm:$0xff]   ;;  %v1457_v8 = vld [vmem:[%s2332_s3 + $0x24] ss:$16 sps:$4 sm:$0xff]   ;;  %386 = vmatprep.subr.bf16.mxu0 %v1451_v4 }
   0x4   :  { %v1459_v9 = vld [vmem:[%s2332_s3 + $0x2c] ss:$16 sps:$4 sm:$0xff]   ;;  %439 = vmatprep.subr.bf16.mxu1 %v1453_v5  ;;  %387 = vmatpush1.bf16.msra.mxu0 %v1455_v6 }
   0x5   :  { %440 = vmatpush1.bf16.msra.mxu1 %v1456_v7  ;;  %388 = vmatprep.subr.bf16.mxu0 %v1457_v8 }
   0x6   :  { %140 = vadd.xlane.f32.xlu0 %v35_v2  ;;  %144 = vadd.xlane.f32.xlu1 %v37_v3 }
   0x7   :  { %441 = vmatprep.subr.bf16.mxu1 %v1459_v9 }
   0x8   :  { %14 = vsyncpa [#allocation3], 0  ;;  %v1461_v26 = vld [vmem:[%s2332_s3 + $0x20] ss:$16 sps:$4 sm:$0xff]   ;;  %v1462_v27 = vld [vmem:[%s2332_s3 + $0x28] ss:$16 sps:$4 sm:$0xff]  }
   0x9   :  { %389 = vmatpush1.bf16.msra.mxu0 %v1461_v26  ;;  %442 = vmatpush1.bf16.msra.mxu1 %v1462_v27  ;;  %v1463_v28 = vld [vmem:[%s2332_s3 + $0x44] ss:$16 sps:$4 sm:$0xff]   ;;  %v1465_v29 = vld [vmem:[%s2332_s3 + $0x4c] ss:$16 sps:$4 sm:$0xff]   ;;  %v1467_v30 = vld [vmem:[%s2332_s3 + $0x40] ss:$16 sps:$4 sm:$0xff]  }
   0xa   :  { %390 = vmatprep.subr.bf16.mxu0 %v1463_v28  ;;  %443 = vmatprep.subr.bf16.mxu1 %v1465_v29  ;;  %v1468_v31 = vld [vmem:[%s2332_s3 + $0x48] ss:$16 sps:$4 sm:$0xff]   ;;  %v1469_v32 = vld [vmem:[%s2332_s3 + $0x64] ss:$16 sps:$4 sm:$0xff]   ;;  %v1471_v33 = vld [vmem:[%s2332_s3 + $0x6c] ss:$16 sps:$4 sm:$0xff]  }
   0xb   :  { %v1473_v34 = vld [vmem:[%s2332_s3 + $0x60] ss:$16 sps:$4 sm:$0xff]   ;;  %v1474_v35 = vld [vmem:[%s2332_s3 + $0x68] ss:$16 sps:$4 sm:$0xff]   ;;  %v1475_v36 = vld [vmem:[%s2332_s3 + $0x84] ss:$16 sps:$4 sm:$0xff]  }
   0xc   :  { %v1477_v37 = vld [vmem:[%s2332_s3 + $0x8c] ss:$16 sps:$4 sm:$0xff]   ;;  %v1479_v38 = vld [vmem:[%s2332_s3 + $0x80] ss:$16 sps:$4 sm:$0xff]   ;;  %v1480_v39 = vld [vmem:[%s2332_s3 + $0x88] ss:$16 sps:$4 sm:$0xff]  }
   0xd   :  { %391 = vmatpush1.bf16.msra.mxu0 %v1467_v30  ;;  %444 = vmatpush1.bf16.msra.mxu1 %v1468_v31  ;;  %v1481_v40 = vld [vmem:[%s2332_s3 + $0xa4] ss:$16 sps:$4 sm:$0xff]   ;;  %v1483_v41 = vld [vmem:[%s2332_s3 + $0xac] ss:$16 sps:$4 sm:$0xff]   ;;  %v1485_v42 = vld [vmem:[%s2332_s3 + $0xa0] ss:$16 sps:$4 sm:$0xff]  }
   0xe   :  { %392 = vmatprep.subr.bf16.mxu0 %v1469_v32  ;;  %445 = vmatprep.subr.bf16.mxu1 %v1471_v33  ;;  %v1486_v43 = vld [vmem:[%s2332_s3 + $0xa8] ss:$16 sps:$4 sm:$0xff]   ;;  %v1487_v44 = vld [vmem:[%s2332_s3 + $0xc4] ss:$16 sps:$4 sm:$0xff]   ;;  %v1489_v45 = vld [vmem:[%s2332_s3 + $0xcc] ss:$16 sps:$4 sm:$0xff]  }
   0xf   :  { %v1491_v46 = vld [vmem:[%s2332_s3 + $0xc0] ss:$16 sps:$4 sm:$0xff]   ;;  %v1492_v47 = vld [vmem:[%s2332_s3 + $0xc8] ss:$16 sps:$4 sm:$0xff]   ;;  %v1493_v48 = vld [vmem:[%s2332_s3 + $0xe4] ss:$16 sps:$4 sm:$0xff]  }
  0x10   :  { %v1495_v49 = vld [vmem:[%s2332_s3 + $0xec] ss:$16 sps:$4 sm:$0xff]   ;;  %v1639_v50 = vmov 0   ;;  %v1497_v51 = vld [vmem:[%s2332_s3 + $0xe0] ss:$16 sps:$4 sm:$0xff]  }
  0x11   :  { %393 = vmatpush1.bf16.msra.mxu0 %v1473_v34  ;;  %446 = vmatpush1.bf16.msra.mxu1 %v1474_v35  ;;  %v1498_v52 = vld [vmem:[%s2332_s3 + $0xe8] ss:$16 sps:$4 sm:$0xff]   ;;  %v1323_v8 = vld [vmem:[%s2331_s2] ss:$0 sm:$0xff]  ;;  %v1507_v29 = vld [vmem:[%s2334_s5 + $0x50] sm:$0xff]  }
  0x12   :  { %394 = vmatprep.subr.bf16.mxu0 %v1475_v36  ;;  %447 = vmatprep.subr.bf16.mxu1 %v1477_v37  ;;  %v1504_v26 = vld [vmem:[%s2334_s5 + $0xc8] sm:$0xff]   ;;  %v1508_v30 = vld [vmem:[%s2334_s5 + $0xd0] sm:$0xff]   ;;  %v1511_v33 = vld [vmem:[%s2334_s5 + $0x58] sm:$0xff]  }
  0x13   :  { %418 = vmatprep.mubr.bf16.mxu0 %v1639_v50  ;;  %471 = vmatprep.mubr.bf16.mxu1 %v1639_v50  ;;  %v1505_v27 = vld [vmem:[%s2334_s5 + $0x8] sm:$0xff]   ;;  %v1509_v31 = vld [vmem:[%s2334_s5 + $0x10] sm:$0xff]   ;;  %v1512_v34 = vld [vmem:[%s2334_s5 + $0xd8] sm:$0xff]  }
  0x14   :  { %v1506_v28 = vld [vmem:[%s2334_s5 + $0x88] sm:$0xff]   ;;  %v1510_v32 = vld [vmem:[%s2334_s5 + $0x90] sm:$0xff]   ;;  %v1513_v35 = vld [vmem:[%s2334_s5 + $0x18] sm:$0xff]  }
  0x15   :  { %395 = vmatpush1.bf16.msra.mxu0 %v1479_v38  ;;  %448 = vmatpush1.bf16.msra.mxu1 %v1480_v39  ;;  %v1514_v36 = vld [vmem:[%s2334_s5 + $0x98] sm:$0xff]   ;;  %v1515_v37 = vld [vmem:[%s2334_s5 + $0x60] sm:$0xff]  }
  0x16   :  { %396 = vmatprep.subr.bf16.mxu0 %v1481_v40  ;;  %449 = vmatprep.subr.bf16.mxu1 %v1483_v41  ;;  %v1516_v38 = vld [vmem:[%s2334_s5 + $0xe0] sm:$0xff]   ;;  %v1519_v41 = vld [vmem:[%s2334_s5 + $0x68] sm:$0xff]  }
  0x17   :  { %v1517_v39 = vld [vmem:[%s2334_s5 + $0x20] sm:$0xff]  }
  0x18   :  { %v1518_v40 = vld [vmem:[%s2334_s5 + $0xa0] sm:$0xff]  }
  0x19   :  { %397 = vmatpush1.bf16.msra.mxu0 %v1485_v42  ;;  %450 = vmatpush1.bf16.msra.mxu1 %v1486_v43  ;;  %v1520_v42 = vld [vmem:[%s2334_s5 + $0xe8] sm:$0xff]  }
  0x1a   :  { %398 = vmatprep.subr.bf16.mxu0 %v1487_v44  ;;  %451 = vmatprep.subr.bf16.mxu1 %v1489_v45  ;;  %v1521_v43 = vld [vmem:[%s2334_s5 + $0x28] sm:$0xff]   ;;  %v206_v45 = vlaneseq }
  0x1b   :  { %v1522_v44 = vld [vmem:[%s2334_s5 + $0xa8] sm:$0xff]  }
  0x1d   :  { %399 = vmatpush1.bf16.msra.mxu0 %v1491_v46  ;;  %452 = vmatpush1.bf16.msra.mxu1 %v1492_v47  ;;  %v1523_v46 = vld [vmem:[%s2334_s5 + $0x70] sm:$0xff]  }
  0x1e   :  { %400 = vmatprep.subr.bf16.mxu0 %v1493_v48  ;;  %453 = vmatprep.subr.bf16.mxu1 %v1495_v49  ;;  %v1524_v47 = vld [vmem:[%s2334_s5 + $0xf0] sm:$0xff]  }
  0x1f   :  { %v1525_v48 = vld [vmem:[%s2334_s5 + $0x30] sm:$0xff]  }
  0x20   :  { %v1526_v49 = vld [vmem:[%s2334_s5 + $0xb0] sm:$0xff]  }
  0x21   :  { %401 = vmatpush1.bf16.msra.mxu0 %v1497_v51  ;;  %454 = vmatpush1.bf16.msra.mxu1 %v1498_v52  ;;  %v1527_v51 = vld [vmem:[%s2334_s5 + $0x78] sm:$0xff]  }
  0x22   :  { %v1528_v52 = vld [vmem:[%s2334_s5 + $0xf8] sm:$0xff]  }
  0x8f   :  { %v139_v10 = vpop.xlane.xlu0 %138  ;;  %v143_v11 = vpop.xlane.xlu1 %142 }
  0x90   :  { %v147_v12 = vmul.f32 0.0078125, %v139_v10  ;;  %v149_v13 = vmul.f32 0.0078125, %v143_v11 }
  0x92   :  { %v1723_v14 = vsub.f32 %v34_v0, %v147_v12  ;;  %v1725_v15 = vsub.f32 %v36_v1, %v149_v13 }
  0x93   :  { %v141_v16 = vpop.xlane.xlu0 %140  ;;  %v145_v17 = vpop.xlane.xlu1 %144 }
  0x94   :  { %v148_v18 = vmul.f32 0.0078125, %v141_v16  ;;  %v155_v19 = vmul.f32 %v1723_v14, %v1723_v14  ;;  %v150_v20 = vmul.f32 0.0078125, %v145_v17  ;;  %v157_v23 = vmul.f32 %v1725_v15, %v1725_v15 }
  0x96   :  { %v1729_v21 = vsub.f32 %v35_v2, %v148_v18  ;;  %159 = vadd.xlane.f32.xlu0 %v155_v19  ;;  %v1731_v22 = vsub.f32 %v37_v3, %v150_v20  ;;  %v1322_v3 = vld [vmem:[%s2330_s1] ss:$0 sm:$0xff] }
  0x98   :  { %v156_v24 = vmul.f32 %v1729_v21, %v1729_v21  ;;  %v158_v25 = vmul.f32 %v1731_v22, %v1731_v22 }
  0x9a   :  { %163 = vadd.xlane.f32.xlu0 %v157_v23  ;;  %161 = vadd.xlane.f32.xlu1 %v156_v24  ;;  %v1499_v23 = vld [vmem:[%s2334_s5 + $0x40] sm:$0xff]  }
  0x9b   :  { %v1502_v24 = vld [vmem:[%s2334_s5 + $0x80] sm:$0xff]   ;;  %1391 = vmatprep.subr.bf16.mxu0 %v1499_v23 }
  0x9e   :  { %165 = vadd.xlane.f32.xlu1 %v158_v25  ;;  %v1503_v25 = vld [vmem:[%s2334_s5 + $0x48] sm:$0xff]  }
 0x123   :  { %v160_v53 = vpop.xlane.xlu0 %159 }
 0x124   :  { %v167_v54 = vmul.f32 0.0078125, %v160_v53  ;;  %v1529_v53 = vld [vmem:[%s2334_s5 + $0x38] sm:$0xff]  }
 0x126   :  { %v171_v55 = vadd.f32 1e-05, %v167_v54  ;;  %v1530_v54 = vld [vmem:[%s2334_s5 + $0xb8] sm:$0xff]  }
 0x127   :  { %v162_v56 = vpop.xlane.xlu1 %161  ;;  %v164_v57 = vpop.xlane.xlu0 %163 }
 0x128   :  { %1531 = vrsqrt.f32 %v171_v55  ;;  %v168_v58 = vmul.f32 0.0078125, %v162_v56  ;;  %v169_v59 = vmul.f32 0.0078125, %v164_v57  ;;  %v72_v57 = vld [vmem:[%s2333_s4] sm:$0xf] }
 0x12a   :  { %v172_v60 = vadd.f32 1e-05, %v168_v58  ;;  %v173_v61 = vadd.f32 1e-05, %v169_v59 }
 0x12b   :  { %v166_v62 = vpop.xlane.xlu1 %165 }
 0x12c   :  { %1533 = vrsqrt.f32 %v172_v60  ;;  %v170_v63 = vmul.f32 0.0078125, %v166_v62 }
 0x12d   :  { %1535 = vrsqrt.f32 %v173_v61 }
 0x12e   :  { %v174_v0 = vadd.f32 1e-05, %v170_v63 }
 0x130   :  { %1537 = vrsqrt.f32 %v174_v0 }
 0x132   :  { %v1532_v1 = vpop.eup %1531 }
 0x133   :  { %v179_v2 = vmul.f32 %v1532_v1, %v1723_v14 }
 0x135   :  { %v189_v6 = vmul.f32 %v1322_v3, %v179_v2 }
 0x136   :  { %v1534_v4 = vpop.eup %1533 }
 0x137   :  { %v180_v5 = vmul.f32 %v1534_v4, %v1729_v21  ;;  %v1536_v7 = vpop.eup %1535  ;;  %v199_v11 = vadd.f32 %v1323_v8, %v189_v6 }
 0x138   :  { %v181_v13 = vmul.f32 %v1536_v7, %v1725_v15  ;;  %v1500_v15 = vld [vmem:[%s2334_s5 + $0xc0] sm:$0xff]  }
 0x139   :  { %v190_v9 = vmul.f32 %v1322_v3, %v180_v5  ;;  %1419 = vmatprep.subr.bf16.mxu1 %v1500_v15 }
 0x13a   :  { %v1538_v10 = vpop.eup %1537  ;;  %v191_v18 = vmul.f32 %v1322_v3, %v181_v13 }
 0x13b   :  { %v200_v12 = vadd.f32 %v1323_v8, %v190_v9  ;;  %v182_v14 = vmul.f32 %v1538_v10, %v1731_v22  ;;  %v1501_v22 = vld [vmem:[%s2334_s5] sm:$0xff]  }
 0x13c   :  { %v201_v20 = vadd.f32 %v1323_v8, %v191_v18 }
 0x13d   :  { %v203_v16 = vpack.c.bf16 %v200_v12, %v199_v11  ;;  %v192_v17 = vmul.f32 %v1322_v3, %v182_v14 }
 0x13f   :  { %419 = vmatmul.mubr.bf16.vlgmr.msra.gmra.mrb[0].mxu0 %v203_v16  ;;  %472 = vmatmul.mubr.bf16.vlgmr.msra.gmra.mrb[0].mxu1 %v203_v16  ;;  %v202_v19 = vadd.f32 %v1323_v8, %v192_v17 }
 0x140   :  { %428 = vmatprep.mubr.bf16.mxu0 %v1639_v50  ;;  %481 = vmatprep.mubr.bf16.mxu1 %v1639_v50  ;;  %v207_v50 = vshrl.u32 %v206_v45, 7 }
 0x141   :  { %v204_v21 = vpack.c.bf16 %v202_v19, %v201_v20  ;;  %1392 = vmatpush3.bf16.msra.mxu0 %v1501_v22  ;;  %1420 = vmatpush3.bf16.msra.mxu1 %v1502_v24 }
 0x142   :  { %1393 = vmatprep.subr.bf16.mxu0 %v1503_v25  ;;  %1421 = vmatprep.subr.bf16.mxu1 %v1504_v26  ;;  %v208_v55 = vsub.s32 0, %v207_v50  ;;  %v216_v56 = vsub.s32 2, %v207_v50  ;;  %v212_v58 = vsub.s32 1, %v207_v50  ;;  %v220_v59 = vsub.s32 3, %v207_v50 }
 0x144   :  { %v1926_v60 = vrot.slane %v72_v57, %v208_v55  ;;  %v1928_v61 = vrot.slane %v72_v57, %v216_v56  ;;  %v1930_v62 = vrot.slane %v72_v57, %v212_v58  ;;  %v1932_v63 = vrot.slane %v72_v57, %v220_v59 }
 0x145   :  { %1394 = vmatpush3.bf16.msra.mxu0 %v1505_v27  ;;  %1422 = vmatpush3.bf16.msra.mxu1 %v1506_v28 }
 0x146   :  { %1395 = vmatprep.subr.bf16.mxu0 %v1507_v29  ;;  %1423 = vmatprep.subr.bf16.mxu1 %v1508_v30 }
 0x147   :  { %429 = vmatmul.mubr.bf16.gmra.mrb[4].mxu0 %v204_v21  ;;  %482 = vmatmul.mubr.bf16.gmra.mrb[4].mxu1 %v204_v21 }
 0x149   :  { %1396 = vmatpush3.bf16.msra.mxu0 %v1509_v31  ;;  %1424 = vmatpush3.bf16.msra.mxu1 %v1510_v32 }
 0x14a   :  { %1397 = vmatprep.subr.bf16.mxu0 %v1511_v33  ;;  %1425 = vmatprep.subr.bf16.mxu1 %v1512_v34 }
 0x14d   :  { %1398 = vmatpush3.bf16.msra.mxu0 %v1513_v35  ;;  %1426 = vmatpush3.bf16.msra.mxu1 %v1514_v36 }
 0x14e   :  { %1399 = vmatprep.subr.bf16.mxu0 %v1515_v37  ;;  %1427 = vmatprep.subr.bf16.mxu1 %v1516_v38 }
 0x151   :  { %1400 = vmatpush3.bf16.msra.mxu0 %v1517_v39  ;;  %1428 = vmatpush3.bf16.msra.mxu1 %v1518_v40 }
 0x152   :  { %1401 = vmatprep.subr.bf16.mxu0 %v1519_v41  ;;  %1429 = vmatprep.subr.bf16.mxu1 %v1520_v42 }
 0x155   :  { %1402 = vmatpush3.bf16.msra.mxu0 %v1521_v43  ;;  %1430 = vmatpush3.bf16.msra.mxu1 %v1522_v44 }
 0x156   :  { %1403 = vmatprep.subr.bf16.mxu0 %v1523_v46  ;;  %1431 = vmatprep.subr.bf16.mxu1 %v1524_v47 }
 0x159   :  { %1404 = vmatpush3.bf16.msra.mxu0 %v1525_v48  ;;  %1432 = vmatpush3.bf16.msra.mxu1 %v1526_v49 }
 0x15a   :  { %1405 = vmatprep.subr.bf16.mxu0 %v1527_v51  ;;  %1433 = vmatprep.subr.bf16.mxu1 %v1528_v52 }
 0x15d   :  { %1406 = vmatpush3.bf16.msra.mxu0 %v1529_v53  ;;  %1434 = vmatpush3.bf16.msra.mxu1 %v1530_v54 }
 0x212   :  { %v420_v0 = vpop.f32.mrb[0].mxu0  ;;  %v473_v1 = vpop.f32.mrb[0].mxu1 }
 0x213   :  { %v1935_v2 = vadd.f32 %v420_v0, %v1926_v60  ;;  %v1938_v3 = vadd.f32 %v473_v1, %v1928_v61  ;;  %v422_v4 = vpop.f32.mrb[1].mxu0  ;;  %v475_v5 = vpop.f32.mrb[1].mxu1 }
 0x214   :  { %v1941_v6 = vadd.f32 %v422_v4, %v1930_v62  ;;  %v1944_v7 = vadd.f32 %v475_v5, %v1932_v63  ;;  %v424_v8 = vpop.f32.mrb[2].mxu0  ;;  %v477_v9 = vpop.f32.mrb[2].mxu1 }
 0x215   :  { %v1947_v10 = vmul.f32 0.70710677, %v1935_v2  ;;  %v1950_v11 = vmul.f32 0.70710677, %v1938_v3  ;;  %v426_v24 = vpop.f32.mrb[3].mxu0  ;;  %v479_v25 = vpop.f32.mrb[3].mxu1  ;;  %v1971_v29 = vadd.f32 %v424_v8, %v1926_v60  ;;  %v1978_v32 = vadd.f32 %v477_v9, %v1928_v61 }
 0x216   :  { %v1953_v12 = vmul.f32 0.70710677, %v1941_v6  ;;  %v1956_v13 = vmul.f32 0.70710677, %v1944_v7  ;;  %v1988_v37 = vadd.f32 %v426_v24, %v1930_v62  ;;  %v1999_v43 = vadd.f32 %v479_v25, %v1932_v63 }
 0x217   :  { %v524_v14 = vand.u32 2147483647, %v1947_v10  ;;  %v526_v16 = vand.u32 2147483647, %v1950_v11  ;;  %v1985_v36 = vmul.f32 0.70710677, %v1971_v29 }
 0x218   :  { %v1961_v17 = vand.u32 2147483647, %v1953_v12  ;;  %v1964_v18 = vand.u32 2147483647, %v1956_v13  ;;  %v1995_v41 = vmul.f32 0.70710677, %v1978_v32 }
 0x219   :  { %v540_v19 = vmul.f32 0.3275911, %v524_v14  ;;  %v542_v20 = vmul.f32 0.3275911, %v526_v16  ;;  %v748_v40 = vsub.f32 0.0, %v524_v14  ;;  %v750_v44 = vsub.f32 0.0, %v526_v16 }
 0x21a   :  { %v541_v21 = vmul.f32 0.3275911, %v1961_v17  ;;  %v543_v22 = vmul.f32 0.3275911, %v1964_v18  ;;  %v430_v26 = vpop.f32.mrb[4].mxu0  ;;  %v1968_v27 = vpop.f32.mrb[4].mxu1 }
 0x21b   :  { %v556_v23 = vadd.f32 1.0, %v540_v19  ;;  %v558_v15 = vadd.f32 1.0, %v542_v20  ;;  %v1973_v30 = vpop.f32.mrb[5].mxu0  ;;  %v1975_v31 = vpop.f32.mrb[5].mxu1  ;;  %v528_v42 = vand.u32 2147483647, %v1985_v36  ;;  %v764_v48 = vmul.f32 %v748_v40, %v524_v14 }
 0x21c   :  { %v557_v28 = vadd.f32 1.0, %v541_v21  ;;  %v1980_v33 = vpop.f32.mrb[6].mxu0  ;;  %v1982_v34 = vpop.f32.mrb[6].mxu1  ;;  %v559_v35 = vadd.f32 1.0, %v543_v22  ;;  %v530_v45 = vand.u32 2147483647, %v1995_v41  ;;  %v766_v53 = vmul.f32 %v750_v44, %v526_v16 }
 0x21d   :  { %1539 = vrcp.f32 %v556_v23  ;;  %v1990_v38 = vpop.f32.mrb[7].mxu0  ;;  %v1992_v39 = vpop.f32.mrb[7].mxu1  ;;  %v2003_v46 = vmul.f32 0.70710677, %v1988_v37  ;;  %v544_v47 = vmul.f32 0.3275911, %v528_v42  ;;  %v2023_v20 = vadd.f32 %v430_v26, %v1926_v60 }
 0x21e   :  { %1541 = vrcp.f32 %v558_v15  ;;  %v546_v49 = vmul.f32 0.3275911, %v530_v45  ;;  %v2007_v52 = vmul.f32 0.70710677, %v1999_v43  ;;  %v752_v57 = vsub.f32 0.0, %v528_v42 }
 0x21f   :  { %1543 = vrcp.f32 %v557_v28  ;;  %v529_v50 = vand.u32 2147483647, %v2003_v46  ;;  %v560_v51 = vadd.f32 1.0, %v544_v47  ;;  %v780_v1 = vmul.f32 1.442695, %v764_v48  ;;  %2341 = vst [vmem:[#allocation5_spill] sm:$0xff] %v2023_v20 }
 0x220   :  { %1545 = vrcp.f32 %v559_v35  ;;  %v562_v54 = vadd.f32 1.0, %v546_v49  ;;  %v2012_v58 = vand.u32 2147483647, %v2007_v52  ;;  %v754_v8 = vsub.f32 0.0, %v530_v45 }
 0x221   :  { %v545_v55 = vmul.f32 0.3275911, %v529_v50  ;;  %1547 = vrcp.f32 %v560_v51  ;;  %v2020_v14 = vmul.f32 0.5, %v1935_v2  ;;  %v784_v19 = vmul.f32 1.442695, %v766_v53 }
 0x222   :  { %1549 = vrcp.f32 %v562_v54  ;;  %v547_v9 = vmul.f32 0.3275911, %v2012_v58  ;;  %v768_v15 = vmul.f32 %v752_v57, %v528_v42  ;;  %v2029_v25 = vmul.f32 0.5, %v1938_v3 }
 0x223   :  { %v561_v4 = vadd.f32 1.0, %v545_v55  ;;  %v749_v2 = vsub.f32 0.0, %v1961_v17  ;;  %v770_v40 = vmul.f32 %v754_v8, %v530_v45  ;;  %v2037_v44 = vmul.f32 0.70710677, %v2023_v20 }
 0x224   :  { %v563_v22 = vadd.f32 1.0, %v547_v9  ;;  %v788_v49 = vmul.f32 1.442695, %v768_v15  ;;  %v753_v51 = vsub.f32 0.0, %v529_v50  ;;  %vm844_vm0 = vcmp.lt.f32.partialorder %v1947_v10, 0.0 }
 0x225   :  { %1551 = vrcp.f32 %v561_v4  ;;  %2342 = vst [vmem:[#allocation6_spill] sm:$0xff] %v2037_v44  ;;  %v2043_v57 = vand.u32 2147483647, %v2037_v44  ;;  %v751_v4 = vsub.f32 0.0, %v1964_v18  ;;  %vm846_vm1 = vcmp.lt.f32.partialorder %v1950_v11, 0.0 }
 0x226   :  { %1553 = vpow2.f32 %v780_v1  ;;  %v765_v1 = vmul.f32 %v749_v2, %v1961_v17  ;;  %v755_v17 = vsub.f32 0.0, %v2012_v58  ;;  %vm848_vm2 = vcmp.lt.f32.partialorder %v1985_v36, 0.0 }
 0x227   :  { %v2009_v56 = vpop.eup %1539  ;;  %1555 = vrcp.f32 %v563_v22  ;;  %v548_v2 = vmul.f32 0.3275911, %v2043_v57  ;;  %vm850_vm3 = vcmp.lt.f32.partialorder %v1995_v41, 0.0  ;;  %v2110_v36 = vadd.f32 %v1973_v30, %v1930_v62 }
 0x228   :  { %v2014_v59 = vpop.eup %1541  ;;  %v604_v0 = vmul.f32 1.0614054, %v2009_v56  ;;  %1557 = vpow2.f32 %v784_v19  ;;  %vm849_vm4 = vcmp.lt.f32.partialorder %v2003_v46, 0.0  ;;  %vm845_vm5 = vcmp.lt.f32.partialorder %v1953_v12, 0.0 }
 0x229   :  { %v606_v5 = vmul.f32 1.0614054, %v2014_v59  ;;  %v2025_v21 = vpop.eup %1543  ;;  %1559 = vpow2.f32 %v788_v49  ;;  %vm847_vm6 = vcmp.lt.f32.partialorder %v1956_v13, 0.0  ;;  %vm851_vm7 = vcmp.lt.f32.partialorder %v2007_v52, 0.0 }
 0x22a   :  { %v620_v16 = vadd.f32 -1.4531521, %v604_v0  ;;  %v605_v28 = vmul.f32 1.0614054, %v2025_v21  ;;  %v2033_v35 = vpop.eup %1545 }
 0x22b   :  { %v622_v23 = vadd.f32 -1.4531521, %v606_v5  ;;  %v607_v48 = vmul.f32 1.0614054, %v2033_v35  ;;  %v2045_v45 = vpop.eup %1547  ;;  %v792_v5 = vmul.f32 1.442695, %v770_v40 }
 0x22c   :  { %v636_v24 = vmul.f32 %v2009_v56, %v620_v16  ;;  %v621_v47 = vadd.f32 -1.4531521, %v605_v28  ;;  %v2050_v8 = vpop.eup %1549 }
 0x22d   :  { %v638_v26 = vmul.f32 %v2014_v59, %v622_v23  ;;  %v623_v55 = vadd.f32 -1.4531521, %v607_v48  ;;  %v608_v23 = vmul.f32 1.0614054, %v2045_v45  ;;  %v610_v22 = vmul.f32 1.0614054, %v2050_v8 }
 0x22e   :  { %v652_v42 = vadd.f32 1.4214138, %v636_v24  ;;  %v637_v54 = vmul.f32 %v2025_v21, %v621_v47  ;;  %v769_v24 = vmul.f32 %v753_v51, %v529_v50  ;;  %v767_v47 = vmul.f32 %v751_v4, %v1964_v18 }
 0x22f   :  { %v654_v3 = vadd.f32 1.4214138, %v638_v26  ;;  %v639_v19 = vmul.f32 %v2033_v35, %v623_v55  ;;  %v624_v26 = vadd.f32 -1.4531521, %v608_v23  ;;  %v2058_v40 = vpop.eup %1551  ;;  %v626_v48 = vadd.f32 -1.4531521, %v610_v22 }
 0x230   :  { %v668_v53 = vmul.f32 %v2009_v56, %v652_v42  ;;  %v653_v16 = vadd.f32 1.4214138, %v637_v54  ;;  %1561 = vpow2.f32 %v792_v5  ;;  %v1554_v51 = vpop.eup %1553  ;;  %v771_v4 = vmul.f32 %v755_v17, %v2012_v58 }
 0x231   :  { %v670_v0 = vmul.f32 %v2014_v59, %v654_v3  ;;  %v640_v50 = vmul.f32 %v2045_v45, %v624_v26  ;;  %v642_v55 = vmul.f32 %v2050_v8, %v626_v48  ;;  %v2066_v23 = vpop.eup %1555  ;;  %v564_v5 = vadd.f32 1.0, %v548_v2 }
 0x232   :  { %v684_v9 = vadd.f32 -0.28449672, %v668_v53  ;;  %v669_v49 = vmul.f32 %v2025_v21, %v653_v16  ;;  %v655_v53 = vadd.f32 1.4214138, %v639_v19  ;;  %v1558_v22 = vpop.eup %1557  ;;  %v611_v26 = vmul.f32 1.0614054, %v2066_v23 }
 0x233   :  { %v686_v15 = vadd.f32 -0.28449672, %v670_v0  ;;  %v609_v0 = vmul.f32 1.0614054, %v2058_v40  ;;  %v656_v18 = vadd.f32 1.4214138, %v640_v50  ;;  %v1560_v50 = vpop.eup %1559 }
 0x234   :  { %v700_v28 = vmul.f32 %v2009_v56, %v684_v9  ;;  %v790_v9 = vmul.f32 1.442695, %v769_v24  ;;  %v658_v19 = vadd.f32 1.4214138, %v642_v55  ;;  %v685_v48 = vadd.f32 -0.28449672, %v669_v49 }
 0x235   :  { %v702_v42 = vmul.f32 %v2014_v59, %v686_v15  ;;  %v671_v44 = vmul.f32 %v2033_v35, %v655_v53  ;;  %v672_v24 = vmul.f32 %v2045_v45, %v656_v18  ;;  %v627_v58 = vadd.f32 -1.4531521, %v611_v26 }
 0x236   :  { %v716_v3 = vadd.f32 0.2548296, %v700_v28  ;;  %v625_v28 = vadd.f32 -1.4531521, %v609_v0  ;;  %v782_v17 = vmul.f32 1.442695, %v765_v1  ;;  %1563 = vpow2.f32 %v790_v9 }
 0x237   :  { %v718_v54 = vadd.f32 0.2548296, %v702_v42  ;;  %v688_v2 = vadd.f32 -0.28449672, %v672_v24  ;;  %1565 = vrcp.f32 %v564_v5  ;;  %v701_v0 = vmul.f32 %v2025_v21, %v685_v48 }
 0x238   :  { %v732_v15 = vmul.f32 %v2009_v56, %v716_v3  ;;  %v674_v56 = vmul.f32 %v2050_v8, %v658_v19  ;;  %v641_v3 = vmul.f32 %v2058_v40, %v625_v28  ;;  %1567 = vpow2.f32 %v782_v17 }
 0x239   :  { %v734_v16 = vmul.f32 %v2014_v59, %v718_v54  ;;  %v794_v59 = vmul.f32 1.442695, %v771_v4  ;;  %v786_v4 = vmul.f32 1.442695, %v767_v47  ;;  %v496_v47 = vmul.f32 0.5, %v1971_v29 }
 0x23a   :  { %v812_v42 = vmul.f32 %v1554_v51, %v732_v15  ;;  %v690_v54 = vadd.f32 -0.28449672, %v674_v56  ;;  %v657_v55 = vadd.f32 1.4214138, %v641_v3  ;;  %v643_v51 = vmul.f32 %v2066_v23, %v627_v58  ;;  %v1562_v18 = vpop.eup %1561 }
 0x23b   :  { %v814_v20 = vmul.f32 %v1558_v22, %v734_v16  ;;  %v704_v15 = vmul.f32 %v2045_v45, %v688_v2  ;;  %v687_v22 = vadd.f32 -0.28449672, %v671_v44  ;;  %1569 = vpow2.f32 %v794_v59 }
 0x23c   :  { %v828_v49 = vsub.f32 1.0, %v812_v42  ;;  %v706_v16 = vmul.f32 %v2050_v8, %v690_v54  ;;  %v673_v1 = vmul.f32 %v2058_v40, %v657_v55  ;;  %v659_v9 = vadd.f32 1.4214138, %v643_v51 }
 0x23d   :  { %v830_v53 = vsub.f32 1.0, %v814_v20  ;;  %v720_v19 = vadd.f32 0.2548296, %v704_v15  ;;  %v717_v42 = vadd.f32 0.2548296, %v701_v0  ;;  %v703_v48 = vmul.f32 %v2033_v35, %v687_v22 }
 0x23e   :  { %v722_v5 = vadd.f32 0.2548296, %v706_v16  ;;  %v689_v20 = vadd.f32 -0.28449672, %v673_v1  ;;  %v860_v28 = vsub.f32 0.0, %v828_v49  ;;  %v675_v3 = vmul.f32 %v2066_v23, %v659_v9 }
 0x23f   :  { %v862_v26 = vsub.f32 0.0, %v830_v53  ;;  %v736_v44 = vmul.f32 %v2045_v45, %v720_v19  ;;  %1571 = vpow2.f32 %v786_v4  ;;  %v2091_v17 = vadd.f32 %v1968_v27, %v1928_v61 }
 0x240   :  { %v738_v24 = vmul.f32 %v2050_v8, %v722_v5  ;;  %v705_v56 = vmul.f32 %v2058_v40, %v689_v20  ;;  %v498_v2 = vmul.f32 0.5, %v1978_v32  ;;  %v691_v54 = vadd.f32 -0.28449672, %v675_v3  ;;  %v1564_v55 = vpop.eup %1563 }
 0x241   :  { %v816_v58 = vmul.f32 %v1560_v50, %v736_v44  ;;  %v876_v8 = vsel %vm844_vm0, %v860_v28, %v828_v49  ;;  %v878_v51 = vsel %vm846_vm1, %v862_v26, %v830_v53  ;;  %v2099_v29 = vpop.eup %1565  ;;  %v733_v27 = vmul.f32 %v2025_v21, %v717_v42 }
 0x242   :  { %v818_v59 = vmul.f32 %v1562_v18, %v738_v24  ;;  %v721_v45 = vadd.f32 0.2548296, %v705_v56  ;;  %v719_v50 = vadd.f32 0.2548296, %v703_v48  ;;  %v707_v10 = vmul.f32 %v2066_v23, %v691_v54  ;;  %v1568_v21 = vpop.eup %1567 }
 0x243   :  { %v832_v0 = vsub.f32 1.0, %v816_v58  ;;  %v2106_v49 = vmul.f32 0.70710677, %v2091_v17  ;;  %v892_v11 = vadd.f32 1.0, %v876_v8  ;;  %v894_v53 = vadd.f32 1.0, %v878_v51 }
 0x244   :  { %v834_v15 = vsub.f32 1.0, %v818_v59  ;;  %v737_v32 = vmul.f32 %v2058_v40, %v721_v45  ;;  %v723_v9 = vadd.f32 0.2548296, %v707_v10  ;;  %v813_v19 = vmul.f32 %v1568_v21, %v733_v27 }
 0x245   :  { %v864_v18 = vsub.f32 0.0, %v832_v0  ;;  %v2113_v40 = vand.u32 2147483647, %v2106_v49  ;;  %v1570_v4 = vpop.eup %1569  ;;  %v735_v5 = vmul.f32 %v2033_v35, %v719_v50  ;;  %v612_v30 = vmul.f32 1.0614054, %v2099_v29 }
 0x246   :  { %v866_v22 = vsub.f32 0.0, %v834_v15  ;;  %v817_v1 = vmul.f32 %v1564_v55, %v737_v32  ;;  %v739_v42 = vmul.f32 %v2066_v23, %v723_v9  ;;  %v2122_v48 = vmul.f32 %v892_v11, %v2020_v14 }
 0x247   :  { %v880_v16 = vsel %vm848_vm2, %v864_v18, %v832_v0  ;;  %v550_v44 = vmul.f32 0.3275911, %v2113_v40  ;;  %v2125_v24 = vmul.f32 %v894_v53, %v2029_v25  ;;  %v2130_v35 = vmul.f32 0.70710677, %v2110_v36 }
 0x248   :  { %v896_v20 = vadd.f32 1.0, %v880_v16  ;;  %v882_v28 = vsel %vm850_vm3, %v866_v22, %v834_v15  ;;  %v833_v58 = vsub.f32 1.0, %v817_v1  ;;  %v819_v23 = vmul.f32 %v1570_v4, %v739_v42 }
 0x249   :  { %v898_v26 = vadd.f32 1.0, %v882_v28  ;;  %v1572_v41 = vpop.eup %1571  ;;  %v566_v59 = vadd.f32 1.0, %v550_v44  ;;  %v2137_v14 = vand.u32 2147483647, %v2130_v35  ;;  %v829_v25 = vsub.f32 1.0, %v813_v19 }
 0x24a   :  { %v2127_v56 = vmul.f32 %v896_v20, %v496_v47  ;;  %v815_v45 = vmul.f32 %v1572_v41, %v735_v5  ;;  %v628_v55 = vadd.f32 -1.4531521, %v612_v30  ;;  %v835_v51 = vsub.f32 1.0, %v819_v23 }
 0x24b   :  { %v2132_v3 = vmul.f32 %v898_v26, %v498_v2  ;;  %1573 = vrcp.f32 %v566_v59  ;;  %v549_v8 = vmul.f32 0.3275911, %v2137_v14  ;;  %v865_v2 = vsub.f32 0.0, %v833_v58 }
 0x24c   :  { %v924_v54 = vpack.c.bf16 %v2127_v56, %v2122_v48  ;;  %v831_v0 = vsub.f32 1.0, %v815_v45  ;;  %v2144_v50 = vadd.f32 %v1975_v31, %v1932_v63  ;;  %v861_v15 = vsub.f32 0.0, %v829_v25 }
 0x24d   :  { %v926_v47 = vpack.c.bf16 %v2132_v3, %v2125_v24  ;;  %v565_v27 = vadd.f32 1.0, %v549_v8  ;;  %v644_v32 = vmul.f32 %v2099_v29, %v628_v55  ;;  %v2149_v18 = vadd.f32 %v1980_v33, %v1926_v60 }
 0x24e   :  { %v2153_v10 = vadd.f32 %v1982_v34, %v1928_v61  ;;  %v493_v11 = vmul.f32 0.5, %v1941_v6  ;;  %v495_v53 = vmul.f32 0.5, %v1944_v7  ;;  %v881_v31 = vsel %vm849_vm4, %v865_v2, %v833_v58 }
 0x24f   :  { %1575 = vrcp.f32 %v565_v27  ;;  %v867_v22 = vsub.f32 0.0, %v835_v51  ;;  %v2159_v21 = vmul.f32 0.70710677, %v2144_v50  ;;  %v2162_v16 = vmul.f32 0.70710677, %v2149_v18 }
 0x250   :  { %v863_v60 = vsub.f32 0.0, %v831_v0  ;;  %v756_v61 = vsub.f32 0.0, %v2043_v57  ;;  %v2167_v6 = vmul.f32 0.70710677, %v2153_v10  ;;  %v877_v7 = vsel %vm845_vm5, %v861_v15, %v829_v25 }
 0x251   :  { %v660_v33 = vadd.f32 1.4214138, %v644_v32  ;;  %v2170_v34 = vand.u32 2147483647, %v2159_v21  ;;  %v2173_v46 = vand.u32 2147483647, %v2162_v16  ;;  %v883_v4 = vsel %vm851_vm7, %v867_v22, %v835_v51 }
 0x252   :  { %v897_v1 = vadd.f32 1.0, %v881_v31  ;;  %v2178_v12 = vand.u32 2147483647, %v2167_v6  ;;  %v497_v9 = vmul.f32 0.5, %v1988_v37  ;;  %v893_v28 = vadd.f32 1.0, %v877_v7 }
 0x253   :  { %v551_v19 = vmul.f32 0.3275911, %v2170_v34  ;;  %v552_v5 = vmul.f32 0.3275911, %v2173_v46  ;;  %v879_v26 = vsel %vm847_vm6, %v863_v60, %v831_v0  ;;  %v772_v42 = vmul.f32 %v756_v61, %v2043_v57 }
 0x254   :  { %v554_v13 = vmul.f32 0.3275911, %v2178_v12  ;;  %v676_v52 = vmul.f32 %v2099_v29, %v660_v33  ;;  %v2191_v37 = vadd.f32 %v1990_v38, %v1930_v62  ;;  %v913_v41 = vmul.f32 %v897_v1, %v497_v9 }
 0x255   :  { %v2183_v20 = vpop.eup %1573  ;;  %v567_v44 = vadd.f32 1.0, %v551_v19  ;;  %v899_v58 = vadd.f32 1.0, %v883_v4  ;;  %v758_v23 = vsub.f32 0.0, %v2113_v40  ;;  %v568_v59 = vadd.f32 1.0, %v552_v5 }
 0x256   :  { %v614_v30 = vmul.f32 1.0614054, %v2183_v20  ;;  %v499_v45 = vmul.f32 0.5, %v1999_v43  ;;  %v570_v57 = vadd.f32 1.0, %v554_v13  ;;  %v909_v8 = vmul.f32 %v893_v28, %v493_v11 }
 0x257   :  { %1577 = vrcp.f32 %v567_v44  ;;  %v895_v2 = vadd.f32 1.0, %v879_v26  ;;  %v796_v51 = vmul.f32 1.442695, %v772_v42  ;;  %v692_v0 = vadd.f32 -0.28449672, %v676_v52 }
 0x258   :  { %v630_v25 = vadd.f32 -1.4531521, %v614_v30  ;;  %1579 = vrcp.f32 %v568_v59  ;;  %v2200_v27 = vmul.f32 0.70710677, %v2191_v37  ;;  %v915_v15 = vmul.f32 %v899_v58, %v499_v45 }
 0x259   :  { %v2195_v55 = vpop.eup %1575  ;;  %v774_v43 = vmul.f32 %v758_v23, %v2113_v40  ;;  %v2205_v32 = vadd.f32 %v1992_v39, %v1932_v63  ;;  %v925_v31 = vpack.c.bf16 %v913_v41, %v909_v8  ;;  %1581 = vrcp.f32 %v570_v57 }
 0x25a   :  { %v646_v62 = vmul.f32 %v2183_v20, %v630_v25  ;;  %v613_v38 = vmul.f32 1.0614054, %v2195_v55  ;;  %v2208_v60 = vand.u32 2147483647, %v2200_v27  ;;  %v911_v61 = vmul.f32 %v895_v2, %v495_v53 }
 0x25b   :  { %1583 = vpow2.f32 %v796_v51  ;;  %v757_v7 = vsub.f32 0.0, %v2137_v14  ;;  %v2212_v33 = vmul.f32 0.70710677, %v2205_v32  ;;  %1156 = vmatprep.mubr.bf16.mxu0 %v925_v31  ;;  %v708_v40 = vmul.f32 %v2099_v29, %v692_v0 }
 0x25c   :  { %v662_v11 = vadd.f32 1.4214138, %v646_v62  ;;  %v629_v22 = vadd.f32 -1.4531521, %v613_v38  ;;  %v553_v1 = vmul.f32 0.3275911, %v2208_v60  ;;  %1157 = vmatmul.mubr.bf16.vlgmr.msra.gmra.mrb[8].mxu0 %v924_v54  ;;  %v927_v19 = vpack.c.bf16 %v915_v15, %v911_v61 }
 0x25d   :  { %v800_v53 = vmul.f32 1.442695, %v774_v43  ;;  %v760_v9 = vsub.f32 0.0, %v2173_v46  ;;  %v2223_v4 = vand.u32 2147483647, %v2212_v33  ;;  %v773_v42 = vmul.f32 %v757_v7, %v2137_v14 }
 0x25e   :  { %v678_v63 = vmul.f32 %v2183_v20, %v662_v11  ;;  %v645_v39 = vmul.f32 %v2195_v55, %v629_v22  ;;  %v569_v26 = vadd.f32 1.0, %v553_v1  ;;  %v759_v13 = vsub.f32 0.0, %v2170_v34  ;;  %1205 = vmatprep.mubr.bf16.mxu1 %v927_v19 }
 0x25f   :  { %v555_v52 = vmul.f32 0.3275911, %v2223_v4  ;;  %v724_v48 = vadd.f32 0.2548296, %v708_v40  ;;  %v762_v54 = vsub.f32 0.0, %v2178_v12  ;;  %1206 = vmatmul.mubr.bf16.vlgmr.msra.gmra.mrb[8].mxu1 %v926_v47  ;;  %v776_v58 = vmul.f32 %v760_v9, %v2173_v46 }
 0x260   :  { %v694_v5 = vadd.f32 -0.28449672, %v678_v63  ;;  %v661_v28 = vadd.f32 1.4214138, %v645_v39  ;;  %1585 = vrcp.f32 %v569_v26  ;;  %v798_v25 = vmul.f32 1.442695, %v773_v42 }
 0x261   :  { %v2228_v30 = vpop.eup %1577  ;;  %v571_v23 = vadd.f32 1.0, %v555_v52  ;;  %1587 = vpow2.f32 %v800_v53  ;;  %v775_v8 = vmul.f32 %v759_v13, %v2170_v34  ;;  %v740_v3 = vmul.f32 %v2099_v29, %v724_v48 }
 0x262   :  { %v677_v56 = vmul.f32 %v2195_v55, %v661_v28  ;;  %v2235_v44 = vpop.eup %1579  ;;  %v710_v14 = vmul.f32 %v2183_v20, %v694_v5  ;;  %v615_v41 = vmul.f32 1.0614054, %v2228_v30  ;;  %v778_v2 = vmul.f32 %v762_v54, %v2178_v12 }
 0x263   :  { %v616_v45 = vmul.f32 1.0614054, %v2235_v44  ;;  %1589 = vrcp.f32 %v571_v23  ;;  %v2242_v24 = vpop.eup %1581  ;;  %v804_v62 = vmul.f32 1.442695, %v776_v58  ;;  %v761_v34 = vsub.f32 0.0, %v2208_v60 }
 0x264   :  { %v693_v59 = vadd.f32 -0.28449672, %v677_v56  ;;  %v631_v57 = vadd.f32 -1.4531521, %v615_v41  ;;  %v726_v0 = vadd.f32 0.2548296, %v710_v14  ;;  %1591 = vpow2.f32 %v798_v25 }
 0x265   :  { %v632_v47 = vadd.f32 -1.4531521, %v616_v45  ;;  %v1584_v51 = vpop.eup %1583  ;;  %v618_v38 = vmul.f32 1.0614054, %v2242_v24  ;;  %v802_v11 = vmul.f32 1.442695, %v775_v8  ;;  %1593 = vpow2.f32 %v804_v62 }
 0x266   :  { %v647_v46 = vmul.f32 %v2228_v30, %v631_v57  ;;  %v709_v15 = vmul.f32 %v2195_v55, %v693_v59  ;;  %v820_v22 = vmul.f32 %v1584_v51, %v740_v3  ;;  %v808_v12 = vmul.f32 1.442695, %v778_v2 }
 0x267   :  { %v648_v43 = vmul.f32 %v2235_v44, %v632_v47  ;;  %v634_v29 = vadd.f32 -1.4531521, %v618_v38  ;;  %v763_v7 = vsub.f32 0.0, %v2223_v4  ;;  %v742_v40 = vmul.f32 %v2183_v20, %v726_v0 }
 0x268   :  { %v663_v31 = vadd.f32 1.4214138, %v647_v46  ;;  %v725_v53 = vadd.f32 0.2548296, %v709_v15  ;;  %v777_v19 = vmul.f32 %v761_v34, %v2208_v60  ;;  %1595 = vpow2.f32 %v802_v11  ;;  %v2343_v11 = vld [vmem:[#allocation5_spill] sm:$0xff] }
 0x269   :  { %v664_v61 = vadd.f32 1.4214138, %v648_v43  ;;  %v650_v39 = vmul.f32 %v2242_v24, %v634_v29  ;;  %v836_v13 = vsub.f32 1.0, %v820_v22  ;;  %1597 = vpow2.f32 %v808_v12  ;;  %v2344_v22 = vld [vmem:[#allocation6_spill] sm:$0xff] }
 0x26a   :  { %v679_v63 = vmul.f32 %v2228_v30, %v663_v31  ;;  %v2255_v1 = vpop.eup %1585  ;;  %v779_v52 = vmul.f32 %v763_v7, %v2223_v4  ;;  %v806_v58 = vmul.f32 1.442695, %v777_v19  ;;  %v741_v59 = vmul.f32 %v2195_v55, %v725_v53 }
 0x26b   :  { %v680_v9 = vmul.f32 %v2235_v44, %v664_v61  ;;  %v666_v28 = vadd.f32 1.4214138, %v650_v39  ;;  %v617_v26 = vmul.f32 1.0614054, %v2255_v1  ;;  %v1588_v42 = vpop.eup %1587  ;;  %v868_v4 = vsub.f32 0.0, %v836_v13 }
 0x26c   :  { %v695_v5 = vadd.f32 -0.28449672, %v679_v63  ;;  %v822_v56 = vmul.f32 %v1588_v42, %v742_v40  ;;  %v810_v46 = vmul.f32 1.442695, %v779_v52  ;;  %1599 = vpow2.f32 %v806_v58 }
 0x26d   :  { %v696_v20 = vadd.f32 -0.28449672, %v680_v9  ;;  %v2261_v48 = vpop.eup %1589  ;;  %v682_v14 = vmul.f32 %v2242_v24, %v666_v28  ;;  %v633_v41 = vadd.f32 -1.4531521, %v617_v26  ;;  %v500_v29 = vmul.f32 0.5, %v2343_v11 }
 0x26e   :  { %v711_v54 = vmul.f32 %v2228_v30, %v695_v5  ;;  %v619_v23 = vmul.f32 1.0614054, %v2261_v48  ;;  %v1592_v47 = vpop.eup %1591  ;;  %v838_v2 = vsub.f32 1.0, %v822_v56  ;;  %vm852_vm8 = vcmp.lt.f32.partialorder %v2344_v22, 0.0 }
 0x26f   :  { %v712_v60 = vmul.f32 %v2235_v44, %v696_v20  ;;  %v698_v25 = vadd.f32 -0.28449672, %v682_v14  ;;  %v649_v57 = vmul.f32 %v2255_v1, %v633_v41  ;;  %v1594_v15 = vpop.eup %1593  ;;  %v821_v43 = vmul.f32 %v1592_v47, %v741_v59 }
 0x270   :  { %v727_v45 = vadd.f32 0.2548296, %v711_v54  ;;  %v635_v3 = vadd.f32 -1.4531521, %v619_v23  ;;  %v870_v40 = vsub.f32 0.0, %v838_v2  ;;  %1601 = vpow2.f32 %v810_v46 }
 0x271   :  { %v728_v8 = vadd.f32 0.2548296, %v712_v60  ;;  %v714_v51 = vmul.f32 %v2242_v24, %v698_v25  ;;  %v665_v0 = vadd.f32 1.4214138, %v649_v57  ;;  %v884_v39 = vsel %vm852_vm8, %v868_v4, %v836_v13 }
 0x272   :  { %v743_v62 = vmul.f32 %v2228_v30, %v727_v45  ;;  %v651_v55 = vmul.f32 %v2261_v48, %v635_v3  ;;  %v1596_v7 = vpop.eup %1595  ;;  %v502_v5 = vmul.f32 0.5, %v2091_v17  ;;  %v837_v28 = vsub.f32 1.0, %v821_v43 }
 0x273   :  { %v744_v38 = vmul.f32 %v2235_v44, %v728_v8  ;;  %v730_v34 = vadd.f32 0.2548296, %v714_v51  ;;  %v681_v31 = vmul.f32 %v2255_v1, %v665_v0  ;;  %v1598_v44 = vpop.eup %1597  ;;  %vm854_vm9 = vcmp.lt.f32.partialorder %v2106_v49, 0.0 }
 0x274   :  { %v667_v12 = vadd.f32 1.4214138, %v651_v55  ;;  %v823_v53 = vmul.f32 %v1596_v7, %v743_v62  ;;  %vm856_vm10 = vcmp.lt.f32.partialorder %v2162_v16, 0.0  ;;  %v900_v52 = vadd.f32 1.0, %v884_v39 }
 0x275   :  { %v824_v61 = vmul.f32 %v1594_v15, %v744_v38  ;;  %v746_v30 = vmul.f32 %v2242_v24, %v730_v34  ;;  %v697_v63 = vadd.f32 -0.28449672, %v681_v31  ;;  %v886_v56 = vsel %vm854_vm9, %v870_v40, %v838_v2 }
 0x276   :  { %v683_v19 = vmul.f32 %v2261_v48, %v667_v12  ;;  %v839_v14 = vsub.f32 1.0, %v823_v53  ;;  %v504_v41 = vmul.f32 0.5, %v2149_v18  ;;  %v869_v58 = vsub.f32 0.0, %v837_v28  ;;  %v1600_v49 = vpop.eup %1599 }
 0x277   :  { %v840_v9 = vsub.f32 1.0, %v824_v61  ;;  %v826_v26 = vmul.f32 %v1598_v44, %v746_v30  ;;  %v713_v42 = vmul.f32 %v2255_v1, %v697_v63  ;;  %v902_v25 = vadd.f32 1.0, %v886_v56 }
 0x278   :  { %v699_v24 = vadd.f32 -0.28449672, %v683_v19  ;;  %vm853_vm11 = vcmp.lt.f32.partialorder %v2130_v35, 0.0  ;;  %vm858_vm12 = vcmp.lt.f32.partialorder %v2167_v6, 0.0  ;;  %v916_v57 = vmul.f32 %v900_v52, %v500_v29  ;;  %v1388_v52 = vld [vmem:[%s2335_s6] ss:$0 sm:$0xff] }
 0x279   :  { %v872_v20 = vsub.f32 0.0, %v840_v9  ;;  %v842_v54 = vsub.f32 1.0, %v826_v26  ;;  %v729_v13 = vadd.f32 0.2548296, %v713_v42  ;;  %v871_v18 = vsub.f32 0.0, %v839_v14 }
 0x27a   :  { %v715_v17 = vmul.f32 %v2261_v48, %v699_v24  ;;  %v506_v47 = vmul.f32 0.5, %v2153_v10  ;;  %v1602_v0 = vpop.eup %1601  ;;  %v885_v46 = vsel %vm853_vm11, %v869_v58, %v837_v28  ;;  %v918_v38 = vmul.f32 %v902_v25, %v502_v5 }
 0x27b   :  { %v888_v60 = vsel %vm856_vm10, %v872_v20, %v840_v9  ;;  %v874_v59 = vsub.f32 0.0, %v842_v54  ;;  %v745_v45 = vmul.f32 %v2255_v1, %v729_v13  ;;  %vm855_vm13 = vcmp.lt.f32.partialorder %v2159_v21, 0.0 }
 0x27c   :  { %v904_v23 = vadd.f32 1.0, %v888_v60  ;;  %v731_v16 = vadd.f32 0.2548296, %v715_v17  ;;  %vm857_vm14 = vcmp.lt.f32.partialorder %v2200_v27, 0.0  ;;  %v901_v15 = vadd.f32 1.0, %v885_v46 }
 0x27d   :  { %v890_v8 = vsel %vm858_vm12, %v874_v59, %v842_v54  ;;  %v825_v3 = vmul.f32 %v1600_v49, %v745_v45  ;;  %v887_v43 = vsel %vm855_vm13, %v871_v18, %v839_v14  ;;  %v501_v11 = vmul.f32 0.5, %v2110_v36  ;;  %v1611_v54 = vld [vmem:[%s2329_s0] sm:$0xff] }
 0x27e   :  { %v920_v4 = vmul.f32 %v904_v23, %v504_v41  ;;  %v906_v2 = vadd.f32 1.0, %v890_v8  ;;  %v747_v51 = vmul.f32 %v2261_v48, %v731_v16  ;;  %v505_v48 = vmul.f32 0.5, %v2191_v37  ;;  %v1612_v41 = vld [vmem:[%s2329_s0 + $0x8] sm:$0xff] }
 0x27f   :  { %v841_v1 = vsub.f32 1.0, %v825_v3  ;;  %v903_v61 = vadd.f32 1.0, %v887_v43  ;;  %vm859_vm15 = vcmp.lt.f32.partialorder %v2212_v33, 0.0  ;;  %v917_v12 = vmul.f32 %v901_v15, %v501_v11 }
 0x280   :  { %v928_v62 = vpack.c.bf16 %v920_v4, %v916_v57  ;;  %v922_v55 = vmul.f32 %v906_v2, %v506_v47  ;;  %v827_v35 = vmul.f32 %v1602_v0, %v747_v51  ;;  %v503_v27 = vmul.f32 0.5, %v2144_v50  ;;  %v1613_v51 = vld [vmem:[%s2329_s0 + $0x10] sm:$0xff] }
 0x281   :  { %v873_v6 = vsub.f32 0.0, %v841_v1  ;;  %v507_v40 = vmul.f32 0.5, %v2205_v32 }
 0x282   :  { %v843_v34 = vsub.f32 1.0, %v827_v35  ;;  %v930_v31 = vpack.c.bf16 %v922_v55, %v918_v38  ;;  %v919_v44 = vmul.f32 %v903_v61, %v503_v27 }
 0x283   :  { %v889_v10 = vsel %vm857_vm14, %v873_v6, %v841_v1  ;;  %v1614_v1 = vld [vmem:[%s2329_s0 + $0x18] sm:$0xff] }
 0x284   :  { %v905_v29 = vadd.f32 1.0, %v889_v10  ;;  %v875_v22 = vsub.f32 0.0, %v843_v34 }
 0x286   :  { %v921_v7 = vmul.f32 %v905_v29, %v505_v48  ;;  %v891_v21 = vsel %vm859_vm15, %v875_v22, %v843_v34 }
 0x287   :  { %v907_v30 = vadd.f32 1.0, %v891_v21 }
 0x288   :  { %v929_v63 = vpack.c.bf16 %v921_v7, %v917_v12 }
 0x289   :  { %v923_v39 = vmul.f32 %v907_v30, %v507_v40 }
 0x28a   :  { %1164 = vmatprep.mubr.bf16.mxu0 %v929_v63 }
 0x28b   :  { %v931_v36 = vpack.c.bf16 %v923_v39, %v919_v44  ;;  %1165 = vmatmul.mubr.bf16.gmra.mrb[12].mxu0 %v928_v62 }
 0x28d   :  { %1213 = vmatprep.mubr.bf16.mxu1 %v931_v36 }
 0x28e   :  { %1214 = vmatmul.mubr.bf16.gmra.mrb[12].mxu1 %v930_v31 }
 0x32f   :  { %v1407_v37 = vpop.f32.mrb[8].mxu0 }
 0x330   :  { %v1408_v53 = vpop.f32.mrb[9].mxu0 }
 0x331   :  { %v1409_v9 = vadd.f32 %v1408_v53, %v1407_v37  ;;  %v1410_v33 = vpop.f32.mrb[10].mxu0  ;;  %v1389_v37 = vld [vmem:[%s2336_s7] ss:$0 sm:$0xff]  ;;  %s1640_s7 = smov [#allocation2]  }
 0x332   :  { %v1411_v19 = vpop.f32.mrb[11].mxu0  ;;  %v1435_v5 = vpop.f32.mrb[8].mxu1 }
 0x333   :  { %v1412_v28 = vadd.f32 %v1411_v19, %v1410_v33  ;;  %v1436_v26 = vpop.f32.mrb[9].mxu1  ;;  %v1390_v33 = vld [vmem:[%s2337_s8] ss:$0 sm:$0xff]  ;;  %s1311_s8 = sshll.u32 %s1640_s7, 4  ;;  %s1312_s8 = int_to_ptr.vmem [resolvable:$true] %s1311_s8 }
 0x334   :  { %v1437_v50 = vadd.f32 %v1436_v26, %v1435_v5  ;;  %v1438_v42 = vpop.f32.mrb[10].mxu1  ;;  %s1615_s23 = scalar_lea.vmem %s1312_s8, 512  ;;  %p1620_p1 = scmp.lt.s32.totalorder %s1312_s8, %s1312_s8 }
 0x335   :  { %v1439_v32 = vpop.f32.mrb[11].mxu1  ;;  %p1616_p0 = scmp.ne.s32.totalorder %s1312_s8, %s1615_s23  ;;  %p1621_p2 = scmp.lt.s32.totalorder %s1615_s23, %s1615_s23 }
 0x336   :  { %v1208_v20 = vadd.f32 %v1437_v50, %v1409_v9  ;;  %v1440_v24 = vadd.f32 %v1439_v32, %v1438_v42 }
 0x337   :  { %p1622_p3 = por %p1621_p2, %p1620_p1 }
 0x338   :  { %v1211_v56 = vadd.f32 %v1440_v24, %v1412_v28  ;;  %v1222_v13 = vadd.f32 %v1611_v54, %v1208_v20 }
 0x339   :  { %p1623_p4 = pnand %p1622_p3, %p1616_p0 }
 0x33a   :  { %v1232_v14 = vadd.f32 %v1388_v52, %v1222_v13  ;;  %v1223_v60 = vadd.f32 %v1612_v41, %v1211_v56 }
 0x33c   :  { %1238 = vadd.xlane.f32.xlu0 %v1232_v14  ;;  %v1233_v17 = vadd.f32 %v1388_v52, %v1223_v60 }
 0x33e   :  { %1240 = vadd.xlane.f32.xlu1 %v1233_v17 }
 0x35e   :  { %v1413_v58 = vpop.f32.mrb[12].mxu0 }
 0x35f   :  { %v1414_v23 = vpop.f32.mrb[13].mxu0 }
 0x360   :  { %v1415_v59 = vadd.f32 %v1414_v23, %v1413_v58  ;;  %v1416_v45 = vpop.f32.mrb[14].mxu0 }
 0x361   :  { %v1441_v49 = vpop.f32.mrb[12].mxu1  ;;  %v1417_v25 = vpop.f32.mrb[15].mxu0 }
 0x362   :  { %v1442_v16 = vpop.f32.mrb[13].mxu1  ;;  %v1418_v57 = vadd.f32 %v1417_v25, %v1416_v45 }
 0x363   :  { %v1443_v4 = vadd.f32 %v1442_v16, %v1441_v49  ;;  %v1444_v8 = vpop.f32.mrb[14].mxu1 }
 0x364   :  { %v1445_v3 = vpop.f32.mrb[15].mxu1 }
 0x365   :  { %v1216_v18 = vadd.f32 %v1443_v4, %v1415_v59  ;;  %v1446_v47 = vadd.f32 %v1445_v3, %v1444_v8 }
 0x367   :  { %v1219_v2 = vadd.f32 %v1446_v47, %v1418_v57  ;;  %v1224_v0 = vadd.f32 %v1613_v51, %v1216_v18 }
 0x369   :  { %v1234_v46 = vadd.f32 %v1388_v52, %v1224_v0  ;;  %v1225_v62 = vadd.f32 %v1614_v1, %v1219_v2 }
 0x36b   :  { %1242 = vadd.xlane.f32.xlu0 %v1234_v46  ;;  %v1235_v38 = vadd.f32 %v1388_v52, %v1225_v62 }
 0x36d   :  { %1244 = vadd.xlane.f32.xlu1 %v1235_v38 }
 0x3c9   :  { %v1239_v55 = vpop.xlane.xlu0 %1238 }
 0x3ca   :  { %v1246_v35 = vmul.f32 0.0078125, %v1239_v55 }
 0x3cb   :  { %v1241_v6 = vpop.xlane.xlu1 %1240 }
 0x3cc   :  { %v1250_v15 = vsub.f32 %v1232_v14, %v1246_v35  ;;  %v1247_v43 = vmul.f32 0.0078125, %v1241_v6 }
 0x3ce   :  { %v1251_v34 = vsub.f32 %v1233_v17, %v1247_v43  ;;  %v1254_v31 = vmul.f32 %v1250_v15, %v1250_v15 }
 0x3d0   :  { %1258 = vadd.xlane.f32.xlu0 %v1254_v31  ;;  %v1255_v10 = vmul.f32 %v1251_v34, %v1251_v34 }
 0x3d2   :  { %1260 = vadd.xlane.f32.xlu1 %v1255_v10 }
 0x3f8   :  { %v1243_v11 = vpop.xlane.xlu0 %1242 }
 0x3f9   :  { %v1248_v48 = vmul.f32 0.0078125, %v1243_v11 }
 0x3fa   :  { %v1245_v29 = vpop.xlane.xlu1 %1244 }
 0x3fb   :  { %v1252_v22 = vsub.f32 %v1234_v46, %v1248_v48  ;;  %v1249_v61 = vmul.f32 0.0078125, %v1245_v29 }
 0x3fd   :  { %v1253_v12 = vsub.f32 %v1235_v38, %v1249_v61  ;;  %v1256_v7 = vmul.f32 %v1252_v22, %v1252_v22 }
 0x3ff   :  { %1262 = vadd.xlane.f32.xlu0 %v1256_v7  ;;  %v1257_v21 = vmul.f32 %v1253_v12, %v1253_v12 }
 0x401   :  { %1264 = vadd.xlane.f32.xlu1 %v1257_v21 }
 0x45d   :  { %v1259_v27 = vpop.xlane.xlu0 %1258 }
 0x45e   :  { %v1266_v40 = vmul.f32 0.0078125, %v1259_v27 }
 0x45f   :  { %v1261_v30 = vpop.xlane.xlu1 %1260 }
 0x460   :  { %v1270_v63 = vadd.f32 1e-05, %v1266_v40  ;;  %v1267_v44 = vmul.f32 0.0078125, %v1261_v30 }
 0x462   :  { %1603 = vrsqrt.f32 %v1270_v63  ;;  %v1271_v39 = vadd.f32 1e-05, %v1267_v44 }
 0x464   :  { %1605 = vrsqrt.f32 %v1271_v39 }
 0x46c   :  { %v1604_v36 = vpop.eup %1603 }
 0x46d   :  { %v1278_v53 = vmul.f32 %v1604_v36, %v1250_v15 }
 0x46e   :  { %v1606_v9 = vpop.eup %1605 }
 0x46f   :  { %v1288_v19 = vmul.f32 %v1389_v37, %v1278_v53  ;;  %v1279_v5 = vmul.f32 %v1606_v9, %v1251_v34 }
 0x471   :  { %v1289_v28 = vmul.f32 %v1389_v37, %v1279_v5  ;;  %v1298_v26 = vadd.f32 %v1390_v33, %v1288_v19 }
 0x473   :  { %v1299_v50 = vadd.f32 %v1390_v33, %v1289_v28  ;;  %1302 = vst [vmem:[#allocation2] sm:$0xff] %v1298_v26 }
 0x475   :  { %1303 = vst [vmem:[#allocation2 + $0x8] sm:$0xff] %v1299_v50 }
 0x48c   :  { %v1263_v42 = vpop.xlane.xlu0 %1262 }
 0x48d   :  { %v1268_v32 = vmul.f32 0.0078125, %v1263_v42 }
 0x48e   :  { %v1265_v20 = vpop.xlane.xlu1 %1264 }
 0x48f   :  { %v1272_v24 = vadd.f32 1e-05, %v1268_v32  ;;  %v1269_v52 = vmul.f32 0.0078125, %v1265_v20 }
 0x491   :  { %1607 = vrsqrt.f32 %v1272_v24  ;;  %v1273_v56 = vadd.f32 1e-05, %v1269_v52 }
 0x493   :  { %1609 = vrsqrt.f32 %v1273_v56 }
 0x49b   :  { %v1608_v54 = vpop.eup %1607 }
 0x49c   :  { %v1280_v13 = vmul.f32 %v1608_v54, %v1252_v22 }
 0x49d   :  { %v1610_v14 = vpop.eup %1609 }
 0x49e   :  { %v1290_v41 = vmul.f32 %v1389_v37, %v1280_v13  ;;  %v1281_v60 = vmul.f32 %v1610_v14, %v1253_v12 }
 0x4a0   :  { %v1300_v17 = vadd.f32 %v1390_v33, %v1290_v41  ;;  %v1291_v58 = vmul.f32 %v1389_v37, %v1281_v60 }
 0x4a2   :  { %1304 = vst [vmem:[#allocation2 + $0x10] sm:$0xff] %v1300_v17  ;;  %v1301_v23 = vadd.f32 %v1390_v33, %v1291_v58 }
 0x4a4   :  { %1305 = vst [vmem:[#allocation2 + $0x18] sm:$0xff] %v1301_v23 }
 0x4a5   :  { %1626 = shalt.err (!%p1623_p4)
}
 0x4a6   :  { %s1627_s26 = scalar_lea.hbm %s2338_s9, 512 }
 0x4a7   :  { %p1628_p5 = scmp.ne.s32.totalorder %s2338_s9, %s1627_s26  ;;  %p1631_p6 = scmp.lt.u32.totalorder %s1627_s26, %s2338_s9 }
 0x4a9   :  { %p1633_p7 = pnand %p1631_p6, %p1628_p5 }
 0x4ab   :  { %1636 = shalt.err (!%p1633_p7)
}
 0x4ac   :  { %s1641_s10 = smov 128   ;;  %s1642_s11 = smov 8  }
 0x4ad   :  { %1317 = dma.vmem_to_hbm [thread:$0]  %s1312_s8, 512, %s2338_s9, [#allocation3], %s1641_s10, %s1641_s10, %s1642_s11  }
 0x4ae   :  { %1637 = dma.done.wait [#allocation3], 512  }
 0x4af   :  { %1638 = vsyncadd [#allocation3], 4294966784 }
 0x4b0   :  { %1321 = vsyncpa [#allocation3], 1 }

</bundles_post_ra>
